<compile_context>
chip_gen: v7x
topology: tpu7x:2x2x1
jax: 0.10.0
libtpu: 0.0.40
codegen_flags: <defaults>
</compile_context>

<pallas_src>
from functools import partial

import numpy as np
import jax
import jax.numpy as jnp
from jax.experimental import pallas as pl
from jax.experimental.pallas import tpu as pltpu


def _bilstm_kernel(x_ref, lens_ref, wih_ref, whh_f_ref, whh_b_ref, bias_ref,
                   out_ref, xg_ref, *, Bt, L, H, unroll):
    # x_ref:     (L*Bt, D)   bf16 time-major rows (row t*Bt + b = x[b, t])
    # lens_ref:  (Bt, 1)     int32 per-row sequence length (0 for padded rows)
    # wih_ref:   (D, 8H)     bf16 [fwd i,f,o,g | bwd i,f,o,g] input weights (T)
    # whh_f_ref: (H, 4H)     bf16 fwd recurrent weights (T), columns [i,f,o,g]
    # whh_b_ref: (H, 4H)     bf16 bwd recurrent weights (T), columns [i,f,o,g]
    # bias_ref:  (1, 8H)     f32  b_ih + b_hh for both directions
    # out_ref:   (Bt, 2H)    f32  [h_fwd_final | h_bwd_final]
    # xg_ref:    (L*Bt, 8H)  bf16 scratch: input-projected gates, all steps/dirs
    H3 = 3 * H
    H4 = 4 * H

    # 1) One big lane-dense MXU matmul for all timesteps and both directions:
    #    (L*Bt, D) @ (D, 8H), bf16 inputs, f32 accumulation; bias added in f32,
    #    stored bf16 to halve the largest VMEM consumer.
    xg_ref[...] = (
        jnp.dot(x_ref[...], wih_ref[...], preferred_element_type=jnp.float32)
        + bias_ref[...]
    ).astype(jnp.bfloat16)

    lens = lens_ref[...]            # (Bt, 1) int32
    whh_f = whh_f_ref[...]          # loop-invariant; VMEM resident
    whh_b = whh_b_ref[...]

    def cell(g4, c):
        # Permuted gate order [i, f, o | g]: one contiguous sigmoid + one tanh.
        s = jax.nn.sigmoid(g4[:, :H3])
        i = s[:, :H]
        f = s[:, H:2 * H]
        o = s[:, 2 * H:H3]
        g = jnp.tanh(g4[:, H3:])
        c_new = f * c + i * g
        h_new = o * jnp.tanh(c_new)
        return h_new, c_new

    def step(s, carry):
        h_f, c_f, h_b, c_b = carry          # four separate (Bt, H) f32 arrays

        # Per-direction recurrent matmuls: bf16 LHS/RHS, f32 accumulation.
        g_f = jnp.dot(h_f.astype(jnp.bfloat16), whh_f,
                      preferred_element_type=jnp.float32)       # (Bt, 4H)
        g_b = jnp.dot(h_b.astype(jnp.bfloat16), whh_b,
                      preferred_element_type=jnp.float32)       # (Bt, 4H)

        rf = pl.multiple_of(s * Bt, Bt)              # fwd reads time s
        rb = pl.multiple_of((L - 1 - s) * Bt, Bt)    # bwd reads time L-1-s
        g_f = g_f + xg_ref[pl.ds(rf, Bt), :H4].astype(jnp.float32)
        g_b = g_b + xg_ref[pl.ds(rb, Bt), H4:].astype(jnp.float32)

        hf_n, cf_n = cell(g_f, c_f)
        hb_n, cb_n = cell(g_b, c_b)

        # pack_padded_sequence semantics: only rows whose sequence actually
        # contains this timestep update their state.
        m_f = s < lens                               # (Bt, 1) bool
        m_b = (L - 1 - s) < lens                     # (Bt, 1) bool
        return (jnp.where(m_f, hf_n, h_f), jnp.where(m_f, cf_n, c_f),
                jnp.where(m_b, hb_n, h_b), jnp.where(m_b, cb_n, c_b))

    z = jnp.zeros((Bt, H), jnp.float32)
    h_f, _, h_b, _ = jax.lax.fori_loop(0, L, step, (z, z, z, z), unroll=unroll)

    out_ref[...] = jnp.concatenate([h_f, h_b], axis=-1)   # once, outside loop


def bilstm_final_hidden(x, seq_lens, w_ih_f, w_hh_f, b_f, w_ih_b, w_hh_b, b_b):
    """x: (B, L, D) padded; seq_lens: (B,) int -> (B, 2H) f32 = cat(h_fwd, h_bwd)."""
    B, L, D = x.shape
    H = w_hh_f.shape[1]
    H2, H3, H4 = 2 * H, 3 * H, 4 * H

    # Batch tiling: large tiles amortize MXU pass latency in the recurrence;
    # the tile axis is a "parallel" grid dim (megacore on v7x, auto DMA overlap
    # of the next tile's x everywhere).  16-row granularity keeps bf16 rows
    # sublane-pair aligned.
    Bt = 128 if B >= 128 else ((B + 15) // 16) * 16
    B_pad = ((B + Bt - 1) // Bt) * Bt
    n_tiles = B_pad // Bt

    # Wrapper-side layout plumbing (pure XLA, one-off):
    #   gate-order permutation  PyTorch [i,f,g,o]  ->  kernel [i,f,o,g]
    def perm_cols(w_t):                    # (K, 4H) columns [i|f|g|o]
        return jnp.concatenate([w_t[:, :H2], w_t[:, H3:], w_t[:, H2:H3]], axis=1)

    def perm_bias(b):                      # (4H,)
        return jnp.concatenate([b[:H2], b[H3:], b[H2:H3]])

    wih = jnp.concatenate(
        [perm_cols(w_ih_f.T), perm_cols(w_ih_b.T)], axis=1).astype(jnp.bfloat16)   # (D, 8H)
    whh_f_k = perm_cols(w_hh_f.T).astype(jnp.bfloat16)                              # (H, 4H)
    whh_b_k = perm_cols(w_hh_b.T).astype(jnp.bfloat16)                              # (H, 4H)
    bias = jnp.concatenate([perm_bias(b_f), perm_bias(b_b)])[None, :].astype(jnp.float32)

    # Time-major within each batch tile: row t*Bt + b  <-  x[i*Bt + b, t, :]
    x_p = jnp.zeros((B_pad, L, D), jnp.float32).at[:B].set(x.astype(jnp.float32))
    x_tiles = (x_p.reshape(n_tiles, Bt, L, D)
                  .transpose(0, 2, 1, 3)
                  .reshape(n_tiles, L * Bt, D)
                  .astype(jnp.bfloat16))

    lens_p = jnp.zeros((B_pad,), jnp.int32).at[:B].set(jnp.asarray(seq_lens, jnp.int32))
    lens_tiles = lens_p.reshape(n_tiles, Bt, 1)

    # Partial unroll for long sequences (vreg pressure), full unroll when short.
    unroll = True if L <= 16 else 8

    # Explicit VMEM budget: xg scratch + double-buffered tile I/O + weights.
    xg_bytes = L * Bt * 8 * H * 2                                   # bf16 scratch
    io_bytes = 2 * (L * Bt * D * 2 + Bt * 4 + Bt * H2 * 4)          # double-buffered
    w_bytes = 2 * (D * 8 * H * 2 + 2 * H * H4 * 2 + 8 * H * 4)
    vmem_limit = max(xg_bytes + io_bytes + w_bytes + (4 << 20), 32 << 20)

    grid_spec = pltpu.PrefetchScalarGridSpec(
        num_scalar_prefetch=0,
        grid=(n_tiles,),
        in_specs=[
            pl.BlockSpec((None, L * Bt, D), lambda i: (i, 0, 0)),   # x tile
            pl.BlockSpec((None, Bt, 1), lambda i: (i, 0, 0)),       # lens tile
            pl.BlockSpec((D, 8 * H), lambda i: (0, 0)),             # wih
            pl.BlockSpec((H, H4), lambda i: (0, 0)),                # whh fwd
            pl.BlockSpec((H, H4), lambda i: (0, 0)),                # whh bwd
            pl.BlockSpec((1, 8 * H), lambda i: (0, 0)),             # bias
        ],
        out_specs=pl.BlockSpec((Bt, H2), lambda i: (i, 0)),
        scratch_shapes=[pltpu.VMEM((L * Bt, 8 * H), jnp.bfloat16)],
    )

    out = pl.pallas_call(
        partial(_bilstm_kernel, Bt=Bt, L=L, H=H, unroll=unroll),
        out_shape=jax.ShapeDtypeStruct((B_pad, H2), jnp.float32),
        grid_spec=grid_spec,
        compiler_params=pltpu.CompilerParams(
            dimension_semantics=("parallel",),
            vmem_limit_bytes=int(vmem_limit)),
    )(x_tiles, lens_tiles, wih, whh_f_k, whh_b_k, bias)
    return out[:B]


class LSTMBiRNN:
    """JAX/Pallas port of the PyTorch LSTMBiRNN module (synthetic weights)."""

    def __init__(self, dim_in, dim_hid, num_rnn_layer, seed=0):
        # The original forward returns cat(hn[0][0], hn[0][1]) = layer-0
        # forward/backward final hidden states, so layers > 0 can never affect
        # the output; only layer-0 weights are materialized here.
        # TODO(synk): original module loads trained nn.LSTM weights; they are
        # synthesized deterministically here (PyTorch-style uniform init).
        self.dim_in, self.dim_hid, self.num_rnn_layer = dim_in, dim_hid, num_rnn_layer
        bound = 1.0 / float(np.sqrt(dim_hid))
        ks = jax.random.split(jax.random.PRNGKey(seed), 8)

        def u(k, shape):
            return jax.random.uniform(k, shape, dtype=jnp.float32,
                                      minval=-bound, maxval=bound)

        self.w_ih_f = u(ks[0], (4 * dim_hid, dim_in))
        self.w_hh_f = u(ks[1], (4 * dim_hid, dim_hid))
        self.b_ih_f = u(ks[2], (4 * dim_hid,))
        self.b_hh_f = u(ks[3], (4 * dim_hid,))
        self.w_ih_b = u(ks[4], (4 * dim_hid, dim_in))
        self.w_hh_b = u(ks[5], (4 * dim_hid, dim_hid))
        self.b_ih_b = u(ks[6], (4 * dim_hid,))
        self.b_hh_b = u(ks[7], (4 * dim_hid,))

    def forward(self, x, seq_lens):
        # The argsort / pack_padded_sequence / un-sort of the PyTorch code is a
        # packing no-op under in-kernel length masking, so it is omitted and
        # the result is produced directly in the original batch order.
        # Note: rows with seq_len == 0 return zeros (PyTorch's
        # pack_padded_sequence would raise instead).
        return bilstm_final_hidden(
            x, seq_lens,
            self.w_ih_f, self.w_hh_f, self.b_ih_f + self.b_hh_f,
            self.w_ih_b, self.w_hh_b, self.b_ih_b + self.b_hh_b)


def _ref_bilstm(x, lens, w_ih_f, w_hh_f, b_f, w_ih_b, w_hh_b, b_b):
    """Pure NumPy reference (float32, original PyTorch gate order)."""
    x = np.asarray(x, np.float32)
    B, L, D = x.shape
    H = w_hh_f.shape[1]
    out = np.zeros((B, 2 * H), np.float32)

    def sig(z):
        return 1.0 / (1.0 + np.exp(-z))

    def cell(xt, h, c, w_ih, w_hh, b):
        g = xt @ w_ih.T + h @ w_hh.T + b
        i, f = sig(g[0:H]), sig(g[H:2 * H])
        gg, o = np.tanh(g[2 * H:3 * H]), sig(g[3 * H:4 * H])
        c = f * c + i * gg
        return o * np.tanh(c), c

    for b in range(B):
        T = int(lens[b])
        h = np.zeros(H, np.float32); c = np.zeros(H, np.float32)
        for t in range(T):
            h, c = cell(x[b, t], h, c, w_ih_f, w_hh_f, b_f)
        out[b, :H] = h
        h = np.zeros(H, np.float32); c = np.zeros(H, np.float32)
        for t in reversed(range(T)):
            h, c = cell(x[b, t], h, c, w_ih_b, w_hh_b, b_b)
        out[b, H:] = h
    return out


if __name__ == "__main__":
    # Small deterministic setup: B=6, L=12, dim_in=128, dim_hid=128 (lane-dense).
    B, L, D, H = 6, 12, 128, 128
    model = LSTMBiRNN(dim_in=D, dim_hid=H, num_rnn_layer=1, seed=0)

    x = jax.random.normal(jax.random.PRNGKey(0), (B, L, D), dtype=jnp.float32)
    seq_lens = np.array([12, 3, 7, 1, 9, 5], dtype=np.int32)

    out = model.forward(x, seq_lens)
    out = jax.block_until_ready(out)

    ref = _ref_bilstm(
        x, seq_lens,
        np.asarray(model.w_ih_f), np.asarray(model.w_hh_f),
        np.asarray(model.b_ih_f + model.b_hh_f),
        np.asarray(model.w_ih_b), np.asarray(model.w_hh_b),
        np.asarray(model.b_ih_b + model.b_hh_b))

    # bf16 MXU inputs / bf16 gate scratch -> tolerance loosened (intentional
    # precision/performance tradeoff; math is still f32-accumulated).
    np.testing.assert_allclose(np.asarray(out), ref, rtol=3e-2, atol=3e-2)
    assert out.shape == (B, 2 * H) and out.dtype == jnp.float32

    print("KERNEL_OK")
</pallas_src>

<mosaic_0001>
module attributes {stable_mosaic.version = 11 : i64} {
  func.func @_bilstm_kernel(%arg0: i32, %arg1: memref<1x192x128xbf16, #tpu.memory_space<vmem>>, %arg2: memref<1x16x1xi32, #tpu.memory_space<vmem>>, %arg3: memref<128x1024xbf16, #tpu.memory_space<vmem>>, %arg4: memref<128x512xbf16, #tpu.memory_space<vmem>>, %arg5: memref<128x512xbf16, #tpu.memory_space<vmem>>, %arg6: memref<1x1024xf32, #tpu.memory_space<vmem>>, %arg7: memref<16x256xf32, #tpu.memory_space<vmem>>, %arg8: memref<192x1024xbf16, #tpu.memory_space<vmem>>) attributes {dimension_semantics = [#tpu.dimension_semantics<parallel>], iteration_bounds = array<i64: 1>, scalar_prefetch = 0 : i64, scratch_operands = 1 : i64, tpu.core_type = #tpu.core_type<tc>, window_params = [{transform_indices = @transform_0, window_bounds = array<i64: 1, 192, 128>}, {transform_indices = @transform_1, window_bounds = array<i64: 1, 16, 1>}, {pipeline_mode = #tpu.pipeline_mode<synchronous>, transform_indices = @transform_2, window_bounds = array<i64: 128, 1024>}, {pipeline_mode = #tpu.pipeline_mode<synchronous>, transform_indices = @transform_3, window_bounds = array<i64: 128, 512>}, {pipeline_mode = #tpu.pipeline_mode<synchronous>, transform_indices = @transform_4, window_bounds = array<i64: 128, 512>}, {pipeline_mode = #tpu.pipeline_mode<synchronous>, transform_indices = @transform_5, window_bounds = array<i64: 1, 1024>}, {transform_indices = @transform_6, window_bounds = array<i64: 16, 256>}]} {
    %c0 = arith.constant 0 : index
    %c0_0 = arith.constant 0 : index
    %c0_1 = arith.constant 0 : index
    %0 = vector.load %arg1[%c0, %c0_0, %c0_1] : memref<1x192x128xbf16, #tpu.memory_space<vmem>>, vector<1x192x128xbf16>
    %1 = vector.shape_cast %0 : vector<1x192x128xbf16> to vector<192x128xbf16>
    %c0_2 = arith.constant 0 : index
    %c0_3 = arith.constant 0 : index
    %2 = vector.load %arg3[%c0_2, %c0_3] : memref<128x1024xbf16, #tpu.memory_space<vmem>>, vector<128x1024xbf16>
    %cst = arith.constant dense<0.000000e+00> : vector<192x1024xf32>
    %3 = tpu.matmul %1, %2, %cst {dimension_numbers = #tpu.dot_dimension_numbers<[1], [0], [0], [1], [0, 0, 1, 1], [], []>} : vector<192x128xbf16>, vector<128x1024xbf16>, vector<192x1024xf32> -> vector<192x1024xf32>
    %c0_4 = arith.constant 0 : index
    %c0_5 = arith.constant 0 : index
    %4 = vector.load %arg6[%c0_4, %c0_5] : memref<1x1024xf32, #tpu.memory_space<vmem>>, vector<1x1024xf32>
    %5 = vector.broadcast %4 : vector<1x1024xf32> to vector<192x1024xf32>
    %6 = arith.addf %3, %5 : vector<192x1024xf32>
    %7 = arith.truncf %6 : vector<192x1024xf32> to vector<192x1024xbf16>
    %c0_6 = arith.constant 0 : index
    %c0_7 = arith.constant 0 : index
    %8 = vector.load %arg8[%c0_6, %c0_7] : memref<192x1024xbf16, #tpu.memory_space<vmem>>, vector<192x1024xbf16>
    tpu.vector_store %arg8[%c0_6, %c0_7], %7 {strides = array<i32>} : memref<192x1024xbf16, #tpu.memory_space<vmem>>, vector<192x1024xbf16>,
    %c0_8 = arith.constant 0 : index
    %c0_9 = arith.constant 0 : index
    %c0_10 = arith.constant 0 : index
    %9 = vector.load %arg2[%c0_8, %c0_9, %c0_10] : memref<1x16x1xi32, #tpu.memory_space<vmem>>, vector<1x16x1xi32>
    %10 = vector.shape_cast %9 : vector<1x16x1xi32> to vector<16x1xi32>
    %c0_11 = arith.constant 0 : index
    %c0_12 = arith.constant 0 : index
    %11 = vector.load %arg4[%c0_11, %c0_12] : memref<128x512xbf16, #tpu.memory_space<vmem>>, vector<128x512xbf16>
    %c0_13 = arith.constant 0 : index
    %c0_14 = arith.constant 0 : index
    %12 = vector.load %arg5[%c0_13, %c0_14] : memref<128x512xbf16, #tpu.memory_space<vmem>>, vector<128x512xbf16>
    %cst_15 = arith.constant 0.000000e+00 : f32
    %13 = vector.broadcast %cst_15 : f32 to vector<16x128xf32>
    %c0_i32 = arith.constant 0 : i32
    %14 = arith.truncf %13 : vector<16x128xf32> to vector<16x128xbf16>
    %cst_16 = arith.constant dense<0.000000e+00> : vector<16x512xf32>
    %15 = tpu.matmul %14, %11, %cst_16 {dimension_numbers = #tpu.dot_dimension_numbers<[1], [0], [0], [1], [0, 0, 1, 1], [], []>} : vector<16x128xbf16>, vector<128x512xbf16>, vector<16x512xf32> -> vector<16x512xf32>
    %16 = arith.truncf %13 : vector<16x128xf32> to vector<16x128xbf16>
    %cst_17 = arith.constant dense<0.000000e+00> : vector<16x512xf32>
    %17 = tpu.matmul %16, %12, %cst_17 {dimension_numbers = #tpu.dot_dimension_numbers<[1], [0], [0], [1], [0, 0, 1, 1], [], []>} : vector<16x128xbf16>, vector<128x512xbf16>, vector<16x512xf32> -> vector<16x512xf32>
    %c16_i32 = arith.constant 16 : i32
    %18 = arith.muli %c0_i32, %c16_i32 : i32
    %19 = tpu.assume_multiple %18, 16 : i32
    %c11_i32 = arith.constant 11 : i32
    %20 = arith.subi %c11_i32, %c0_i32 : i32
    %c16_i32_18 = arith.constant 16 : i32
    %21 = arith.muli %20, %c16_i32_18 : i32
    %22 = tpu.assume_multiple %21, 16 : i32
    %23 = arith.index_cast %19 : i32 to index
    %c0_19 = arith.constant 0 : index
    %24 = vector.load %arg8[%23, %c0_19] : memref<192x1024xbf16, #tpu.memory_space<vmem>>, vector<16x512xbf16>
    %25 = arith.extf %24 : vector<16x512xbf16> to vector<16x512xf32>
    %26 = arith.addf %15, %25 : vector<16x512xf32>
    %27 = arith.index_cast %22 : i32 to index
    %c512 = arith.constant 512 : index
    %28 = vector.load %arg8[%27, %c512] : memref<192x1024xbf16, #tpu.memory_space<vmem>>, vector<16x512xbf16>
    %29 = arith.extf %28 : vector<16x512xbf16> to vector<16x512xf32>
    %30 = arith.addf %17, %29 : vector<16x512xf32>
    %31 = vector.extract_strided_slice %26 {offsets = [0, 0], sizes = [16, 384], strides = [1, 1]} : vector<16x512xf32> to vector<16x384xf32>
    %32 = arith.negf %31 : vector<16x384xf32>
    %33 = math.exp %32 : vector<16x384xf32>
    %cst_20 = arith.constant 1.000000e+00 : f32
    %34 = vector.broadcast %cst_20 : f32 to vector<16x384xf32>
    %35 = arith.addf %34, %33 : vector<16x384xf32>
    %36 = arith.divf %34, %35 : vector<16x384xf32>
    %37 = vector.extract_strided_slice %36 {offsets = [0, 0], sizes = [16, 128], strides = [1, 1]} : vector<16x384xf32> to vector<16x128xf32>
    %38 = vector.extract_strided_slice %36 {offsets = [0, 128], sizes = [16, 128], strides = [1, 1]} : vector<16x384xf32> to vector<16x128xf32>
    %39 = vector.extract_strided_slice %36 {offsets = [0, 256], sizes = [16, 128], strides = [1, 1]} : vector<16x384xf32> to vector<16x128xf32>
    %40 = vector.extract_strided_slice %26 {offsets = [0, 384], sizes = [16, 128], strides = [1, 1]} : vector<16x512xf32> to vector<16x128xf32>
    %41 = math.tanh %40 : vector<16x128xf32>
    %42 = arith.mulf %38, %13 : vector<16x128xf32>
    %43 = arith.mulf %37, %41 : vector<16x128xf32>
    %44 = arith.addf %42, %43 : vector<16x128xf32>
    %45 = math.tanh %44 : vector<16x128xf32>
    %46 = arith.mulf %39, %45 : vector<16x128xf32>
    %47 = vector.extract_strided_slice %30 {offsets = [0, 0], sizes = [16, 384], strides = [1, 1]} : vector<16x512xf32> to vector<16x384xf32>
    %48 = arith.negf %47 : vector<16x384xf32>
    %49 = math.exp %48 : vector<16x384xf32>
    %cst_21 = arith.constant 1.000000e+00 : f32
    %50 = vector.broadcast %cst_21 : f32 to vector<16x384xf32>
    %51 = arith.addf %50, %49 : vector<16x384xf32>
    %52 = arith.divf %50, %51 : vector<16x384xf32>
    %53 = vector.extract_strided_slice %52 {offsets = [0, 0], sizes = [16, 128], strides = [1, 1]} : vector<16x384xf32> to vector<16x128xf32>
    %54 = vector.extract_strided_slice %52 {offsets = [0, 128], sizes = [16, 128], strides = [1, 1]} : vector<16x384xf32> to vector<16x128xf32>
    %55 = vector.extract_strided_slice %52 {offsets = [0, 256], sizes = [16, 128], strides = [1, 1]} : vector<16x384xf32> to vector<16x128xf32>
    %56 = vector.extract_strided_slice %30 {offsets = [0, 384], sizes = [16, 128], strides = [1, 1]} : vector<16x512xf32> to vector<16x128xf32>
    %57 = math.tanh %56 : vector<16x128xf32>
    %58 = arith.mulf %54, %13 : vector<16x128xf32>
    %59 = arith.mulf %53, %57 : vector<16x128xf32>
    %60 = arith.addf %58, %59 : vector<16x128xf32>
    %61 = math.tanh %60 : vector<16x128xf32>
    %62 = arith.mulf %55, %61 : vector<16x128xf32>
    %63 = vector.broadcast %c0_i32 : i32 to vector<16x1xi32>
    %64 = arith.cmpi slt, %63, %10 : vector<16x1xi32>
    %c11_i32_22 = arith.constant 11 : i32
    %65 = arith.subi %c11_i32_22, %c0_i32 : i32
    %66 = vector.broadcast %65 : i32 to vector<16x1xi32>
    %67 = arith.cmpi slt, %66, %10 : vector<16x1xi32>
    %68 = vector.shape_cast %64 : vector<16x1xi1> to vector<16x1xi1>
    %69 = vector.broadcast %68 : vector<16x1xi1> to vector<16x128xi1>
    %70 = arith.select %69, %46, %13 : vector<16x128xi1>, vector<16x128xf32>
    %71 = vector.shape_cast %64 : vector<16x1xi1> to vector<16x1xi1>
    %72 = vector.broadcast %71 : vector<16x1xi1> to vector<16x128xi1>
    %73 = arith.select %72, %44, %13 : vector<16x128xi1>, vector<16x128xf32>
    %74 = vector.shape_cast %67 : vector<16x1xi1> to vector<16x1xi1>
    %75 = vector.broadcast %74 : vector<16x1xi1> to vector<16x128xi1>
    %76 = arith.select %75, %62, %13 : vector<16x128xi1>, vector<16x128xf32>
    %77 = vector.shape_cast %67 : vector<16x1xi1> to vector<16x1xi1>
    %78 = vector.broadcast %77 : vector<16x1xi1> to vector<16x128xi1>
    %79 = arith.select %78, %60, %13 : vector<16x128xi1>, vector<16x128xf32>
    %c1_i32 = arith.constant 1 : i32
    %80 = arith.truncf %70 : vector<16x128xf32> to vector<16x128xbf16>
    %cst_23 = arith.constant dense<0.000000e+00> : vector<16x512xf32>
    %81 = tpu.matmul %80, %11, %cst_23 {dimension_numbers = #tpu.dot_dimension_numbers<[1], [0], [0], [1], [0, 0, 1, 1], [], []>} : vector<16x128xbf16>, vector<128x512xbf16>, vector<16x512xf32> -> vector<16x512xf32>
    %82 = arith.truncf %76 : vector<16x128xf32> to vector<16x128xbf16>
    %cst_24 = arith.constant dense<0.000000e+00> : vector<16x512xf32>
    %83 = tpu.matmul %82, %12, %cst_24 {dimension_numbers = #tpu.dot_dimension_numbers<[1], [0], [0], [1], [0, 0, 1, 1], [], []>} : vector<16x128xbf16>, vector<128x512xbf16>, vector<16x512xf32> -> vector<16x512xf32>
    %c16_i32_25 = arith.constant 16 : i32
    %84 = arith.muli %c1_i32, %c16_i32_25 : i32
    %85 = tpu.assume_multiple %84, 16 : i32
    %c11_i32_26 = arith.constant 11 : i32
    %86 = arith.subi %c11_i32_26, %c1_i32 : i32
    %c16_i32_27 = arith.constant 16 : i32
    %87 = arith.muli %86, %c16_i32_27 : i32
    %88 = tpu.assume_multiple %87, 16 : i32
    %89 = arith.index_cast %85 : i32 to index
    %c0_28 = arith.constant 0 : index
    %90 = vector.load %arg8[%89, %c0_28] : memref<192x1024xbf16, #tpu.memory_space<vmem>>, vector<16x512xbf16>
    %91 = arith.extf %90 : vector<16x512xbf16> to vector<16x512xf32>
    %92 = arith.addf %81, %91 : vector<16x512xf32>
    %93 = arith.index_cast %88 : i32 to index
    %c512_29 = arith.constant 512 : index
    %94 = vector.load %arg8[%93, %c512_29] : memref<192x1024xbf16, #tpu.memory_space<vmem>>, vector<16x512xbf16>
    %95 = arith.extf %94 : vector<16x512xbf16> to vector<16x512xf32>
    %96 = arith.addf %83, %95 : vector<16x512xf32>
    %97 = vector.extract_strided_slice %92 {offsets = [0, 0], sizes = [16, 384], strides = [1, 1]} : vector<16x512xf32> to vector<16x384xf32>
    %98 = arith.negf %97 : vector<16x384xf32>
    %99 = math.exp %98 : vector<16x384xf32>
    %cst_30 = arith.constant 1.000000e+00 : f32
    %100 = vector.broadcast %cst_30 : f32 to vector<16x384xf32>
    %101 = arith.addf %100, %99 : vector<16x384xf32>
    %102 = arith.divf %100, %101 : vector<16x384xf32>
    %103 = vector.extract_strided_slice %102 {offsets = [0, 0], sizes = [16, 128], strides = [1, 1]} : vector<16x384xf32> to vector<16x128xf32>
    %104 = vector.extract_strided_slice %102 {offsets = [0, 128], sizes = [16, 128], strides = [1, 1]} : vector<16x384xf32> to vector<16x128xf32>
    %105 = vector.extract_strided_slice %102 {offsets = [0, 256], sizes = [16, 128], strides = [1, 1]} : vector<16x384xf32> to vector<16x128xf32>
    %106 = vector.extract_strided_slice %92 {offsets = [0, 384], sizes = [16, 128], strides = [1, 1]} : vector<16x512xf32> to vector<16x128xf32>
    %107 = math.tanh %106 : vector<16x128xf32>
    %108 = arith.mulf %104, %73 : vector<16x128xf32>
    %109 = arith.mulf %103, %107 : vector<16x128xf32>
    %110 = arith.addf %108, %109 : vector<16x128xf32>
    %111 = math.tanh %110 : vector<16x128xf32>
    %112 = arith.mulf %105, %111 : vector<16x128xf32>
    %113 = vector.extract_strided_slice %96 {offsets = [0, 0], sizes = [16, 384], strides = [1, 1]} : vector<16x512xf32> to vector<16x384xf32>
    %114 = arith.negf %113 : vector<16x384xf32>
    %115 = math.exp %114 : vector<16x384xf32>
    %cst_31 = arith.constant 1.000000e+00 : f32
    %116 = vector.broadcast %cst_31 : f32 to vector<16x384xf32>
    %117 = arith.addf %116, %115 : vector<16x384xf32>
    %118 = arith.divf %116, %117 : vector<16x384xf32>
    %119 = vector.extract_strided_slice %118 {offsets = [0, 0], sizes = [16, 128], strides = [1, 1]} : vector<16x384xf32> to vector<16x128xf32>
    %120 = vector.extract_strided_slice %118 {offsets = [0, 128], sizes = [16, 128], strides = [1, 1]} : vector<16x384xf32> to vector<16x128xf32>
    %121 = vector.extract_strided_slice %118 {offsets = [0, 256], sizes = [16, 128], strides = [1, 1]} : vector<16x384xf32> to vector<16x128xf32>
    %122 = vector.extract_strided_slice %96 {offsets = [0, 384], sizes = [16, 128], strides = [1, 1]} : vector<16x512xf32> to vector<16x128xf32>
    %123 = math.tanh %122 : vector<16x128xf32>
    %124 = arith.mulf %120, %79 : vector<16x128xf32>
    %125 = arith.mulf %119, %123 : vector<16x128xf32>
    %126 = arith.addf %124, %125 : vector<16x128xf32>
    %127 = math.tanh %126 : vector<16x128xf32>
    %128 = arith.mulf %121, %127 : vector<16x128xf32>
    %129 = vector.broadcast %c1_i32 : i32 to vector<16x1xi32>
    %130 = arith.cmpi slt, %129, %10 : vector<16x1xi32>
    %c11_i32_32 = arith.constant 11 : i32
    %131 = arith.subi %c11_i32_32, %c1_i32 : i32
    %132 = vector.broadcast %131 : i32 to vector<16x1xi32>
    %133 = arith.cmpi slt, %132, %10 : vector<16x1xi32>
    %134 = vector.shape_cast %130 : vector<16x1xi1> to vector<16x1xi1>
    %135 = vector.broadcast %134 : vector<16x1xi1> to vector<16x128xi1>
    %136 = arith.select %135, %112, %70 : vector<16x128xi1>, vector<16x128xf32>
    %137 = vector.shape_cast %130 : vector<16x1xi1> to vector<16x1xi1>
    %138 = vector.broadcast %137 : vector<16x1xi1> to vector<16x128xi1>
    %139 = arith.select %138, %110, %73 : vector<16x128xi1>, vector<16x128xf32>
    %140 = vector.shape_cast %133 : vector<16x1xi1> to vector<16x1xi1>
    %141 = vector.broadcast %140 : vector<16x1xi1> to vector<16x128xi1>
    %142 = arith.select %141, %128, %76 : vector<16x128xi1>, vector<16x128xf32>
    %143 = vector.shape_cast %133 : vector<16x1xi1> to vector<16x1xi1>
    %144 = vector.broadcast %143 : vector<16x1xi1> to vector<16x128xi1>
    %145 = arith.select %144, %126, %79 : vector<16x128xi1>, vector<16x128xf32>
    %c2_i32 = arith.constant 2 : i32
    %146 = arith.truncf %136 : vector<16x128xf32> to vector<16x128xbf16>
    %cst_33 = arith.constant dense<0.000000e+00> : vector<16x512xf32>
    %147 = tpu.matmul %146, %11, %cst_33 {dimension_numbers = #tpu.dot_dimension_numbers<[1], [0], [0], [1], [0, 0, 1, 1], [], []>} : vector<16x128xbf16>, vector<128x512xbf16>, vector<16x512xf32> -> vector<16x512xf32>
    %148 = arith.truncf %142 : vector<16x128xf32> to vector<16x128xbf16>
    %cst_34 = arith.constant dense<0.000000e+00> : vector<16x512xf32>
    %149 = tpu.matmul %148, %12, %cst_34 {dimension_numbers = #tpu.dot_dimension_numbers<[1], [0], [0], [1], [0, 0, 1, 1], [], []>} : vector<16x128xbf16>, vector<128x512xbf16>, vector<16x512xf32> -> vector<16x512xf32>
    %c16_i32_35 = arith.constant 16 : i32
    %150 = arith.muli %c2_i32, %c16_i32_35 : i32
    %151 = tpu.assume_multiple %150, 16 : i32
    %c11_i32_36 = arith.constant 11 : i32
    %152 = arith.subi %c11_i32_36, %c2_i32 : i32
    %c16_i32_37 = arith.constant 16 : i32
    %153 = arith.muli %152, %c16_i32_37 : i32
    %154 = tpu.assume_multiple %153, 16 : i32
    %155 = arith.index_cast %151 : i32 to index
    %c0_38 = arith.constant 0 : index
    %156 = vector.load %arg8[%155, %c0_38] : memref<192x1024xbf16, #tpu.memory_space<vmem>>, vector<16x512xbf16>
    %157 = arith.extf %156 : vector<16x512xbf16> to vector<16x512xf32>
    %158 = arith.addf %147, %157 : vector<16x512xf32>
    %159 = arith.index_cast %154 : i32 to index
    %c512_39 = arith.constant 512 : index
    %160 = vector.load %arg8[%159, %c512_39] : memref<192x1024xbf16, #tpu.memory_space<vmem>>, vector<16x512xbf16>
    %161 = arith.extf %160 : vector<16x512xbf16> to vector<16x512xf32>
    %162 = arith.addf %149, %161 : vector<16x512xf32>
    %163 = vector.extract_strided_slice %158 {offsets = [0, 0], sizes = [16, 384], strides = [1, 1]} : vector<16x512xf32> to vector<16x384xf32>
    %164 = arith.negf %163 : vector<16x384xf32>
    %165 = math.exp %164 : vector<16x384xf32>
    %cst_40 = arith.constant 1.000000e+00 : f32
    %166 = vector.broadcast %cst_40 : f32 to vector<16x384xf32>
    %167 = arith.addf %166, %165 : vector<16x384xf32>
    %168 = arith.divf %166, %167 : vector<16x384xf32>
    %169 = vector.extract_strided_slice %168 {offsets = [0, 0], sizes = [16, 128], strides = [1, 1]} : vector<16x384xf32> to vector<16x128xf32>
    %170 = vector.extract_strided_slice %168 {offsets = [0, 128], sizes = [16, 128], strides = [1, 1]} : vector<16x384xf32> to vector<16x128xf32>
    %171 = vector.extract_strided_slice %168 {offsets = [0, 256], sizes = [16, 128], strides = [1, 1]} : vector<16x384xf32> to vector<16x128xf32>
    %172 = vector.extract_strided_slice %158 {offsets = [0, 384], sizes = [16, 128], strides = [1, 1]} : vector<16x512xf32> to vector<16x128xf32>
    %173 = math.tanh %172 : vector<16x128xf32>
    %174 = arith.mulf %170, %139 : vector<16x128xf32>
    %175 = arith.mulf %169, %173 : vector<16x128xf32>
    %176 = arith.addf %174, %175 : vector<16x128xf32>
    %177 = math.tanh %176 : vector<16x128xf32>
    %178 = arith.mulf %171, %177 : vector<16x128xf32>
    %179 = vector.extract_strided_slice %162 {offsets = [0, 0], sizes = [16, 384], strides = [1, 1]} : vector<16x512xf32> to vector<16x384xf32>
    %180 = arith.negf %179 : vector<16x384xf32>
    %181 = math.exp %180 : vector<16x384xf32>
    %cst_41 = arith.constant 1.000000e+00 : f32
    %182 = vector.broadcast %cst_41 : f32 to vector<16x384xf32>
    %183 = arith.addf %182, %181 : vector<16x384xf32>
    %184 = arith.divf %182, %183 : vector<16x384xf32>
    %185 = vector.extract_strided_slice %184 {offsets = [0, 0], sizes = [16, 128], strides = [1, 1]} : vector<16x384xf32> to vector<16x128xf32>
    %186 = vector.extract_strided_slice %184 {offsets = [0, 128], sizes = [16, 128], strides = [1, 1]} : vector<16x384xf32> to vector<16x128xf32>
    %187 = vector.extract_strided_slice %184 {offsets = [0, 256], sizes = [16, 128], strides = [1, 1]} : vector<16x384xf32> to vector<16x128xf32>
    %188 = vector.extract_strided_slice %162 {offsets = [0, 384], sizes = [16, 128], strides = [1, 1]} : vector<16x512xf32> to vector<16x128xf32>
    %189 = math.tanh %188 : vector<16x128xf32>
    %190 = arith.mulf %186, %145 : vector<16x128xf32>
    %191 = arith.mulf %185, %189 : vector<16x128xf32>
    %192 = arith.addf %190, %191 : vector<16x128xf32>
    %193 = math.tanh %192 : vector<16x128xf32>
    %194 = arith.mulf %187, %193 : vector<16x128xf32>
    %195 = vector.broadcast %c2_i32 : i32 to vector<16x1xi32>
    %196 = arith.cmpi slt, %195, %10 : vector<16x1xi32>
    %c11_i32_42 = arith.constant 11 : i32
    %197 = arith.subi %c11_i32_42, %c2_i32 : i32
    %198 = vector.broadcast %197 : i32 to vector<16x1xi32>
    %199 = arith.cmpi slt, %198, %10 : vector<16x1xi32>
    %200 = vector.shape_cast %196 : vector<16x1xi1> to vector<16x1xi1>
    %201 = vector.broadcast %200 : vector<16x1xi1> to vector<16x128xi1>
    %202 = arith.select %201, %178, %136 : vector<16x128xi1>, vector<16x128xf32>
    %203 = vector.shape_cast %196 : vector<16x1xi1> to vector<16x1xi1>
    %204 = vector.broadcast %203 : vector<16x1xi1> to vector<16x128xi1>
    %205 = arith.select %204, %176, %139 : vector<16x128xi1>, vector<16x128xf32>
    %206 = vector.shape_cast %199 : vector<16x1xi1> to vector<16x1xi1>
    %207 = vector.broadcast %206 : vector<16x1xi1> to vector<16x128xi1>
    %208 = arith.select %207, %194, %142 : vector<16x128xi1>, vector<16x128xf32>
    %209 = vector.shape_cast %199 : vector<16x1xi1> to vector<16x1xi1>
    %210 = vector.broadcast %209 : vector<16x1xi1> to vector<16x128xi1>
    %211 = arith.select %210, %192, %145 : vector<16x128xi1>, vector<16x128xf32>
    %c3_i32 = arith.constant 3 : i32
    %212 = arith.truncf %202 : vector<16x128xf32> to vector<16x128xbf16>
    %cst_43 = arith.constant dense<0.000000e+00> : vector<16x512xf32>
    %213 = tpu.matmul %212, %11, %cst_43 {dimension_numbers = #tpu.dot_dimension_numbers<[1], [0], [0], [1], [0, 0, 1, 1], [], []>} : vector<16x128xbf16>, vector<128x512xbf16>, vector<16x512xf32> -> vector<16x512xf32>
    %214 = arith.truncf %208 : vector<16x128xf32> to vector<16x128xbf16>
    %cst_44 = arith.constant dense<0.000000e+00> : vector<16x512xf32>
    %215 = tpu.matmul %214, %12, %cst_44 {dimension_numbers = #tpu.dot_dimension_numbers<[1], [0], [0], [1], [0, 0, 1, 1], [], []>} : vector<16x128xbf16>, vector<128x512xbf16>, vector<16x512xf32> -> vector<16x512xf32>
    %c16_i32_45 = arith.constant 16 : i32
    %216 = arith.muli %c3_i32, %c16_i32_45 : i32
    %217 = tpu.assume_multiple %216, 16 : i32
    %c11_i32_46 = arith.constant 11 : i32
    %218 = arith.subi %c11_i32_46, %c3_i32 : i32
    %c16_i32_47 = arith.constant 16 : i32
    %219 = arith.muli %218, %c16_i32_47 : i32
    %220 = tpu.assume_multiple %219, 16 : i32
    %221 = arith.index_cast %217 : i32 to index
    %c0_48 = arith.constant 0 : index
    %222 = vector.load %arg8[%221, %c0_48] : memref<192x1024xbf16, #tpu.memory_space<vmem>>, vector<16x512xbf16>
    %223 = arith.extf %222 : vector<16x512xbf16> to vector<16x512xf32>
    %224 = arith.addf %213, %223 : vector<16x512xf32>
    %225 = arith.index_cast %220 : i32 to index
    %c512_49 = arith.constant 512 : index
    %226 = vector.load %arg8[%225, %c512_49] : memref<192x1024xbf16, #tpu.memory_space<vmem>>, vector<16x512xbf16>
    %227 = arith.extf %226 : vector<16x512xbf16> to vector<16x512xf32>
    %228 = arith.addf %215, %227 : vector<16x512xf32>
    %229 = vector.extract_strided_slice %224 {offsets = [0, 0], sizes = [16, 384], strides = [1, 1]} : vector<16x512xf32> to vector<16x384xf32>
    %230 = arith.negf %229 : vector<16x384xf32>
    %231 = math.exp %230 : vector<16x384xf32>
    %cst_50 = arith.constant 1.000000e+00 : f32
    %232 = vector.broadcast %cst_50 : f32 to vector<16x384xf32>
    %233 = arith.addf %232, %231 : vector<16x384xf32>
    %234 = arith.divf %232, %233 : vector<16x384xf32>
    %235 = vector.extract_strided_slice %234 {offsets = [0, 0], sizes = [16, 128], strides = [1, 1]} : vector<16x384xf32> to vector<16x128xf32>
    %236 = vector.extract_strided_slice %234 {offsets = [0, 128], sizes = [16, 128], strides = [1, 1]} : vector<16x384xf32> to vector<16x128xf32>
    %237 = vector.extract_strided_slice %234 {offsets = [0, 256], sizes = [16, 128], strides = [1, 1]} : vector<16x384xf32> to vector<16x128xf32>
    %238 = vector.extract_strided_slice %224 {offsets = [0, 384], sizes = [16, 128], strides = [1, 1]} : vector<16x512xf32> to vector<16x128xf32>
    %239 = math.tanh %238 : vector<16x128xf32>
    %240 = arith.mulf %236, %205 : vector<16x128xf32>
    %241 = arith.mulf %235, %239 : vector<16x128xf32>
    %242 = arith.addf %240, %241 : vector<16x128xf32>
    %243 = math.tanh %242 : vector<16x128xf32>
    %244 = arith.mulf %237, %243 : vector<16x128xf32>
    %245 = vector.extract_strided_slice %228 {offsets = [0, 0], sizes = [16, 384], strides = [1, 1]} : vector<16x512xf32> to vector<16x384xf32>
    %246 = arith.negf %245 : vector<16x384xf32>
    %247 = math.exp %246 : vector<16x384xf32>
    %cst_51 = arith.constant 1.000000e+00 : f32
    %248 = vector.broadcast %cst_51 : f32 to vector<16x384xf32>
    %249 = arith.addf %248, %247 : vector<16x384xf32>
    %250 = arith.divf %248, %249 : vector<16x384xf32>
    %251 = vector.extract_strided_slice %250 {offsets = [0, 0], sizes = [16, 128], strides = [1, 1]} : vector<16x384xf32> to vector<16x128xf32>
    %252 = vector.extract_strided_slice %250 {offsets = [0, 128], sizes = [16, 128], strides = [1, 1]} : vector<16x384xf32> to vector<16x128xf32>
    %253 = vector.extract_strided_slice %250 {offsets = [0, 256], sizes = [16, 128], strides = [1, 1]} : vector<16x384xf32> to vector<16x128xf32>
    %254 = vector.extract_strided_slice %228 {offsets = [0, 384], sizes = [16, 128], strides = [1, 1]} : vector<16x512xf32> to vector<16x128xf32>
    %255 = math.tanh %254 : vector<16x128xf32>
    %256 = arith.mulf %252, %211 : vector<16x128xf32>
    %257 = arith.mulf %251, %255 : vector<16x128xf32>
    %258 = arith.addf %256, %257 : vector<16x128xf32>
    %259 = math.tanh %258 : vector<16x128xf32>
    %260 = arith.mulf %253, %259 : vector<16x128xf32>
    %261 = vector.broadcast %c3_i32 : i32 to vector<16x1xi32>
    %262 = arith.cmpi slt, %261, %10 : vector<16x1xi32>
    %c11_i32_52 = arith.constant 11 : i32
    %263 = arith.subi %c11_i32_52, %c3_i32 : i32
    %264 = vector.broadcast %263 : i32 to vector<16x1xi32>
    %265 = arith.cmpi slt, %264, %10 : vector<16x1xi32>
    %266 = vector.shape_cast %262 : vector<16x1xi1> to vector<16x1xi1>
    %267 = vector.broadcast %266 : vector<16x1xi1> to vector<16x128xi1>
    %268 = arith.select %267, %244, %202 : vector<16x128xi1>, vector<16x128xf32>
    %269 = vector.shape_cast %262 : vector<16x1xi1> to vector<16x1xi1>
    %270 = vector.broadcast %269 : vector<16x1xi1> to vector<16x128xi1>
    %271 = arith.select %270, %242, %205 : vector<16x128xi1>, vector<16x128xf32>
    %272 = vector.shape_cast %265 : vector<16x1xi1> to vector<16x1xi1>
    %273 = vector.broadcast %272 : vector<16x1xi1> to vector<16x128xi1>
    %274 = arith.select %273, %260, %208 : vector<16x128xi1>, vector<16x128xf32>
    %275 = vector.shape_cast %265 : vector<16x1xi1> to vector<16x1xi1>
    %276 = vector.broadcast %275 : vector<16x1xi1> to vector<16x128xi1>
    %277 = arith.select %276, %258, %211 : vector<16x128xi1>, vector<16x128xf32>
    %c4_i32 = arith.constant 4 : i32
    %278 = arith.truncf %268 : vector<16x128xf32> to vector<16x128xbf16>
    %cst_53 = arith.constant dense<0.000000e+00> : vector<16x512xf32>
    %279 = tpu.matmul %278, %11, %cst_53 {dimension_numbers = #tpu.dot_dimension_numbers<[1], [0], [0], [1], [0, 0, 1, 1], [], []>} : vector<16x128xbf16>, vector<128x512xbf16>, vector<16x512xf32> -> vector<16x512xf32>
    %280 = arith.truncf %274 : vector<16x128xf32> to vector<16x128xbf16>
    %cst_54 = arith.constant dense<0.000000e+00> : vector<16x512xf32>
    %281 = tpu.matmul %280, %12, %cst_54 {dimension_numbers = #tpu.dot_dimension_numbers<[1], [0], [0], [1], [0, 0, 1, 1], [], []>} : vector<16x128xbf16>, vector<128x512xbf16>, vector<16x512xf32> -> vector<16x512xf32>
    %c16_i32_55 = arith.constant 16 : i32
    %282 = arith.muli %c4_i32, %c16_i32_55 : i32
    %283 = tpu.assume_multiple %282, 16 : i32
    %c11_i32_56 = arith.constant 11 : i32
    %284 = arith.subi %c11_i32_56, %c4_i32 : i32
    %c16_i32_57 = arith.constant 16 : i32
    %285 = arith.muli %284, %c16_i32_57 : i32
    %286 = tpu.assume_multiple %285, 16 : i32
    %287 = arith.index_cast %283 : i32 to index
    %c0_58 = arith.constant 0 : index
    %288 = vector.load %arg8[%287, %c0_58] : memref<192x1024xbf16, #tpu.memory_space<vmem>>, vector<16x512xbf16>
    %289 = arith.extf %288 : vector<16x512xbf16> to vector<16x512xf32>
    %290 = arith.addf %279, %289 : vector<16x512xf32>
    %291 = arith.index_cast %286 : i32 to index
    %c512_59 = arith.constant 512 : index
    %292 = vector.load %arg8[%291, %c512_59] : memref<192x1024xbf16, #tpu.memory_space<vmem>>, vector<16x512xbf16>
    %293 = arith.extf %292 : vector<16x512xbf16> to vector<16x512xf32>
    %294 = arith.addf %281, %293 : vector<16x512xf32>
    %295 = vector.extract_strided_slice %290 {offsets = [0, 0], sizes = [16, 384], strides = [1, 1]} : vector<16x512xf32> to vector<16x384xf32>
    %296 = arith.negf %295 : vector<16x384xf32>
    %297 = math.exp %296 : vector<16x384xf32>
    %cst_60 = arith.constant 1.000000e+00 : f32
    %298 = vector.broadcast %cst_60 : f32 to vector<16x384xf32>
    %299 = arith.addf %298, %297 : vector<16x384xf32>
    %300 = arith.divf %298, %299 : vector<16x384xf32>
    %301 = vector.extract_strided_slice %300 {offsets = [0, 0], sizes = [16, 128], strides = [1, 1]} : vector<16x384xf32> to vector<16x128xf32>
    %302 = vector.extract_strided_slice %300 {offsets = [0, 128], sizes = [16, 128], strides = [1, 1]} : vector<16x384xf32> to vector<16x128xf32>
    %303 = vector.extract_strided_slice %300 {offsets = [0, 256], sizes = [16, 128], strides = [1, 1]} : vector<16x384xf32> to vector<16x128xf32>
    %304 = vector.extract_strided_slice %290 {offsets = [0, 384], sizes = [16, 128], strides = [1, 1]} : vector<16x512xf32> to vector<16x128xf32>
    %305 = math.tanh %304 : vector<16x128xf32>
    %306 = arith.mulf %302, %271 : vector<16x128xf32>
    %307 = arith.mulf %301, %305 : vector<16x128xf32>
    %308 = arith.addf %306, %307 : vector<16x128xf32>
    %309 = math.tanh %308 : vector<16x128xf32>
    %310 = arith.mulf %303, %309 : vector<16x128xf32>
    %311 = vector.extract_strided_slice %294 {offsets = [0, 0], sizes = [16, 384], strides = [1, 1]} : vector<16x512xf32> to vector<16x384xf32>
    %312 = arith.negf %311 : vector<16x384xf32>
    %313 = math.exp %312 : vector<16x384xf32>
    %cst_61 = arith.constant 1.000000e+00 : f32
    %314 = vector.broadcast %cst_61 : f32 to vector<16x384xf32>
    %315 = arith.addf %314, %313 : vector<16x384xf32>
    %316 = arith.divf %314, %315 : vector<16x384xf32>
    %317 = vector.extract_strided_slice %316 {offsets = [0, 0], sizes = [16, 128], strides = [1, 1]} : vector<16x384xf32> to vector<16x128xf32>
    %318 = vector.extract_strided_slice %316 {offsets = [0, 128], sizes = [16, 128], strides = [1, 1]} : vector<16x384xf32> to vector<16x128xf32>
    %319 = vector.extract_strided_slice %316 {offsets = [0, 256], sizes = [16, 128], strides = [1, 1]} : vector<16x384xf32> to vector<16x128xf32>
    %320 = vector.extract_strided_slice %294 {offsets = [0, 384], sizes = [16, 128], strides = [1, 1]} : vector<16x512xf32> to vector<16x128xf32>
    %321 = math.tanh %320 : vector<16x128xf32>
    %322 = arith.mulf %318, %277 : vector<16x128xf32>
    %323 = arith.mulf %317, %321 : vector<16x128xf32>
    %324 = arith.addf %322, %323 : vector<16x128xf32>
    %325 = math.tanh %324 : vector<16x128xf32>
    %326 = arith.mulf %319, %325 : vector<16x128xf32>
    %327 = vector.broadcast %c4_i32 : i32 to vector<16x1xi32>
    %328 = arith.cmpi slt, %327, %10 : vector<16x1xi32>
    %c11_i32_62 = arith.constant 11 : i32
    %329 = arith.subi %c11_i32_62, %c4_i32 : i32
    %330 = vector.broadcast %329 : i32 to vector<16x1xi32>
    %331 = arith.cmpi slt, %330, %10 : vector<16x1xi32>
    %332 = vector.shape_cast %328 : vector<16x1xi1> to vector<16x1xi1>
    %333 = vector.broadcast %332 : vector<16x1xi1> to vector<16x128xi1>
    %334 = arith.select %333, %310, %268 : vector<16x128xi1>, vector<16x128xf32>
    %335 = vector.shape_cast %328 : vector<16x1xi1> to vector<16x1xi1>
    %336 = vector.broadcast %335 : vector<16x1xi1> to vector<16x128xi1>
    %337 = arith.select %336, %308, %271 : vector<16x128xi1>, vector<16x128xf32>
    %338 = vector.shape_cast %331 : vector<16x1xi1> to vector<16x1xi1>
    %339 = vector.broadcast %338 : vector<16x1xi1> to vector<16x128xi1>
    %340 = arith.select %339, %326, %274 : vector<16x128xi1>, vector<16x128xf32>
    %341 = vector.shape_cast %331 : vector<16x1xi1> to vector<16x1xi1>
    %342 = vector.broadcast %341 : vector<16x1xi1> to vector<16x128xi1>
    %343 = arith.select %342, %324, %277 : vector<16x128xi1>, vector<16x128xf32>
    %c5_i32 = arith.constant 5 : i32
    %344 = arith.truncf %334 : vector<16x128xf32> to vector<16x128xbf16>
    %cst_63 = arith.constant dense<0.000000e+00> : vector<16x512xf32>
    %345 = tpu.matmul %344, %11, %cst_63 {dimension_numbers = #tpu.dot_dimension_numbers<[1], [0], [0], [1], [0, 0, 1, 1], [], []>} : vector<16x128xbf16>, vector<128x512xbf16>, vector<16x512xf32> -> vector<16x512xf32>
    %346 = arith.truncf %340 : vector<16x128xf32> to vector<16x128xbf16>
    %cst_64 = arith.constant dense<0.000000e+00> : vector<16x512xf32>
    %347 = tpu.matmul %346, %12, %cst_64 {dimension_numbers = #tpu.dot_dimension_numbers<[1], [0], [0], [1], [0, 0, 1, 1], [], []>} : vector<16x128xbf16>, vector<128x512xbf16>, vector<16x512xf32> -> vector<16x512xf32>
    %c16_i32_65 = arith.constant 16 : i32
    %348 = arith.muli %c5_i32, %c16_i32_65 : i32
    %349 = tpu.assume_multiple %348, 16 : i32
    %c11_i32_66 = arith.constant 11 : i32
    %350 = arith.subi %c11_i32_66, %c5_i32 : i32
    %c16_i32_67 = arith.constant 16 : i32
    %351 = arith.muli %350, %c16_i32_67 : i32
    %352 = tpu.assume_multiple %351, 16 : i32
    %353 = arith.index_cast %349 : i32 to index
    %c0_68 = arith.constant 0 : index
    %354 = vector.load %arg8[%353, %c0_68] : memref<192x1024xbf16, #tpu.memory_space<vmem>>, vector<16x512xbf16>
    %355 = arith.extf %354 : vector<16x512xbf16> to vector<16x512xf32>
    %356 = arith.addf %345, %355 : vector<16x512xf32>
    %357 = arith.index_cast %352 : i32 to index
    %c512_69 = arith.constant 512 : index
    %358 = vector.load %arg8[%357, %c512_69] : memref<192x1024xbf16, #tpu.memory_space<vmem>>, vector<16x512xbf16>
    %359 = arith.extf %358 : vector<16x512xbf16> to vector<16x512xf32>
    %360 = arith.addf %347, %359 : vector<16x512xf32>
    %361 = vector.extract_strided_slice %356 {offsets = [0, 0], sizes = [16, 384], strides = [1, 1]} : vector<16x512xf32> to vector<16x384xf32>
    %362 = arith.negf %361 : vector<16x384xf32>
    %363 = math.exp %362 : vector<16x384xf32>
    %cst_70 = arith.constant 1.000000e+00 : f32
    %364 = vector.broadcast %cst_70 : f32 to vector<16x384xf32>
    %365 = arith.addf %364, %363 : vector<16x384xf32>
    %366 = arith.divf %364, %365 : vector<16x384xf32>
    %367 = vector.extract_strided_slice %366 {offsets = [0, 0], sizes = [16, 128], strides = [1, 1]} : vector<16x384xf32> to vector<16x128xf32>
    %368 = vector.extract_strided_slice %366 {offsets = [0, 128], sizes = [16, 128], strides = [1, 1]} : vector<16x384xf32> to vector<16x128xf32>
    %369 = vector.extract_strided_slice %366 {offsets = [0, 256], sizes = [16, 128], strides = [1, 1]} : vector<16x384xf32> to vector<16x128xf32>
    %370 = vector.extract_strided_slice %356 {offsets = [0, 384], sizes = [16, 128], strides = [1, 1]} : vector<16x512xf32> to vector<16x128xf32>
    %371 = math.tanh %370 : vector<16x128xf32>
    %372 = arith.mulf %368, %337 : vector<16x128xf32>
    %373 = arith.mulf %367, %371 : vector<16x128xf32>
    %374 = arith.addf %372, %373 : vector<16x128xf32>
    %375 = math.tanh %374 : vector<16x128xf32>
    %376 = arith.mulf %369, %375 : vector<16x128xf32>
    %377 = vector.extract_strided_slice %360 {offsets = [0, 0], sizes = [16, 384], strides = [1, 1]} : vector<16x512xf32> to vector<16x384xf32>
    %378 = arith.negf %377 : vector<16x384xf32>
    %379 = math.exp %378 : vector<16x384xf32>
    %cst_71 = arith.constant 1.000000e+00 : f32
    %380 = vector.broadcast %cst_71 : f32 to vector<16x384xf32>
    %381 = arith.addf %380, %379 : vector<16x384xf32>
    %382 = arith.divf %380, %381 : vector<16x384xf32>
    %383 = vector.extract_strided_slice %382 {offsets = [0, 0], sizes = [16, 128], strides = [1, 1]} : vector<16x384xf32> to vector<16x128xf32>
    %384 = vector.extract_strided_slice %382 {offsets = [0, 128], sizes = [16, 128], strides = [1, 1]} : vector<16x384xf32> to vector<16x128xf32>
    %385 = vector.extract_strided_slice %382 {offsets = [0, 256], sizes = [16, 128], strides = [1, 1]} : vector<16x384xf32> to vector<16x128xf32>
    %386 = vector.extract_strided_slice %360 {offsets = [0, 384], sizes = [16, 128], strides = [1, 1]} : vector<16x512xf32> to vector<16x128xf32>
    %387 = math.tanh %386 : vector<16x128xf32>
    %388 = arith.mulf %384, %343 : vector<16x128xf32>
    %389 = arith.mulf %383, %387 : vector<16x128xf32>
    %390 = arith.addf %388, %389 : vector<16x128xf32>
    %391 = math.tanh %390 : vector<16x128xf32>
    %392 = arith.mulf %385, %391 : vector<16x128xf32>
    %393 = vector.broadcast %c5_i32 : i32 to vector<16x1xi32>
    %394 = arith.cmpi slt, %393, %10 : vector<16x1xi32>
    %c11_i32_72 = arith.constant 11 : i32
    %395 = arith.subi %c11_i32_72, %c5_i32 : i32
    %396 = vector.broadcast %395 : i32 to vector<16x1xi32>
    %397 = arith.cmpi slt, %396, %10 : vector<16x1xi32>
    %398 = vector.shape_cast %394 : vector<16x1xi1> to vector<16x1xi1>
    %399 = vector.broadcast %398 : vector<16x1xi1> to vector<16x128xi1>
    %400 = arith.select %399, %376, %334 : vector<16x128xi1>, vector<16x128xf32>
    %401 = vector.shape_cast %394 : vector<16x1xi1> to vector<16x1xi1>
    %402 = vector.broadcast %401 : vector<16x1xi1> to vector<16x128xi1>
    %403 = arith.select %402, %374, %337 : vector<16x128xi1>, vector<16x128xf32>
    %404 = vector.shape_cast %397 : vector<16x1xi1> to vector<16x1xi1>
    %405 = vector.broadcast %404 : vector<16x1xi1> to vector<16x128xi1>
    %406 = arith.select %405, %392, %340 : vector<16x128xi1>, vector<16x128xf32>
    %407 = vector.shape_cast %397 : vector<16x1xi1> to vector<16x1xi1>
    %408 = vector.broadcast %407 : vector<16x1xi1> to vector<16x128xi1>
    %409 = arith.select %408, %390, %343 : vector<16x128xi1>, vector<16x128xf32>
    %c6_i32 = arith.constant 6 : i32
    %410 = arith.truncf %400 : vector<16x128xf32> to vector<16x128xbf16>
    %cst_73 = arith.constant dense<0.000000e+00> : vector<16x512xf32>
    %411 = tpu.matmul %410, %11, %cst_73 {dimension_numbers = #tpu.dot_dimension_numbers<[1], [0], [0], [1], [0, 0, 1, 1], [], []>} : vector<16x128xbf16>, vector<128x512xbf16>, vector<16x512xf32> -> vector<16x512xf32>
    %412 = arith.truncf %406 : vector<16x128xf32> to vector<16x128xbf16>
    %cst_74 = arith.constant dense<0.000000e+00> : vector<16x512xf32>
    %413 = tpu.matmul %412, %12, %cst_74 {dimension_numbers = #tpu.dot_dimension_numbers<[1], [0], [0], [1], [0, 0, 1, 1], [], []>} : vector<16x128xbf16>, vector<128x512xbf16>, vector<16x512xf32> -> vector<16x512xf32>
    %c16_i32_75 = arith.constant 16 : i32
    %414 = arith.muli %c6_i32, %c16_i32_75 : i32
    %415 = tpu.assume_multiple %414, 16 : i32
    %c11_i32_76 = arith.constant 11 : i32
    %416 = arith.subi %c11_i32_76, %c6_i32 : i32
    %c16_i32_77 = arith.constant 16 : i32
    %417 = arith.muli %416, %c16_i32_77 : i32
    %418 = tpu.assume_multiple %417, 16 : i32
    %419 = arith.index_cast %415 : i32 to index
    %c0_78 = arith.constant 0 : index
    %420 = vector.load %arg8[%419, %c0_78] : memref<192x1024xbf16, #tpu.memory_space<vmem>>, vector<16x512xbf16>
    %421 = arith.extf %420 : vector<16x512xbf16> to vector<16x512xf32>
    %422 = arith.addf %411, %421 : vector<16x512xf32>
    %423 = arith.index_cast %418 : i32 to index
    %c512_79 = arith.constant 512 : index
    %424 = vector.load %arg8[%423, %c512_79] : memref<192x1024xbf16, #tpu.memory_space<vmem>>, vector<16x512xbf16>
    %425 = arith.extf %424 : vector<16x512xbf16> to vector<16x512xf32>
    %426 = arith.addf %413, %425 : vector<16x512xf32>
    %427 = vector.extract_strided_slice %422 {offsets = [0, 0], sizes = [16, 384], strides = [1, 1]} : vector<16x512xf32> to vector<16x384xf32>
    %428 = arith.negf %427 : vector<16x384xf32>
    %429 = math.exp %428 : vector<16x384xf32>
    %cst_80 = arith.constant 1.000000e+00 : f32
    %430 = vector.broadcast %cst_80 : f32 to vector<16x384xf32>
    %431 = arith.addf %430, %429 : vector<16x384xf32>
    %432 = arith.divf %430, %431 : vector<16x384xf32>
    %433 = vector.extract_strided_slice %432 {offsets = [0, 0], sizes = [16, 128], strides = [1, 1]} : vector<16x384xf32> to vector<16x128xf32>
    %434 = vector.extract_strided_slice %432 {offsets = [0, 128], sizes = [16, 128], strides = [1, 1]} : vector<16x384xf32> to vector<16x128xf32>
    %435 = vector.extract_strided_slice %432 {offsets = [0, 256], sizes = [16, 128], strides = [1, 1]} : vector<16x384xf32> to vector<16x128xf32>
    %436 = vector.extract_strided_slice %422 {offsets = [0, 384], sizes = [16, 128], strides = [1, 1]} : vector<16x512xf32> to vector<16x128xf32>
    %437 = math.tanh %436 : vector<16x128xf32>
    %438 = arith.mulf %434, %403 : vector<16x128xf32>
    %439 = arith.mulf %433, %437 : vector<16x128xf32>
    %440 = arith.addf %438, %439 : vector<16x128xf32>
    %441 = math.tanh %440 : vector<16x128xf32>
    %442 = arith.mulf %435, %441 : vector<16x128xf32>
    %443 = vector.extract_strided_slice %426 {offsets = [0, 0], sizes = [16, 384], strides = [1, 1]} : vector<16x512xf32> to vector<16x384xf32>
    %444 = arith.negf %443 : vector<16x384xf32>
    %445 = math.exp %444 : vector<16x384xf32>
    %cst_81 = arith.constant 1.000000e+00 : f32
    %446 = vector.broadcast %cst_81 : f32 to vector<16x384xf32>
    %447 = arith.addf %446, %445 : vector<16x384xf32>
    %448 = arith.divf %446, %447 : vector<16x384xf32>
    %449 = vector.extract_strided_slice %448 {offsets = [0, 0], sizes = [16, 128], strides = [1, 1]} : vector<16x384xf32> to vector<16x128xf32>
    %450 = vector.extract_strided_slice %448 {offsets = [0, 128], sizes = [16, 128], strides = [1, 1]} : vector<16x384xf32> to vector<16x128xf32>
    %451 = vector.extract_strided_slice %448 {offsets = [0, 256], sizes = [16, 128], strides = [1, 1]} : vector<16x384xf32> to vector<16x128xf32>
    %452 = vector.extract_strided_slice %426 {offsets = [0, 384], sizes = [16, 128], strides = [1, 1]} : vector<16x512xf32> to vector<16x128xf32>
    %453 = math.tanh %452 : vector<16x128xf32>
    %454 = arith.mulf %450, %409 : vector<16x128xf32>
    %455 = arith.mulf %449, %453 : vector<16x128xf32>
    %456 = arith.addf %454, %455 : vector<16x128xf32>
    %457 = math.tanh %456 : vector<16x128xf32>
    %458 = arith.mulf %451, %457 : vector<16x128xf32>
    %459 = vector.broadcast %c6_i32 : i32 to vector<16x1xi32>
    %460 = arith.cmpi slt, %459, %10 : vector<16x1xi32>
    %c11_i32_82 = arith.constant 11 : i32
    %461 = arith.subi %c11_i32_82, %c6_i32 : i32
    %462 = vector.broadcast %461 : i32 to vector<16x1xi32>
    %463 = arith.cmpi slt, %462, %10 : vector<16x1xi32>
    %464 = vector.shape_cast %460 : vector<16x1xi1> to vector<16x1xi1>
    %465 = vector.broadcast %464 : vector<16x1xi1> to vector<16x128xi1>
    %466 = arith.select %465, %442, %400 : vector<16x128xi1>, vector<16x128xf32>
    %467 = vector.shape_cast %460 : vector<16x1xi1> to vector<16x1xi1>
    %468 = vector.broadcast %467 : vector<16x1xi1> to vector<16x128xi1>
    %469 = arith.select %468, %440, %403 : vector<16x128xi1>, vector<16x128xf32>
    %470 = vector.shape_cast %463 : vector<16x1xi1> to vector<16x1xi1>
    %471 = vector.broadcast %470 : vector<16x1xi1> to vector<16x128xi1>
    %472 = arith.select %471, %458, %406 : vector<16x128xi1>, vector<16x128xf32>
    %473 = vector.shape_cast %463 : vector<16x1xi1> to vector<16x1xi1>
    %474 = vector.broadcast %473 : vector<16x1xi1> to vector<16x128xi1>
    %475 = arith.select %474, %456, %409 : vector<16x128xi1>, vector<16x128xf32>
    %c7_i32 = arith.constant 7 : i32
    %476 = arith.truncf %466 : vector<16x128xf32> to vector<16x128xbf16>
    %cst_83 = arith.constant dense<0.000000e+00> : vector<16x512xf32>
    %477 = tpu.matmul %476, %11, %cst_83 {dimension_numbers = #tpu.dot_dimension_numbers<[1], [0], [0], [1], [0, 0, 1, 1], [], []>} : vector<16x128xbf16>, vector<128x512xbf16>, vector<16x512xf32> -> vector<16x512xf32>
    %478 = arith.truncf %472 : vector<16x128xf32> to vector<16x128xbf16>
    %cst_84 = arith.constant dense<0.000000e+00> : vector<16x512xf32>
    %479 = tpu.matmul %478, %12, %cst_84 {dimension_numbers = #tpu.dot_dimension_numbers<[1], [0], [0], [1], [0, 0, 1, 1], [], []>} : vector<16x128xbf16>, vector<128x512xbf16>, vector<16x512xf32> -> vector<16x512xf32>
    %c16_i32_85 = arith.constant 16 : i32
    %480 = arith.muli %c7_i32, %c16_i32_85 : i32
    %481 = tpu.assume_multiple %480, 16 : i32
    %c11_i32_86 = arith.constant 11 : i32
    %482 = arith.subi %c11_i32_86, %c7_i32 : i32
    %c16_i32_87 = arith.constant 16 : i32
    %483 = arith.muli %482, %c16_i32_87 : i32
    %484 = tpu.assume_multiple %483, 16 : i32
    %485 = arith.index_cast %481 : i32 to index
    %c0_88 = arith.constant 0 : index
    %486 = vector.load %arg8[%485, %c0_88] : memref<192x1024xbf16, #tpu.memory_space<vmem>>, vector<16x512xbf16>
    %487 = arith.extf %486 : vector<16x512xbf16> to vector<16x512xf32>
    %488 = arith.addf %477, %487 : vector<16x512xf32>
    %489 = arith.index_cast %484 : i32 to index
    %c512_89 = arith.constant 512 : index
    %490 = vector.load %arg8[%489, %c512_89] : memref<192x1024xbf16, #tpu.memory_space<vmem>>, vector<16x512xbf16>
    %491 = arith.extf %490 : vector<16x512xbf16> to vector<16x512xf32>
    %492 = arith.addf %479, %491 : vector<16x512xf32>
    %493 = vector.extract_strided_slice %488 {offsets = [0, 0], sizes = [16, 384], strides = [1, 1]} : vector<16x512xf32> to vector<16x384xf32>
    %494 = arith.negf %493 : vector<16x384xf32>
    %495 = math.exp %494 : vector<16x384xf32>
    %cst_90 = arith.constant 1.000000e+00 : f32
    %496 = vector.broadcast %cst_90 : f32 to vector<16x384xf32>
    %497 = arith.addf %496, %495 : vector<16x384xf32>
    %498 = arith.divf %496, %497 : vector<16x384xf32>
    %499 = vector.extract_strided_slice %498 {offsets = [0, 0], sizes = [16, 128], strides = [1, 1]} : vector<16x384xf32> to vector<16x128xf32>
    %500 = vector.extract_strided_slice %498 {offsets = [0, 128], sizes = [16, 128], strides = [1, 1]} : vector<16x384xf32> to vector<16x128xf32>
    %501 = vector.extract_strided_slice %498 {offsets = [0, 256], sizes = [16, 128], strides = [1, 1]} : vector<16x384xf32> to vector<16x128xf32>
    %502 = vector.extract_strided_slice %488 {offsets = [0, 384], sizes = [16, 128], strides = [1, 1]} : vector<16x512xf32> to vector<16x128xf32>
    %503 = math.tanh %502 : vector<16x128xf32>
    %504 = arith.mulf %500, %469 : vector<16x128xf32>
    %505 = arith.mulf %499, %503 : vector<16x128xf32>
    %506 = arith.addf %504, %505 : vector<16x128xf32>
    %507 = math.tanh %506 : vector<16x128xf32>
    %508 = arith.mulf %501, %507 : vector<16x128xf32>
    %509 = vector.extract_strided_slice %492 {offsets = [0, 0], sizes = [16, 384], strides = [1, 1]} : vector<16x512xf32> to vector<16x384xf32>
    %510 = arith.negf %509 : vector<16x384xf32>
    %511 = math.exp %510 : vector<16x384xf32>
    %cst_91 = arith.constant 1.000000e+00 : f32
    %512 = vector.broadcast %cst_91 : f32 to vector<16x384xf32>
    %513 = arith.addf %512, %511 : vector<16x384xf32>
    %514 = arith.divf %512, %513 : vector<16x384xf32>
    %515 = vector.extract_strided_slice %514 {offsets = [0, 0], sizes = [16, 128], strides = [1, 1]} : vector<16x384xf32> to vector<16x128xf32>
    %516 = vector.extract_strided_slice %514 {offsets = [0, 128], sizes = [16, 128], strides = [1, 1]} : vector<16x384xf32> to vector<16x128xf32>
    %517 = vector.extract_strided_slice %514 {offsets = [0, 256], sizes = [16, 128], strides = [1, 1]} : vector<16x384xf32> to vector<16x128xf32>
    %518 = vector.extract_strided_slice %492 {offsets = [0, 384], sizes = [16, 128], strides = [1, 1]} : vector<16x512xf32> to vector<16x128xf32>
    %519 = math.tanh %518 : vector<16x128xf32>
    %520 = arith.mulf %516, %475 : vector<16x128xf32>
    %521 = arith.mulf %515, %519 : vector<16x128xf32>
    %522 = arith.addf %520, %521 : vector<16x128xf32>
    %523 = math.tanh %522 : vector<16x128xf32>
    %524 = arith.mulf %517, %523 : vector<16x128xf32>
    %525 = vector.broadcast %c7_i32 : i32 to vector<16x1xi32>
    %526 = arith.cmpi slt, %525, %10 : vector<16x1xi32>
    %c11_i32_92 = arith.constant 11 : i32
    %527 = arith.subi %c11_i32_92, %c7_i32 : i32
    %528 = vector.broadcast %527 : i32 to vector<16x1xi32>
    %529 = arith.cmpi slt, %528, %10 : vector<16x1xi32>
    %530 = vector.shape_cast %526 : vector<16x1xi1> to vector<16x1xi1>
    %531 = vector.broadcast %530 : vector<16x1xi1> to vector<16x128xi1>
    %532 = arith.select %531, %508, %466 : vector<16x128xi1>, vector<16x128xf32>
    %533 = vector.shape_cast %526 : vector<16x1xi1> to vector<16x1xi1>
    %534 = vector.broadcast %533 : vector<16x1xi1> to vector<16x128xi1>
    %535 = arith.select %534, %506, %469 : vector<16x128xi1>, vector<16x128xf32>
    %536 = vector.shape_cast %529 : vector<16x1xi1> to vector<16x1xi1>
    %537 = vector.broadcast %536 : vector<16x1xi1> to vector<16x128xi1>
    %538 = arith.select %537, %524, %472 : vector<16x128xi1>, vector<16x128xf32>
    %539 = vector.shape_cast %529 : vector<16x1xi1> to vector<16x1xi1>
    %540 = vector.broadcast %539 : vector<16x1xi1> to vector<16x128xi1>
    %541 = arith.select %540, %522, %475 : vector<16x128xi1>, vector<16x128xf32>
    %c8_i32 = arith.constant 8 : i32
    %542 = arith.truncf %532 : vector<16x128xf32> to vector<16x128xbf16>
    %cst_93 = arith.constant dense<0.000000e+00> : vector<16x512xf32>
    %543 = tpu.matmul %542, %11, %cst_93 {dimension_numbers = #tpu.dot_dimension_numbers<[1], [0], [0], [1], [0, 0, 1, 1], [], []>} : vector<16x128xbf16>, vector<128x512xbf16>, vector<16x512xf32> -> vector<16x512xf32>
    %544 = arith.truncf %538 : vector<16x128xf32> to vector<16x128xbf16>
    %cst_94 = arith.constant dense<0.000000e+00> : vector<16x512xf32>
    %545 = tpu.matmul %544, %12, %cst_94 {dimension_numbers = #tpu.dot_dimension_numbers<[1], [0], [0], [1], [0, 0, 1, 1], [], []>} : vector<16x128xbf16>, vector<128x512xbf16>, vector<16x512xf32> -> vector<16x512xf32>
    %c16_i32_95 = arith.constant 16 : i32
    %546 = arith.muli %c8_i32, %c16_i32_95 : i32
    %547 = tpu.assume_multiple %546, 16 : i32
    %c11_i32_96 = arith.constant 11 : i32
    %548 = arith.subi %c11_i32_96, %c8_i32 : i32
    %c16_i32_97 = arith.constant 16 : i32
    %549 = arith.muli %548, %c16_i32_97 : i32
    %550 = tpu.assume_multiple %549, 16 : i32
    %551 = arith.index_cast %547 : i32 to index
    %c0_98 = arith.constant 0 : index
    %552 = vector.load %arg8[%551, %c0_98] : memref<192x1024xbf16, #tpu.memory_space<vmem>>, vector<16x512xbf16>
    %553 = arith.extf %552 : vector<16x512xbf16> to vector<16x512xf32>
    %554 = arith.addf %543, %553 : vector<16x512xf32>
    %555 = arith.index_cast %550 : i32 to index
    %c512_99 = arith.constant 512 : index
    %556 = vector.load %arg8[%555, %c512_99] : memref<192x1024xbf16, #tpu.memory_space<vmem>>, vector<16x512xbf16>
    %557 = arith.extf %556 : vector<16x512xbf16> to vector<16x512xf32>
    %558 = arith.addf %545, %557 : vector<16x512xf32>
    %559 = vector.extract_strided_slice %554 {offsets = [0, 0], sizes = [16, 384], strides = [1, 1]} : vector<16x512xf32> to vector<16x384xf32>
    %560 = arith.negf %559 : vector<16x384xf32>
    %561 = math.exp %560 : vector<16x384xf32>
    %cst_100 = arith.constant 1.000000e+00 : f32
    %562 = vector.broadcast %cst_100 : f32 to vector<16x384xf32>
    %563 = arith.addf %562, %561 : vector<16x384xf32>
    %564 = arith.divf %562, %563 : vector<16x384xf32>
    %565 = vector.extract_strided_slice %564 {offsets = [0, 0], sizes = [16, 128], strides = [1, 1]} : vector<16x384xf32> to vector<16x128xf32>
    %566 = vector.extract_strided_slice %564 {offsets = [0, 128], sizes = [16, 128], strides = [1, 1]} : vector<16x384xf32> to vector<16x128xf32>
    %567 = vector.extract_strided_slice %564 {offsets = [0, 256], sizes = [16, 128], strides = [1, 1]} : vector<16x384xf32> to vector<16x128xf32>
    %568 = vector.extract_strided_slice %554 {offsets = [0, 384], sizes = [16, 128], strides = [1, 1]} : vector<16x512xf32> to vector<16x128xf32>
    %569 = math.tanh %568 : vector<16x128xf32>
    %570 = arith.mulf %566, %535 : vector<16x128xf32>
    %571 = arith.mulf %565, %569 : vector<16x128xf32>
    %572 = arith.addf %570, %571 : vector<16x128xf32>
    %573 = math.tanh %572 : vector<16x128xf32>
    %574 = arith.mulf %567, %573 : vector<16x128xf32>
    %575 = vector.extract_strided_slice %558 {offsets = [0, 0], sizes = [16, 384], strides = [1, 1]} : vector<16x512xf32> to vector<16x384xf32>
    %576 = arith.negf %575 : vector<16x384xf32>
    %577 = math.exp %576 : vector<16x384xf32>
    %cst_101 = arith.constant 1.000000e+00 : f32
    %578 = vector.broadcast %cst_101 : f32 to vector<16x384xf32>
    %579 = arith.addf %578, %577 : vector<16x384xf32>
    %580 = arith.divf %578, %579 : vector<16x384xf32>
    %581 = vector.extract_strided_slice %580 {offsets = [0, 0], sizes = [16, 128], strides = [1, 1]} : vector<16x384xf32> to vector<16x128xf32>
    %582 = vector.extract_strided_slice %580 {offsets = [0, 128], sizes = [16, 128], strides = [1, 1]} : vector<16x384xf32> to vector<16x128xf32>
    %583 = vector.extract_strided_slice %580 {offsets = [0, 256], sizes = [16, 128], strides = [1, 1]} : vector<16x384xf32> to vector<16x128xf32>
    %584 = vector.extract_strided_slice %558 {offsets = [0, 384], sizes = [16, 128], strides = [1, 1]} : vector<16x512xf32> to vector<16x128xf32>
    %585 = math.tanh %584 : vector<16x128xf32>
    %586 = arith.mulf %582, %541 : vector<16x128xf32>
    %587 = arith.mulf %581, %585 : vector<16x128xf32>
    %588 = arith.addf %586, %587 : vector<16x128xf32>
    %589 = math.tanh %588 : vector<16x128xf32>
    %590 = arith.mulf %583, %589 : vector<16x128xf32>
    %591 = vector.broadcast %c8_i32 : i32 to vector<16x1xi32>
    %592 = arith.cmpi slt, %591, %10 : vector<16x1xi32>
    %c11_i32_102 = arith.constant 11 : i32
    %593 = arith.subi %c11_i32_102, %c8_i32 : i32
    %594 = vector.broadcast %593 : i32 to vector<16x1xi32>
    %595 = arith.cmpi slt, %594, %10 : vector<16x1xi32>
    %596 = vector.shape_cast %592 : vector<16x1xi1> to vector<16x1xi1>
    %597 = vector.broadcast %596 : vector<16x1xi1> to vector<16x128xi1>
    %598 = arith.select %597, %574, %532 : vector<16x128xi1>, vector<16x128xf32>
    %599 = vector.shape_cast %592 : vector<16x1xi1> to vector<16x1xi1>
    %600 = vector.broadcast %599 : vector<16x1xi1> to vector<16x128xi1>
    %601 = arith.select %600, %572, %535 : vector<16x128xi1>, vector<16x128xf32>
    %602 = vector.shape_cast %595 : vector<16x1xi1> to vector<16x1xi1>
    %603 = vector.broadcast %602 : vector<16x1xi1> to vector<16x128xi1>
    %604 = arith.select %603, %590, %538 : vector<16x128xi1>, vector<16x128xf32>
    %605 = vector.shape_cast %595 : vector<16x1xi1> to vector<16x1xi1>
    %606 = vector.broadcast %605 : vector<16x1xi1> to vector<16x128xi1>
    %607 = arith.select %606, %588, %541 : vector<16x128xi1>, vector<16x128xf32>
    %c9_i32 = arith.constant 9 : i32
    %608 = arith.truncf %598 : vector<16x128xf32> to vector<16x128xbf16>
    %cst_103 = arith.constant dense<0.000000e+00> : vector<16x512xf32>
    %609 = tpu.matmul %608, %11, %cst_103 {dimension_numbers = #tpu.dot_dimension_numbers<[1], [0], [0], [1], [0, 0, 1, 1], [], []>} : vector<16x128xbf16>, vector<128x512xbf16>, vector<16x512xf32> -> vector<16x512xf32>
    %610 = arith.truncf %604 : vector<16x128xf32> to vector<16x128xbf16>
    %cst_104 = arith.constant dense<0.000000e+00> : vector<16x512xf32>
    %611 = tpu.matmul %610, %12, %cst_104 {dimension_numbers = #tpu.dot_dimension_numbers<[1], [0], [0], [1], [0, 0, 1, 1], [], []>} : vector<16x128xbf16>, vector<128x512xbf16>, vector<16x512xf32> -> vector<16x512xf32>
    %c16_i32_105 = arith.constant 16 : i32
    %612 = arith.muli %c9_i32, %c16_i32_105 : i32
    %613 = tpu.assume_multiple %612, 16 : i32
    %c11_i32_106 = arith.constant 11 : i32
    %614 = arith.subi %c11_i32_106, %c9_i32 : i32
    %c16_i32_107 = arith.constant 16 : i32
    %615 = arith.muli %614, %c16_i32_107 : i32
    %616 = tpu.assume_multiple %615, 16 : i32
    %617 = arith.index_cast %613 : i32 to index
    %c0_108 = arith.constant 0 : index
    %618 = vector.load %arg8[%617, %c0_108] : memref<192x1024xbf16, #tpu.memory_space<vmem>>, vector<16x512xbf16>
    %619 = arith.extf %618 : vector<16x512xbf16> to vector<16x512xf32>
    %620 = arith.addf %609, %619 : vector<16x512xf32>
    %621 = arith.index_cast %616 : i32 to index
    %c512_109 = arith.constant 512 : index
    %622 = vector.load %arg8[%621, %c512_109] : memref<192x1024xbf16, #tpu.memory_space<vmem>>, vector<16x512xbf16>
    %623 = arith.extf %622 : vector<16x512xbf16> to vector<16x512xf32>
    %624 = arith.addf %611, %623 : vector<16x512xf32>
    %625 = vector.extract_strided_slice %620 {offsets = [0, 0], sizes = [16, 384], strides = [1, 1]} : vector<16x512xf32> to vector<16x384xf32>
    %626 = arith.negf %625 : vector<16x384xf32>
    %627 = math.exp %626 : vector<16x384xf32>
    %cst_110 = arith.constant 1.000000e+00 : f32
    %628 = vector.broadcast %cst_110 : f32 to vector<16x384xf32>
    %629 = arith.addf %628, %627 : vector<16x384xf32>
    %630 = arith.divf %628, %629 : vector<16x384xf32>
    %631 = vector.extract_strided_slice %630 {offsets = [0, 0], sizes = [16, 128], strides = [1, 1]} : vector<16x384xf32> to vector<16x128xf32>
    %632 = vector.extract_strided_slice %630 {offsets = [0, 128], sizes = [16, 128], strides = [1, 1]} : vector<16x384xf32> to vector<16x128xf32>
    %633 = vector.extract_strided_slice %630 {offsets = [0, 256], sizes = [16, 128], strides = [1, 1]} : vector<16x384xf32> to vector<16x128xf32>
    %634 = vector.extract_strided_slice %620 {offsets = [0, 384], sizes = [16, 128], strides = [1, 1]} : vector<16x512xf32> to vector<16x128xf32>
    %635 = math.tanh %634 : vector<16x128xf32>
    %636 = arith.mulf %632, %601 : vector<16x128xf32>
    %637 = arith.mulf %631, %635 : vector<16x128xf32>
    %638 = arith.addf %636, %637 : vector<16x128xf32>
    %639 = math.tanh %638 : vector<16x128xf32>
    %640 = arith.mulf %633, %639 : vector<16x128xf32>
    %641 = vector.extract_strided_slice %624 {offsets = [0, 0], sizes = [16, 384], strides = [1, 1]} : vector<16x512xf32> to vector<16x384xf32>
    %642 = arith.negf %641 : vector<16x384xf32>
    %643 = math.exp %642 : vector<16x384xf32>
    %cst_111 = arith.constant 1.000000e+00 : f32
    %644 = vector.broadcast %cst_111 : f32 to vector<16x384xf32>
    %645 = arith.addf %644, %643 : vector<16x384xf32>
    %646 = arith.divf %644, %645 : vector<16x384xf32>
    %647 = vector.extract_strided_slice %646 {offsets = [0, 0], sizes = [16, 128], strides = [1, 1]} : vector<16x384xf32> to vector<16x128xf32>
    %648 = vector.extract_strided_slice %646 {offsets = [0, 128], sizes = [16, 128], strides = [1, 1]} : vector<16x384xf32> to vector<16x128xf32>
    %649 = vector.extract_strided_slice %646 {offsets = [0, 256], sizes = [16, 128], strides = [1, 1]} : vector<16x384xf32> to vector<16x128xf32>
    %650 = vector.extract_strided_slice %624 {offsets = [0, 384], sizes = [16, 128], strides = [1, 1]} : vector<16x512xf32> to vector<16x128xf32>
    %651 = math.tanh %650 : vector<16x128xf32>
    %652 = arith.mulf %648, %607 : vector<16x128xf32>
    %653 = arith.mulf %647, %651 : vector<16x128xf32>
    %654 = arith.addf %652, %653 : vector<16x128xf32>
    %655 = math.tanh %654 : vector<16x128xf32>
    %656 = arith.mulf %649, %655 : vector<16x128xf32>
    %657 = vector.broadcast %c9_i32 : i32 to vector<16x1xi32>
    %658 = arith.cmpi slt, %657, %10 : vector<16x1xi32>
    %c11_i32_112 = arith.constant 11 : i32
    %659 = arith.subi %c11_i32_112, %c9_i32 : i32
    %660 = vector.broadcast %659 : i32 to vector<16x1xi32>
    %661 = arith.cmpi slt, %660, %10 : vector<16x1xi32>
    %662 = vector.shape_cast %658 : vector<16x1xi1> to vector<16x1xi1>
    %663 = vector.broadcast %662 : vector<16x1xi1> to vector<16x128xi1>
    %664 = arith.select %663, %640, %598 : vector<16x128xi1>, vector<16x128xf32>
    %665 = vector.shape_cast %658 : vector<16x1xi1> to vector<16x1xi1>
    %666 = vector.broadcast %665 : vector<16x1xi1> to vector<16x128xi1>
    %667 = arith.select %666, %638, %601 : vector<16x128xi1>, vector<16x128xf32>
    %668 = vector.shape_cast %661 : vector<16x1xi1> to vector<16x1xi1>
    %669 = vector.broadcast %668 : vector<16x1xi1> to vector<16x128xi1>
    %670 = arith.select %669, %656, %604 : vector<16x128xi1>, vector<16x128xf32>
    %671 = vector.shape_cast %661 : vector<16x1xi1> to vector<16x1xi1>
    %672 = vector.broadcast %671 : vector<16x1xi1> to vector<16x128xi1>
    %673 = arith.select %672, %654, %607 : vector<16x128xi1>, vector<16x128xf32>
    %c10_i32 = arith.constant 10 : i32
    %674 = arith.truncf %664 : vector<16x128xf32> to vector<16x128xbf16>
    %cst_113 = arith.constant dense<0.000000e+00> : vector<16x512xf32>
    %675 = tpu.matmul %674, %11, %cst_113 {dimension_numbers = #tpu.dot_dimension_numbers<[1], [0], [0], [1], [0, 0, 1, 1], [], []>} : vector<16x128xbf16>, vector<128x512xbf16>, vector<16x512xf32> -> vector<16x512xf32>
    %676 = arith.truncf %670 : vector<16x128xf32> to vector<16x128xbf16>
    %cst_114 = arith.constant dense<0.000000e+00> : vector<16x512xf32>
    %677 = tpu.matmul %676, %12, %cst_114 {dimension_numbers = #tpu.dot_dimension_numbers<[1], [0], [0], [1], [0, 0, 1, 1], [], []>} : vector<16x128xbf16>, vector<128x512xbf16>, vector<16x512xf32> -> vector<16x512xf32>
    %c16_i32_115 = arith.constant 16 : i32
    %678 = arith.muli %c10_i32, %c16_i32_115 : i32
    %679 = tpu.assume_multiple %678, 16 : i32
    %c11_i32_116 = arith.constant 11 : i32
    %680 = arith.subi %c11_i32_116, %c10_i32 : i32
    %c16_i32_117 = arith.constant 16 : i32
    %681 = arith.muli %680, %c16_i32_117 : i32
    %682 = tpu.assume_multiple %681, 16 : i32
    %683 = arith.index_cast %679 : i32 to index
    %c0_118 = arith.constant 0 : index
    %684 = vector.load %arg8[%683, %c0_118] : memref<192x1024xbf16, #tpu.memory_space<vmem>>, vector<16x512xbf16>
    %685 = arith.extf %684 : vector<16x512xbf16> to vector<16x512xf32>
    %686 = arith.addf %675, %685 : vector<16x512xf32>
    %687 = arith.index_cast %682 : i32 to index
    %c512_119 = arith.constant 512 : index
    %688 = vector.load %arg8[%687, %c512_119] : memref<192x1024xbf16, #tpu.memory_space<vmem>>, vector<16x512xbf16>
    %689 = arith.extf %688 : vector<16x512xbf16> to vector<16x512xf32>
    %690 = arith.addf %677, %689 : vector<16x512xf32>
    %691 = vector.extract_strided_slice %686 {offsets = [0, 0], sizes = [16, 384], strides = [1, 1]} : vector<16x512xf32> to vector<16x384xf32>
    %692 = arith.negf %691 : vector<16x384xf32>
    %693 = math.exp %692 : vector<16x384xf32>
    %cst_120 = arith.constant 1.000000e+00 : f32
    %694 = vector.broadcast %cst_120 : f32 to vector<16x384xf32>
    %695 = arith.addf %694, %693 : vector<16x384xf32>
    %696 = arith.divf %694, %695 : vector<16x384xf32>
    %697 = vector.extract_strided_slice %696 {offsets = [0, 0], sizes = [16, 128], strides = [1, 1]} : vector<16x384xf32> to vector<16x128xf32>
    %698 = vector.extract_strided_slice %696 {offsets = [0, 128], sizes = [16, 128], strides = [1, 1]} : vector<16x384xf32> to vector<16x128xf32>
    %699 = vector.extract_strided_slice %696 {offsets = [0, 256], sizes = [16, 128], strides = [1, 1]} : vector<16x384xf32> to vector<16x128xf32>
    %700 = vector.extract_strided_slice %686 {offsets = [0, 384], sizes = [16, 128], strides = [1, 1]} : vector<16x512xf32> to vector<16x128xf32>
    %701 = math.tanh %700 : vector<16x128xf32>
    %702 = arith.mulf %698, %667 : vector<16x128xf32>
    %703 = arith.mulf %697, %701 : vector<16x128xf32>
    %704 = arith.addf %702, %703 : vector<16x128xf32>
    %705 = math.tanh %704 : vector<16x128xf32>
    %706 = arith.mulf %699, %705 : vector<16x128xf32>
    %707 = vector.extract_strided_slice %690 {offsets = [0, 0], sizes = [16, 384], strides = [1, 1]} : vector<16x512xf32> to vector<16x384xf32>
    %708 = arith.negf %707 : vector<16x384xf32>
    %709 = math.exp %708 : vector<16x384xf32>
    %cst_121 = arith.constant 1.000000e+00 : f32
    %710 = vector.broadcast %cst_121 : f32 to vector<16x384xf32>
    %711 = arith.addf %710, %709 : vector<16x384xf32>
    %712 = arith.divf %710, %711 : vector<16x384xf32>
    %713 = vector.extract_strided_slice %712 {offsets = [0, 0], sizes = [16, 128], strides = [1, 1]} : vector<16x384xf32> to vector<16x128xf32>
    %714 = vector.extract_strided_slice %712 {offsets = [0, 128], sizes = [16, 128], strides = [1, 1]} : vector<16x384xf32> to vector<16x128xf32>
    %715 = vector.extract_strided_slice %712 {offsets = [0, 256], sizes = [16, 128], strides = [1, 1]} : vector<16x384xf32> to vector<16x128xf32>
    %716 = vector.extract_strided_slice %690 {offsets = [0, 384], sizes = [16, 128], strides = [1, 1]} : vector<16x512xf32> to vector<16x128xf32>
    %717 = math.tanh %716 : vector<16x128xf32>
    %718 = arith.mulf %714, %673 : vector<16x128xf32>
    %719 = arith.mulf %713, %717 : vector<16x128xf32>
    %720 = arith.addf %718, %719 : vector<16x128xf32>
    %721 = math.tanh %720 : vector<16x128xf32>
    %722 = arith.mulf %715, %721 : vector<16x128xf32>
    %723 = vector.broadcast %c10_i32 : i32 to vector<16x1xi32>
    %724 = arith.cmpi slt, %723, %10 : vector<16x1xi32>
    %c11_i32_122 = arith.constant 11 : i32
    %725 = arith.subi %c11_i32_122, %c10_i32 : i32
    %726 = vector.broadcast %725 : i32 to vector<16x1xi32>
    %727 = arith.cmpi slt, %726, %10 : vector<16x1xi32>
    %728 = vector.shape_cast %724 : vector<16x1xi1> to vector<16x1xi1>
    %729 = vector.broadcast %728 : vector<16x1xi1> to vector<16x128xi1>
    %730 = arith.select %729, %706, %664 : vector<16x128xi1>, vector<16x128xf32>
    %731 = vector.shape_cast %724 : vector<16x1xi1> to vector<16x1xi1>
    %732 = vector.broadcast %731 : vector<16x1xi1> to vector<16x128xi1>
    %733 = arith.select %732, %704, %667 : vector<16x128xi1>, vector<16x128xf32>
    %734 = vector.shape_cast %727 : vector<16x1xi1> to vector<16x1xi1>
    %735 = vector.broadcast %734 : vector<16x1xi1> to vector<16x128xi1>
    %736 = arith.select %735, %722, %670 : vector<16x128xi1>, vector<16x128xf32>
    %737 = vector.shape_cast %727 : vector<16x1xi1> to vector<16x1xi1>
    %738 = vector.broadcast %737 : vector<16x1xi1> to vector<16x128xi1>
    %739 = arith.select %738, %720, %673 : vector<16x128xi1>, vector<16x128xf32>
    %c11_i32_123 = arith.constant 11 : i32
    %740 = arith.truncf %730 : vector<16x128xf32> to vector<16x128xbf16>
    %cst_124 = arith.constant dense<0.000000e+00> : vector<16x512xf32>
    %741 = tpu.matmul %740, %11, %cst_124 {dimension_numbers = #tpu.dot_dimension_numbers<[1], [0], [0], [1], [0, 0, 1, 1], [], []>} : vector<16x128xbf16>, vector<128x512xbf16>, vector<16x512xf32> -> vector<16x512xf32>
    %742 = arith.truncf %736 : vector<16x128xf32> to vector<16x128xbf16>
    %cst_125 = arith.constant dense<0.000000e+00> : vector<16x512xf32>
    %743 = tpu.matmul %742, %12, %cst_125 {dimension_numbers = #tpu.dot_dimension_numbers<[1], [0], [0], [1], [0, 0, 1, 1], [], []>} : vector<16x128xbf16>, vector<128x512xbf16>, vector<16x512xf32> -> vector<16x512xf32>
    %c16_i32_126 = arith.constant 16 : i32
    %744 = arith.muli %c11_i32_123, %c16_i32_126 : i32
    %745 = tpu.assume_multiple %744, 16 : i32
    %c11_i32_127 = arith.constant 11 : i32
    %746 = arith.subi %c11_i32_127, %c11_i32_123 : i32
    %c16_i32_128 = arith.constant 16 : i32
    %747 = arith.muli %746, %c16_i32_128 : i32
    %748 = tpu.assume_multiple %747, 16 : i32
    %749 = arith.index_cast %745 : i32 to index
    %c0_129 = arith.constant 0 : index
    %750 = vector.load %arg8[%749, %c0_129] : memref<192x1024xbf16, #tpu.memory_space<vmem>>, vector<16x512xbf16>
    %751 = arith.extf %750 : vector<16x512xbf16> to vector<16x512xf32>
    %752 = arith.addf %741, %751 : vector<16x512xf32>
    %753 = arith.index_cast %748 : i32 to index
    %c512_130 = arith.constant 512 : index
    %754 = vector.load %arg8[%753, %c512_130] : memref<192x1024xbf16, #tpu.memory_space<vmem>>, vector<16x512xbf16>
    %755 = arith.extf %754 : vector<16x512xbf16> to vector<16x512xf32>
    %756 = arith.addf %743, %755 : vector<16x512xf32>
    %757 = vector.extract_strided_slice %752 {offsets = [0, 0], sizes = [16, 384], strides = [1, 1]} : vector<16x512xf32> to vector<16x384xf32>
    %758 = arith.negf %757 : vector<16x384xf32>
    %759 = math.exp %758 : vector<16x384xf32>
    %cst_131 = arith.constant 1.000000e+00 : f32
    %760 = vector.broadcast %cst_131 : f32 to vector<16x384xf32>
    %761 = arith.addf %760, %759 : vector<16x384xf32>
    %762 = arith.divf %760, %761 : vector<16x384xf32>
    %763 = vector.extract_strided_slice %762 {offsets = [0, 0], sizes = [16, 128], strides = [1, 1]} : vector<16x384xf32> to vector<16x128xf32>
    %764 = vector.extract_strided_slice %762 {offsets = [0, 128], sizes = [16, 128], strides = [1, 1]} : vector<16x384xf32> to vector<16x128xf32>
    %765 = vector.extract_strided_slice %762 {offsets = [0, 256], sizes = [16, 128], strides = [1, 1]} : vector<16x384xf32> to vector<16x128xf32>
    %766 = vector.extract_strided_slice %752 {offsets = [0, 384], sizes = [16, 128], strides = [1, 1]} : vector<16x512xf32> to vector<16x128xf32>
    %767 = math.tanh %766 : vector<16x128xf32>
    %768 = arith.mulf %764, %733 : vector<16x128xf32>
    %769 = arith.mulf %763, %767 : vector<16x128xf32>
    %770 = arith.addf %768, %769 : vector<16x128xf32>
    %771 = math.tanh %770 : vector<16x128xf32>
    %772 = arith.mulf %765, %771 : vector<16x128xf32>
    %773 = vector.extract_strided_slice %756 {offsets = [0, 0], sizes = [16, 384], strides = [1, 1]} : vector<16x512xf32> to vector<16x384xf32>
    %774 = arith.negf %773 : vector<16x384xf32>
    %775 = math.exp %774 : vector<16x384xf32>
    %cst_132 = arith.constant 1.000000e+00 : f32
    %776 = vector.broadcast %cst_132 : f32 to vector<16x384xf32>
    %777 = arith.addf %776, %775 : vector<16x384xf32>
    %778 = arith.divf %776, %777 : vector<16x384xf32>
    %779 = vector.extract_strided_slice %778 {offsets = [0, 0], sizes = [16, 128], strides = [1, 1]} : vector<16x384xf32> to vector<16x128xf32>
    %780 = vector.extract_strided_slice %778 {offsets = [0, 128], sizes = [16, 128], strides = [1, 1]} : vector<16x384xf32> to vector<16x128xf32>
    %781 = vector.extract_strided_slice %778 {offsets = [0, 256], sizes = [16, 128], strides = [1, 1]} : vector<16x384xf32> to vector<16x128xf32>
    %782 = vector.extract_strided_slice %756 {offsets = [0, 384], sizes = [16, 128], strides = [1, 1]} : vector<16x512xf32> to vector<16x128xf32>
    %783 = math.tanh %782 : vector<16x128xf32>
    %784 = arith.mulf %780, %739 : vector<16x128xf32>
    %785 = arith.mulf %779, %783 : vector<16x128xf32>
    %786 = arith.addf %784, %785 : vector<16x128xf32>
    %787 = math.tanh %786 : vector<16x128xf32>
    %788 = arith.mulf %781, %787 : vector<16x128xf32>
    %789 = vector.broadcast %c11_i32_123 : i32 to vector<16x1xi32>
    %790 = arith.cmpi slt, %789, %10 : vector<16x1xi32>
    %c11_i32_133 = arith.constant 11 : i32
    %791 = arith.subi %c11_i32_133, %c11_i32_123 : i32
    %792 = vector.broadcast %791 : i32 to vector<16x1xi32>
    %793 = arith.cmpi slt, %792, %10 : vector<16x1xi32>
    %794 = vector.shape_cast %790 : vector<16x1xi1> to vector<16x1xi1>
    %795 = vector.broadcast %794 : vector<16x1xi1> to vector<16x128xi1>
    %796 = arith.select %795, %772, %730 : vector<16x128xi1>, vector<16x128xf32>
    %797 = vector.shape_cast %790 : vector<16x1xi1> to vector<16x1xi1>
    %798 = vector.broadcast %797 : vector<16x1xi1> to vector<16x128xi1>
    %799 = arith.select %798, %770, %733 : vector<16x128xi1>, vector<16x128xf32>
    %800 = vector.shape_cast %793 : vector<16x1xi1> to vector<16x1xi1>
    %801 = vector.broadcast %800 : vector<16x1xi1> to vector<16x128xi1>
    %802 = arith.select %801, %788, %736 : vector<16x128xi1>, vector<16x128xf32>
    %803 = vector.shape_cast %793 : vector<16x1xi1> to vector<16x1xi1>
    %804 = vector.broadcast %803 : vector<16x1xi1> to vector<16x128xi1>
    %805 = arith.select %804, %786, %739 : vector<16x128xi1>, vector<16x128xf32>
    %c12_i32 = arith.constant 12 : i32
    %806 = tpu.concatenate %796, %802 in 1 : vector<16x128xf32>, vector<16x128xf32> -> vector<16x256xf32>
    %c0_134 = arith.constant 0 : index
    %c0_135 = arith.constant 0 : index
    %807 = vector.load %arg7[%c0_134, %c0_135] : memref<16x256xf32, #tpu.memory_space<vmem>>, vector<16x256xf32>
    tpu.vector_store %arg7[%c0_134, %c0_135], %806 {strides = array<i32>} : memref<16x256xf32, #tpu.memory_space<vmem>>, vector<16x256xf32>,
    return
  }
  func.func @transform_0(%arg0: i32) -> (i32, i32, i32) {
    %c0_i32 = arith.constant 0 : i32
    %c0_i32_0 = arith.constant 0 : i32
    %c0_i32_1 = arith.constant 0 : i32
    return %arg0, %c0_i32, %c0_i32_0 : i32, i32, i32
  }
  func.func @transform_1(%arg0: i32) -> (i32, i32, i32) {
    %c0_i32 = arith.constant 0 : i32
    %c0_i32_0 = arith.constant 0 : i32
    %c0_i32_1 = arith.constant 0 : i32
    return %arg0, %c0_i32, %c0_i32_0 : i32, i32, i32
  }
  func.func @transform_2(%arg0: i32) -> (i32, i32) {
    %c0_i32 = arith.constant 0 : i32
    %c0_i32_0 = arith.constant 0 : i32
    %c0_i32_1 = arith.constant 0 : i32
    return %c0_i32, %c0_i32_0 : i32, i32
  }
  func.func @transform_3(%arg0: i32) -> (i32, i32) {
    %c0_i32 = arith.constant 0 : i32
    %c0_i32_0 = arith.constant 0 : i32
    %c0_i32_1 = arith.constant 0 : i32
    return %c0_i32, %c0_i32_0 : i32, i32
  }
  func.func @transform_4(%arg0: i32) -> (i32, i32) {
    %c0_i32 = arith.constant 0 : i32
    %c0_i32_0 = arith.constant 0 : i32
    %c0_i32_1 = arith.constant 0 : i32
    return %c0_i32, %c0_i32_0 : i32, i32
  }
  func.func @transform_5(%arg0: i32) -> (i32, i32) {
    %c0_i32 = arith.constant 0 : i32
    %c0_i32_0 = arith.constant 0 : i32
    %c0_i32_1 = arith.constant 0 : i32
    return %c0_i32, %c0_i32_0 : i32, i32
  }
  func.func @transform_6(%arg0: i32) -> (i32, i32) {
    %c0_i32 = arith.constant 0 : i32
    %c0_i32_0 = arith.constant 0 : i32
    return %arg0, %c0_i32 : i32, i32
  }
}

</mosaic_0001>

<bundles_post_ra>
// kernel: tpu_custom_call.1
= control target key start
LH: loop header
LB: loop body
LE: loop exit
PB: predicated region body
PF: predicated region fallthrough
CT: control target
= control target key end

     0   :  { %11 = vsyncpa [#allocation4], 0  ;;  %s9975_s0 = inlined_call_operand.hbm [shape: bf16[1,192,128], index: 0, kind: input, shape index: {}]   ;;  %s9976_s1 = inlined_call_operand.vmem [shape: s32[1,16,1], index: 1, kind: input, shape index: {}]   ;;  %s9977_s2 = inlined_call_operand.hbm [shape: bf16[128,1024], index: 2, kind: input, shape index: {}]   ;;  %s9978_s3 = inlined_call_operand.hbm [shape: bf16[128,512], index: 3, kind: input, shape index: {}]   ;;  %s9979_s4 = inlined_call_operand.hbm [shape: bf16[128,512], index: 4, kind: input, shape index: {}]   ;;  %s9980_s5 = inlined_call_operand.vmem [shape: f32[1,1024], index: 5, kind: input, shape index: {}]   ;;  %s9981_s6 = inlined_call_operand.hbm [shape: f32[16,256], index: 6, kind: output, shape index: {}]  }
   0x1   :  { %12 = vsyncpa [#allocation7], 0 }
   0x2   :  { %13 = vsyncpa [#allocation10], 0 }
   0x3   :  { %14 = vsyncpa [#allocation5], 0  ;;  %s7184_s21 = smov [#allocation6]   ;;  %s7066_s25 = scalar_lea.hbm %s9977_s2, 8192 }
   0x4   :  { %s34_s22 = sshll.u32 %s7184_s21, 4  ;;  %p7067_p0 = scmp.ne.s32.totalorder %s9977_s2, %s7066_s25  ;;  %s35_s22 = int_to_ptr.vmem [resolvable:$true] %s34_s22 }
   0x5   :  { %p7070_p1 = scmp.lt.u32.totalorder %s7066_s25, %s9977_s2 }
   0x7   :  { %p7072_p2 = pnand %p7070_p1, %p7067_p0 }
   0x9   :  { %7075 = shalt.err (!%p7072_p2)
}
   0xa   :  { %s7076_s30 = scalar_lea.vmem %s35_s22, 8192  ;;  %p7081_p4 = scmp.lt.s32.totalorder %s35_s22, %s35_s22 }
   0xb   :  { %p7077_p3 = scmp.ne.s32.totalorder %s35_s22, %s7076_s30  ;;  %p7082_p5 = scmp.lt.s32.totalorder %s7076_s30, %s7076_s30 }
   0xd   :  { %p7083_p6 = por %p7082_p5, %p7081_p4 }
   0xf   :  { %p7084_p7 = pnand %p7083_p6, %p7077_p3 }
  0x11   :  { %7087 = shalt.err (!%p7084_p7)
}
  0x12   :  { %s7185_s7 = smov 512   ;;  %s7186_s8 = smov 32  }
  0x13   :  { %40 = dma.hbm_to_vmem [thread:$0]  %s9977_s2, 8192, %s35_s22, [#allocation7], %s7185_s7, %s7185_s7, %s7186_s8  }
  0x14   :  { %s7187_s11 = smov [#allocation3]   ;;  %s7088_s15 = scalar_lea.hbm %s9975_s0, 1536 }
  0x15   :  { %s20_s12 = sshll.u32 %s7187_s11, 4  ;;  %p7089_p8 = scmp.ne.s32.totalorder %s9975_s0, %s7088_s15  ;;  %s21_s12 = int_to_ptr.vmem [resolvable:$true] %s20_s12 }
  0x16   :  { %p7092_p9 = scmp.lt.u32.totalorder %s7088_s15, %s9975_s0 }
  0x18   :  { %p7094_p10 = pnand %p7092_p9, %p7089_p8 }
  0x1a   :  { %7097 = shalt.err (!%p7094_p10)
}
  0x1b   :  { %s7098_s20 = scalar_lea.vmem %s21_s12, 1536  ;;  %p7103_p12 = scmp.lt.s32.totalorder %s21_s12, %s21_s12 }
  0x1c   :  { %p7099_p11 = scmp.ne.s32.totalorder %s21_s12, %s7098_s20  ;;  %p7104_p13 = scmp.lt.s32.totalorder %s7098_s20, %s7098_s20 }
  0x1e   :  { %p7105_p0 = por %p7104_p13, %p7103_p12 }
  0x20   :  { %p7106_p1 = pnand %p7105_p0, %p7099_p11 }
  0x22   :  { %7109 = shalt.err (!%p7106_p1)
}
  0x23   :  { %s7188_s2 = smov 64   ;;  %s7189_s21 = smov 4  }
  0x24   :  { %26 = dma.hbm_to_vmem [thread:$0]  %s9975_s0, 1536, %s21_s12, [#allocation4], %s7188_s2, %s7188_s2, %s7189_s21  }
  0x25   :  { %s7190_s24 = smov [#allocation8]   ;;  %s7110_s28 = scalar_lea.hbm %s9978_s3, 4096 }
  0x26   :  { %s46_s25 = sshll.u32 %s7190_s24, 4  ;;  %p7111_p2 = scmp.ne.s32.totalorder %s9978_s3, %s7110_s28  ;;  %s47_s25 = int_to_ptr.vmem [resolvable:$true] %s46_s25 }
  0x27   :  { %p7114_p3 = scmp.lt.u32.totalorder %s7110_s28, %s9978_s3 }
  0x29   :  { %p7116_p4 = pnand %p7114_p3, %p7111_p2 }
  0x2b   :  { %7119 = shalt.err (!%p7116_p4)
}
  0x2c   :  { %s7120_s9 = scalar_lea.vmem %s47_s25, 4096  ;;  %p7125_p6 = scmp.lt.s32.totalorder %s47_s25, %s47_s25 }
  0x2d   :  { %p7121_p5 = scmp.ne.s32.totalorder %s47_s25, %s7120_s9  ;;  %p7126_p7 = scmp.lt.s32.totalorder %s7120_s9, %s7120_s9 }
  0x2f   :  { %p7127_p8 = por %p7126_p7, %p7125_p6 }
  0x31   :  { %p7128_p9 = pnand %p7127_p8, %p7121_p5 }
  0x33   :  { %7131 = shalt.err (!%p7128_p9)
}
  0x34   :  { %s7191_s0 = smov 256   ;;  %s7192_s10 = smov 16  }
  0x35   :  { %52 = dma.hbm_to_vmem [thread:$0]  %s9978_s3, 4096, %s47_s25, [#allocation7], %s7191_s0, %s7191_s0, %s7192_s10  }
  0x36   :  { %s7193_s13 = smov [#allocation9]   ;;  %s7132_s17 = scalar_lea.hbm %s9979_s4, 4096 }
  0x37   :  { %s58_s14 = sshll.u32 %s7193_s13, 4  ;;  %p7133_p10 = scmp.ne.s32.totalorder %s9979_s4, %s7132_s17  ;;  %s59_s14 = int_to_ptr.vmem [resolvable:$true] %s58_s14 }
  0x38   :  { %p7136_p11 = scmp.lt.u32.totalorder %s7132_s17, %s9979_s4 }
  0x3a   :  { %p7138_p12 = pnand %p7136_p11, %p7133_p10 }
  0x3c   :  { %7141 = shalt.err (!%p7138_p12)
}
  0x3d   :  { %s7142_s21 = scalar_lea.vmem %s59_s14, 4096  ;;  %p7147_p0 = scmp.lt.s32.totalorder %s59_s14, %s59_s14 }
  0x3e   :  { %p7143_p13 = scmp.ne.s32.totalorder %s59_s14, %s7142_s21  ;;  %p7148_p1 = scmp.lt.s32.totalorder %s7142_s21, %s7142_s21 }
  0x40   :  { %p7149_p2 = por %p7148_p1, %p7147_p0 }
  0x42   :  { %p7150_p3 = pnand %p7149_p2, %p7143_p13 }
  0x44   :  { %7153 = shalt.err (!%p7150_p3)
}
  0x45   :  { %64 = dma.hbm_to_vmem [thread:$0]  %s9979_s4, 4096, %s59_s14, [#allocation10], %s7191_s0, %s7191_s0, %s7192_s10  }
  0x46   :  { %7176 = dma.done.wait [#allocation4], 1536  }
  0x47   :  { %7177 = vsyncadd [#allocation4], 4294965760 }
  0x48   :  { %7178 = dma.done.wait [#allocation7], 12288  }
  0x49   :  { %7179 = vsyncadd [#allocation7], 4294955008 }
  0x4a   :  { %7180 = dma.done.wait [#allocation10], 4096  }
  0x4b   :  { %7181 = vsyncadd [#allocation10], 4294963200  ;;  %v9982_v0 = vmov 0   ;;  %v104_v1 = vld [vmem:[#allocation6] sm:$0xff]  ;;  %v105_v3 = vld [vmem:[#allocation6 + $0x8] sm:$0xff] }
  0x4c   :  { %634 = vmatprep.mubr.bf16.mxu0 %v9982_v0  ;;  %787 = vmatprep.mubr.bf16.mxu1 %v9982_v0  ;;  %v108_v2 = vld [vmem:[#allocation6 + $0x20] sm:$0xff]  ;;  %v109_v5 = vld [vmem:[#allocation6 + $0x28] sm:$0xff]  ;;  %v106_v62 = vld [vmem:[#allocation6 + $0x10] sm:$0xff] }
  0x4d   :  { %5932 = vset.pattern.permute.xlu0 %v9982_v0  ;;  %5933 = vset.pattern.permute.xlu1 %v9982_v0  ;;  %v5637_v4 = vcombine.high %v104_v1, %v108_v2  ;;  %v5636_v6 = vcombine.low %v104_v1, %v108_v2  ;;  %v112_v7 = vld [vmem:[#allocation6 + $0x40] sm:$0xff]  ;;  %v5639_v9 = vcombine.high %v105_v3, %v109_v5  ;;  %v113_v12 = vld [vmem:[#allocation6 + $0x48] sm:$0xff]  ;;  %v110_v63 = vld [vmem:[#allocation6 + $0x30] sm:$0xff] }
  0x4e   :  { %v116_v8 = vld [vmem:[#allocation6 + $0x60] sm:$0xff]  ;;  %v5638_v10 = vcombine.low %v105_v3, %v109_v5  ;;  %v117_v13 = vld [vmem:[#allocation6 + $0x68] sm:$0xff]  ;;  %v107_v2 = vld [vmem:[#allocation6 + $0x18] sm:$0xff] }
  0x4f   :  { %v5645_v11 = vcombine.high %v112_v7, %v116_v8  ;;  %v120_v14 = vld [vmem:[#allocation6 + $0x80] sm:$0xff]  ;;  %602 = vmatprep.subr.bf16.mxu0 %v5637_v4  ;;  %v5647_v15 = vcombine.high %v113_v12, %v117_v13  ;;  %v121_v17 = vld [vmem:[#allocation6 + $0x88] sm:$0xff]  ;;  %755 = vmatprep.subr.bf16.mxu1 %v5639_v9  ;;  %v5644_v19 = vcombine.low %v112_v7, %v116_v8  ;;  %v111_v3 = vld [vmem:[#allocation6 + $0x38] sm:$0xff] }
  0x50   :  { %v124_v16 = vld [vmem:[#allocation6 + $0xa0] sm:$0xff]  ;;  %v125_v18 = vld [vmem:[#allocation6 + $0xa8] sm:$0xff]  ;;  %603 = vmatpush1.bf16.msra.mxu0 %v5636_v6  ;;  %756 = vmatpush1.bf16.msra.mxu1 %v5638_v10  ;;  %v5646_v20 = vcombine.low %v113_v12, %v117_v13  ;;  %v5641_v6 = vcombine.high %v106_v62, %v110_v63  ;;  %v5643_v8 = vcombine.high %v107_v2, %v111_v3  ;;  %v114_v9 = vld [vmem:[#allocation6 + $0x50] sm:$0xff] }
  0x51   :  { %604 = vmatprep.subr.bf16.mxu0 %v5645_v11  ;;  %v5653_v21 = vcombine.high %v120_v14, %v124_v16  ;;  %757 = vmatprep.subr.bf16.mxu1 %v5647_v15  ;;  %v5655_v22 = vcombine.high %v121_v17, %v125_v18  ;;  %v128_v23 = vld [vmem:[#allocation6 + $0xc0] sm:$0xff]  ;;  %v129_v25 = vld [vmem:[#allocation6 + $0xc8] sm:$0xff]  ;;  %v5652_v27 = vcombine.low %v120_v14, %v124_v16  ;;  %v118_v10 = vld [vmem:[#allocation6 + $0x70] sm:$0xff] }
  0x52   :  { %v132_v24 = vld [vmem:[#allocation6 + $0xe0] sm:$0xff]  ;;  %v133_v26 = vld [vmem:[#allocation6 + $0xe8] sm:$0xff]  ;;  %v5654_v28 = vcombine.low %v121_v17, %v125_v18  ;;  %v5640_v11 = vcombine.low %v106_v62, %v110_v63  ;;  %v115_v12 = vld [vmem:[#allocation6 + $0x58] sm:$0xff]  ;;  %v5649_v14 = vcombine.high %v114_v9, %v118_v10  ;;  %v5642_v15 = vcombine.low %v107_v2, %v111_v3 }
  0x53   :  { %v5661_v29 = vcombine.high %v128_v23, %v132_v24  ;;  %v5663_v30 = vcombine.high %v129_v25, %v133_v26  ;;  %v136_v31 = vld [vmem:[#allocation6 + $0x100] sm:$0xff]  ;;  %v137_v33 = vld [vmem:[#allocation6 + $0x108] sm:$0xff]  ;;  %v5660_v35 = vcombine.low %v128_v23, %v132_v24  ;;  %v5662_v36 = vcombine.low %v129_v25, %v133_v26  ;;  %v119_v13 = vld [vmem:[#allocation6 + $0x78] sm:$0xff] }
  0x54   :  { %605 = vmatpush1.bf16.msra.mxu0 %v5644_v19  ;;  %758 = vmatpush1.bf16.msra.mxu1 %v5646_v20  ;;  %v140_v32 = vld [vmem:[#allocation6 + $0x120] sm:$0xff]  ;;  %v141_v34 = vld [vmem:[#allocation6 + $0x128] sm:$0xff]  ;;  %v122_v16 = vld [vmem:[#allocation6 + $0x90] sm:$0xff]  ;;  %v5651_v18 = vcombine.high %v115_v12, %v119_v13  ;;  %v5648_v20 = vcombine.low %v114_v9, %v118_v10  ;;  %v5650_v24 = vcombine.low %v115_v12, %v119_v13 }
  0x55   :  { %606 = vmatprep.subr.bf16.mxu0 %v5653_v21  ;;  %759 = vmatprep.subr.bf16.mxu1 %v5655_v22  ;;  %v5669_v37 = vcombine.high %v136_v31, %v140_v32  ;;  %v144_v38 = vld [vmem:[#allocation6 + $0x140] sm:$0xff]  ;;  %v5671_v39 = vcombine.high %v137_v33, %v141_v34  ;;  %v145_v41 = vld [vmem:[#allocation6 + $0x148] sm:$0xff]  ;;  %v5668_v43 = vcombine.low %v136_v31, %v140_v32  ;;  %v126_v17 = vld [vmem:[#allocation6 + $0xb0] sm:$0xff] }
  0x56   :  { %v148_v40 = vld [vmem:[#allocation6 + $0x160] sm:$0xff]  ;;  %v149_v42 = vld [vmem:[#allocation6 + $0x168] sm:$0xff]  ;;  %v5670_v44 = vcombine.low %v137_v33, %v141_v34  ;;  %v123_v19 = vld [vmem:[#allocation6 + $0x98] sm:$0xff]  ;;  %v5657_v22 = vcombine.high %v122_v16, %v126_v17 }
  0x57   :  { %v5677_v45 = vcombine.high %v144_v38, %v148_v40  ;;  %v152_v46 = vld [vmem:[#allocation6 + $0x180] sm:$0xff]  ;;  %v5679_v47 = vcombine.high %v145_v41, %v149_v42  ;;  %v153_v49 = vld [vmem:[#allocation6 + $0x188] sm:$0xff]  ;;  %v5676_v51 = vcombine.low %v144_v38, %v148_v40  ;;  %v5678_v52 = vcombine.low %v145_v41, %v149_v42  ;;  %v127_v21 = vld [vmem:[#allocation6 + $0xb8] sm:$0xff] }
  0x58   :  { %607 = vmatpush1.bf16.msra.mxu0 %v5652_v27  ;;  %760 = vmatpush1.bf16.msra.mxu1 %v5654_v28  ;;  %v156_v48 = vld [vmem:[#allocation6 + $0x1a0] sm:$0xff]  ;;  %v157_v50 = vld [vmem:[#allocation6 + $0x1a8] sm:$0xff]  ;;  %v130_v25 = vld [vmem:[#allocation6 + $0xd0] sm:$0xff]  ;;  %v5659_v27 = vcombine.high %v123_v19, %v127_v21  ;;  %v5658_v34 = vcombine.low %v123_v19, %v127_v21 }
  0x59   :  { %608 = vmatprep.subr.bf16.mxu0 %v5661_v29  ;;  %761 = vmatprep.subr.bf16.mxu1 %v5663_v30  ;;  %v5685_v53 = vcombine.high %v152_v46, %v156_v48  ;;  %v5687_v54 = vcombine.high %v153_v49, %v157_v50  ;;  %v160_v55 = vld [vmem:[#allocation6 + $0x1c0] sm:$0xff]  ;;  %v161_v57 = vld [vmem:[#allocation6 + $0x1c8] sm:$0xff]  ;;  %v5684_v59 = vcombine.low %v152_v46, %v156_v48  ;;  %v134_v26 = vld [vmem:[#allocation6 + $0xf0] sm:$0xff] }
  0x5a   :  { %v164_v56 = vld [vmem:[#allocation6 + $0x1e0] sm:$0xff]  ;;  %v165_v58 = vld [vmem:[#allocation6 + $0x1e8] sm:$0xff]  ;;  %v5686_v60 = vcombine.low %v153_v49, %v157_v50  ;;  %v131_v28 = vld [vmem:[#allocation6 + $0xd8] sm:$0xff]  ;;  %v5656_v30 = vcombine.low %v122_v16, %v126_v17  ;;  %v5665_v33 = vcombine.high %v130_v25, %v134_v26 }
  0x5b   :  { %v5693_v61 = vcombine.high %v160_v55, %v164_v56  ;;  %v5695_v1 = vcombine.high %v161_v57, %v165_v58  ;;  %v5692_v4 = vcombine.low %v160_v55, %v164_v56  ;;  %v5694_v5 = vcombine.low %v161_v57, %v165_v58  ;;  %v7289_v7 = vld [vmem:[#allocation3] sm:$0xff]   ;;  %v7295_v23 = vld [vmem:[#allocation3 + $0x8] sm:$0xff]   ;;  %v135_v29 = vld [vmem:[#allocation6 + $0xf8] sm:$0xff] }
  0x5c   :  { %609 = vmatpush1.bf16.msra.mxu0 %v5660_v35  ;;  %762 = vmatpush1.bf16.msra.mxu1 %v5662_v36  ;;  %v138_v31 = vld [vmem:[#allocation6 + $0x110] sm:$0xff]  ;;  %v139_v35 = vld [vmem:[#allocation6 + $0x118] sm:$0xff]  ;;  %v5667_v36 = vcombine.high %v131_v28, %v135_v29  ;;  %v7315_v9 = vld [vmem:[#allocation3 + $0x20] sm:$0xff]  }
  0x5d   :  { %610 = vmatprep.subr.bf16.mxu0 %v5669_v37  ;;  %763 = vmatprep.subr.bf16.mxu1 %v5671_v39  ;;  %v142_v32 = vld [vmem:[#allocation6 + $0x130] sm:$0xff]  ;;  %v143_v37 = vld [vmem:[#allocation6 + $0x138] sm:$0xff]  ;;  %v5664_v39 = vcombine.low %v130_v25, %v134_v26 }
  0x5e   :  { %v7301_v38 = vld [vmem:[#allocation3 + $0x10] sm:$0xff]   ;;  %v5673_v42 = vcombine.high %v138_v31, %v142_v32  ;;  %v5675_v46 = vcombine.high %v139_v35, %v143_v37  ;;  %v7307_v55 = vld [vmem:[#allocation3 + $0x18] sm:$0xff]  }
  0x5f   :  { %v146_v40 = vld [vmem:[#allocation6 + $0x150] sm:$0xff]  ;;  %v167_v62 = vld [vmem:[#allocation6 + $0x1f8] sm:$0xff] }
  0x60   :  { %611 = vmatpush1.bf16.msra.mxu0 %v5668_v43  ;;  %764 = vmatpush1.bf16.msra.mxu1 %v5670_v44  ;;  %v150_v41 = vld [vmem:[#allocation6 + $0x170] sm:$0xff]  ;;  %v5666_v43 = vcombine.low %v131_v28, %v135_v29  ;;  %v147_v44 = vld [vmem:[#allocation6 + $0x158] sm:$0xff] }
  0x61   :  { %612 = vmatprep.subr.bf16.mxu0 %v5677_v45  ;;  %765 = vmatprep.subr.bf16.mxu1 %v5679_v47  ;;  %v151_v45 = vld [vmem:[#allocation6 + $0x178] sm:$0xff]  ;;  %v5672_v47 = vcombine.low %v138_v31, %v142_v32  ;;  %v154_v48 = vld [vmem:[#allocation6 + $0x190] sm:$0xff]  ;;  %v5681_v50 = vcombine.high %v146_v40, %v150_v41  ;;  %v5680_v56 = vcombine.low %v146_v40, %v150_v41 }
  0x62   :  { %v158_v49 = vld [vmem:[#allocation6 + $0x1b0] sm:$0xff]  ;;  %v7317_v10 = vld [vmem:[#allocation8 + $0xc] ss:$16 sps:$4 sm:$0xff]   ;;  %v7386_v25 = vld [vmem:[#allocation8 + $0x28] ss:$16 sps:$4 sm:$0xff]  }
  0x63   :  { %v162_v57 = vld [vmem:[#allocation6 + $0x1d0] sm:$0xff]  ;;  %v7337_v13 = vld [vmem:[#allocation3 + $0x38] sm:$0xff]  }
  0x64   :  { %613 = vmatpush1.bf16.msra.mxu0 %v5676_v51  ;;  %766 = vmatpush1.bf16.msra.mxu1 %v5678_v52  ;;  %v5674_v51 = vcombine.low %v139_v35, %v143_v37  ;;  %v5683_v52 = vcombine.high %v147_v44, %v151_v45  ;;  %v166_v58 = vld [vmem:[#allocation6 + $0x1f0] sm:$0xff]  ;;  %v7361_v17 = vld [vmem:[#allocation3 + $0x58] sm:$0xff]  }
  0x65   :  { %614 = vmatprep.subr.bf16.mxu0 %v5685_v53  ;;  %767 = vmatprep.subr.bf16.mxu1 %v5687_v54  ;;  %v155_v53 = vld [vmem:[#allocation6 + $0x198] sm:$0xff]  ;;  %v5697_v2 = vcombine.high %v162_v57, %v166_v58  ;;  %v7331_v12 = vld [vmem:[#allocation3 + $0x30] sm:$0xff]  }
  0x66   :  { %v159_v54 = vld [vmem:[#allocation6 + $0x1b8] sm:$0xff]  ;;  %v7355_v16 = vld [vmem:[#allocation3 + $0x50] sm:$0xff]  }
  0x67   :  { %v5691_v63 = vcombine.high %v155_v53, %v159_v54  ;;  %v5690_v3 = vcombine.low %v155_v53, %v159_v54  ;;  %v7369_v19 = vld [vmem:[#allocation8 + $0x24] ss:$16 sps:$4 sm:$0xff]   ;;  %v7374_v21 = vld [vmem:[#allocation8 + $0x2c] ss:$16 sps:$4 sm:$0xff]   ;;  %v7398_v28 = vld [vmem:[#allocation8 + $0x48] ss:$16 sps:$4 sm:$0xff]  }
  0x68   :  { %615 = vmatpush1.bf16.msra.mxu0 %v5684_v59  ;;  %768 = vmatpush1.bf16.msra.mxu1 %v5686_v60  ;;  %v5689_v59 = vcombine.high %v154_v48, %v158_v49  ;;  %v5682_v60 = vcombine.low %v147_v44, %v151_v45  ;;  %v7389_v26 = vld [vmem:[#allocation8 + $0x4c] ss:$16 sps:$4 sm:$0xff]   ;;  %v7412_v31 = vld [vmem:[#allocation8 + $0x84] ss:$16 sps:$4 sm:$0xff]   ;;  %v7414_v32 = vld [vmem:[#allocation8 + $0x68] ss:$16 sps:$4 sm:$0xff]  }
  0x69   :  { %616 = vmatprep.subr.bf16.mxu0 %v5693_v61  ;;  %769 = vmatprep.subr.bf16.mxu1 %v5695_v1  ;;  %v163_v61 = vld [vmem:[#allocation6 + $0x1d8] sm:$0xff]  ;;  %v5688_v1 = vcombine.low %v154_v48, %v158_v49  ;;  %v7436_v37 = vld [vmem:[#allocation8 + $0xa0] ss:$16 sps:$4 sm:$0xff]  }
  0x6a   :  { %v7402_v29 = vld [vmem:[#allocation8 + $0x6c] ss:$16 sps:$4 sm:$0xff]   ;;  %v7426_v35 = vld [vmem:[#allocation8 + $0x88] ss:$16 sps:$4 sm:$0xff]   ;;  %v7464_v45 = vld [vmem:[#allocation8 + $0xe0] ss:$16 sps:$4 sm:$0xff]  }
  0x6b   :  { %v7442_v40 = vld [vmem:[#allocation8 + $0xa8] ss:$16 sps:$4 sm:$0xff]   ;;  %v7445_v41 = vld [vmem:[#allocation8 + $0xcc] ss:$16 sps:$4 sm:$0xff]   ;;  %v7494_v49 = vld [vmem:[%s9976_s1] sm:$0xff] }
  0x6c   :  { %617 = vmatpush1.bf16.msra.mxu0 %v5692_v4  ;;  %770 = vmatpush1.bf16.msra.mxu1 %v5694_v5  ;;  %v5699_v4 = vcombine.high %v163_v61, %v167_v62  ;;  %v5696_v5 = vcombine.low %v162_v57, %v166_v58  ;;  %v7458_v44 = vld [vmem:[#allocation8 + $0xec] ss:$16 sps:$4 sm:$0xff]   ;;  %vm2090_vm0 = vcmp.gt.s32.totalorder %v7494_v49, 0  ;;  %vm2422_vm2 = vcmp.gt.s32.totalorder %v7494_v49, 1 }
  0x6d   :  { %908 = vmatprep.subr.bf16.mxu0 %v5641_v6  ;;  %1061 = vmatprep.subr.bf16.mxu1 %v5643_v8  ;;  %v5698_v6 = vcombine.low %v163_v61, %v167_v62  ;;  %v7313_v8 = vld [vmem:[#allocation8 + $0x4] ss:$16 sps:$4 sm:$0xff]   ;;  %v7473_v48 = vld [vmem:[#allocation9 + $0xc] ss:$16 sps:$4 sm:$0xff]   ;;  %v2426_v53 = vsel %vm2422_vm2, 1, %v9982_v0  ;;  %vm2424_vm3 = vcmp.gt.s32.totalorder %v7494_v49, 10 }
  0x6e   :  { %v2440_v54 = vsel %vm2424_vm3, 1, %v9982_v0  ;;  %vm2754_vm4 = vcmp.gt.s32.totalorder %v7494_v49, 2  ;;  %vm2756_vm5 = vcmp.gt.s32.totalorder %v7494_v49, 9  ;;  %vm3086_vm6 = vcmp.gt.s32.totalorder %v7494_v49, 3 }
  0x6f   :  { %635 = vmatmul.mubr.bf16.vlgmr.msra.gmra.mrb[0].mxu0 %v7289_v7  ;;  %788 = vmatmul.mubr.bf16.vlgmr.msra.gmra.mrb[0].mxu1 %v7289_v7  ;;  %v3090_v57 = vsel %vm3086_vm6, 1, %v9982_v0  ;;  %vm3088_vm7 = vcmp.gt.s32.totalorder %v7494_v49, 8  ;;  %vm2092_vm8 = vcmp.gt.s32.totalorder %v7494_v49, 11  ;;  %vm3418_vm9 = vcmp.gt.s32.totalorder %v7494_v49, 4 }
  0x70   :  { %909 = vmatpush1.bf16.msra.mxu0 %v5640_v11  ;;  %644 = vmatprep.mubr.bf16.mxu0 %v9982_v0  ;;  %v7325_v11 = vld [vmem:[#allocation3 + $0x28] sm:$0xff]   ;;  %v3104_v58 = vsel %vm3088_vm7, 1, %v9982_v0  ;;  %vm3420_vm11 = vcmp.gt.s32.totalorder %v7494_v49, 7  ;;  %vm3750_vm13 = vcmp.gt.s32.totalorder %v7494_v49, 5  ;;  %vm3752_vm15 = vcmp.gt.s32.totalorder %v7494_v49, 6 }
  0x71   :  { %797 = vmatprep.mubr.bf16.mxu1 %v9982_v0  ;;  %910 = vmatprep.subr.bf16.mxu0 %v5649_v14  ;;  %v7343_v14 = vld [vmem:[#allocation3 + $0x40] sm:$0xff]   ;;  %v3436_v62 = vsel %vm3420_vm11, 1, %v9982_v0 }
  0x72   :  { %1062 = vmatpush1.bf16.msra.mxu1 %v5642_v15  ;;  %v7349_v15 = vld [vmem:[#allocation3 + $0x48] sm:$0xff]   ;;  %v6012_v49 = vld [vmem:[#allocation9 + $0x64] ss:$16 sps:$4 sm:$0xff]  }
  0x73   :  { %1063 = vmatprep.subr.bf16.mxu1 %v5651_v18  ;;  %v7367_v18 = vld [vmem:[#allocation8] ss:$16 sps:$4 sm:$0xff]  }
  0x74   :  { %911 = vmatpush1.bf16.msra.mxu0 %v5648_v20  ;;  %v7371_v20 = vld [vmem:[#allocation8 + $0x8] ss:$16 sps:$4 sm:$0xff]  }
  0x75   :  { %912 = vmatprep.subr.bf16.mxu0 %v5657_v22  ;;  %v7378_v22 = vld [vmem:[#allocation8 + $0x20] ss:$16 sps:$4 sm:$0xff]  }
  0x76   :  { %1064 = vmatpush1.bf16.msra.mxu1 %v5650_v24  ;;  %v7382_v24 = vld [vmem:[#allocation8 + $0x44] ss:$16 sps:$4 sm:$0xff]  }
  0x77   :  { %645 = vmatmul.mubr.bf16.gmra.mrb[4].mxu0 %v7295_v23  ;;  %1065 = vmatprep.subr.bf16.mxu1 %v5659_v27  ;;  %v7396_v27 = vld [vmem:[#allocation8 + $0x64] ss:$16 sps:$4 sm:$0xff]  }
  0x78   :  { %798 = vmatmul.mubr.bf16.gmra.mrb[4].mxu1 %v7295_v23  ;;  %654 = vmatprep.mubr.bf16.mxu0 %v9982_v0 }
  0x79   :  { %807 = vmatprep.mubr.bf16.mxu1 %v9982_v0  ;;  %913 = vmatpush1.bf16.msra.mxu0 %v5656_v30  ;;  %v7408_v30 = vld [vmem:[#allocation8 + $0x60] ss:$16 sps:$4 sm:$0xff]  }
  0x7a   :  { %914 = vmatprep.subr.bf16.mxu0 %v5665_v33  ;;  %1066 = vmatpush1.bf16.msra.mxu1 %v5658_v34  ;;  %v7417_v33 = vld [vmem:[#allocation8 + $0x8c] ss:$16 sps:$4 sm:$0xff]   ;;  %v7424_v34 = vld [vmem:[#allocation8 + $0xa4] ss:$16 sps:$4 sm:$0xff]  }
  0x7b   :  { %1067 = vmatprep.subr.bf16.mxu1 %v5667_v36  ;;  %v7430_v36 = vld [vmem:[#allocation8 + $0xac] ss:$16 sps:$4 sm:$0xff]  }
  0x7d   :  { %915 = vmatpush1.bf16.msra.mxu0 %v5664_v39  ;;  %v7440_v39 = vld [vmem:[#allocation8 + $0xc4] ss:$16 sps:$4 sm:$0xff]  }
  0x7e   :  { %916 = vmatprep.subr.bf16.mxu0 %v5673_v42  ;;  %1068 = vmatpush1.bf16.msra.mxu1 %v5666_v43  ;;  %v7452_v42 = vld [vmem:[#allocation8 + $0xe4] ss:$16 sps:$4 sm:$0xff]   ;;  %v7454_v43 = vld [vmem:[#allocation8 + $0xc8] ss:$16 sps:$4 sm:$0xff]  }
  0x7f   :  { %655 = vmatmul.mubr.bf16.gmra.mrb[8].mxu0 %v7301_v38  ;;  %1069 = vmatprep.subr.bf16.mxu1 %v5675_v46  ;;  %v7468_v46 = vld [vmem:[#allocation8 + $0xe8] ss:$16 sps:$4 sm:$0xff]  }
  0x80   :  { %808 = vmatmul.mubr.bf16.gmra.mrb[8].mxu1 %v7301_v38  ;;  %664 = vmatprep.mubr.bf16.mxu0 %v9982_v0 }
  0x81   :  { %817 = vmatprep.mubr.bf16.mxu1 %v9982_v0  ;;  %917 = vmatpush1.bf16.msra.mxu0 %v5672_v47  ;;  %v7470_v47 = vld [vmem:[#allocation9 + $0x4] ss:$16 sps:$4 sm:$0xff]  }
  0x82   :  { %918 = vmatprep.subr.bf16.mxu0 %v5681_v50  ;;  %1070 = vmatpush1.bf16.msra.mxu1 %v5674_v51  ;;  %v2094_v50 = vsel %vm2090_vm0, 1, %v9982_v0  ;;  %v7501_v51 = vld [vmem:[%s9976_s1 + $0x8] sm:$0xff] }
  0x83   :  { %1071 = vmatprep.subr.bf16.mxu1 %v5683_v52  ;;  %2097 = vperm.xlu0 %5932, %v2094_v50   ;;  %vm2091_vm1 = vcmp.gt.s32.totalorder %v7501_v51, 0  ;;  %vm2093_vm10 = vcmp.gt.s32.totalorder %v7501_v51, 11  ;;  %vm2423_vm12 = vcmp.gt.s32.totalorder %v7501_v51, 1  ;;  %vm2425_vm14 = vcmp.gt.s32.totalorder %v7501_v51, 10 }
  0x84   :  { %v2095_v52 = vsel %vm2091_vm1, 1, %v9982_v0  ;;  %v2109_v61 = vsel %vm2093_vm10, 1, %v9982_v0  ;;  %vm2755_vm0 = vcmp.gt.s32.totalorder %v7501_v51, 2  ;;  %v170_v50 = vlaneseq }
  0x85   :  { %919 = vmatpush1.bf16.msra.mxu0 %v5680_v56  ;;  %v2772_v56 = vsel %vm2756_vm5, 1, %v9982_v0  ;;  %vm2757_vm1 = vcmp.gt.s32.totalorder %v7501_v51, 9  ;;  %vm3087_vm2 = vcmp.gt.s32.totalorder %v7501_v51, 3  ;;  %vm3089_vm3 = vcmp.gt.s32.totalorder %v7501_v51, 8 }
  0x86   :  { %920 = vmatprep.subr.bf16.mxu0 %v5689_v59  ;;  %1072 = vmatpush1.bf16.msra.mxu1 %v5682_v60  ;;  %v2108_v59 = vsel %vm2092_vm8, 1, %v9982_v0  ;;  %v3422_v60 = vsel %vm3418_vm9, 1, %v9982_v0  ;;  %vm3421_vm5 = vcmp.gt.s32.totalorder %v7501_v51, 7  ;;  %vm3751_vm6 = vcmp.gt.s32.totalorder %v7501_v51, 5 }
  0x87   :  { %665 = vmatmul.mubr.bf16.gmra.mrb[12].mxu0 %v7307_v55  ;;  %1073 = vmatprep.subr.bf16.mxu1 %v5691_v63  ;;  %v2427_v63 = vsel %vm2423_vm12, 1, %v9982_v0  ;;  %vm3753_vm7 = vcmp.gt.s32.totalorder %v7501_v51, 6 }
  0x88   :  { %818 = vmatmul.mubr.bf16.gmra.mrb[12].mxu1 %v7307_v55  ;;  %674 = vmatprep.mubr.bf16.mxu0 %v9982_v0 }
  0x89   :  { %827 = vmatprep.mubr.bf16.mxu1 %v9982_v0  ;;  %921 = vmatpush1.bf16.msra.mxu0 %v5688_v1  ;;  %v5998_v1 = vld [vmem:[#allocation9] ss:$16 sps:$4 sm:$0xff]  }
  0x8a   :  { %922 = vmatprep.subr.bf16.mxu0 %v5697_v2  ;;  %1074 = vmatpush1.bf16.msra.mxu1 %v5690_v3  ;;  %v3754_v2 = vsel %vm3750_vm13, 1, %v9982_v0  ;;  %v5999_v3 = vld [vmem:[#allocation9 + $0x8] ss:$16 sps:$4 sm:$0xff]  }
  0x8b   :  { %1075 = vmatprep.subr.bf16.mxu1 %v5699_v4  ;;  %2100 = vperm.xlu0 %5932, %v2095_v52   ;;  %v6000_v4 = vld [vmem:[#allocation9 + $0x24] ss:$16 sps:$4 sm:$0xff]   ;;  %v6014_v52 = vld [vmem:[#allocation9 + $0x6c] ss:$16 sps:$4 sm:$0xff]  }
  0x8c   :  { %2111 = vperm.xlu1 %5933, %v2108_v59   ;;  %v6022_v59 = vld [vmem:[#allocation9 + $0x80] ss:$16 sps:$4 sm:$0xff]  }
  0x8d   :  { %923 = vmatpush1.bf16.msra.mxu0 %v5696_v5  ;;  %v6002_v5 = vld [vmem:[#allocation9 + $0x2c] ss:$16 sps:$4 sm:$0xff]  }
  0x8e   :  { %1076 = vmatpush1.bf16.msra.mxu1 %v5698_v6  ;;  %1647 = vmatprep.subr.bf16.mxu0 %v7313_v8  ;;  %v6004_v6 = vld [vmem:[#allocation9 + $0x20] ss:$16 sps:$4 sm:$0xff]  }
  0x8f   :  { %675 = vmatmul.mubr.bf16.gmra.mrb[16].mxu0 %v7315_v9  ;;  %1690 = vmatprep.subr.bf16.mxu1 %v7317_v10 }
  0x90   :  { %828 = vmatmul.mubr.bf16.gmra.mrb[16].mxu1 %v7315_v9  ;;  %684 = vmatprep.mubr.bf16.mxu0 %v9982_v0 }
  0x91   :  { %837 = vmatprep.mubr.bf16.mxu1 %v9982_v0  ;;  %2429 = vperm.xlu0 %5932, %v2426_v53   ;;  %v6016_v53 = vld [vmem:[#allocation9 + $0x60] ss:$16 sps:$4 sm:$0xff]  }
  0x92   :  { %2114 = vperm.xlu1 %5933, %v2109_v61   ;;  %v3091_v61 = vsel %vm3087_vm2, 1, %v9982_v0 }
  0x95   :  { %2443 = vperm.xlu0 %5932, %v2440_v54   ;;  %v2773_v54 = vsel %vm2757_vm1, 1, %v9982_v0 }
  0x96   :  { %2432 = vperm.xlu1 %5933, %v2427_v63  }
  0x97   :  { %685 = vmatmul.mubr.bf16.gmra.mrb[20].mxu0 %v7325_v11 }
  0x98   :  { %838 = vmatmul.mubr.bf16.gmra.mrb[20].mxu1 %v7325_v11  ;;  %694 = vmatprep.mubr.bf16.mxu0 %v9982_v0 }
  0x99   :  { %847 = vmatprep.mubr.bf16.mxu1 %v9982_v0 }
  0x9f   :  { %695 = vmatmul.mubr.bf16.gmra.mrb[24].mxu0 %v7331_v12 }
  0xa0   :  { %848 = vmatmul.mubr.bf16.gmra.mrb[24].mxu1 %v7331_v12  ;;  %704 = vmatprep.mubr.bf16.mxu0 %v9982_v0 }
  0xa1   :  { %857 = vmatprep.mubr.bf16.mxu1 %v9982_v0 }
  0xa7   :  { %705 = vmatmul.mubr.bf16.gmra.mrb[28].mxu0 %v7337_v13 }
  0xa8   :  { %858 = vmatmul.mubr.bf16.gmra.mrb[28].mxu1 %v7337_v13  ;;  %714 = vmatprep.mubr.bf16.mxu0 %v9982_v0 }
  0xa9   :  { %867 = vmatprep.mubr.bf16.mxu1 %v9982_v0 }
  0xaf   :  { %715 = vmatmul.mubr.bf16.gmra.mrb[32].mxu0 %v7343_v14 }
  0xb0   :  { %868 = vmatmul.mubr.bf16.gmra.mrb[32].mxu1 %v7343_v14  ;;  %724 = vmatprep.mubr.bf16.mxu0 %v9982_v0 }
  0xb1   :  { %877 = vmatprep.mubr.bf16.mxu1 %v9982_v0 }
  0xb7   :  { %725 = vmatmul.mubr.bf16.gmra.mrb[36].mxu0 %v7349_v15 }
  0xb8   :  { %878 = vmatmul.mubr.bf16.gmra.mrb[36].mxu1 %v7349_v15  ;;  %734 = vmatprep.mubr.bf16.mxu0 %v9982_v0 }
  0xb9   :  { %887 = vmatprep.mubr.bf16.mxu1 %v9982_v0 }
  0xbf   :  { %735 = vmatmul.mubr.bf16.gmra.mrb[40].mxu0 %v7355_v16 }
  0xc0   :  { %888 = vmatmul.mubr.bf16.gmra.mrb[40].mxu1 %v7355_v16  ;;  %744 = vmatprep.mubr.bf16.mxu0 %v9982_v0 }
  0xc1   :  { %897 = vmatprep.mubr.bf16.mxu1 %v9982_v0 }
  0xc7   :  { %745 = vmatmul.mubr.bf16.gmra.mrb[44].mxu0 %v7361_v17 }
  0xc8   :  { %898 = vmatmul.mubr.bf16.gmra.mrb[44].mxu1 %v7361_v17  ;;  %940 = vmatprep.mubr.bf16.mxu0 %v9982_v0 }
  0xc9   :  { %1093 = vmatprep.mubr.bf16.mxu1 %v9982_v0 }
  0xcf   :  { %941 = vmatmul.mubr.bf16.vlgmr.msra.gmra.mrb[48].mxu0 %v7289_v7 }
  0xd0   :  { %1094 = vmatmul.mubr.bf16.vlgmr.msra.gmra.mrb[48].mxu1 %v7289_v7  ;;  %1648 = vmatpush1.bf16.msra.mxu0 %v7367_v18  ;;  %v7393_v7 = vld [vmem:[#allocation8 + $0x40] ss:$16 sps:$4 sm:$0xff]  }
  0xd1   :  { %950 = vmatprep.mubr.bf16.mxu0 %v9982_v0  ;;  %1103 = vmatprep.mubr.bf16.mxu1 %v9982_v0 }
  0xd2   :  { %1649 = vmatprep.subr.bf16.mxu0 %v7369_v19  ;;  %1691 = vmatpush1.bf16.msra.mxu1 %v7371_v20 }
  0xd3   :  { %1692 = vmatprep.subr.bf16.mxu1 %v7374_v21 }
  0xd4   :  { %1650 = vmatpush1.bf16.msra.mxu0 %v7378_v22 }
  0xd5   :  { %1651 = vmatprep.subr.bf16.mxu0 %v7382_v24 }
  0xd6   :  { %1693 = vmatpush1.bf16.msra.mxu1 %v7386_v25 }
  0xd7   :  { %951 = vmatmul.mubr.bf16.gmra.mrb[52].mxu0 %v7295_v23  ;;  %1694 = vmatprep.subr.bf16.mxu1 %v7389_v26 }
  0xd8   :  { %1104 = vmatmul.mubr.bf16.gmra.mrb[52].mxu1 %v7295_v23  ;;  %960 = vmatprep.mubr.bf16.mxu0 %v9982_v0  ;;  %v7420_v23 = vld [vmem:[#allocation8 + $0x80] ss:$16 sps:$4 sm:$0xff]  }
  0xd9   :  { %1113 = vmatprep.mubr.bf16.mxu1 %v9982_v0  ;;  %1652 = vmatpush1.bf16.msra.mxu0 %v7393_v7 }
  0xda   :  { %1653 = vmatprep.subr.bf16.mxu0 %v7396_v27  ;;  %1695 = vmatpush1.bf16.msra.mxu1 %v7398_v28 }
  0xdb   :  { %1696 = vmatprep.subr.bf16.mxu1 %v7402_v29 }
  0xdd   :  { %1654 = vmatpush1.bf16.msra.mxu0 %v7408_v30 }
  0xde   :  { %1655 = vmatprep.subr.bf16.mxu0 %v7412_v31  ;;  %1697 = vmatpush1.bf16.msra.mxu1 %v7414_v32 }
  0xdf   :  { %961 = vmatmul.mubr.bf16.gmra.mrb[56].mxu0 %v7301_v38  ;;  %1698 = vmatprep.subr.bf16.mxu1 %v7417_v33 }
  0xe0   :  { %1114 = vmatmul.mubr.bf16.gmra.mrb[56].mxu1 %v7301_v38  ;;  %970 = vmatprep.mubr.bf16.mxu0 %v9982_v0  ;;  %v7448_v38 = vld [vmem:[#allocation8 + $0xc0] ss:$16 sps:$4 sm:$0xff]  }
  0xe1   :  { %1123 = vmatprep.mubr.bf16.mxu1 %v9982_v0  ;;  %1656 = vmatpush1.bf16.msra.mxu0 %v7420_v23 }
  0xe2   :  { %1657 = vmatprep.subr.bf16.mxu0 %v7424_v34  ;;  %1699 = vmatpush1.bf16.msra.mxu1 %v7426_v35 }
  0xe3   :  { %1700 = vmatprep.subr.bf16.mxu1 %v7430_v36 }
  0xe5   :  { %1658 = vmatpush1.bf16.msra.mxu0 %v7436_v37 }
  0xe6   :  { %1659 = vmatprep.subr.bf16.mxu0 %v7440_v39  ;;  %1701 = vmatpush1.bf16.msra.mxu1 %v7442_v40 }
  0xe7   :  { %971 = vmatmul.mubr.bf16.gmra.mrb[60].mxu0 %v7307_v55  ;;  %1702 = vmatprep.subr.bf16.mxu1 %v7445_v41 }
  0xe8   :  { %1124 = vmatmul.mubr.bf16.gmra.mrb[60].mxu1 %v7307_v55  ;;  %980 = vmatprep.mubr.bf16.mxu0 %v9982_v0  ;;  %v2758_v55 = vsel %vm2754_vm4, 1, %v9982_v0  ;;  %vm3419_vm4 = vcmp.gt.s32.totalorder %v7501_v51, 4 }
  0xe9   :  { %1133 = vmatprep.mubr.bf16.mxu1 %v9982_v0  ;;  %1660 = vmatpush1.bf16.msra.mxu0 %v7448_v38 }
  0xea   :  { %1661 = vmatprep.subr.bf16.mxu0 %v7452_v42  ;;  %1703 = vmatpush1.bf16.msra.mxu1 %v7454_v43 }
  0xeb   :  { %1704 = vmatprep.subr.bf16.mxu1 %v7458_v44  ;;  %2761 = vperm.xlu0 %5932, %v2758_v55   ;;  %v6017_v55 = vld [vmem:[#allocation9 + $0x68] ss:$16 sps:$4 sm:$0xff]  }
  0xed   :  { %1662 = vmatpush1.bf16.msra.mxu0 %v7464_v45 }
  0xee   :  { %1705 = vmatpush1.bf16.msra.mxu1 %v7468_v46  ;;  %1908 = vmatprep.subr.bf16.mxu0 %v7470_v47 }
  0xef   :  { %981 = vmatmul.mubr.bf16.gmra.mrb[64].mxu0 %v7315_v9  ;;  %1951 = vmatprep.subr.bf16.mxu1 %v7473_v48 }
  0xf0   :  { %1134 = vmatmul.mubr.bf16.gmra.mrb[64].mxu1 %v7315_v9  ;;  %990 = vmatprep.mubr.bf16.mxu0 %v9982_v0  ;;  %v2441_v9 = vsel %vm2425_vm14, 1, %v9982_v0 }
  0xf1   :  { %1143 = vmatprep.mubr.bf16.mxu1 %v9982_v0  ;;  %2775 = vperm.xlu0 %5932, %v2772_v56   ;;  %v6018_v56 = vld [vmem:[#allocation9 + $0x84] ss:$16 sps:$4 sm:$0xff]  }
  0xf2   :  { %2446 = vperm.xlu1 %5933, %v2441_v9  }
  0xf5   :  { %3093 = vperm.xlu0 %5932, %v3090_v57   ;;  %v7561_v57 = vshrl.u32 %v170_v50, 7 }
  0xf7   :  { %991 = vmatmul.mubr.bf16.gmra.mrb[68].mxu0 %v7325_v11  ;;  %v172_v63 = vsub.s32 0, %v7561_v57 }
  0xf8   :  { %1144 = vmatmul.mubr.bf16.gmra.mrb[68].mxu1 %v7325_v11  ;;  %1000 = vmatprep.mubr.bf16.mxu0 %v9982_v0  ;;  %v6005_v11 = vld [vmem:[#allocation9 + $0x28] ss:$16 sps:$4 sm:$0xff]  }
  0xf9   :  { %1153 = vmatprep.mubr.bf16.mxu1 %v9982_v0  ;;  %3107 = vperm.xlu0 %5932, %v3104_v58   ;;  %v6020_v58 = vld [vmem:[#allocation9 + $0x8c] ss:$16 sps:$4 sm:$0xff]  }
  0xfd   :  { %3425 = vperm.xlu0 %5932, %v3422_v60   ;;  %v180_v60 = vsub.s32 2, %v7561_v57 }
  0xff   :  { %1001 = vmatmul.mubr.bf16.gmra.mrb[72].mxu0 %v7331_v12 }
 0x100   :  { %1154 = vmatmul.mubr.bf16.gmra.mrb[72].mxu1 %v7331_v12  ;;  %1010 = vmatprep.mubr.bf16.mxu0 %v9982_v0  ;;  %v6006_v12 = vld [vmem:[#allocation9 + $0x44] ss:$16 sps:$4 sm:$0xff]  }
 0x101   :  { %1163 = vmatprep.mubr.bf16.mxu1 %v9982_v0  ;;  %3439 = vperm.xlu0 %5932, %v3436_v62   ;;  %v6023_v62 = vld [vmem:[#allocation9 + $0x88] ss:$16 sps:$4 sm:$0xff]  }
 0x105   :  { %3757 = vperm.xlu0 %5932, %v3754_v2   ;;  %v184_v2 = vsub.s32 3, %v7561_v57 }
 0x107   :  { %1011 = vmatmul.mubr.bf16.gmra.mrb[76].mxu0 %v7337_v13 }
 0x108   :  { %1164 = vmatmul.mubr.bf16.gmra.mrb[76].mxu1 %v7337_v13  ;;  %1020 = vmatprep.mubr.bf16.mxu0 %v9982_v0  ;;  %v3768_v13 = vsel %vm3752_vm15, 1, %v9982_v0 }
 0x109   :  { %1173 = vmatprep.mubr.bf16.mxu1 %v9982_v0  ;;  %3771 = vperm.xlu0 %5932, %v3768_v13   ;;  %v6029_v13 = vld [vmem:[#allocation9 + $0xa8] ss:$16 sps:$4 sm:$0xff]  }
 0x10f   :  { %1021 = vmatmul.mubr.bf16.gmra.mrb[80].mxu0 %v7343_v14 }
 0x110   :  { %1174 = vmatmul.mubr.bf16.gmra.mrb[80].mxu1 %v7343_v14  ;;  %1030 = vmatprep.mubr.bf16.mxu0 %v9982_v0  ;;  %v6008_v14 = vld [vmem:[#allocation9 + $0x4c] ss:$16 sps:$4 sm:$0xff]  }
 0x111   :  { %1183 = vmatprep.mubr.bf16.mxu1 %v9982_v0 }
 0x117   :  { %1031 = vmatmul.mubr.bf16.gmra.mrb[84].mxu0 %v7349_v15 }
 0x118   :  { %1184 = vmatmul.mubr.bf16.gmra.mrb[84].mxu1 %v7349_v15  ;;  %1040 = vmatprep.mubr.bf16.mxu0 %v9982_v0  ;;  %v6010_v15 = vld [vmem:[#allocation9 + $0x40] ss:$16 sps:$4 sm:$0xff]  }
 0x119   :  { %1193 = vmatprep.mubr.bf16.mxu1 %v9982_v0 }
 0x11f   :  { %1041 = vmatmul.mubr.bf16.gmra.mrb[88].mxu0 %v7355_v16 }
 0x120   :  { %1194 = vmatmul.mubr.bf16.gmra.mrb[88].mxu1 %v7355_v16  ;;  %1050 = vmatprep.mubr.bf16.mxu0 %v9982_v0  ;;  %v2759_v16 = vsel %vm2755_vm0, 1, %v9982_v0 }
 0x121   :  { %1203 = vmatprep.mubr.bf16.mxu1 %v9982_v0  ;;  %2764 = vperm.xlu1 %5933, %v2759_v16  }
 0x125   :  { %2778 = vperm.xlu1 %5933, %v2773_v54   ;;  %v6034_v54 = vld [vmem:[#allocation9 + $0xc0] ss:$16 sps:$4 sm:$0xff]  }
 0x127   :  { %1051 = vmatmul.mubr.bf16.gmra.mrb[92].mxu0 %v7361_v17 }
 0x128   :  { %1204 = vmatmul.mubr.bf16.gmra.mrb[92].mxu1 %v7361_v17  ;;  %1679 = vmatprep.mubr.bf16.mxu0 %v9982_v0  ;;  %v6011_v17 = vld [vmem:[#allocation9 + $0x48] ss:$16 sps:$4 sm:$0xff]  }
 0x129   :  { %1722 = vmatprep.mubr.bf16.mxu1 %v9982_v0  ;;  %3096 = vperm.xlu1 %5933, %v3091_v61  }
 0x12f   :  { %1680 = vmatmul.mubr.bf16.vlgmr.msra.gmra.mrb[96].mxu0 %v9982_v0 }
 0x130   :  { %1723 = vmatmul.mubr.bf16.vlgmr.msra.gmra.mrb[96].mxu1 %v9982_v0  ;;  %1909 = vmatpush1.bf16.msra.mxu0 %v5998_v1  ;;  %v6024_v1 = vld [vmem:[#allocation9 + $0xa4] ss:$16 sps:$4 sm:$0xff]  }
 0x131   :  { %1952 = vmatpush1.bf16.msra.mxu1 %v5999_v3  ;;  %1910 = vmatprep.subr.bf16.mxu0 %v6000_v4  ;;  %v7571_v3 = vld [vmem:[%s9980_s5] sm:$0xff]  ;;  %v6026_v4 = vld [vmem:[#allocation9 + $0xac] ss:$16 sps:$4 sm:$0xff]   ;;  %s7195_s5 = smov [#allocation11]  }
 0x132   :  { %1953 = vmatprep.subr.bf16.mxu1 %v6002_v5  ;;  %1940 = vmatprep.mubr.bf16.mxu0 %v9982_v0  ;;  %v176_v5 = vsub.s32 1, %v7561_v57  ;;  %v7576_v9 = vrot.slane %v7571_v3, %v180_v60  ;;  %s5599_s27 = sshll.u32 %s7195_s5, 4  ;;  %s5600_s27 = int_to_ptr.vmem [resolvable:$true] %s5599_s27 }
 0x133   :  { %1983 = vmatprep.mubr.bf16.mxu1 %v9982_v0  ;;  %s7154_s28 = scalar_lea.vmem %s5600_s27, 512  ;;  %p7159_p5 = scmp.lt.s32.totalorder %s5600_s27, %s5600_s27 }
 0x134   :  { %1911 = vmatpush1.bf16.msra.mxu0 %v6004_v6  ;;  %v6028_v6 = vld [vmem:[#allocation9 + $0xa0] ss:$16 sps:$4 sm:$0xff]   ;;  %p7155_p4 = scmp.ne.s32.totalorder %s5600_s27, %s7154_s28  ;;  %p7160_p6 = scmp.lt.s32.totalorder %s7154_s28, %s7154_s28 }
 0x135   :  { %1954 = vmatpush1.bf16.msra.mxu1 %v6005_v11  ;;  %1912 = vmatprep.subr.bf16.mxu0 %v6006_v12  ;;  %v3105_v11 = vsel %vm3089_vm3, 1, %v9982_v0  ;;  %v7580_v12 = vrot.slane %v7571_v3, %v172_v63  ;;  %v6036_v63 = vld [vmem:[#allocation9 + $0xe4] ss:$16 sps:$4 sm:$0xff]  }
 0x136   :  { %1955 = vmatprep.subr.bf16.mxu1 %v6008_v14  ;;  %v6030_v14 = vld [vmem:[#allocation9 + $0xc4] ss:$16 sps:$4 sm:$0xff]   ;;  %3110 = vperm.xlu1 %5933, %v3105_v11   ;;  %p7161_p7 = por %p7160_p6, %p7159_p5 }
 0x138   :  { %1913 = vmatpush1.bf16.msra.mxu0 %v6010_v15  ;;  %v7583_v15 = vrot.slane %v7571_v3, %v184_v2  ;;  %p7162_p8 = pnand %p7161_p7, %p7155_p4 }
 0x139   :  { %1956 = vmatpush1.bf16.msra.mxu1 %v6011_v17  ;;  %1914 = vmatprep.subr.bf16.mxu0 %v6012_v49  ;;  %v7586_v17 = vrot.slane %v7571_v3, %v176_v5  ;;  %v6032_v49 = vld [vmem:[#allocation9 + $0xcc] ss:$16 sps:$4 sm:$0xff]  }
 0x13a   :  { %1957 = vmatprep.subr.bf16.mxu1 %v6014_v52 }
 0x13c   :  { %1915 = vmatpush1.bf16.msra.mxu0 %v6016_v53 }
 0x13d   :  { %1958 = vmatpush1.bf16.msra.mxu1 %v6017_v55  ;;  %1916 = vmatprep.subr.bf16.mxu0 %v6018_v56 }
 0x13e   :  { %1959 = vmatprep.subr.bf16.mxu1 %v6020_v58  ;;  %v3423_v58 = vsel %vm3419_vm4, 1, %v9982_v0 }
 0x13f   :  { %3428 = vperm.xlu1 %5933, %v3423_v58  }
 0x140   :  { %1917 = vmatpush1.bf16.msra.mxu0 %v6022_v59 }
 0x141   :  { %1960 = vmatpush1.bf16.msra.mxu1 %v6023_v62  ;;  %1918 = vmatprep.subr.bf16.mxu0 %v6024_v1  ;;  %v6035_v62 = vld [vmem:[#allocation9 + $0xc8] ss:$16 sps:$4 sm:$0xff]  }
 0x142   :  { %v636_v16 = vpop.f32.mrb[0].mxu0  ;;  %1961 = vmatprep.subr.bf16.mxu1 %v6026_v4  ;;  %v789_v52 = vpop.f32.mrb[0].mxu1 }
 0x143   :  { %v638_v50 = vpop.f32.mrb[1].mxu0  ;;  %v790_v55 = vadd.f32 %v789_v52, %v7576_v9  ;;  %v791_v56 = vpop.f32.mrb[1].mxu1  ;;  %v637_v59 = vadd.f32 %v636_v16, %v7580_v12 }
 0x144   :  { %1919 = vmatpush1.bf16.msra.mxu0 %v6028_v6  ;;  %v640_v53 = vpop.f32.mrb[2].mxu0  ;;  %v792_v1 = vadd.f32 %v791_v56, %v7583_v15  ;;  %v793_v2 = vpop.f32.mrb[2].mxu1  ;;  %v639_v4 = vadd.f32 %v638_v50, %v7586_v17  ;;  %v6038_v6 = vld [vmem:[#allocation9 + $0xec] ss:$16 sps:$4 sm:$0xff]   ;;  %v3437_v50 = vsel %vm3421_vm5, 1, %v9982_v0 }
 0x145   :  { %1962 = vmatpush1.bf16.msra.mxu1 %v6029_v13  ;;  %v641_v60 = vadd.f32 %v640_v53, %v7580_v12  ;;  %v642_v61 = vpop.f32.mrb[3].mxu0  ;;  %1920 = vmatprep.subr.bf16.mxu0 %v6030_v14  ;;  %v794_v11 = vadd.f32 %v793_v2, %v7576_v9  ;;  %v795_v52 = vpop.f32.mrb[3].mxu1  ;;  %v6040_v53 = vld [vmem:[#allocation9 + $0xe0] ss:$16 sps:$4 sm:$0xff]  }
 0x146   :  { %v643_v5 = vadd.f32 %v642_v61, %v7586_v17  ;;  %1963 = vmatprep.subr.bf16.mxu1 %v6032_v49  ;;  %v796_v14 = vadd.f32 %v795_v52, %v7583_v15  ;;  %v6041_v49 = vld [vmem:[#allocation9 + $0xe8] ss:$16 sps:$4 sm:$0xff]   ;;  %3442 = vperm.xlu1 %5933, %v3437_v50  }
 0x147   :  { %v7598_v13 = vpack.c.bf16 %v641_v60, %v637_v59  ;;  %v7603_v56 = vpack.c.bf16 %v794_v11, %v790_v55 }
 0x148   :  { %v7601_v16 = vpack.c.bf16 %v643_v5, %v639_v4  ;;  %1921 = vmatpush1.bf16.msra.mxu0 %v6034_v54  ;;  %v7606_v61 = vpack.c.bf16 %v796_v14, %v792_v1  ;;  %v3755_v4 = vsel %vm3751_vm6, 1, %v9982_v0 }
 0x149   :  { %1964 = vmatpush1.bf16.msra.mxu1 %v6035_v62  ;;  %1922 = vmatprep.subr.bf16.mxu0 %v6036_v63 }
 0x14a   :  { %v646_v2 = vpop.f32.mrb[4].mxu0  ;;  %1965 = vmatprep.subr.bf16.mxu1 %v6038_v6  ;;  %3760 = vperm.xlu1 %5933, %v3755_v4  }
 0x14b   :  { %v648_v59 = vpop.f32.mrb[5].mxu0  ;;  %v799_v60 = vpop.f32.mrb[4].mxu1  ;;  %v647_v62 = vadd.f32 %v646_v2, %v7580_v12 }
 0x14c   :  { %1923 = vmatpush1.bf16.msra.mxu0 %v6040_v53  ;;  %v650_v58 = vpop.f32.mrb[6].mxu0  ;;  %v800_v54 = vadd.f32 %v799_v60, %v7576_v9  ;;  %v801_v55 = vpop.f32.mrb[5].mxu1  ;;  %v649_v11 = vadd.f32 %v648_v59, %v7586_v17  ;;  %v3769_v59 = vsel %vm3753_vm7, 1, %v9982_v0 }
 0x14d   :  { %1966 = vmatpush1.bf16.msra.mxu1 %v6041_v49  ;;  %v651_v63 = vadd.f32 %v650_v58, %v7580_v12  ;;  %v652_v1 = vpop.f32.mrb[7].mxu0  ;;  %v802_v5 = vadd.f32 %v801_v55, %v7583_v15  ;;  %v803_v6 = vpop.f32.mrb[6].mxu1  ;;  %2139 = vmatprep.subr.bf16.mxu0 %v7313_v8 }
 0x14e   :  { %v653_v52 = vadd.f32 %v652_v1, %v7586_v17  ;;  %v804_v14 = vadd.f32 %v803_v6, %v7576_v9  ;;  %v805_v53 = vpop.f32.mrb[7].mxu1  ;;  %2182 = vmatprep.subr.bf16.mxu1 %v7317_v10  ;;  %3774 = vperm.xlu1 %5933, %v3769_v59  }
 0x14f   :  { %v7620_v50 = vpack.c.bf16 %v651_v63, %v647_v62  ;;  %1941 = vmatmul.mubr.bf16.vlgmr.msra.gmra.mrb[100].mxu0 %v9982_v0  ;;  %v806_v49 = vadd.f32 %v805_v53, %v7583_v15 }
 0x150   :  { %v7624_v2 = vpack.c.bf16 %v653_v52, %v649_v11  ;;  %1984 = vmatmul.mubr.bf16.vlgmr.msra.gmra.mrb[100].mxu1 %v9982_v0  ;;  %v7627_v8 = vpack.c.bf16 %v804_v14, %v800_v54  ;;  %2140 = vmatpush1.bf16.msra.mxu0 %v7367_v18 }
 0x151   :  { %v7631_v51 = vpack.c.bf16 %v806_v49, %v802_v5  ;;  %2183 = vmatpush1.bf16.msra.mxu1 %v7371_v20  ;;  %2141 = vmatprep.subr.bf16.mxu0 %v7369_v19 }
 0x152   :  { %v656_v10 = vpop.f32.mrb[8].mxu0  ;;  %2184 = vmatprep.subr.bf16.mxu1 %v7374_v21  ;;  %2171 = vmatprep.mubr.bf16.mxu0 %v9982_v0 }
 0x153   :  { %v658_v60 = vpop.f32.mrb[9].mxu0  ;;  %v809_v58 = vpop.f32.mrb[8].mxu1  ;;  %2214 = vmatprep.mubr.bf16.mxu1 %v9982_v0  ;;  %v657_v20 = vadd.f32 %v656_v10, %v7580_v12 }
 0x154   :  { %v660_v54 = vpop.f32.mrb[10].mxu0  ;;  %v810_v55 = vadd.f32 %v809_v58, %v7576_v9  ;;  %v811_v18 = vpop.f32.mrb[9].mxu1  ;;  %2142 = vmatpush1.bf16.msra.mxu0 %v7378_v22  ;;  %v659_v63 = vadd.f32 %v658_v60, %v7586_v17 }
 0x155   :  { %v661_v19 = vadd.f32 %v660_v54, %v7580_v12  ;;  %v662_v4 = vpop.f32.mrb[11].mxu0  ;;  %v812_v21 = vadd.f32 %v811_v18, %v7583_v15  ;;  %v813_v62 = vpop.f32.mrb[10].mxu1  ;;  %2185 = vmatpush1.bf16.msra.mxu1 %v7386_v25  ;;  %2143 = vmatprep.subr.bf16.mxu0 %v7382_v24 }
 0x156   :  { %v663_v1 = vadd.f32 %v662_v4, %v7586_v17  ;;  %v814_v5 = vadd.f32 %v813_v62, %v7576_v9  ;;  %v815_v6 = vpop.f32.mrb[11].mxu1  ;;  %2186 = vmatprep.subr.bf16.mxu1 %v7389_v26 }
 0x157   :  { %v7649_v22 = vpack.c.bf16 %v661_v19, %v657_v20  ;;  %v816_v11 = vadd.f32 %v815_v6, %v7583_v15 }
 0x158   :  { %v7652_v52 = vpack.c.bf16 %v663_v1, %v659_v63  ;;  %v7654_v14 = vpack.c.bf16 %v814_v5, %v810_v55  ;;  %2144 = vmatpush1.bf16.msra.mxu0 %v7393_v7 }
 0x159   :  { %10359 = vst [vmem:[#allocation16_spill] sm:$0xff] %v7649_v22  ;;  %v7657_v24 = vpack.c.bf16 %v816_v11, %v812_v21  ;;  %2187 = vmatpush1.bf16.msra.mxu1 %v7398_v28  ;;  %2145 = vmatprep.subr.bf16.mxu0 %v7396_v27  ;;  %v8224_v22 = vld [vmem:[#allocation8 + $0x64] ss:$16 sps:$4 sm:$0xff]  }
 0x15a   :  { %10360 = vst [vmem:[#allocation17_spill] sm:$0xff] %v7652_v52  ;;  %10361 = vst [vmem:[#allocation18_spill] sm:$0xff] %v7654_v14  ;;  %v666_v25 = vpop.f32.mrb[12].mxu0  ;;  %2188 = vmatprep.subr.bf16.mxu1 %v7402_v29  ;;  %v8218_v52 = vld [vmem:[#allocation8 + $0x40] ss:$16 sps:$4 sm:$0xff]  }
 0x15b   :  { %10362 = vst [vmem:[#allocation19_spill] sm:$0xff] %v7657_v24  ;;  %v668_v26 = vpop.f32.mrb[13].mxu0  ;;  %v819_v53 = vpop.f32.mrb[12].mxu1  ;;  %v667_v60 = vadd.f32 %v666_v25, %v7580_v12  ;;  %v8215_v24 = vld [vmem:[#allocation8 + $0x4c] ss:$16 sps:$4 sm:$0xff]   ;;  %10464 = vst [vmem:[#allocation120_spill] sm:$0xff] %v8218_v52 }
 0x15c   :  { %v670_v49 = vpop.f32.mrb[14].mxu0  ;;  %v820_v59 = vadd.f32 %v819_v53, %v7576_v9  ;;  %v821_v10 = vpop.f32.mrb[13].mxu1  ;;  %2146 = vmatpush1.bf16.msra.mxu0 %v7408_v30  ;;  %v669_v27 = vadd.f32 %v668_v26, %v7586_v17  ;;  %10463 = vst [vmem:[#allocation119_spill] sm:$0xff] %v8215_v24  ;;  %v8221_v14 = vld [vmem:[#allocation8 + $0x48] ss:$16 sps:$4 sm:$0xff]   ;;  %10466 = vst [vmem:[#allocation122_spill] sm:$0xff] %v8224_v22 }
 0x15d   :  { %v671_v7 = vadd.f32 %v670_v49, %v7580_v12  ;;  %v672_v58 = vpop.f32.mrb[15].mxu0  ;;  %v822_v28 = vadd.f32 %v821_v10, %v7583_v15  ;;  %v823_v54 = vpop.f32.mrb[14].mxu1  ;;  %2189 = vmatpush1.bf16.msra.mxu1 %v7414_v32  ;;  %2147 = vmatprep.subr.bf16.mxu0 %v7412_v31  ;;  %10465 = vst [vmem:[#allocation121_spill] sm:$0xff] %v8221_v14 }
 0x15e   :  { %v673_v29 = vadd.f32 %v672_v58, %v7586_v17  ;;  %v824_v55 = vadd.f32 %v823_v54, %v7576_v9  ;;  %v825_v18 = vpop.f32.mrb[15].mxu1  ;;  %2190 = vmatprep.subr.bf16.mxu1 %v7417_v33 }
 0x15f   :  { %v7673_v30 = vpack.c.bf16 %v671_v7, %v667_v60  ;;  %v826_v20 = vadd.f32 %v825_v18, %v7583_v15 }
 0x160   :  { %v7676_v19 = vpack.c.bf16 %v673_v29, %v669_v27  ;;  %v7678_v4 = vpack.c.bf16 %v824_v55, %v820_v59  ;;  %2148 = vmatpush1.bf16.msra.mxu0 %v7420_v23 }
 0x161   :  { %10363 = vst [vmem:[#allocation20_spill] sm:$0xff] %v7673_v30  ;;  %v7681_v31 = vpack.c.bf16 %v826_v20, %v822_v28  ;;  %2191 = vmatpush1.bf16.msra.mxu1 %v7426_v35  ;;  %2149 = vmatprep.subr.bf16.mxu0 %v7424_v34  ;;  %v8195_v30 = vld [vmem:[#allocation8 + $0x8] ss:$16 sps:$4 sm:$0xff]  }
 0x162   :  { %10364 = vst [vmem:[#allocation21_spill] sm:$0xff] %v7676_v19  ;;  %10365 = vst [vmem:[#allocation22_spill] sm:$0xff] %v7678_v4  ;;  %v676_v32 = vpop.f32.mrb[16].mxu0  ;;  %2192 = vmatprep.subr.bf16.mxu1 %v7430_v36  ;;  %v8178_v19 = vld [vmem:[#allocation8 + $0x4] ss:$16 sps:$4 sm:$0xff]  }
 0x163   :  { %10366 = vst [vmem:[#allocation23_spill] sm:$0xff] %v7681_v31  ;;  %v678_v33 = vpop.f32.mrb[17].mxu0  ;;  %v829_v21 = vpop.f32.mrb[16].mxu1  ;;  %v677_v5 = vadd.f32 %v676_v32, %v7580_v12  ;;  %10454 = vst [vmem:[#allocation110_spill] sm:$0xff] %v8178_v19  ;;  %v8181_v4 = vld [vmem:[#allocation8 + $0xc] ss:$16 sps:$4 sm:$0xff]  }
 0x164   :  { %v680_v62 = vpop.f32.mrb[18].mxu0  ;;  %v830_v63 = vadd.f32 %v829_v21, %v7576_v9  ;;  %v831_v1 = vpop.f32.mrb[17].mxu1  ;;  %2150 = vmatpush1.bf16.msra.mxu0 %v7436_v37  ;;  %v679_v34 = vadd.f32 %v678_v33, %v7586_v17  ;;  %10455 = vst [vmem:[#allocation111_spill] sm:$0xff] %v8181_v4  ;;  %10457 = vst [vmem:[#allocation113_spill] sm:$0xff] %v8195_v30 }
 0x165   :  { %v681_v23 = vadd.f32 %v680_v62, %v7580_v12  ;;  %v682_v6 = vpop.f32.mrb[19].mxu0  ;;  %v832_v35 = vadd.f32 %v831_v1, %v7583_v15  ;;  %v833_v11 = vpop.f32.mrb[18].mxu1  ;;  %2193 = vmatpush1.bf16.msra.mxu1 %v7442_v40  ;;  %2151 = vmatprep.subr.bf16.mxu0 %v7440_v39 }
 0x166   :  { %v683_v36 = vadd.f32 %v682_v6, %v7586_v17  ;;  %v834_v25 = vadd.f32 %v833_v11, %v7576_v9  ;;  %v835_v26 = vpop.f32.mrb[19].mxu1  ;;  %2194 = vmatprep.subr.bf16.mxu1 %v7445_v41 }
 0x167   :  { %v7697_v37 = vpack.c.bf16 %v681_v23, %v677_v5  ;;  %v836_v53 = vadd.f32 %v835_v26, %v7583_v15 }
 0x168   :  { %v7700_v49 = vpack.c.bf16 %v683_v36, %v679_v34  ;;  %v7702_v59 = vpack.c.bf16 %v834_v25, %v830_v63  ;;  %2152 = vmatpush1.bf16.msra.mxu0 %v7448_v38 }
 0x169   :  { %10367 = vst [vmem:[#allocation24_spill] sm:$0xff] %v7697_v37  ;;  %v7705_v39 = vpack.c.bf16 %v836_v53, %v832_v35  ;;  %2195 = vmatpush1.bf16.msra.mxu1 %v7454_v43  ;;  %2153 = vmatprep.subr.bf16.mxu0 %v7452_v42  ;;  %v8162_v37 = vld [vmem:[#allocation9 + $0xe4] ss:$16 sps:$4 sm:$0xff]  }
 0x16a   :  { %10368 = vst [vmem:[#allocation25_spill] sm:$0xff] %v7700_v49  ;;  %10369 = vst [vmem:[#allocation26_spill] sm:$0xff] %v7702_v59  ;;  %v686_v40 = vpop.f32.mrb[20].mxu0  ;;  %2196 = vmatprep.subr.bf16.mxu1 %v7458_v44  ;;  %v8156_v49 = vld [vmem:[#allocation9 + $0xc0] ss:$16 sps:$4 sm:$0xff]  }
 0x16b   :  { %10370 = vst [vmem:[#allocation27_spill] sm:$0xff] %v7705_v39  ;;  %v688_v41 = vpop.f32.mrb[21].mxu0  ;;  %v839_v10 = vpop.f32.mrb[20].mxu1  ;;  %v687_v28 = vadd.f32 %v686_v40, %v7580_v12  ;;  %10446 = vst [vmem:[#allocation102_spill] sm:$0xff] %v8156_v49  ;;  %v8159_v59 = vld [vmem:[#allocation9 + $0xc8] ss:$16 sps:$4 sm:$0xff]  }
 0x16c   :  { %v690_v60 = vpop.f32.mrb[22].mxu0  ;;  %v840_v7 = vadd.f32 %v839_v10, %v7576_v9  ;;  %v841_v58 = vpop.f32.mrb[21].mxu1  ;;  %2154 = vmatpush1.bf16.msra.mxu0 %v7464_v45  ;;  %v689_v42 = vadd.f32 %v688_v41, %v7586_v17  ;;  %10447 = vst [vmem:[#allocation103_spill] sm:$0xff] %v8159_v59  ;;  %10448 = vst [vmem:[#allocation104_spill] sm:$0xff] %v8162_v37 }
 0x16d   :  { %v691_v38 = vadd.f32 %v690_v60, %v7580_v12  ;;  %v692_v54 = vpop.f32.mrb[23].mxu0  ;;  %v842_v43 = vadd.f32 %v841_v58, %v7583_v15  ;;  %v843_v27 = vpop.f32.mrb[22].mxu1  ;;  %2197 = vmatpush1.bf16.msra.mxu1 %v7468_v46  ;;  %2240 = vmatprep.subr.bf16.mxu0 %v7470_v47 }
 0x16e   :  { %v693_v44 = vadd.f32 %v692_v54, %v7586_v17  ;;  %v844_v29 = vadd.f32 %v843_v27, %v7576_v9  ;;  %v845_v55 = vpop.f32.mrb[23].mxu1  ;;  %2283 = vmatprep.subr.bf16.mxu1 %v7473_v48 }
 0x16f   :  { %v7721_v45 = vpack.c.bf16 %v691_v38, %v687_v28  ;;  %v846_v18 = vadd.f32 %v845_v55, %v7583_v15 }
 0x170   :  { %v7724_v20 = vpack.c.bf16 %v693_v44, %v689_v42  ;;  %v7726_v32 = vpack.c.bf16 %v844_v29, %v840_v7 }
 0x171   :  { %10371 = vst [vmem:[#allocation28_spill] sm:$0xff] %v7721_v45  ;;  %v7728_v46 = vpack.c.bf16 %v846_v18, %v842_v43 }
 0x172   :  { %10372 = vst [vmem:[#allocation29_spill] sm:$0xff] %v7724_v20  ;;  %10373 = vst [vmem:[#allocation30_spill] sm:$0xff] %v7726_v32  ;;  %v696_v47 = vpop.f32.mrb[24].mxu0 }
 0x173   :  { %10374 = vst [vmem:[#allocation31_spill] sm:$0xff] %v7728_v46  ;;  %v698_v33 = vpop.f32.mrb[25].mxu0  ;;  %v849_v21 = vpop.f32.mrb[24].mxu1  ;;  %v697_v5 = vadd.f32 %v696_v47, %v7580_v12 }
 0x174   :  { %v700_v62 = vpop.f32.mrb[26].mxu0  ;;  %v850_v63 = vadd.f32 %v849_v21, %v7576_v9  ;;  %v851_v1 = vpop.f32.mrb[25].mxu1  ;;  %v699_v11 = vadd.f32 %v698_v33, %v7586_v17 }
 0x175   :  { %v701_v48 = vadd.f32 %v700_v62, %v7580_v12  ;;  %v702_v23 = vpop.f32.mrb[27].mxu0  ;;  %v852_v6 = vadd.f32 %v851_v1, %v7583_v15  ;;  %v853_v35 = vpop.f32.mrb[26].mxu1 }
 0x176   :  { %v703_v34 = vadd.f32 %v702_v23, %v7586_v17  ;;  %v854_v36 = vadd.f32 %v853_v35, %v7576_v9  ;;  %v855_v25 = vpop.f32.mrb[27].mxu1 }
 0x177   :  { %v7737_v26 = vpack.c.bf16 %v701_v48, %v697_v5  ;;  %v856_v53 = vadd.f32 %v855_v25, %v7583_v15 }
 0x178   :  { %v7740_v40 = vpack.c.bf16 %v703_v34, %v699_v11  ;;  %v7742_v41 = vpack.c.bf16 %v854_v36, %v850_v63 }
 0x179   :  { %10375 = vst [vmem:[#allocation32_spill] sm:$0xff] %v7737_v26  ;;  %v7744_v10 = vpack.c.bf16 %v856_v53, %v852_v6 }
 0x17a   :  { %10376 = vst [vmem:[#allocation33_spill] sm:$0xff] %v7740_v40  ;;  %10377 = vst [vmem:[#allocation34_spill] sm:$0xff] %v7742_v41  ;;  %v706_v60 = vpop.f32.mrb[28].mxu0 }
 0x17b   :  { %10378 = vst [vmem:[#allocation35_spill] sm:$0xff] %v7744_v10  ;;  %v708_v7 = vpop.f32.mrb[29].mxu0  ;;  %v859_v58 = vpop.f32.mrb[28].mxu1  ;;  %v707_v43 = vadd.f32 %v706_v60, %v7580_v12 }
 0x17c   :  { %v710_v28 = vpop.f32.mrb[30].mxu0  ;;  %v860_v38 = vadd.f32 %v859_v58, %v7576_v9  ;;  %v861_v54 = vpop.f32.mrb[29].mxu1  ;;  %v709_v55 = vadd.f32 %v708_v7, %v7586_v17 }
 0x17d   :  { %v711_v27 = vadd.f32 %v710_v28, %v7580_v12  ;;  %v712_v42 = vpop.f32.mrb[31].mxu0  ;;  %v862_v44 = vadd.f32 %v861_v54, %v7583_v15  ;;  %v863_v29 = vpop.f32.mrb[30].mxu1 }
 0x17e   :  { %v713_v18 = vadd.f32 %v712_v42, %v7586_v17  ;;  %v864_v47 = vadd.f32 %v863_v29, %v7576_v9  ;;  %v865_v33 = vpop.f32.mrb[31].mxu1 }
 0x17f   :  { %v7753_v21 = vpack.c.bf16 %v711_v27, %v707_v43  ;;  %v866_v62 = vadd.f32 %v865_v33, %v7583_v15 }
 0x180   :  { %v7756_v63 = vpack.c.bf16 %v713_v18, %v709_v55  ;;  %v7758_v1 = vpack.c.bf16 %v864_v47, %v860_v38 }
 0x181   :  { %10379 = vst [vmem:[#allocation36_spill] sm:$0xff] %v7753_v21  ;;  %v7760_v5 = vpack.c.bf16 %v866_v62, %v862_v44 }
 0x182   :  { %10380 = vst [vmem:[#allocation37_spill] sm:$0xff] %v7756_v63  ;;  %10381 = vst [vmem:[#allocation38_spill] sm:$0xff] %v7758_v1  ;;  %v716_v48 = vpop.f32.mrb[32].mxu0 }
 0x183   :  { %10382 = vst [vmem:[#allocation39_spill] sm:$0xff] %v7760_v5  ;;  %v718_v23 = vpop.f32.mrb[33].mxu0  ;;  %v869_v6 = vpop.f32.mrb[32].mxu1  ;;  %v717_v36 = vadd.f32 %v716_v48, %v7580_v12 }
 0x184   :  { %v720_v35 = vpop.f32.mrb[34].mxu0  ;;  %v870_v11 = vadd.f32 %v869_v6, %v7576_v9  ;;  %v871_v34 = vpop.f32.mrb[33].mxu1  ;;  %v719_v58 = vadd.f32 %v718_v23, %v7586_v17 }
 0x185   :  { %v721_v25 = vadd.f32 %v720_v35, %v7580_v12  ;;  %v722_v53 = vpop.f32.mrb[35].mxu0  ;;  %v872_v60 = vadd.f32 %v871_v34, %v7583_v15  ;;  %v873_v7 = vpop.f32.mrb[34].mxu1 }
 0x186   :  { %v723_v28 = vadd.f32 %v722_v53, %v7586_v17  ;;  %v874_v38 = vadd.f32 %v873_v7, %v7576_v9  ;;  %v875_v54 = vpop.f32.mrb[35].mxu1 }
 0x187   :  { %v7769_v43 = vpack.c.bf16 %v721_v25, %v717_v36  ;;  %v876_v27 = vadd.f32 %v875_v54, %v7583_v15 }
 0x188   :  { %v7772_v42 = vpack.c.bf16 %v723_v28, %v719_v58  ;;  %v7774_v44 = vpack.c.bf16 %v874_v38, %v870_v11 }
 0x189   :  { %10383 = vst [vmem:[#allocation40_spill] sm:$0xff] %v7769_v43  ;;  %v7776_v29 = vpack.c.bf16 %v876_v27, %v872_v60 }
 0x18a   :  { %10384 = vst [vmem:[#allocation41_spill] sm:$0xff] %v7772_v42  ;;  %10385 = vst [vmem:[#allocation42_spill] sm:$0xff] %v7774_v44  ;;  %v726_v55 = vpop.f32.mrb[36].mxu0 }
 0x18b   :  { %10386 = vst [vmem:[#allocation43_spill] sm:$0xff] %v7776_v29  ;;  %v728_v18 = vpop.f32.mrb[37].mxu0  ;;  %v879_v47 = vpop.f32.mrb[36].mxu1  ;;  %v727_v23 = vadd.f32 %v726_v55, %v7580_v12 }
 0x18c   :  { %v730_v33 = vpop.f32.mrb[38].mxu0  ;;  %v880_v62 = vadd.f32 %v879_v47, %v7576_v9  ;;  %v881_v48 = vpop.f32.mrb[37].mxu1  ;;  %v729_v11 = vadd.f32 %v728_v18, %v7586_v17 }
 0x18d   :  { %v731_v6 = vadd.f32 %v730_v33, %v7580_v12  ;;  %v732_v35 = vpop.f32.mrb[39].mxu0  ;;  %v882_v34 = vadd.f32 %v881_v48, %v7583_v15  ;;  %v883_v36 = vpop.f32.mrb[38].mxu1 }
 0x18e   :  { %v733_v25 = vadd.f32 %v732_v35, %v7586_v17  ;;  %v884_v53 = vadd.f32 %v883_v36, %v7576_v9  ;;  %v885_v60 = vpop.f32.mrb[39].mxu1 }
 0x18f   :  { %v7785_v7 = vpack.c.bf16 %v731_v6, %v727_v23  ;;  %v886_v58 = vadd.f32 %v885_v60, %v7583_v15 }
 0x190   :  { %v7788_v28 = vpack.c.bf16 %v733_v25, %v729_v11  ;;  %v7790_v38 = vpack.c.bf16 %v884_v53, %v880_v62 }
 0x191   :  { %10387 = vst [vmem:[#allocation44_spill] sm:$0xff] %v7785_v7  ;;  %v7792_v54 = vpack.c.bf16 %v886_v58, %v882_v34 }
 0x192   :  { %10388 = vst [vmem:[#allocation45_spill] sm:$0xff] %v7788_v28  ;;  %10389 = vst [vmem:[#allocation46_spill] sm:$0xff] %v7790_v38  ;;  %v736_v27 = vpop.f32.mrb[40].mxu0 }
 0x193   :  { %10390 = vst [vmem:[#allocation47_spill] sm:$0xff] %v7792_v54  ;;  %v738_v55 = vpop.f32.mrb[41].mxu0  ;;  %v889_v47 = vpop.f32.mrb[40].mxu1  ;;  %v737_v35 = vadd.f32 %v736_v27, %v7580_v12 }
 0x194   :  { %v740_v33 = vpop.f32.mrb[42].mxu0  ;;  %v890_v18 = vadd.f32 %v889_v47, %v7576_v9  ;;  %v891_v48 = vpop.f32.mrb[41].mxu1  ;;  %v739_v62 = vadd.f32 %v738_v55, %v7586_v17  ;;  %v188_v55 = vsub.s32 4, %v7561_v57 }
 0x195   :  { %v741_v23 = vadd.f32 %v740_v33, %v7580_v12  ;;  %v742_v6 = vpop.f32.mrb[43].mxu0  ;;  %v892_v36 = vadd.f32 %v891_v48, %v7583_v15  ;;  %v893_v11 = vpop.f32.mrb[42].mxu1 }
 0x196   :  { %v743_v34 = vadd.f32 %v742_v6, %v7586_v17  ;;  %v894_v25 = vadd.f32 %v893_v11, %v7576_v9  ;;  %v895_v53 = vpop.f32.mrb[43].mxu1 }
 0x197   :  { %v7801_v60 = vpack.c.bf16 %v741_v23, %v737_v35  ;;  %v896_v58 = vadd.f32 %v895_v53, %v7583_v15  ;;  %v196_v35 = vsub.s32 6, %v7561_v57 }
 0x198   :  { %v7804_v47 = vpack.c.bf16 %v743_v34, %v739_v62  ;;  %v7806_v27 = vpack.c.bf16 %v894_v25, %v890_v18  ;;  %v200_v25 = vsub.s32 7, %v7561_v57 }
 0x199   :  { %10391 = vst [vmem:[#allocation48_spill] sm:$0xff] %v7801_v60  ;;  %v7808_v33 = vpack.c.bf16 %v896_v58, %v892_v36 }
 0x19a   :  { %10392 = vst [vmem:[#allocation49_spill] sm:$0xff] %v7804_v47  ;;  %10393 = vst [vmem:[#allocation50_spill] sm:$0xff] %v7806_v27  ;;  %v746_v0 = vpop.f32.mrb[44].mxu0 }
 0x19b   :  { %10394 = vst [vmem:[#allocation51_spill] sm:$0xff] %v7808_v33  ;;  %v748_v48 = vpop.f32.mrb[45].mxu0  ;;  %v899_v54 = vpop.f32.mrb[44].mxu1  ;;  %v747_v23 = vadd.f32 %v746_v0, %v7580_v12  ;;  %v192_v33 = vsub.s32 5, %v7561_v57  ;;  %v7837_v57 = vrot.slane %v7571_v3, %v200_v25 }
 0x19c   :  { %v750_v28 = vpop.f32.mrb[46].mxu0  ;;  %v900_v6 = vadd.f32 %v899_v54, %v7576_v9  ;;  %v901_v11 = vpop.f32.mrb[45].mxu1  ;;  %v749_v53 = vadd.f32 %v748_v48, %v7586_v17  ;;  %v7832_v48 = vrot.slane %v7571_v3, %v188_v55 }
 0x19d   :  { %v751_v62 = vadd.f32 %v750_v28, %v7580_v12  ;;  %v752_v34 = vpop.f32.mrb[47].mxu0  ;;  %v902_v18 = vadd.f32 %v901_v11, %v7583_v15  ;;  %v903_v36 = vpop.f32.mrb[46].mxu1  ;;  %v7829_v11 = vrot.slane %v7571_v3, %v196_v35 }
 0x19e   :  { %v753_v58 = vadd.f32 %v752_v34, %v7586_v17  ;;  %v904_v54 = vadd.f32 %v903_v36, %v7576_v9  ;;  %v905_v47 = vpop.f32.mrb[47].mxu1 }
 0x19f   :  { %v7821_v27 = vpack.c.bf16 %v751_v62, %v747_v23  ;;  %v906_v0 = vadd.f32 %v905_v47, %v7583_v15  ;;  %v7840_v23 = vrot.slane %v7571_v3, %v192_v33 }
 0x1a0   :  { %v7824_v12 = vpack.c.bf16 %v753_v58, %v749_v53  ;;  %v7826_v28 = vpack.c.bf16 %v904_v54, %v900_v6 }
 0x1a1   :  { %10395 = vst [vmem:[#allocation52_spill] sm:$0xff] %v7821_v27  ;;  %v7834_v17 = vpack.c.bf16 %v906_v0, %v902_v18 }
 0x1a2   :  { %10396 = vst [vmem:[#allocation53_spill] sm:$0xff] %v7824_v12  ;;  %10397 = vst [vmem:[#allocation54_spill] sm:$0xff] %v7826_v28  ;;  %v942_v9 = vpop.f32.mrb[48].mxu0 }
 0x1a3   :  { %10398 = vst [vmem:[#allocation55_spill] sm:$0xff] %v7834_v17  ;;  %v944_v15 = vpop.f32.mrb[49].mxu0  ;;  %v1095_v47 = vpop.f32.mrb[48].mxu1  ;;  %v943_v35 = vadd.f32 %v942_v9, %v7832_v48 }
 0x1a4   :  { %v946_v62 = vpop.f32.mrb[50].mxu0  ;;  %v1096_v6 = vadd.f32 %v1095_v47, %v7829_v11  ;;  %v1097_v34 = vpop.f32.mrb[49].mxu1  ;;  %v945_v25 = vadd.f32 %v944_v15, %v7840_v23 }
 0x1a5   :  { %v947_v55 = vadd.f32 %v946_v62, %v7832_v48  ;;  %v948_v36 = vpop.f32.mrb[51].mxu0  ;;  %v1098_v18 = vadd.f32 %v1097_v34, %v7837_v57  ;;  %v1099_v53 = vpop.f32.mrb[50].mxu1 }
 0x1a6   :  { %v949_v58 = vadd.f32 %v948_v36, %v7840_v23  ;;  %v1100_v3 = vadd.f32 %v1099_v53, %v7829_v11  ;;  %v1101_v33 = vpop.f32.mrb[51].mxu1 }
 0x1a7   :  { %v7849_v54 = vpack.c.bf16 %v947_v55, %v943_v35  ;;  %v1102_v0 = vadd.f32 %v1101_v33, %v7837_v57 }
 0x1a8   :  { %v7852_v47 = vpack.c.bf16 %v949_v58, %v945_v25  ;;  %v7854_v9 = vpack.c.bf16 %v1100_v3, %v1096_v6 }
 0x1a9   :  { %10399 = vst [vmem:[#allocation56_spill] sm:$0xff] %v7849_v54  ;;  %v7856_v62 = vpack.c.bf16 %v1102_v0, %v1098_v18 }
 0x1aa   :  { %10400 = vst [vmem:[#allocation57_spill] sm:$0xff] %v7852_v47  ;;  %10401 = vst [vmem:[#allocation58_spill] sm:$0xff] %v7854_v9  ;;  %v952_v17 = vpop.f32.mrb[52].mxu0 }
 0x1ab   :  { %10402 = vst [vmem:[#allocation59_spill] sm:$0xff] %v7856_v62  ;;  %v954_v34 = vpop.f32.mrb[53].mxu0  ;;  %v1105_v12 = vpop.f32.mrb[52].mxu1  ;;  %v953_v53 = vadd.f32 %v952_v17, %v7832_v48 }
 0x1ac   :  { %v956_v28 = vpop.f32.mrb[54].mxu0  ;;  %v1106_v15 = vadd.f32 %v1105_v12, %v7829_v11  ;;  %v1107_v36 = vpop.f32.mrb[53].mxu1  ;;  %v955_v6 = vadd.f32 %v954_v34, %v7840_v23 }
 0x1ad   :  { %v957_v35 = vadd.f32 %v956_v28, %v7832_v48  ;;  %v958_v55 = vpop.f32.mrb[55].mxu0  ;;  %v1108_v33 = vadd.f32 %v1107_v36, %v7837_v57  ;;  %v1109_v25 = vpop.f32.mrb[54].mxu1 }
 0x1ae   :  { %v959_v18 = vadd.f32 %v958_v55, %v7840_v23  ;;  %v1110_v58 = vadd.f32 %v1109_v25, %v7829_v11  ;;  %v1111_v3 = vpop.f32.mrb[55].mxu1 }
 0x1af   :  { %v7865_v0 = vpack.c.bf16 %v957_v35, %v953_v53  ;;  %v1112_v12 = vadd.f32 %v1111_v3, %v7837_v57 }
 0x1b0   :  { %v7868_v62 = vpack.c.bf16 %v959_v18, %v955_v6  ;;  %v7870_v17 = vpack.c.bf16 %v1110_v58, %v1106_v15 }
 0x1b1   :  { %10403 = vst [vmem:[#allocation60_spill] sm:$0xff] %v7865_v0  ;;  %v7872_v28 = vpack.c.bf16 %v1112_v12, %v1108_v33 }
 0x1b2   :  { %10404 = vst [vmem:[#allocation61_spill] sm:$0xff] %v7868_v62  ;;  %10405 = vst [vmem:[#allocation62_spill] sm:$0xff] %v7870_v17  ;;  %v962_v47 = vpop.f32.mrb[56].mxu0 }
 0x1b3   :  { %10406 = vst [vmem:[#allocation63_spill] sm:$0xff] %v7872_v28  ;;  %v964_v36 = vpop.f32.mrb[57].mxu0  ;;  %v1115_v9 = vpop.f32.mrb[56].mxu1  ;;  %v963_v25 = vadd.f32 %v962_v47, %v7832_v48 }
 0x1b4   :  { %v966_v54 = vpop.f32.mrb[58].mxu0  ;;  %v1116_v34 = vadd.f32 %v1115_v9, %v7829_v11  ;;  %v1117_v55 = vpop.f32.mrb[57].mxu1  ;;  %v965_v15 = vadd.f32 %v964_v36, %v7840_v23 }
 0x1b5   :  { %v967_v53 = vadd.f32 %v966_v54, %v7832_v48  ;;  %v968_v35 = vpop.f32.mrb[59].mxu0  ;;  %v1118_v3 = vadd.f32 %v1117_v55, %v7837_v57  ;;  %v1119_v6 = vpop.f32.mrb[58].mxu1 }
 0x1b6   :  { %v969_v33 = vadd.f32 %v968_v35, %v7840_v23  ;;  %v1120_v18 = vadd.f32 %v1119_v6, %v7829_v11  ;;  %v1121_v58 = vpop.f32.mrb[59].mxu1 }
 0x1b7   :  { %v7881_v12 = vpack.c.bf16 %v967_v53, %v963_v25  ;;  %v1122_v9 = vadd.f32 %v1121_v58, %v7837_v57 }
 0x1b8   :  { %v7884_v27 = vpack.c.bf16 %v969_v33, %v965_v15  ;;  %v7886_v47 = vpack.c.bf16 %v1120_v18, %v1116_v34 }
 0x1b9   :  { %10407 = vst [vmem:[#allocation64_spill] sm:$0xff] %v7881_v12  ;;  %v7888_v54 = vpack.c.bf16 %v1122_v9, %v1118_v3 }
 0x1ba   :  { %10408 = vst [vmem:[#allocation65_spill] sm:$0xff] %v7884_v27  ;;  %10409 = vst [vmem:[#allocation66_spill] sm:$0xff] %v7886_v47  ;;  %v972_v28 = vpop.f32.mrb[60].mxu0 }
 0x1bb   :  { %10410 = vst [vmem:[#allocation67_spill] sm:$0xff] %v7888_v54  ;;  %v974_v55 = vpop.f32.mrb[61].mxu0  ;;  %v1125_v62 = vpop.f32.mrb[60].mxu1  ;;  %v973_v6 = vadd.f32 %v972_v28, %v7832_v48 }
 0x1bc   :  { %v976_v17 = vpop.f32.mrb[62].mxu0  ;;  %v1126_v36 = vadd.f32 %v1125_v62, %v7829_v11  ;;  %v1127_v35 = vpop.f32.mrb[61].mxu1  ;;  %v975_v34 = vadd.f32 %v974_v55, %v7840_v23 }
 0x1bd   :  { %v977_v25 = vadd.f32 %v976_v17, %v7832_v48  ;;  %v978_v53 = vpop.f32.mrb[63].mxu0  ;;  %v1128_v58 = vadd.f32 %v1127_v35, %v7837_v57  ;;  %v1129_v15 = vpop.f32.mrb[62].mxu1 }
 0x1be   :  { %v979_v3 = vadd.f32 %v978_v53, %v7840_v23  ;;  %v1130_v33 = vadd.f32 %v1129_v15, %v7829_v11  ;;  %v1131_v18 = vpop.f32.mrb[63].mxu1 }
 0x1bf   :  { %v7897_v9 = vpack.c.bf16 %v977_v25, %v973_v6  ;;  %v1132_v62 = vadd.f32 %v1131_v18, %v7837_v57 }
 0x1c0   :  { %v7900_v0 = vpack.c.bf16 %v979_v3, %v975_v34  ;;  %v7902_v28 = vpack.c.bf16 %v1130_v33, %v1126_v36 }
 0x1c1   :  { %10411 = vst [vmem:[#allocation68_spill] sm:$0xff] %v7897_v9  ;;  %v7904_v17 = vpack.c.bf16 %v1132_v62, %v1128_v58 }
 0x1c2   :  { %10412 = vst [vmem:[#allocation69_spill] sm:$0xff] %v7900_v0  ;;  %10413 = vst [vmem:[#allocation70_spill] sm:$0xff] %v7902_v28  ;;  %v982_v60 = vpop.f32.mrb[64].mxu0 }
 0x1c3   :  { %10414 = vst [vmem:[#allocation71_spill] sm:$0xff] %v7904_v17  ;;  %v984_v35 = vpop.f32.mrb[65].mxu0  ;;  %v1135_v54 = vpop.f32.mrb[64].mxu1  ;;  %v983_v15 = vadd.f32 %v982_v60, %v7832_v48 }
 0x1c4   :  { %v986_v27 = vpop.f32.mrb[66].mxu0  ;;  %v1136_v55 = vadd.f32 %v1135_v54, %v7829_v11  ;;  %v1137_v53 = vpop.f32.mrb[65].mxu1  ;;  %v985_v36 = vadd.f32 %v984_v35, %v7840_v23 }
 0x1c5   :  { %v987_v6 = vadd.f32 %v986_v27, %v7832_v48  ;;  %v988_v25 = vpop.f32.mrb[67].mxu0  ;;  %v1138_v18 = vadd.f32 %v1137_v53, %v7837_v57  ;;  %v1139_v34 = vpop.f32.mrb[66].mxu1 }
 0x1c6   :  { %v989_v58 = vadd.f32 %v988_v25, %v7840_v23  ;;  %v1140_v3 = vadd.f32 %v1139_v34, %v7829_v11  ;;  %v1141_v33 = vpop.f32.mrb[67].mxu1 }
 0x1c7   :  { %v7913_v62 = vpack.c.bf16 %v987_v6, %v983_v15  ;;  %v1142_v54 = vadd.f32 %v1141_v33, %v7837_v57 }
 0x1c8   :  { %v7916_v47 = vpack.c.bf16 %v989_v58, %v985_v36  ;;  %v7918_v60 = vpack.c.bf16 %v1140_v3, %v1136_v55 }
 0x1c9   :  { %10415 = vst [vmem:[#allocation72_spill] sm:$0xff] %v7913_v62  ;;  %v7920_v27 = vpack.c.bf16 %v1142_v54, %v1138_v18 }
 0x1ca   :  { %10416 = vst [vmem:[#allocation73_spill] sm:$0xff] %v7916_v47  ;;  %10417 = vst [vmem:[#allocation74_spill] sm:$0xff] %v7918_v60  ;;  %v992_v12 = vpop.f32.mrb[68].mxu0 }
 0x1cb   :  { %10418 = vst [vmem:[#allocation75_spill] sm:$0xff] %v7920_v27  ;;  %v994_v53 = vpop.f32.mrb[69].mxu0  ;;  %v1145_v38 = vpop.f32.mrb[68].mxu1  ;;  %v993_v34 = vadd.f32 %v992_v12, %v7832_v48 }
 0x1cc   :  { %v996_v7 = vpop.f32.mrb[70].mxu0  ;;  %v1146_v35 = vadd.f32 %v1145_v38, %v7829_v11  ;;  %v1147_v25 = vpop.f32.mrb[69].mxu1  ;;  %v995_v55 = vadd.f32 %v994_v53, %v7840_v23 }
 0x1cd   :  { %v997_v15 = vadd.f32 %v996_v7, %v7832_v48  ;;  %v998_v6 = vpop.f32.mrb[71].mxu0  ;;  %v1148_v33 = vadd.f32 %v1147_v25, %v7837_v57  ;;  %v1149_v36 = vpop.f32.mrb[70].mxu1 }
 0x1ce   :  { %v999_v18 = vadd.f32 %v998_v6, %v7840_v23  ;;  %v1150_v58 = vadd.f32 %v1149_v36, %v7829_v11  ;;  %v1151_v3 = vpop.f32.mrb[71].mxu1 }
 0x1cf   :  { %v7929_v54 = vpack.c.bf16 %v997_v15, %v993_v34  ;;  %v1152_v38 = vadd.f32 %v1151_v3, %v7837_v57 }
 0x1d0   :  { %v7932_v17 = vpack.c.bf16 %v999_v18, %v995_v55  ;;  %v7934_v12 = vpack.c.bf16 %v1150_v58, %v1146_v35 }
 0x1d1   :  { %10419 = vst [vmem:[#allocation76_spill] sm:$0xff] %v7929_v54  ;;  %v7936_v7 = vpack.c.bf16 %v1152_v38, %v1148_v33 }
 0x1d2   :  { %10420 = vst [vmem:[#allocation77_spill] sm:$0xff] %v7932_v17  ;;  %10421 = vst [vmem:[#allocation78_spill] sm:$0xff] %v7934_v12  ;;  %v1002_v0 = vpop.f32.mrb[72].mxu0 }
 0x1d3   :  { %10422 = vst [vmem:[#allocation79_spill] sm:$0xff] %v7936_v7  ;;  %v1004_v25 = vpop.f32.mrb[73].mxu0  ;;  %v1155_v28 = vpop.f32.mrb[72].mxu1  ;;  %v1003_v36 = vadd.f32 %v1002_v0, %v7832_v48 }
 0x1d4   :  { %v1006_v9 = vpop.f32.mrb[74].mxu0  ;;  %v1156_v53 = vadd.f32 %v1155_v28, %v7829_v11  ;;  %v1157_v6 = vpop.f32.mrb[73].mxu1  ;;  %v1005_v35 = vadd.f32 %v1004_v25, %v7840_v23 }
 0x1d5   :  { %v1007_v34 = vadd.f32 %v1006_v9, %v7832_v48  ;;  %v1008_v15 = vpop.f32.mrb[75].mxu0  ;;  %v1158_v3 = vadd.f32 %v1157_v6, %v7837_v57  ;;  %v1159_v55 = vpop.f32.mrb[74].mxu1 }
 0x1d6   :  { %v1009_v33 = vadd.f32 %v1008_v15, %v7840_v23  ;;  %v1160_v18 = vadd.f32 %v1159_v55, %v7829_v11  ;;  %v1161_v58 = vpop.f32.mrb[75].mxu1 }
 0x1d7   :  { %v7945_v38 = vpack.c.bf16 %v1007_v34, %v1003_v36  ;;  %v1162_v28 = vadd.f32 %v1161_v58, %v7837_v57 }
 0x1d8   :  { %v7948_v29 = vpack.c.bf16 %v1009_v33, %v1005_v35  ;;  %v7950_v0 = vpack.c.bf16 %v1160_v18, %v1156_v53 }
 0x1d9   :  { %10423 = vst [vmem:[#allocation80_spill] sm:$0xff] %v7945_v38  ;;  %v7952_v9 = vpack.c.bf16 %v1162_v28, %v1158_v3 }
 0x1da   :  { %10424 = vst [vmem:[#allocation81_spill] sm:$0xff] %v7948_v29  ;;  %10425 = vst [vmem:[#allocation82_spill] sm:$0xff] %v7950_v0  ;;  %v1012_v42 = vpop.f32.mrb[76].mxu0 }
 0x1db   :  { %10426 = vst [vmem:[#allocation83_spill] sm:$0xff] %v7952_v9  ;;  %v1014_v6 = vpop.f32.mrb[77].mxu0  ;;  %v1165_v44 = vpop.f32.mrb[76].mxu1  ;;  %v1013_v55 = vadd.f32 %v1012_v42, %v7832_v48 }
 0x1dc   :  { %v1016_v43 = vpop.f32.mrb[78].mxu0  ;;  %v1166_v25 = vadd.f32 %v1165_v44, %v7829_v11  ;;  %v1167_v15 = vpop.f32.mrb[77].mxu1  ;;  %v1015_v53 = vadd.f32 %v1014_v6, %v7840_v23 }
 0x1dd   :  { %v1017_v36 = vadd.f32 %v1016_v43, %v7832_v48  ;;  %v1018_v34 = vpop.f32.mrb[79].mxu0  ;;  %v1168_v58 = vadd.f32 %v1167_v15, %v7837_v57  ;;  %v1169_v35 = vpop.f32.mrb[78].mxu1 }
 0x1de   :  { %v1019_v3 = vadd.f32 %v1018_v34, %v7840_v23  ;;  %v1170_v33 = vadd.f32 %v1169_v35, %v7829_v11  ;;  %v1171_v18 = vpop.f32.mrb[79].mxu1 }
 0x1df   :  { %v7961_v28 = vpack.c.bf16 %v1017_v36, %v1013_v55  ;;  %v1172_v44 = vadd.f32 %v1171_v18, %v7837_v57 }
 0x1e0   :  { %v7964_v27 = vpack.c.bf16 %v1019_v3, %v1015_v53  ;;  %v7966_v42 = vpack.c.bf16 %v1170_v33, %v1166_v25 }
 0x1e1   :  { %10427 = vst [vmem:[#allocation84_spill] sm:$0xff] %v7961_v28  ;;  %v7968_v43 = vpack.c.bf16 %v1172_v44, %v1168_v58  ;;  %v8152_v28 = vpop.permute.xlu1 %2111 }
 0x1e2   :  { %10428 = vst [vmem:[#allocation85_spill] sm:$0xff] %v7964_v27  ;;  %10429 = vst [vmem:[#allocation86_spill] sm:$0xff] %v7966_v42  ;;  %v1022_v47 = vpop.f32.mrb[80].mxu0  ;;  %vm10261_vm11 = vcmp.eq.s32.totalorder %v8152_v28, 1 }
 0x1e3   :  { %10430 = vst [vmem:[#allocation87_spill] sm:$0xff] %v7968_v43  ;;  %v1024_v15 = vpop.f32.mrb[81].mxu0  ;;  %v1175_v60 = vpop.f32.mrb[80].mxu1  ;;  %v1023_v35 = vadd.f32 %v1022_v47, %v7832_v48  ;;  %v8119_v43 = vld [vmem:[#allocation9 + $0x84] ss:$16 sps:$4 sm:$0xff]   ;;  %10444 = vst [vmem:[#allocation100_spill] sm:$0xff] %v8152_v28 }
 0x1e4   :  { %v1026_v62 = vpop.f32.mrb[82].mxu0  ;;  %v1176_v6 = vadd.f32 %v1175_v60, %v7829_v11  ;;  %v1177_v34 = vpop.f32.mrb[81].mxu1  ;;  %v1025_v25 = vadd.f32 %v1024_v15, %v7840_v23 }
 0x1e5   :  { %v1027_v55 = vadd.f32 %v1026_v62, %v7832_v48  ;;  %v1028_v36 = vpop.f32.mrb[83].mxu0  ;;  %v1178_v18 = vadd.f32 %v1177_v34, %v7837_v57  ;;  %v1179_v53 = vpop.f32.mrb[82].mxu1 }
 0x1e6   :  { %v1029_v58 = vadd.f32 %v1028_v36, %v7840_v23  ;;  %v1180_v3 = vadd.f32 %v1179_v53, %v7829_v11  ;;  %v1181_v33 = vpop.f32.mrb[83].mxu1  ;;  %v8176_v31 = vpop.permute.xlu1 %2114 }
 0x1e7   :  { %v7977_v44 = vpack.c.bf16 %v1027_v55, %v1023_v35  ;;  %v1182_v60 = vadd.f32 %v1181_v33, %v7837_v57  ;;  %10453 = vst [vmem:[#allocation109_spill] sm:$0xff] %v8176_v31  ;;  %vm10260_vm12 = vcmp.eq.s32.totalorder %v8176_v31, 1 }
 0x1e8   :  { %v7980_v5 = vpack.c.bf16 %v1029_v58, %v1025_v25  ;;  %v7982_v47 = vpack.c.bf16 %v1180_v3, %v1176_v6  ;;  %vm5782_vm13 = vmpackc.low %vm10260_vm12, %vm10261_vm11 }
 0x1e9   :  { %10431 = vst [vmem:[#allocation88_spill] sm:$0xff] %v7977_v44  ;;  %v7984_v62 = vpack.c.bf16 %v1182_v60, %v1178_v18  ;;  %v8173_v44 = vld [vmem:[#allocation9 + $0xe8] ss:$16 sps:$4 sm:$0xff]  }
 0x1ea   :  { %10432 = vst [vmem:[#allocation89_spill] sm:$0xff] %v7980_v5  ;;  %10433 = vst [vmem:[#allocation90_spill] sm:$0xff] %v7982_v47  ;;  %v1032_v63 = vpop.f32.mrb[84].mxu0 }
 0x1eb   :  { %10434 = vst [vmem:[#allocation91_spill] sm:$0xff] %v7984_v62  ;;  %v1034_v34 = vpop.f32.mrb[85].mxu0  ;;  %v1185_v1 = vpop.f32.mrb[84].mxu1  ;;  %v1033_v53 = vadd.f32 %v1032_v63, %v7832_v48  ;;  %v8165_v62 = vld [vmem:[#allocation9 + $0xec] ss:$16 sps:$4 sm:$0xff]   ;;  %10452 = vst [vmem:[#allocation108_spill] sm:$0xff] %v8173_v44 }
 0x1ec   :  { %v1036_v21 = vpop.f32.mrb[86].mxu0  ;;  %v1186_v15 = vadd.f32 %v1185_v1, %v7829_v11  ;;  %v1187_v36 = vpop.f32.mrb[85].mxu1  ;;  %v1035_v6 = vadd.f32 %v1034_v34, %v7840_v23  ;;  %10449 = vst [vmem:[#allocation105_spill] sm:$0xff] %v8165_v62 }
 0x1ed   :  { %v1037_v35 = vadd.f32 %v1036_v21, %v7832_v48  ;;  %v1038_v55 = vpop.f32.mrb[87].mxu0  ;;  %v1188_v33 = vadd.f32 %v1187_v36, %v7837_v57  ;;  %v1189_v25 = vpop.f32.mrb[86].mxu1 }
 0x1ee   :  { %v1039_v18 = vadd.f32 %v1038_v55, %v7840_v23  ;;  %v1190_v58 = vadd.f32 %v1189_v25, %v7829_v11  ;;  %v1191_v3 = vpop.f32.mrb[87].mxu1 }
 0x1ef   :  { %v7993_v60 = vpack.c.bf16 %v1037_v35, %v1033_v53  ;;  %v1192_v1 = vadd.f32 %v1191_v3, %v7837_v57 }
 0x1f0   :  { %v7996_v7 = vpack.c.bf16 %v1039_v18, %v1035_v6  ;;  %v7998_v63 = vpack.c.bf16 %v1190_v58, %v1186_v15 }
 0x1f1   :  { %10435 = vst [vmem:[#allocation92_spill] sm:$0xff] %v7993_v60  ;;  %v8000_v21 = vpack.c.bf16 %v1192_v1, %v1188_v33  ;;  %v8212_v60 = vld [vmem:[#allocation8 + $0x44] ss:$16 sps:$4 sm:$0xff]  }
 0x1f2   :  { %10436 = vst [vmem:[#allocation93_spill] sm:$0xff] %v7996_v7  ;;  %10437 = vst [vmem:[#allocation94_spill] sm:$0xff] %v7998_v63  ;;  %v1042_v17 = vpop.f32.mrb[88].mxu0  ;;  %v8201_v7 = vld [vmem:[#allocation8 + $0x2c] ss:$16 sps:$4 sm:$0xff]  }
 0x1f3   :  { %10438 = vst [vmem:[#allocation95_spill] sm:$0xff] %v8000_v21  ;;  %v1044_v36 = vpop.f32.mrb[89].mxu0  ;;  %v1195_v12 = vpop.f32.mrb[88].mxu1  ;;  %v1043_v25 = vadd.f32 %v1042_v17, %v7832_v48  ;;  %v8198_v21 = vld [vmem:[#allocation8 + $0x24] ss:$16 sps:$4 sm:$0xff]   ;;  %10459 = vst [vmem:[#allocation115_spill] sm:$0xff] %v8201_v7 }
 0x1f4   :  { %v1046_v54 = vpop.f32.mrb[90].mxu0  ;;  %v1196_v34 = vadd.f32 %v1195_v12, %v7829_v11  ;;  %v1197_v55 = vpop.f32.mrb[89].mxu1  ;;  %v1045_v15 = vadd.f32 %v1044_v36, %v7840_v23  ;;  %10458 = vst [vmem:[#allocation114_spill] sm:$0xff] %v8198_v21  ;;  %v8209_v63 = vld [vmem:[#allocation8 + $0x28] ss:$16 sps:$4 sm:$0xff]   ;;  %10462 = vst [vmem:[#allocation118_spill] sm:$0xff] %v8212_v60 }
 0x1f5   :  { %v1047_v53 = vadd.f32 %v1046_v54, %v7832_v48  ;;  %v1048_v35 = vpop.f32.mrb[91].mxu0  ;;  %v1198_v3 = vadd.f32 %v1197_v55, %v7837_v57  ;;  %v1199_v6 = vpop.f32.mrb[90].mxu1  ;;  %10461 = vst [vmem:[#allocation117_spill] sm:$0xff] %v8209_v63 }
 0x1f6   :  { %v1049_v33 = vadd.f32 %v1048_v35, %v7840_v23  ;;  %v1200_v18 = vadd.f32 %v1199_v6, %v7829_v11  ;;  %v1201_v58 = vpop.f32.mrb[91].mxu1 }
 0x1f7   :  { %v8009_v1 = vpack.c.bf16 %v1047_v53, %v1043_v25  ;;  %v1202_v12 = vadd.f32 %v1201_v58, %v7837_v57 }
 0x1f8   :  { %v8012_v10 = vpack.c.bf16 %v1049_v33, %v1045_v15  ;;  %v8014_v17 = vpack.c.bf16 %v1200_v18, %v1196_v34 }
 0x1f9   :  { %v8016_v54 = vpack.c.bf16 %v1202_v12, %v1198_v3 }
 0x1fa   :  { %v1052_v40 = vpop.f32.mrb[92].mxu0 }
 0x1fb   :  { %v1054_v55 = vpop.f32.mrb[93].mxu0  ;;  %v1205_v41 = vpop.f32.mrb[92].mxu1  ;;  %v1053_v6 = vadd.f32 %v1052_v40, %v7832_v48 }
 0x1fc   :  { %v1056_v26 = vpop.f32.mrb[94].mxu0  ;;  %v1206_v36 = vadd.f32 %v1205_v41, %v7829_v11  ;;  %v1207_v35 = vpop.f32.mrb[93].mxu1  ;;  %v1055_v34 = vadd.f32 %v1054_v55, %v7840_v23  ;;  %v1481_v55 = vunpack.c.l.bf16 %v7603_v56 }
 0x1fd   :  { %v1057_v25 = vadd.f32 %v1056_v26, %v7832_v48  ;;  %v1058_v53 = vpop.f32.mrb[95].mxu0  ;;  %v1208_v58 = vadd.f32 %v1207_v35, %v7837_v57  ;;  %v1209_v15 = vpop.f32.mrb[94].mxu1  ;;  %v1479_v48 = vunpack.c.l.bf16 %v7598_v13 }
 0x1fe   :  { %v1059_v3 = vadd.f32 %v1058_v53, %v7840_v23  ;;  %v1210_v33 = vadd.f32 %v1209_v15, %v7829_v11  ;;  %v1211_v18 = vpop.f32.mrb[95].mxu1  ;;  %v1480_v23 = vunpack.c.l.bf16 %v7601_v16 }
 0x1ff   :  { %v8025_v12 = vpack.c.bf16 %v1057_v25, %v1053_v6  ;;  %v1212_v41 = vadd.f32 %v1211_v18, %v7837_v57  ;;  %v1482_v6 = vunpack.c.l.bf16 %v7606_v61  ;;  %v1483_v57 = vunpack.c.h.bf16 %v7598_v13 }
 0x200   :  { %v8028_v9 = vpack.c.bf16 %v1059_v3, %v1055_v34  ;;  %v8030_v40 = vpack.c.bf16 %v1210_v33, %v1206_v36  ;;  %v1484_v33 = vunpack.c.h.bf16 %v7601_v16 }
 0x201   :  { %v8032_v26 = vpack.c.bf16 %v1212_v41, %v1208_v58  ;;  %v1485_v58 = vunpack.c.h.bf16 %v7603_v56 }
 0x202   :  { %v1681_v35 = vpop.f32.mrb[96].mxu0 }
 0x203   :  { %v1682_v53 = vadd.f32 %v1681_v35, %v1479_v48  ;;  %v1724_v11 = vpop.f32.mrb[96].mxu1  ;;  %v1683_v15 = vpop.f32.mrb[97].mxu0  ;;  %v1486_v48 = vunpack.c.h.bf16 %v7606_v61 }
 0x204   :  { %v1725_v25 = vadd.f32 %v1724_v11, %v1481_v55  ;;  %v1684_v34 = vadd.f32 %v1683_v15, %v1480_v23  ;;  %v1726_v36 = vpop.f32.mrb[97].mxu1  ;;  %v1685_v3 = vpop.f32.mrb[98].mxu0 }
 0x205   :  { %v5764_v18 = vmul.f32 -1.442695, %v1682_v53  ;;  %v1727_v41 = vadd.f32 %v1726_v36, %v1482_v6  ;;  %v1686_v29 = vadd.f32 %v1685_v3, %v1483_v57  ;;  %v1728_v0 = vpop.f32.mrb[98].mxu1  ;;  %v1687_v38 = vpop.f32.mrb[99].mxu0 }
 0x206   :  { %v5765_v35 = vmul.f32 -1.442695, %v1684_v34  ;;  %v1729_v46 = vadd.f32 %v1728_v0, %v1485_v58  ;;  %v1688_v20 = vadd.f32 %v1687_v38, %v1484_v33  ;;  %v1730_v32 = vpop.f32.mrb[99].mxu1  ;;  %v5766_v56 = vmul.f32 -1.442695, %v1725_v25 }
 0x207   :  { %6042 = vpow2.f32 %v5764_v18  ;;  %v5767_v13 = vmul.f32 -1.442695, %v1686_v29  ;;  %v1731_v55 = vadd.f32 %v1730_v32, %v1486_v48  ;;  %v1740_v33 = vunpack.c.l.bf16 %v8025_v12 }
 0x208   :  { %6044 = vpow2.f32 %v5765_v35  ;;  %v5768_v23 = vmul.f32 -1.442695, %v1688_v20  ;;  %v5769_v53 = vmul.f32 -1.442695, %v1729_v46  ;;  %v1742_v48 = vunpack.c.l.bf16 %v8030_v40 }
 0x209   :  { %6046 = vpow2.f32 %v5767_v13  ;;  %v1741_v35 = vunpack.c.l.bf16 %v8028_v9  ;;  %v1744_v13 = vunpack.c.h.bf16 %v8025_v12 }
 0x20a   :  { %6048 = vpow2.f32 %v5768_v23 }
 0x20b   :  { %6050 = vpow2.f32 %v5766_v56 }
 0x20c   :  { %6052 = vtanh.f32 %v1727_v41 }
 0x211   :  { %v6043_v16 = vpop.eup %6042 }
 0x212   :  { %v2012_v11 = vadd.f32 1.0, %v6043_v16  ;;  %v6045_v15 = vpop.eup %6044 }
 0x213   :  { %v2013_v61 = vadd.f32 1.0, %v6045_v15  ;;  %v6047_v6 = vpop.eup %6046  ;;  %v1743_v15 = vunpack.c.l.bf16 %v8032_v26 }
 0x214   :  { %6054 = vrcp.f32 %v2012_v11  ;;  %v2015_v38 = vadd.f32 1.0, %v6047_v6  ;;  %v6049_v0 = vpop.eup %6048 }
 0x215   :  { %6056 = vpow2.f32 %v5769_v53  ;;  %v2016_v32 = vadd.f32 1.0, %v6049_v0  ;;  %v6051_v20 = vpop.eup %6050 }
 0x216   :  { %6058 = vrcp.f32 %v2013_v61  ;;  %v6053_v29 = vpop.eup %6052  ;;  %v2014_v36 = vadd.f32 1.0, %v6051_v20 }
 0x217   :  { %6060 = vtanh.f32 %v1731_v55  ;;  %v1746_v55 = vunpack.c.h.bf16 %v8030_v40 }
 0x218   :  { %6062 = vrcp.f32 %v2015_v38 }
 0x219   :  { %6064 = vrcp.f32 %v2016_v32 }
 0x21a   :  { %6066 = vrcp.f32 %v2014_v36 }
 0x21e   :  { %v6055_v57 = vpop.eup %6054 }
 0x21f   :  { %v6057_v25 = vpop.eup %6056  ;;  %v2034_v46 = vmul.f32 %v6055_v57, %v6053_v29  ;;  %v1745_v57 = vunpack.c.h.bf16 %v8028_v9 }
 0x220   :  { %v6059_v34 = vpop.eup %6058  ;;  %v2017_v6 = vadd.f32 1.0, %v6057_v25 }
 0x221   :  { %v6061_v3 = vpop.eup %6060  ;;  %v2032_v58 = vmul.f32 0.0, %v6059_v34 }
 0x222   :  { %v6063_v18 = vpop.eup %6062  ;;  %v1942_v41 = vpop.f32.mrb[100].mxu0 }
 0x223   :  { %v8047_v23 = vadd.f32 %v2034_v46, %v2032_v58  ;;  %v2035_v56 = vmul.f32 %v6063_v18, %v6061_v3  ;;  %v1943_v16 = vadd.f32 %v1942_v41, %v1740_v33  ;;  %v1985_v53 = vpop.f32.mrb[100].mxu1  ;;  %v1944_v11 = vpop.f32.mrb[101].mxu0  ;;  %v1747_v33 = vunpack.c.h.bf16 %v8032_v26 }
 0x224   :  { %v6065_v61 = vpop.eup %6064  ;;  %v1986_v38 = vadd.f32 %v1985_v53, %v1742_v48  ;;  %v1945_v0 = vadd.f32 %v1944_v11, %v1741_v35  ;;  %v1987_v32 = vpop.f32.mrb[101].mxu1 }
 0x225   :  { %v1946_v20 = vpop.f32.mrb[102].mxu0  ;;  %6068 = vtanh.f32 %v8047_v23  ;;  %v2033_v12 = vmul.f32 0.0, %v6065_v61  ;;  %v5770_v29 = vmul.f32 -1.442695, %v1943_v16  ;;  %v1989_v40 = vpop.f32.mrb[102].mxu1  ;;  %v1988_v3 = vadd.f32 %v1987_v32, %v1743_v15 }
 0x226   :  { %v1948_v46 = vpop.f32.mrb[103].mxu0  ;;  %v5771_v34 = vmul.f32 -1.442695, %v1945_v0  ;;  %v1947_v58 = vadd.f32 %v1946_v20, %v1744_v13  ;;  %v1991_v18 = vpop.f32.mrb[103].mxu1  ;;  %v1990_v25 = vadd.f32 %v1989_v40, %v1746_v55  ;;  %v5772_v53 = vmul.f32 -1.442695, %v1986_v38 }
 0x227   :  { %v8053_v36 = vadd.f32 %v2035_v56, %v2033_v12  ;;  %6070 = vpow2.f32 %v5770_v29  ;;  %v1949_v41 = vadd.f32 %v1948_v46, %v1745_v57  ;;  %v1992_v35 = vadd.f32 %v1991_v18, %v1747_v33  ;;  %v6067_v9 = vpop.eup %6066  ;;  %v8056_v11 = vpop.permute.xlu0 %2097  ;;  %v8081_v33 = vld [vmem:[#allocation9 + $0x2c] ss:$16 sps:$4 sm:$0xff]  }
 0x228   :  { %6072 = vrcp.f32 %v2017_v6  ;;  %v5773_v48 = vmul.f32 -1.442695, %v1947_v58  ;;  %10439 = vst [vmem:[#allocation96_spill] sm:$0xff] %v8056_v11  ;;  %v5775_v61 = vmul.f32 -1.442695, %v1990_v25  ;;  %vm10259_vm8 = vcmp.eq.s32.totalorder %v8056_v11, 1 }
 0x229   :  { %6074 = vtanh.f32 %v8053_v36  ;;  %v5774_v16 = vmul.f32 -1.442695, %v1949_v41  ;;  %v8078_v58 = vld [vmem:[#allocation9 + $0x24] ss:$16 sps:$4 sm:$0xff]   ;;  %v10441_v18 = vmov 0  }
 0x22a   :  { %6076 = vpow2.f32 %v5771_v34  ;;  %v8072_v34 = vld [vmem:[#allocation9] ss:$16 sps:$4 sm:$0xff]  }
 0x22b   :  { %6078 = vpow2.f32 %v5773_v48  ;;  %v8062_v20 = vpop.permute.xlu0 %2100  ;;  %v8086_v48 = vld [vmem:[#allocation9 + $0x20] ss:$16 sps:$4 sm:$0xff]  }
 0x22c   :  { %6080 = vpow2.f32 %v5774_v16  ;;  %10440 = vst [vmem:[#allocation97_spill] sm:$0xff] %v8062_v20  ;;  %vm10250_vm9 = vcmp.eq.s32.totalorder %v8062_v20, 1 }
 0x22d   :  { %6082 = vpow2.f32 %v5772_v53  ;;  %vm5776_vm10 = vmpackc.low %vm10250_vm9, %vm10259_vm8  ;;  %v8095_v53 = vld [vmem:[#allocation9 + $0x4c] ss:$16 sps:$4 sm:$0xff]  }
 0x22e   :  { %6084 = vtanh.f32 %v1988_v3  ;;  %v8075_v3 = vld [vmem:[#allocation9 + $0x8] ss:$16 sps:$4 sm:$0xff]  }
 0x22f   :  { %v6069_v13 = vpop.eup %6068 }
 0x230   :  { %v8058_v26 = vmul.f32 %v6069_v13, %v6067_v9  ;;  %v8092_v9 = vld [vmem:[#allocation9 + $0x44] ss:$16 sps:$4 sm:$0xff]  }
 0x231   :  { %v6071_v56 = vpop.eup %6070 }
 0x232   :  { %v6073_v15 = vpop.eup %6072  ;;  %v2060_v55 = vadd.f32 1.0, %v6071_v56 }
 0x233   :  { %v6075_v6 = vpop.eup %6074 }
 0x234   :  { %v6077_v0 = vpop.eup %6076  ;;  %v8060_v32 = vmul.f32 %v6075_v6, %v6073_v15  ;;  %6086 = vrcp.f32 %v2060_v55  ;;  %v8101_v6 = vld [vmem:[#allocation9 + $0x48] ss:$16 sps:$4 sm:$0xff]  }
 0x235   :  { %v2061_v38 = vadd.f32 1.0, %v6077_v0  ;;  %v6079_v12 = vpop.eup %6078  ;;  %6088 = vpow2.f32 %v5775_v61  ;;  %v8098_v61 = vld [vmem:[#allocation9 + $0x40] ss:$16 sps:$4 sm:$0xff]  }
 0x236   :  { %v5777_v29 = vpack.c.bf16 %v8060_v32, %v8058_v26  ;;  %v2063_v40 = vadd.f32 1.0, %v6079_v12  ;;  %v6081_v57 = vpop.eup %6080  ;;  %v8104_v12 = vld [vmem:[#allocation9 + $0x64] ss:$16 sps:$4 sm:$0xff]  }
 0x237   :  { %6090 = vrcp.f32 %v2061_v38  ;;  %v2064_v46 = vadd.f32 1.0, %v6081_v57  ;;  %v6083_v25 = vpop.eup %6082 }
 0x238   :  { %6092 = vtanh.f32 %v1992_v35  ;;  %5778 = vmatmul.mubr.msk.bf16.vlgmr.msra.gmra.mrb[104].mxu0 %vm5776_vm10, %v5777_v29  ;;  %5781 = vmatmul.mubr.msk.bf16.vlgmr.msra.gmra.mrb[104].mxu1 %vm5776_vm10, %v5777_v29  ;;  %v6085_v41 = vpop.eup %6084  ;;  %v8089_v35 = vld [vmem:[#allocation9 + $0x28] ss:$16 sps:$4 sm:$0xff]   ;;  %v2062_v55 = vadd.f32 1.0, %v6083_v25  ;;  %v8107_v29 = vld [vmem:[#allocation9 + $0x6c] ss:$16 sps:$4 sm:$0xff]  }
 0x239   :  { %6094 = vrcp.f32 %v2063_v40  ;;  %2241 = vmatpush1.bf16.msra.mxu0 %v8072_v34  ;;  %2284 = vmatpush1.bf16.msra.mxu1 %v8075_v3 }
 0x23a   :  { %2242 = vmatprep.subr.bf16.mxu0 %v8078_v58  ;;  %2285 = vmatprep.subr.bf16.mxu1 %v8081_v33  ;;  %6096 = vrcp.f32 %v2064_v46 }
 0x23b   :  { %2272 = vmatprep.mubr.bf16.mxu0 %v10441_v18  ;;  %2315 = vmatprep.mubr.bf16.mxu1 %v10441_v18  ;;  %6098 = vrcp.f32 %v2062_v55  ;;  %v8127_v55 = vld [vmem:[#allocation9 + $0x80] ss:$16 sps:$4 sm:$0xff]  }
 0x23d   :  { %2243 = vmatpush1.bf16.msra.mxu0 %v8086_v48  ;;  %2286 = vmatpush1.bf16.msra.mxu1 %v8089_v35 }
 0x23e   :  { %v6087_v16 = vpop.eup %6086  ;;  %2244 = vmatprep.subr.bf16.mxu0 %v8092_v9  ;;  %2287 = vmatprep.subr.bf16.mxu1 %v8095_v53 }
 0x23f   :  { %v2082_v13 = vmul.f32 %v6087_v16, %v6085_v41  ;;  %v6089_v56 = vpop.eup %6088  ;;  %v8112_v16 = vld [vmem:[#allocation9 + $0x60] ss:$16 sps:$4 sm:$0xff]  }
 0x240   :  { %v2065_v41 = vadd.f32 1.0, %v6089_v56 }
 0x241   :  { %v6091_v15 = vpop.eup %6090  ;;  %2245 = vmatpush1.bf16.msra.mxu0 %v8098_v61  ;;  %2288 = vmatpush1.bf16.msra.mxu1 %v8101_v6 }
 0x242   :  { %v6093_v0 = vpop.eup %6092  ;;  %v2080_v38 = vmul.f32 0.0, %v6091_v15  ;;  %2246 = vmatprep.subr.bf16.mxu0 %v8104_v12  ;;  %2289 = vmatprep.subr.bf16.mxu1 %v8107_v29  ;;  %v8115_v15 = vld [vmem:[#allocation9 + $0x68] ss:$16 sps:$4 sm:$0xff]  }
 0x243   :  { %v6095_v40 = vpop.eup %6094 }
 0x244   :  { %v8110_v57 = vadd.f32 %v2082_v13, %v2080_v38  ;;  %v2083_v46 = vmul.f32 %v6095_v40, %v6093_v0  ;;  %v6097_v25 = vpop.eup %6096  ;;  %v8122_v13 = vld [vmem:[#allocation9 + $0x8c] ss:$16 sps:$4 sm:$0xff]   ;;  %v8130_v0 = vld [vmem:[#allocation9 + $0x88] ss:$16 sps:$4 sm:$0xff]   ;;  %v8134_v38 = vld [vmem:[#allocation9 + $0xa4] ss:$16 sps:$4 sm:$0xff]  }
 0x245   :  { %2247 = vmatpush1.bf16.msra.mxu0 %v8112_v16  ;;  %2290 = vmatpush1.bf16.msra.mxu1 %v8115_v15  ;;  %v2081_v45 = vmul.f32 0.0, %v6097_v25  ;;  %v8137_v40 = vld [vmem:[#allocation9 + $0xac] ss:$16 sps:$4 sm:$0xff]   ;;  %v8146_v25 = vld [vmem:[#allocation9 + $0xc4] ss:$16 sps:$4 sm:$0xff]   ;;  %v6099_v27 = vpop.eup %6098 }
 0x246   :  { %6100 = vtanh.f32 %v8110_v57  ;;  %2248 = vmatprep.subr.bf16.mxu0 %v8119_v43  ;;  %2291 = vmatprep.subr.bf16.mxu1 %v8122_v13  ;;  %10442 = vst [vmem:[#allocation98_spill] sm:$0xff] %v8146_v25 }
 0x247   :  { %v8125_v56 = vadd.f32 %v2083_v46, %v2081_v45  ;;  %6102 = vrcp.f32 %v2065_v41  ;;  %v8140_v45 = vld [vmem:[#allocation9 + $0xa0] ss:$16 sps:$4 sm:$0xff]   ;;  %v8143_v46 = vld [vmem:[#allocation9 + $0xa8] ss:$16 sps:$4 sm:$0xff]   ;;  %v8149_v41 = vld [vmem:[#allocation9 + $0xcc] ss:$16 sps:$4 sm:$0xff]  }
 0x248   :  { %10443 = vst [vmem:[#allocation99_spill] sm:$0xff] %v8149_v41 }
 0x249   :  { %2249 = vmatpush1.bf16.msra.mxu0 %v8127_v55  ;;  %2292 = vmatpush1.bf16.msra.mxu1 %v8130_v0  ;;  %6104 = vtanh.f32 %v8125_v56 }
 0x24a   :  { %2250 = vmatprep.subr.bf16.mxu0 %v8134_v38  ;;  %2293 = vmatprep.subr.bf16.mxu1 %v8137_v40 }
 0x24d   :  { %2251 = vmatpush1.bf16.msra.mxu0 %v8140_v45  ;;  %2294 = vmatpush1.bf16.msra.mxu1 %v8143_v46 }
 0x24e   :  { %2252 = vmatprep.subr.bf16.mxu0 %v8146_v25  ;;  %2295 = vmatprep.subr.bf16.mxu1 %v8149_v41 }
 0x250   :  { %v6101_v42 = vpop.eup %6100 }
 0x251   :  { %v8154_v39 = vmul.f32 %v6101_v42, %v6099_v27  ;;  %2253 = vmatpush1.bf16.msra.mxu0 %v8156_v49  ;;  %2296 = vmatpush1.bf16.msra.mxu1 %v8159_v59  ;;  %v6103_v5 = vpop.eup %6102  ;;  %v8170_v42 = vld [vmem:[#allocation9 + $0xe0] ss:$16 sps:$4 sm:$0xff]  }
 0x252   :  { %2254 = vmatprep.subr.bf16.mxu0 %v8162_v37  ;;  %2297 = vmatprep.subr.bf16.mxu1 %v8165_v62  ;;  %10451 = vst [vmem:[#allocation107_spill] sm:$0xff] %v8170_v42  ;;  %v2138_v62 = vunpack.c.h.bf16 %v7631_v51 }
 0x253   :  { %10445 = vst [vmem:[#allocation101_spill] sm:$0xff] %v8154_v39  ;;  %v6105_v47 = vpop.eup %6104 }
 0x254   :  { %v8168_v27 = vmul.f32 %v6105_v47, %v6103_v5  ;;  %v8192_v47 = vld [vmem:[#allocation8] ss:$16 sps:$4 sm:$0xff]  }
 0x255   :  { %2255 = vmatpush1.bf16.msra.mxu0 %v8170_v42  ;;  %2298 = vmatpush1.bf16.msra.mxu1 %v8173_v44  ;;  %10456 = vst [vmem:[#allocation112_spill] sm:$0xff] %v8192_v47 }
 0x256   :  { %10450 = vst [vmem:[#allocation106_spill] sm:$0xff] %v8168_v27  ;;  %2471 = vmatprep.subr.bf16.mxu0 %v8178_v19  ;;  %2514 = vmatprep.subr.bf16.mxu1 %v8181_v4  ;;  %v5783_v5 = vpack.c.bf16 %v8168_v27, %v8154_v39  ;;  %v2137_v19 = vunpack.c.h.bf16 %v7627_v8  ;;  %v2136_v39 = vunpack.c.h.bf16 %v7624_v2 }
 0x258   :  { %5784 = vmatmul.mubr.msk.bf16.vlgmr.msra.gmra.mrb[108].mxu0 %vm5782_vm13, %v5783_v5  ;;  %5787 = vmatmul.mubr.msk.bf16.vlgmr.msra.gmra.mrb[108].mxu1 %vm5782_vm13, %v5783_v5  ;;  %v8206_v5 = vld [vmem:[#allocation8 + $0x20] ss:$16 sps:$4 sm:$0xff]  }
 0x259   :  { %2472 = vmatpush1.bf16.msra.mxu0 %v8192_v47  ;;  %2515 = vmatpush1.bf16.msra.mxu1 %v8195_v30  ;;  %10460 = vst [vmem:[#allocation116_spill] sm:$0xff] %v8206_v5 }
 0x25a   :  { %2473 = vmatprep.subr.bf16.mxu0 %v8198_v21  ;;  %2516 = vmatprep.subr.bf16.mxu1 %v8201_v7  ;;  %v2134_v21 = vunpack.c.l.bf16 %v7631_v51 }
 0x25b   :  { %2503 = vmatprep.mubr.bf16.mxu0 %v10441_v18  ;;  %2546 = vmatprep.mubr.bf16.mxu1 %v10441_v18 }
 0x25d   :  { %2474 = vmatpush1.bf16.msra.mxu0 %v8206_v5  ;;  %2517 = vmatpush1.bf16.msra.mxu1 %v8209_v63  ;;  %v8227_v63 = vld [vmem:[#allocation8 + $0x6c] ss:$16 sps:$4 sm:$0xff]  }
 0x25e   :  { %2475 = vmatprep.subr.bf16.mxu0 %v8212_v60  ;;  %2518 = vmatprep.subr.bf16.mxu1 %v8215_v24  ;;  %10467 = vst [vmem:[#allocation123_spill] sm:$0xff] %v8227_v63  ;;  %v8230_v60 = vld [vmem:[#allocation8 + $0x60] ss:$16 sps:$4 sm:$0xff]   ;;  %v8233_v24 = vld [vmem:[#allocation8 + $0x68] ss:$16 sps:$4 sm:$0xff]  }
 0x25f   :  { %10468 = vst [vmem:[#allocation124_spill] sm:$0xff] %v8230_v60  ;;  %10469 = vst [vmem:[#allocation125_spill] sm:$0xff] %v8233_v24 }
 0x261   :  { %2476 = vmatpush1.bf16.msra.mxu0 %v8218_v52  ;;  %2519 = vmatpush1.bf16.msra.mxu1 %v8221_v14  ;;  %v8236_v52 = vld [vmem:[#allocation8 + $0x84] ss:$16 sps:$4 sm:$0xff]   ;;  %v8239_v14 = vld [vmem:[#allocation8 + $0x8c] ss:$16 sps:$4 sm:$0xff]  }
 0x262   :  { %2477 = vmatprep.subr.bf16.mxu0 %v8224_v22  ;;  %2520 = vmatprep.subr.bf16.mxu1 %v8227_v63  ;;  %10470 = vst [vmem:[#allocation126_spill] sm:$0xff] %v8236_v52  ;;  %10471 = vst [vmem:[#allocation127_spill] sm:$0xff] %v8239_v14  ;;  %v8242_v22 = vld [vmem:[#allocation8 + $0x80] ss:$16 sps:$4 sm:$0xff]   ;;  %v8245_v63 = vld [vmem:[#allocation8 + $0x88] ss:$16 sps:$4 sm:$0xff]  }
 0x263   :  { %10472 = vst [vmem:[#allocation128_spill] sm:$0xff] %v8242_v22  ;;  %10473 = vst [vmem:[#allocation129_spill] sm:$0xff] %v8245_v63 }
 0x265   :  { %2478 = vmatpush1.bf16.msra.mxu0 %v8230_v60  ;;  %2521 = vmatpush1.bf16.msra.mxu1 %v8233_v24  ;;  %v8248_v60 = vld [vmem:[#allocation8 + $0xa4] ss:$16 sps:$4 sm:$0xff]   ;;  %v8251_v24 = vld [vmem:[#allocation8 + $0xac] ss:$16 sps:$4 sm:$0xff]  }
 0x266   :  { %2479 = vmatprep.subr.bf16.mxu0 %v8236_v52  ;;  %2522 = vmatprep.subr.bf16.mxu1 %v8239_v14  ;;  %10474 = vst [vmem:[#allocation130_spill] sm:$0xff] %v8248_v60  ;;  %10475 = vst [vmem:[#allocation131_spill] sm:$0xff] %v8251_v24  ;;  %v8254_v52 = vld [vmem:[#allocation8 + $0xa0] ss:$16 sps:$4 sm:$0xff]   ;;  %v8257_v14 = vld [vmem:[#allocation8 + $0xa8] ss:$16 sps:$4 sm:$0xff]  }
 0x267   :  { %10476 = vst [vmem:[#allocation132_spill] sm:$0xff] %v8254_v52  ;;  %10477 = vst [vmem:[#allocation133_spill] sm:$0xff] %v8257_v14 }
 0x269   :  { %2480 = vmatpush1.bf16.msra.mxu0 %v8242_v22  ;;  %2523 = vmatpush1.bf16.msra.mxu1 %v8245_v63  ;;  %v8260_v22 = vld [vmem:[#allocation8 + $0xc4] ss:$16 sps:$4 sm:$0xff]   ;;  %v8263_v63 = vld [vmem:[#allocation8 + $0xcc] ss:$16 sps:$4 sm:$0xff]  }
 0x26a   :  { %2481 = vmatprep.subr.bf16.mxu0 %v8248_v60  ;;  %2524 = vmatprep.subr.bf16.mxu1 %v8251_v24  ;;  %10478 = vst [vmem:[#allocation134_spill] sm:$0xff] %v8260_v22  ;;  %10479 = vst [vmem:[#allocation135_spill] sm:$0xff] %v8263_v63  ;;  %v8266_v60 = vld [vmem:[#allocation8 + $0xc0] ss:$16 sps:$4 sm:$0xff]   ;;  %v8269_v24 = vld [vmem:[#allocation8 + $0xc8] ss:$16 sps:$4 sm:$0xff]  }
 0x26b   :  { %10480 = vst [vmem:[#allocation136_spill] sm:$0xff] %v8266_v60  ;;  %10481 = vst [vmem:[#allocation137_spill] sm:$0xff] %v8269_v24  ;;  %v10521_v20 = vld [vmem:[#allocation127_spill] sm:$0xff]  ;;  %v10522_v11 = vld [vmem:[#allocation128_spill] sm:$0xff] }
 0x26c   :  { %v10523_v31 = vld [vmem:[#allocation129_spill] sm:$0xff] }
 0x26d   :  { %2482 = vmatpush1.bf16.msra.mxu0 %v8254_v52  ;;  %2525 = vmatpush1.bf16.msra.mxu1 %v8257_v14  ;;  %v8272_v52 = vld [vmem:[#allocation8 + $0xe4] ss:$16 sps:$4 sm:$0xff]   ;;  %v8275_v14 = vld [vmem:[#allocation8 + $0xec] ss:$16 sps:$4 sm:$0xff]  }
 0x26e   :  { %2483 = vmatprep.subr.bf16.mxu0 %v8260_v22  ;;  %2526 = vmatprep.subr.bf16.mxu1 %v8263_v63  ;;  %10482 = vst [vmem:[#allocation138_spill] sm:$0xff] %v8272_v52  ;;  %10483 = vst [vmem:[#allocation139_spill] sm:$0xff] %v8275_v14  ;;  %v8278_v22 = vld [vmem:[#allocation8 + $0xe0] ss:$16 sps:$4 sm:$0xff]   ;;  %v8281_v63 = vld [vmem:[#allocation8 + $0xe8] ss:$16 sps:$4 sm:$0xff]  }
 0x26f   :  { %10484 = vst [vmem:[#allocation140_spill] sm:$0xff] %v8278_v22  ;;  %10485 = vst [vmem:[#allocation141_spill] sm:$0xff] %v8281_v63  ;;  %v10524_v28 = vld [vmem:[#allocation130_spill] sm:$0xff] }
 0x271   :  { %2484 = vmatpush1.bf16.msra.mxu0 %v8266_v60  ;;  %2527 = vmatpush1.bf16.msra.mxu1 %v8269_v24  ;;  %v8284_v60 = vld [vmem:[#allocation9 + $0x4] ss:$16 sps:$4 sm:$0xff]   ;;  %v8287_v24 = vld [vmem:[#allocation9 + $0xc] ss:$16 sps:$4 sm:$0xff]  }
 0x272   :  { %2485 = vmatprep.subr.bf16.mxu0 %v8272_v52  ;;  %2528 = vmatprep.subr.bf16.mxu1 %v8275_v14  ;;  %10486 = vst [vmem:[#allocation142_spill] sm:$0xff] %v8284_v60  ;;  %10487 = vst [vmem:[#allocation143_spill] sm:$0xff] %v8287_v24  ;;  %v2131_v52 = vunpack.c.l.bf16 %v7620_v50  ;;  %v2133_v14 = vunpack.c.l.bf16 %v7627_v8 }
 0x275   :  { %2486 = vmatpush1.bf16.msra.mxu0 %v8278_v22  ;;  %2529 = vmatpush1.bf16.msra.mxu1 %v8281_v63  ;;  %v2132_v22 = vunpack.c.l.bf16 %v7624_v2 }
 0x276   :  { %2572 = vmatprep.subr.bf16.mxu0 %v8284_v60  ;;  %2615 = vmatprep.subr.bf16.mxu1 %v8287_v24  ;;  %v2135_v60 = vunpack.c.h.bf16 %v7620_v50 }
 0x30b   :  { %v2173_v5 = vpop.f32.mrb[104].mxu0  ;;  %v2216_v7 = vpop.f32.mrb[104].mxu1 }
 0x30c   :  { %v2174_v30 = vadd.f32 %v2173_v5, %v2131_v52  ;;  %v2217_v63 = vadd.f32 %v2216_v7, %v2133_v14  ;;  %v2175_v47 = vpop.f32.mrb[105].mxu0  ;;  %v2218_v4 = vpop.f32.mrb[105].mxu1 }
 0x30d   :  { %v2176_v27 = vadd.f32 %v2175_v47, %v2132_v22  ;;  %v2219_v24 = vadd.f32 %v2218_v4, %v2134_v21  ;;  %v2177_v44 = vpop.f32.mrb[106].mxu0  ;;  %v2220_v42 = vpop.f32.mrb[106].mxu1 }
 0x30e   :  { %v5788_v37 = vmul.f32 -1.442695, %v2174_v30  ;;  %v2178_v59 = vadd.f32 %v2177_v44, %v2135_v60  ;;  %v2221_v49 = vadd.f32 %v2220_v42, %v2137_v19  ;;  %v2179_v41 = vpop.f32.mrb[107].mxu0  ;;  %v2222_v52 = vpop.f32.mrb[107].mxu1  ;;  %v5790_v8 = vmul.f32 -1.442695, %v2217_v63 }
 0x30f   :  { %v5789_v14 = vmul.f32 -1.442695, %v2176_v27  ;;  %v2180_v7 = vadd.f32 %v2179_v41, %v2136_v39  ;;  %v2223_v5 = vadd.f32 %v2222_v52, %v2138_v62  ;;  %v8300_v21 = vpop.permute.xlu1 %2432  ;;  %v2106_v27 = vsel %vm10259_vm8, %v8047_v23, 0.0 }
 0x310   :  { %6106 = vpow2.f32 %v5788_v37  ;;  %v5791_v50 = vmul.f32 -1.442695, %v2178_v59  ;;  %v5793_v22 = vmul.f32 -1.442695, %v2221_v49  ;;  %10489 = vst [vmem:[#allocation145_spill] sm:$0xff] %v8300_v21  ;;  %vm10272_vm15 = vcmp.eq.s32.totalorder %v8300_v21, 1 }
 0x311   :  { %v5792_v25 = vmul.f32 -1.442695, %v2180_v7  ;;  %6108 = vpow2.f32 %v5789_v14  ;;  %v2232_v14 = vunpack.c.l.bf16 %v8009_v1  ;;  %v2234_v7 = vunpack.c.l.bf16 %v8014_v17  ;;  %v10525_v21 = vld [vmem:[#allocation131_spill] sm:$0xff] }
 0x312   :  { %6110 = vpow2.f32 %v5791_v50  ;;  %v2237_v23 = vunpack.c.h.bf16 %v8012_v10 }
 0x313   :  { %6112 = vpow2.f32 %v5792_v25 }
 0x314   :  { %6114 = vtanh.f32 %v2219_v24  ;;  %v8298_v24 = vpop.permute.xlu0 %2429 }
 0x315   :  { %6116 = vpow2.f32 %v5790_v8  ;;  %10488 = vst [vmem:[#allocation144_spill] sm:$0xff] %v8298_v24  ;;  %vm10273_vm14 = vcmp.eq.s32.totalorder %v8298_v24, 1  ;;  %v2233_v8 = vunpack.c.l.bf16 %v8012_v10  ;;  %v10526_v24 = vld [vmem:[#allocation132_spill] sm:$0xff] }
 0x316   :  { %6118 = vpow2.f32 %v5793_v22  ;;  %v2238_v22 = vunpack.c.h.bf16 %v8014_v17 }
 0x31a   :  { %v6107_v4 = vpop.eup %6106 }
 0x31b   :  { %v2344_v2 = vadd.f32 1.0, %v6107_v4  ;;  %v6109_v51 = vpop.eup %6108 }
 0x31c   :  { %v6111_v30 = vpop.eup %6110  ;;  %v2345_v19 = vadd.f32 1.0, %v6109_v51 }
 0x31d   :  { %6120 = vrcp.f32 %v2344_v2  ;;  %v2347_v44 = vadd.f32 1.0, %v6111_v30  ;;  %v6113_v39 = vpop.eup %6112  ;;  %v2107_v2 = vsel %vm10250_vm9, %v8053_v36, 0.0 }
 0x31e   :  { %6122 = vtanh.f32 %v2223_v5  ;;  %v2348_v37 = vadd.f32 1.0, %v6113_v39  ;;  %v6115_v59 = vpop.eup %6114  ;;  %v2236_v5 = vunpack.c.h.bf16 %v8009_v1  ;;  %v2235_v39 = vunpack.c.l.bf16 %v8016_v54 }
 0x31f   :  { %6124 = vrcp.f32 %v2345_v19  ;;  %v6117_v62 = vpop.eup %6116 }
 0x320   :  { %6126 = vrcp.f32 %v2347_v44  ;;  %v6119_v60 = vpop.eup %6118  ;;  %v2346_v42 = vadd.f32 1.0, %v6117_v62 }
 0x321   :  { %6128 = vrcp.f32 %v2348_v37  ;;  %v2349_v30 = vadd.f32 1.0, %v6119_v60 }
 0x322   :  { %6130 = vrcp.f32 %v2346_v42  ;;  %v2239_v42 = vunpack.c.h.bf16 %v8016_v54 }
 0x327   :  { %v6121_v49 = vpop.eup %6120 }
 0x328   :  { %v6123_v63 = vpop.eup %6122  ;;  %v2366_v25 = vmul.f32 %v6121_v49, %v6115_v59 }
 0x329   :  { %v6125_v41 = vpop.eup %6124 }
 0x32a   :  { %v6127_v47 = vpop.eup %6126  ;;  %v2364_v52 = vmul.f32 %v6125_v41, %v2106_v27 }
 0x32b   :  { %v2367_v50 = vmul.f32 %v6127_v47, %v6123_v63  ;;  %v6129_v4 = vpop.eup %6128  ;;  %v2274_v19 = vpop.f32.mrb[108].mxu0 }
 0x32c   :  { %v2368_v51 = vadd.f32 %v2366_v25, %v2364_v52  ;;  %v2317_v44 = vpop.f32.mrb[108].mxu1  ;;  %v2365_v1 = vmul.f32 %v6129_v4, %v2107_v2  ;;  %v2275_v37 = vadd.f32 %v2274_v19, %v2232_v14  ;;  %v2276_v62 = vpop.f32.mrb[109].mxu0 }
 0x32d   :  { %v2318_v59 = vadd.f32 %v2317_v44, %v2234_v7  ;;  %v2319_v49 = vpop.f32.mrb[109].mxu1  ;;  %v2277_v17 = vadd.f32 %v2276_v62, %v2233_v8  ;;  %v2278_v63 = vpop.f32.mrb[110].mxu0 }
 0x32e   :  { %6132 = vtanh.f32 %v2368_v51  ;;  %v2320_v10 = vadd.f32 %v2319_v49, %v2235_v39  ;;  %v2321_v41 = vpop.f32.mrb[110].mxu1  ;;  %v8319_v36 = vsel %vm10273_vm14, %v2368_v51, %v2106_v27  ;;  %v2369_v60 = vadd.f32 %v2367_v50, %v2365_v1  ;;  %v2280_v52 = vpop.f32.mrb[111].mxu0 }
 0x32f   :  { %v5794_v25 = vmul.f32 -1.442695, %v2275_v37  ;;  %v2279_v47 = vadd.f32 %v2278_v63, %v2236_v5  ;;  %v2323_v4 = vpop.f32.mrb[111].mxu1  ;;  %6134 = vrcp.f32 %v2349_v30  ;;  %v5795_v14 = vmul.f32 -1.442695, %v2277_v17  ;;  %v6131_v5 = vpop.eup %6130 }
 0x330   :  { %v2322_v7 = vadd.f32 %v2321_v41, %v2238_v22  ;;  %v2281_v19 = vadd.f32 %v2280_v52, %v2237_v23  ;;  %6136 = vtanh.f32 %v2369_v60  ;;  %v2324_v44 = vadd.f32 %v2323_v4, %v2239_v42 }
 0x331   :  { %v5797_v8 = vmul.f32 -1.442695, %v2279_v47  ;;  %v8324_v39 = vsel %vm10272_vm15, %v2369_v60, %v2107_v2  ;;  %6138 = vpow2.f32 %v5794_v25  ;;  %v5796_v54 = vmul.f32 -1.442695, %v2318_v59 }
 0x332   :  { %v5798_v27 = vmul.f32 -1.442695, %v2281_v19  ;;  %6140 = vpow2.f32 %v5795_v14  ;;  %v5799_v1 = vmul.f32 -1.442695, %v2322_v7  ;;  %v2104_v22 = vsel %vm10259_vm8, %v8058_v26, 0.0 }
 0x333   :  { %6142 = vpow2.f32 %v5797_v8  ;;  %v2105_v49 = vsel %vm10250_vm9, %v8060_v32, 0.0  ;;  %v2120_v8 = vsel %vm10261_vm11, %v8110_v57, 0.0 }
 0x334   :  { %6144 = vpow2.f32 %v5798_v27 }
 0x335   :  { %6146 = vtanh.f32 %v2320_v10 }
 0x336   :  { %6148 = vpow2.f32 %v5796_v54 }
 0x337   :  { %6150 = vpow2.f32 %v5799_v1 }
 0x338   :  { %v6133_v50 = vpop.eup %6132 }
 0x339   :  { %v2372_v51 = vmul.f32 %v6133_v50, %v6131_v5  ;;  %v6135_v30 = vpop.eup %6134 }
 0x33a   :  { %v6137_v23 = vpop.eup %6136 }
 0x33b   :  { %v8331_v2 = vsel %vm10273_vm14, %v2372_v51, %v2104_v22  ;;  %v6139_v37 = vpop.eup %6138  ;;  %v2373_v62 = vmul.f32 %v6137_v23, %v6135_v30  ;;  %v8359_v51 = vpop.permute.xlu0 %2443  ;;  %v2121_v30 = vsel %vm10260_vm12, %v8125_v56, 0.0 }
 0x33c   :  { %v2392_v59 = vadd.f32 1.0, %v6139_v37  ;;  %v6141_v17 = vpop.eup %6140  ;;  %10490 = vst [vmem:[#allocation146_spill] sm:$0xff] %v8359_v51  ;;  %vm10275_vm0 = vcmp.eq.s32.totalorder %v8359_v51, 1  ;;  %v8373_v56 = vpop.permute.xlu1 %2446  ;;  %v10528_v51 = vld [vmem:[#allocation134_spill] sm:$0xff] }
 0x33d   :  { %v8338_v63 = vsel %vm10272_vm15, %v2373_v62, %v2105_v49  ;;  %v6143_v26 = vpop.eup %6142  ;;  %v2393_v41 = vadd.f32 1.0, %v6141_v17  ;;  %10491 = vst [vmem:[#allocation147_spill] sm:$0xff] %v8373_v56  ;;  %vm10274_vm1 = vcmp.eq.s32.totalorder %v8373_v56, 1  ;;  %v10492_v49 = vld [vmem:[#allocation98_spill] sm:$0xff]  ;;  %v10527_v56 = vld [vmem:[#allocation133_spill] sm:$0xff] }
 0x33e   :  { %6152 = vrcp.f32 %v2392_v59  ;;  %v2454_v60 = vpack.c.bf16 %v8338_v63, %v8331_v2  ;;  %v2395_v10 = vadd.f32 1.0, %v6143_v26  ;;  %v6145_v25 = vpop.eup %6144  ;;  %v10493_v59 = vld [vmem:[#allocation99_spill] sm:$0xff] }
 0x33f   :  { %6154 = vtanh.f32 %v2324_v44  ;;  %v2396_v32 = vadd.f32 1.0, %v6145_v25  ;;  %v6147_v47 = vpop.eup %6146  ;;  %v10497_v25 = vld [vmem:[#allocation105_spill] sm:$0xff] }
 0x340   :  { %6156 = vrcp.f32 %v2393_v41  ;;  %2504 = vmatmul.mubr.bf16.vlgmr.msra.gmra.mrb[112].mxu0 %v2454_v60  ;;  %2547 = vmatmul.mubr.bf16.vlgmr.msra.gmra.mrb[112].mxu1 %v2454_v60  ;;  %v6149_v52 = vpop.eup %6148  ;;  %v10494_v41 = vld [vmem:[#allocation102_spill] sm:$0xff]  ;;  %v10495_v60 = vld [vmem:[#allocation103_spill] sm:$0xff] }
 0x341   :  { %6158 = vrcp.f32 %v2395_v10  ;;  %2573 = vmatpush1.bf16.msra.mxu0 %v8072_v34  ;;  %2616 = vmatpush1.bf16.msra.mxu1 %v8075_v3  ;;  %v6151_v42 = vpop.eup %6150  ;;  %v2394_v44 = vadd.f32 1.0, %v6149_v52  ;;  %v10496_v10 = vld [vmem:[#allocation104_spill] sm:$0xff]  ;;  %v10498_v52 = vld [vmem:[#allocation101_spill] sm:$0xff] }
 0x342   :  { %2574 = vmatprep.subr.bf16.mxu0 %v8078_v58  ;;  %2617 = vmatprep.subr.bf16.mxu1 %v8081_v33  ;;  %6160 = vrcp.f32 %v2396_v32  ;;  %v2397_v22 = vadd.f32 1.0, %v6151_v42  ;;  %v2118_v42 = vsel %vm10261_vm11, %v10498_v52, 0.0  ;;  %v10514_v52 = vld [vmem:[#allocation120_spill] sm:$0xff] }
 0x343   :  { %2604 = vmatprep.mubr.bf16.mxu0 %v10441_v18  ;;  %2647 = vmatprep.mubr.bf16.mxu1 %v10441_v18  ;;  %6162 = vrcp.f32 %v2394_v44  ;;  %v10502_v44 = vld [vmem:[#allocation106_spill] sm:$0xff] }
 0x345   :  { %2575 = vmatpush1.bf16.msra.mxu0 %v8086_v48  ;;  %2618 = vmatpush1.bf16.msra.mxu1 %v8089_v35 }
 0x346   :  { %2576 = vmatprep.subr.bf16.mxu0 %v8092_v9  ;;  %2619 = vmatprep.subr.bf16.mxu1 %v8095_v53 }
 0x348   :  { %v6153_v4 = vpop.eup %6152 }
 0x349   :  { %v6155_v14 = vpop.eup %6154  ;;  %v2414_v7 = vmul.f32 %v6153_v4, %v6147_v47  ;;  %2577 = vmatpush1.bf16.msra.mxu0 %v8098_v61  ;;  %2620 = vmatpush1.bf16.msra.mxu1 %v8101_v6 }
 0x34a   :  { %v6157_v19 = vpop.eup %6156  ;;  %2578 = vmatprep.subr.bf16.mxu0 %v8104_v12  ;;  %2621 = vmatprep.subr.bf16.mxu1 %v8107_v29 }
 0x34b   :  { %v6159_v27 = vpop.eup %6158  ;;  %v2412_v5 = vmul.f32 %v6157_v19, %v2120_v8  ;;  %v10501_v19 = vld [vmem:[#allocation108_spill] sm:$0xff] }
 0x34c   :  { %v2415_v50 = vmul.f32 %v6159_v27, %v6155_v14  ;;  %v6161_v54 = vpop.eup %6160  ;;  %v2119_v27 = vsel %vm10260_vm12, %v10502_v44, 0.0  ;;  %v10518_v44 = vld [vmem:[#allocation124_spill] sm:$0xff] }
 0x34d   :  { %v2416_v1 = vadd.f32 %v2414_v7, %v2412_v5  ;;  %2579 = vmatpush1.bf16.msra.mxu0 %v8112_v16  ;;  %2622 = vmatpush1.bf16.msra.mxu1 %v8115_v15  ;;  %v2413_v57 = vmul.f32 %v6161_v54, %v2121_v30  ;;  %v6163_v17 = vpop.eup %6162  ;;  %v10500_v7 = vld [vmem:[#allocation107_spill] sm:$0xff]  ;;  %v10503_v5 = vld [vmem:[#allocation110_spill] sm:$0xff] }
 0x34e   :  { %2580 = vmatprep.subr.bf16.mxu0 %v8119_v43  ;;  %2623 = vmatprep.subr.bf16.mxu1 %v8122_v13 }
 0x34f   :  { %6164 = vtanh.f32 %v2416_v1  ;;  %v8371_v23 = vsel %vm10275_vm0, %v2416_v1, %v2120_v8  ;;  %v2417_v37 = vadd.f32 %v2415_v50, %v2413_v57  ;;  %v10504_v50 = vld [vmem:[#allocation111_spill] sm:$0xff]  ;;  %v10506_v1 = vld [vmem:[#allocation112_spill] sm:$0xff]  ;;  %v10508_v57 = vld [vmem:[#allocation114_spill] sm:$0xff] }
 0x350   :  { %6166 = vrcp.f32 %v2397_v22  ;;  %v10507_v22 = vld [vmem:[#allocation113_spill] sm:$0xff] }
 0x351   :  { %2581 = vmatpush1.bf16.msra.mxu0 %v8127_v55  ;;  %2624 = vmatpush1.bf16.msra.mxu1 %v8130_v0  ;;  %6168 = vtanh.f32 %v2417_v37  ;;  %v8382_v62 = vsel %vm10274_vm1, %v2417_v37, %v2121_v30  ;;  %v10509_v37 = vld [vmem:[#allocation115_spill] sm:$0xff] }
 0x352   :  { %2582 = vmatprep.subr.bf16.mxu0 %v8134_v38  ;;  %2625 = vmatprep.subr.bf16.mxu1 %v8137_v40 }
 0x355   :  { %2583 = vmatpush1.bf16.msra.mxu0 %v8140_v45  ;;  %2626 = vmatpush1.bf16.msra.mxu1 %v8143_v46 }
 0x356   :  { %2584 = vmatprep.subr.bf16.mxu0 %v10492_v49  ;;  %2627 = vmatprep.subr.bf16.mxu1 %v10493_v59 }
 0x359   :  { %v6165_v26 = vpop.eup %6164  ;;  %2585 = vmatpush1.bf16.msra.mxu0 %v10494_v41  ;;  %2628 = vmatpush1.bf16.msra.mxu1 %v10495_v60 }
 0x35a   :  { %2586 = vmatprep.subr.bf16.mxu0 %v10496_v10  ;;  %2629 = vmatprep.subr.bf16.mxu1 %v10497_v25  ;;  %v2420_v32 = vmul.f32 %v6165_v26, %v6163_v17  ;;  %v6167_v47 = vpop.eup %6166  ;;  %v10510_v17 = vld [vmem:[#allocation116_spill] sm:$0xff]  ;;  %v10511_v26 = vld [vmem:[#allocation117_spill] sm:$0xff] }
 0x35b   :  { %v6169_v4 = vpop.eup %6168 }
 0x35c   :  { %v8397_v14 = vsel %vm10275_vm0, %v2420_v32, %v2118_v42  ;;  %v2421_v8 = vmul.f32 %v6169_v4, %v6167_v47  ;;  %v10512_v32 = vld [vmem:[#allocation118_spill] sm:$0xff]  ;;  %v10513_v47 = vld [vmem:[#allocation119_spill] sm:$0xff]  ;;  %v10515_v42 = vld [vmem:[#allocation121_spill] sm:$0xff] }
 0x35d   :  { %10499 = vst [vmem:[#allocation98_spill] sm:$0xff] %v8397_v14  ;;  %2587 = vmatpush1.bf16.msra.mxu0 %v10500_v7  ;;  %2630 = vmatpush1.bf16.msra.mxu1 %v10501_v19  ;;  %v10516_v4 = vld [vmem:[#allocation122_spill] sm:$0xff] }
 0x35e   :  { %2803 = vmatprep.subr.bf16.mxu0 %v10503_v5  ;;  %2846 = vmatprep.subr.bf16.mxu1 %v10504_v50  ;;  %v8408_v54 = vsel %vm10274_vm1, %v2421_v8, %v2119_v27  ;;  %v10517_v8 = vld [vmem:[#allocation123_spill] sm:$0xff]  ;;  %v10519_v27 = vld [vmem:[#allocation125_spill] sm:$0xff] }
 0x35f   :  { %10505 = vst [vmem:[#allocation99_spill] sm:$0xff] %v8408_v54  ;;  %v2455_v30 = vpack.c.bf16 %v8408_v54, %v8397_v14 }
 0x361   :  { %2605 = vmatmul.mubr.bf16.vlgmr.msra.gmra.mrb[116].mxu0 %v2455_v30  ;;  %2648 = vmatmul.mubr.bf16.vlgmr.msra.gmra.mrb[116].mxu1 %v2455_v30  ;;  %v10520_v30 = vld [vmem:[#allocation126_spill] sm:$0xff] }
 0x362   :  { %2804 = vmatpush1.bf16.msra.mxu0 %v10506_v1  ;;  %2847 = vmatpush1.bf16.msra.mxu1 %v10507_v22 }
 0x363   :  { %2805 = vmatprep.subr.bf16.mxu0 %v10508_v57  ;;  %2848 = vmatprep.subr.bf16.mxu1 %v10509_v37 }
 0x364   :  { %2835 = vmatprep.mubr.bf16.mxu0 %v10441_v18  ;;  %2878 = vmatprep.mubr.bf16.mxu1 %v10441_v18 }
 0x366   :  { %2806 = vmatpush1.bf16.msra.mxu0 %v10510_v17  ;;  %2849 = vmatpush1.bf16.msra.mxu1 %v10511_v26 }
 0x367   :  { %2807 = vmatprep.subr.bf16.mxu0 %v10512_v32  ;;  %2850 = vmatprep.subr.bf16.mxu1 %v10513_v47 }
 0x36a   :  { %2808 = vmatpush1.bf16.msra.mxu0 %v10514_v52  ;;  %2851 = vmatpush1.bf16.msra.mxu1 %v10515_v42  ;;  %v10540_v42 = vld [vmem:[#allocation17_spill] sm:$0xff]  ;;  %v10541_v52 = vld [vmem:[#allocation19_spill] sm:$0xff] }
 0x36b   :  { %2809 = vmatprep.subr.bf16.mxu0 %v10516_v4  ;;  %2852 = vmatprep.subr.bf16.mxu1 %v10517_v8  ;;  %v10539_v8 = vld [vmem:[#allocation18_spill] sm:$0xff]  ;;  %v2468_v57 = vunpack.c.h.bf16 %v10540_v42  ;;  %v2470_v22 = vunpack.c.h.bf16 %v10541_v52 }
 0x36e   :  { %2810 = vmatpush1.bf16.msra.mxu0 %v10518_v44  ;;  %2853 = vmatpush1.bf16.msra.mxu1 %v10519_v27  ;;  %v10529_v44 = vld [vmem:[#allocation135_spill] sm:$0xff]  ;;  %v10530_v27 = vld [vmem:[#allocation136_spill] sm:$0xff] }
 0x36f   :  { %2811 = vmatprep.subr.bf16.mxu0 %v10520_v30  ;;  %2854 = vmatprep.subr.bf16.mxu1 %v10521_v20  ;;  %v10531_v30 = vld [vmem:[#allocation137_spill] sm:$0xff]  ;;  %v10532_v20 = vld [vmem:[#allocation138_spill] sm:$0xff] }
 0x372   :  { %2812 = vmatpush1.bf16.msra.mxu0 %v10522_v11  ;;  %2855 = vmatpush1.bf16.msra.mxu1 %v10523_v31  ;;  %v10533_v11 = vld [vmem:[#allocation139_spill] sm:$0xff]  ;;  %v10534_v31 = vld [vmem:[#allocation140_spill] sm:$0xff] }
 0x373   :  { %2813 = vmatprep.subr.bf16.mxu0 %v10524_v28  ;;  %2856 = vmatprep.subr.bf16.mxu1 %v10525_v21  ;;  %v10535_v28 = vld [vmem:[#allocation141_spill] sm:$0xff]  ;;  %v10536_v21 = vld [vmem:[#allocation142_spill] sm:$0xff] }
 0x376   :  { %2814 = vmatpush1.bf16.msra.mxu0 %v10526_v24  ;;  %2857 = vmatpush1.bf16.msra.mxu1 %v10527_v56  ;;  %v10537_v24 = vld [vmem:[#allocation143_spill] sm:$0xff]  ;;  %v10538_v56 = vld [vmem:[#allocation16_spill] sm:$0xff] }
 0x377   :  { %2815 = vmatprep.subr.bf16.mxu0 %v10528_v51  ;;  %2858 = vmatprep.subr.bf16.mxu1 %v10529_v44  ;;  %v2463_v51 = vunpack.c.l.bf16 %v10538_v56  ;;  %v2465_v44 = vunpack.c.l.bf16 %v10539_v8 }
 0x37a   :  { %2816 = vmatpush1.bf16.msra.mxu0 %v10530_v27  ;;  %2859 = vmatpush1.bf16.msra.mxu1 %v10531_v30  ;;  %v2464_v30 = vunpack.c.l.bf16 %v10540_v42 }
 0x37b   :  { %2817 = vmatprep.subr.bf16.mxu0 %v10532_v20  ;;  %2860 = vmatprep.subr.bf16.mxu1 %v10533_v11  ;;  %v2466_v20 = vunpack.c.l.bf16 %v10541_v52 }
 0x37e   :  { %2818 = vmatpush1.bf16.msra.mxu0 %v10534_v31  ;;  %2861 = vmatpush1.bf16.msra.mxu1 %v10535_v28  ;;  %v2467_v28 = vunpack.c.h.bf16 %v10538_v56 }
 0x37f   :  { %2904 = vmatprep.subr.bf16.mxu0 %v10536_v21  ;;  %2947 = vmatprep.subr.bf16.mxu1 %v10537_v24  ;;  %v2469_v21 = vunpack.c.h.bf16 %v10539_v8 }
 0x413   :  { %v2505_v4 = vpop.f32.mrb[112].mxu0  ;;  %v2548_v27 = vpop.f32.mrb[112].mxu1 }
 0x414   :  { %v2506_v47 = vadd.f32 %v2505_v4, %v2463_v51  ;;  %v2549_v11 = vadd.f32 %v2548_v27, %v2465_v44  ;;  %v2507_v32 = vpop.f32.mrb[113].mxu0  ;;  %v2550_v31 = vpop.f32.mrb[113].mxu1 }
 0x415   :  { %v2508_v26 = vadd.f32 %v2507_v32, %v2464_v30  ;;  %v2551_v24 = vadd.f32 %v2550_v31, %v2466_v20  ;;  %v2509_v17 = vpop.f32.mrb[114].mxu0  ;;  %v2552_v37 = vpop.f32.mrb[114].mxu1 }
 0x416   :  { %v5800_v1 = vmul.f32 -1.442695, %v2506_v47  ;;  %v2510_v54 = vadd.f32 %v2509_v17, %v2467_v28  ;;  %v2553_v14 = vadd.f32 %v2552_v37, %v2469_v21  ;;  %v2511_v50 = vpop.f32.mrb[115].mxu0  ;;  %v2554_v51 = vpop.f32.mrb[115].mxu1  ;;  %v5802_v31 = vmul.f32 -1.442695, %v2549_v11 }
 0x417   :  { %v5801_v4 = vmul.f32 -1.442695, %v2508_v26  ;;  %v2512_v44 = vadd.f32 %v2511_v50, %v2468_v57  ;;  %v2555_v27 = vadd.f32 %v2554_v51, %v2470_v22  ;;  %v8454_v17 = vpop.permute.xlu0 %2761  ;;  %v8456_v26 = vpop.permute.xlu1 %2764 }
 0x418   :  { %6170 = vpow2.f32 %v5800_v1  ;;  %v5803_v56 = vmul.f32 -1.442695, %v2510_v54  ;;  %v5805_v20 = vmul.f32 -1.442695, %v2553_v14  ;;  %10542 = vst [vmem:[#allocation102_spill] sm:$0xff] %v8454_v17  ;;  %10543 = vst [vmem:[#allocation103_spill] sm:$0xff] %v8456_v26 }
 0x419   :  { %v5804_v5 = vmul.f32 -1.442695, %v2512_v44  ;;  %6172 = vpow2.f32 %v5801_v4  ;;  %vm2766_vm2 = vcmp.eq.s32.totalorder %v8454_v17, 1  ;;  %vm2767_vm3 = vcmp.eq.s32.totalorder %v8456_v26, 1  ;;  %v10544_v4 = vld [vmem:[#allocation92_spill] sm:$0xff] }
 0x41a   :  { %6174 = vpow2.f32 %v5803_v56  ;;  %v2564_v44 = vunpack.c.l.bf16 %v10544_v4  ;;  %v8811_v26 = vld [vmem:[#allocation8 + $0x8c] ss:$16 sps:$4 sm:$0xff]   ;;  %v8814_v17 = vld [vmem:[#allocation8 + $0x80] ss:$16 sps:$4 sm:$0xff]  }
 0x41b   :  { %6176 = vpow2.f32 %v5804_v5 }
 0x41c   :  { %6178 = vtanh.f32 %v2551_v24 }
 0x41d   :  { %6180 = vpow2.f32 %v5802_v31  ;;  %v2568_v31 = vunpack.c.h.bf16 %v10544_v4 }
 0x41e   :  { %6182 = vpow2.f32 %v5805_v20 }
 0x422   :  { %v6171_v32 = vpop.eup %6170 }
 0x423   :  { %v2676_v42 = vadd.f32 1.0, %v6171_v32  ;;  %v6173_v47 = vpop.eup %6172 }
 0x424   :  { %v6175_v28 = vpop.eup %6174  ;;  %v2677_v21 = vadd.f32 1.0, %v6173_v47  ;;  %v10546_v47 = vld [vmem:[#allocation93_spill] sm:$0xff] }
 0x425   :  { %6184 = vrcp.f32 %v2676_v42  ;;  %v2679_v37 = vadd.f32 1.0, %v6175_v28  ;;  %v6177_v50 = vpop.eup %6176  ;;  %v2565_v28 = vunpack.c.l.bf16 %v10546_v47 }
 0x426   :  { %6186 = vtanh.f32 %v2555_v27  ;;  %v2680_v54 = vadd.f32 1.0, %v6177_v50  ;;  %v6179_v1 = vpop.eup %6178  ;;  %v10545_v27 = vld [vmem:[#allocation94_spill] sm:$0xff] }
 0x427   :  { %6188 = vrcp.f32 %v2677_v21  ;;  %v6181_v5 = vpop.eup %6180  ;;  %v2566_v56 = vunpack.c.l.bf16 %v10545_v27  ;;  %v2570_v21 = vunpack.c.h.bf16 %v10545_v27 }
 0x428   :  { %6190 = vrcp.f32 %v2679_v37  ;;  %v6183_v11 = vpop.eup %6182  ;;  %v2678_v52 = vadd.f32 1.0, %v6181_v5 }
 0x429   :  { %6192 = vrcp.f32 %v2680_v54  ;;  %v2681_v42 = vadd.f32 1.0, %v6183_v11 }
 0x42a   :  { %6194 = vrcp.f32 %v2678_v52 }
 0x42f   :  { %v6185_v14 = vpop.eup %6184 }
 0x430   :  { %v6187_v22 = vpop.eup %6186  ;;  %v2698_v24 = vmul.f32 %v6185_v14, %v6179_v1  ;;  %v10547_v1 = vld [vmem:[#allocation95_spill] sm:$0xff]  ;;  %v2569_v14 = vunpack.c.h.bf16 %v10546_v47 }
 0x431   :  { %v6189_v57 = vpop.eup %6188  ;;  %v2567_v5 = vunpack.c.l.bf16 %v10547_v1  ;;  %v2571_v19 = vunpack.c.h.bf16 %v10547_v1 }
 0x432   :  { %v6191_v8 = vpop.eup %6190  ;;  %v2696_v30 = vmul.f32 %v6189_v57, %v8319_v36 }
 0x433   :  { %v2699_v51 = vmul.f32 %v6191_v8, %v6187_v22  ;;  %v6193_v20 = vpop.eup %6192 }
 0x434   :  { %v2700_v32 = vadd.f32 %v2698_v24, %v2696_v30  ;;  %v2697_v37 = vmul.f32 %v6193_v20, %v8324_v39  ;;  %v2606_v50 = vpop.f32.mrb[116].mxu0  ;;  %v2649_v54 = vpop.f32.mrb[116].mxu1 }
 0x435   :  { %v2607_v22 = vadd.f32 %v2606_v50, %v2564_v44  ;;  %v2650_v57 = vadd.f32 %v2649_v54, %v2566_v56  ;;  %v2608_v8 = vpop.f32.mrb[117].mxu0  ;;  %v2651_v4 = vpop.f32.mrb[117].mxu1 }
 0x436   :  { %6196 = vtanh.f32 %v2700_v32  ;;  %v8472_v11 = vsel %vm2766_vm2, %v2700_v32, %v8319_v36  ;;  %v2701_v24 = vadd.f32 %v2699_v51, %v2697_v37  ;;  %v2609_v52 = vadd.f32 %v2608_v8, %v2565_v28  ;;  %v2610_v27 = vpop.f32.mrb[118].mxu0  ;;  %v2653_v20 = vpop.f32.mrb[118].mxu1 }
 0x437   :  { %v2652_v30 = vadd.f32 %v2651_v4, %v2567_v5  ;;  %6198 = vrcp.f32 %v2681_v42  ;;  %v5806_v7 = vmul.f32 -1.442695, %v2607_v22  ;;  %v2611_v47 = vadd.f32 %v2610_v27, %v2568_v31  ;;  %v2612_v44 = vpop.f32.mrb[119].mxu0  ;;  %v2655_v56 = vpop.f32.mrb[119].mxu1 }
 0x438   :  { %v2654_v25 = vadd.f32 %v2653_v20, %v2570_v21  ;;  %6200 = vtanh.f32 %v2701_v24  ;;  %v5807_v50 = vmul.f32 -1.442695, %v2609_v52  ;;  %v2613_v54 = vadd.f32 %v2612_v44, %v2569_v14  ;;  %v6195_v42 = vpop.eup %6194  ;;  %v8507_v27 = vpop.permute.xlu0 %2775  ;;  %v10556_v44 = vld [vmem:[#allocation98_spill] sm:$0xff] }
 0x439   :  { %v2656_v10 = vadd.f32 %v2655_v56, %v2571_v19  ;;  %6202 = vpow2.f32 %v5806_v7  ;;  %v5809_v36 = vmul.f32 -1.442695, %v2611_v47  ;;  %v8478_v51 = vsel %vm2767_vm3, %v2701_v24, %v8324_v39  ;;  %10548 = vst [vmem:[#allocation101_spill] sm:$0xff] %v8507_v27  ;;  %v10554_v47 = vld [vmem:[#allocation110_spill] sm:$0xff] }
 0x43a   :  { %6204 = vpow2.f32 %v5807_v50  ;;  %v5810_v32 = vmul.f32 -1.442695, %v2613_v54  ;;  %v5808_v31 = vmul.f32 -1.442695, %v2650_v57  ;;  %v5811_v14 = vmul.f32 -1.442695, %v2654_v25 }
 0x43b   :  { %6206 = vpow2.f32 %v5809_v36  ;;  %vm2780_vm4 = vcmp.eq.s32.totalorder %v8507_v27, 1  ;;  %v10558_v54 = vld [vmem:[#allocation112_spill] sm:$0xff]  ;;  %v10559_v36 = vld [vmem:[#allocation113_spill] sm:$0xff] }
 0x43c   :  { %6208 = vpow2.f32 %v5810_v32  ;;  %v10560_v32 = vld [vmem:[#allocation114_spill] sm:$0xff] }
 0x43d   :  { %6210 = vpow2.f32 %v5808_v31  ;;  %v10563_v31 = vld [vmem:[#allocation117_spill] sm:$0xff]  ;;  %v8820_v27 = vld [vmem:[#allocation8 + $0xa4] ss:$16 sps:$4 sm:$0xff]  }
 0x43e   :  { %6212 = vtanh.f32 %v2652_v30 }
 0x440   :  { %v6197_v28 = vpop.eup %6196 }
 0x441   :  { %v2704_v21 = vmul.f32 %v6197_v28, %v6195_v42  ;;  %v6199_v37 = vpop.eup %6198  ;;  %v10561_v42 = vld [vmem:[#allocation115_spill] sm:$0xff]  ;;  %v10562_v28 = vld [vmem:[#allocation116_spill] sm:$0xff] }
 0x442   :  { %v6201_v1 = vpop.eup %6200 }
 0x443   :  { %v6203_v5 = vpop.eup %6202  ;;  %v2705_v19 = vmul.f32 %v6201_v1, %v6199_v37  ;;  %v8483_v39 = vsel %vm2766_vm2, %v2704_v21, %v8331_v2  ;;  %v10564_v21 = vld [vmem:[#allocation118_spill] sm:$0xff]  ;;  %v10565_v37 = vld [vmem:[#allocation119_spill] sm:$0xff]  ;;  %v10566_v1 = vld [vmem:[#allocation120_spill] sm:$0xff] }
 0x444   :  { %v2724_v7 = vadd.f32 1.0, %v6203_v5  ;;  %v6205_v22 = vpop.eup %6204  ;;  %v10567_v5 = vld [vmem:[#allocation121_spill] sm:$0xff] }
 0x445   :  { %v8488_v8 = vsel %vm2767_vm3, %v2705_v19, %v8338_v63  ;;  %v2725_v57 = vadd.f32 1.0, %v6205_v22  ;;  %v6207_v4 = vpop.eup %6206  ;;  %v10569_v19 = vld [vmem:[#allocation123_spill] sm:$0xff]  ;;  %v10571_v22 = vld [vmem:[#allocation125_spill] sm:$0xff] }
 0x446   :  { %6214 = vrcp.f32 %v2724_v7  ;;  %v2786_v25 = vpack.c.bf16 %v8488_v8, %v8483_v39  ;;  %v2727_v24 = vadd.f32 1.0, %v6207_v4  ;;  %v6209_v52 = vpop.eup %6208  ;;  %v10570_v7 = vld [vmem:[#allocation124_spill] sm:$0xff]  ;;  %10625 = vst [vmem:[#allocation123_spill] sm:$0xff] %v8811_v26 }
 0x447   :  { %6216 = vpow2.f32 %v5811_v14  ;;  %v2728_v2 = vadd.f32 1.0, %v6209_v52  ;;  %v6211_v63 = vpop.eup %6210  ;;  %v10568_v14 = vld [vmem:[#allocation122_spill] sm:$0xff]  ;;  %v10574_v4 = vld [vmem:[#allocation128_spill] sm:$0xff]  ;;  %10626 = vst [vmem:[#allocation124_spill] sm:$0xff] %v8814_v17 }
 0x448   :  { %6218 = vrcp.f32 %v2725_v57  ;;  %2836 = vmatmul.mubr.bf16.vlgmr.msra.gmra.mrb[120].mxu0 %v2786_v25  ;;  %2879 = vmatmul.mubr.bf16.vlgmr.msra.gmra.mrb[120].mxu1 %v2786_v25  ;;  %v2726_v30 = vadd.f32 1.0, %v6211_v63  ;;  %v10572_v57 = vld [vmem:[#allocation126_spill] sm:$0xff]  ;;  %v10573_v25 = vld [vmem:[#allocation127_spill] sm:$0xff]  ;;  %v10578_v63 = vld [vmem:[#allocation132_spill] sm:$0xff] }
 0x449   :  { %6220 = vtanh.f32 %v2656_v10  ;;  %2905 = vmatpush1.bf16.msra.mxu0 %v8072_v34  ;;  %2948 = vmatpush1.bf16.msra.mxu1 %v8075_v3  ;;  %v6213_v34 = vpop.eup %6212  ;;  %v10576_v52 = vld [vmem:[#allocation130_spill] sm:$0xff]  ;;  %10628 = vst [vmem:[#allocation126_spill] sm:$0xff] %v8820_v27 }
 0x44a   :  { %6222 = vrcp.f32 %v2727_v24  ;;  %2906 = vmatprep.subr.bf16.mxu0 %v8078_v58  ;;  %2949 = vmatprep.subr.bf16.mxu1 %v8081_v33  ;;  %v10575_v24 = vld [vmem:[#allocation129_spill] sm:$0xff] }
 0x44b   :  { %2936 = vmatprep.mubr.bf16.mxu0 %v10441_v18  ;;  %2979 = vmatprep.mubr.bf16.mxu1 %v10441_v18  ;;  %6224 = vrcp.f32 %v2728_v2  ;;  %v10577_v2 = vld [vmem:[#allocation131_spill] sm:$0xff] }
 0x44c   :  { %6226 = vrcp.f32 %v2726_v30  ;;  %v10584_v30 = vld [vmem:[#allocation138_spill] sm:$0xff] }
 0x44d   :  { %2907 = vmatpush1.bf16.msra.mxu0 %v8086_v48  ;;  %2950 = vmatpush1.bf16.msra.mxu1 %v8089_v35 }
 0x44e   :  { %2908 = vmatprep.subr.bf16.mxu0 %v8092_v9  ;;  %2951 = vmatprep.subr.bf16.mxu1 %v8095_v53 }
 0x450   :  { %v6215_v3 = vpop.eup %6214 }
 0x451   :  { %v6217_v10 = vpop.eup %6216  ;;  %v2746_v58 = vmul.f32 %v6215_v3, %v6213_v34  ;;  %2909 = vmatpush1.bf16.msra.mxu0 %v8098_v61  ;;  %2952 = vmatpush1.bf16.msra.mxu1 %v8101_v6  ;;  %v10579_v34 = vld [vmem:[#allocation133_spill] sm:$0xff]  ;;  %v10580_v3 = vld [vmem:[#allocation134_spill] sm:$0xff] }
 0x452   :  { %v6219_v33 = vpop.eup %6218  ;;  %2910 = vmatprep.subr.bf16.mxu0 %v8104_v12  ;;  %2953 = vmatprep.subr.bf16.mxu1 %v8107_v29  ;;  %v2729_v6 = vadd.f32 1.0, %v6217_v10  ;;  %v10581_v10 = vld [vmem:[#allocation135_spill] sm:$0xff] }
 0x453   :  { %v6221_v48 = vpop.eup %6220  ;;  %v2744_v35 = vmul.f32 %v6219_v33, %v8371_v23  ;;  %v10583_v33 = vld [vmem:[#allocation137_spill] sm:$0xff] }
 0x454   :  { %v6223_v9 = vpop.eup %6222 }
 0x455   :  { %v2748_v53 = vadd.f32 %v2746_v58, %v2744_v35  ;;  %v2747_v20 = vmul.f32 %v6223_v9, %v6221_v48  ;;  %2911 = vmatpush1.bf16.msra.mxu0 %v8112_v16  ;;  %2954 = vmatpush1.bf16.msra.mxu1 %v8115_v15  ;;  %v6225_v61 = vpop.eup %6224  ;;  %v8520_v16 = vpop.permute.xlu1 %2778  ;;  %v10582_v58 = vld [vmem:[#allocation136_spill] sm:$0xff]  ;;  %v10585_v48 = vld [vmem:[#allocation139_spill] sm:$0xff]  ;;  %v10587_v9 = vld [vmem:[#allocation141_spill] sm:$0xff] }
 0x456   :  { %2912 = vmatprep.subr.bf16.mxu0 %v8119_v43  ;;  %2955 = vmatprep.subr.bf16.mxu1 %v8122_v13  ;;  %v2745_v12 = vmul.f32 %v6225_v61, %v8382_v62  ;;  %10549 = vst [vmem:[#allocation106_spill] sm:$0xff] %v8520_v16  ;;  %vm2781_vm5 = vcmp.eq.s32.totalorder %v8520_v16, 1  ;;  %v6227_v13 = vpop.eup %6226  ;;  %v10586_v35 = vld [vmem:[#allocation140_spill] sm:$0xff]  ;;  %v8817_v16 = vld [vmem:[#allocation8 + $0x88] ss:$16 sps:$4 sm:$0xff]  }
 0x457   :  { %6228 = vtanh.f32 %v2748_v53  ;;  %v8518_v29 = vsel %vm2780_vm4, %v2748_v53, %v8371_v23  ;;  %v10588_v53 = vld [vmem:[#allocation142_spill] sm:$0xff]  ;;  %v10590_v61 = vld [vmem:[#allocation20_spill] sm:$0xff]  ;;  %10627 = vst [vmem:[#allocation125_spill] sm:$0xff] %v8817_v16 }
 0x458   :  { %v2749_v15 = vadd.f32 %v2747_v20, %v2745_v12  ;;  %6230 = vrcp.f32 %v2729_v6  ;;  %v10589_v20 = vld [vmem:[#allocation143_spill] sm:$0xff]  ;;  %v2795_v6 = vunpack.c.l.bf16 %v10590_v61  ;;  %v10591_v12 = vld [vmem:[#allocation22_spill] sm:$0xff] }
 0x459   :  { %2913 = vmatpush1.bf16.msra.mxu0 %v8127_v55  ;;  %2956 = vmatpush1.bf16.msra.mxu1 %v8130_v0  ;;  %v10550_v0 = vld [vmem:[#allocation104_spill] sm:$0xff] }
 0x45a   :  { %2914 = vmatprep.subr.bf16.mxu0 %v8134_v38  ;;  %2957 = vmatprep.subr.bf16.mxu1 %v8137_v40  ;;  %6232 = vtanh.f32 %v2749_v15  ;;  %v8530_v43 = vsel %vm2781_vm5, %v2749_v15, %v8382_v62  ;;  %v10551_v38 = vld [vmem:[#allocation105_spill] sm:$0xff]  ;;  %v2797_v15 = vunpack.c.l.bf16 %v10591_v12 }
 0x45d   :  { %2915 = vmatpush1.bf16.msra.mxu0 %v8140_v45  ;;  %2958 = vmatpush1.bf16.msra.mxu1 %v8143_v46  ;;  %v10552_v45 = vld [vmem:[#allocation107_spill] sm:$0xff]  ;;  %v10553_v46 = vld [vmem:[#allocation108_spill] sm:$0xff] }
 0x45e   :  { %2916 = vmatprep.subr.bf16.mxu0 %v10492_v49  ;;  %2959 = vmatprep.subr.bf16.mxu1 %v10493_v59  ;;  %v10555_v59 = vld [vmem:[#allocation111_spill] sm:$0xff] }
 0x461   :  { %v6229_v55 = vpop.eup %6228  ;;  %2917 = vmatpush1.bf16.msra.mxu0 %v10494_v41  ;;  %2960 = vmatpush1.bf16.msra.mxu1 %v10495_v60  ;;  %v10557_v60 = vld [vmem:[#allocation99_spill] sm:$0xff] }
 0x462   :  { %2918 = vmatprep.subr.bf16.mxu0 %v10550_v0  ;;  %2961 = vmatprep.subr.bf16.mxu1 %v10551_v38  ;;  %v2752_v40 = vmul.f32 %v6229_v55, %v6227_v13  ;;  %v6231_v23 = vpop.eup %6230  ;;  %v10592_v0 = vld [vmem:[#allocation21_spill] sm:$0xff] }
 0x463   :  { %v2796_v38 = vunpack.c.l.bf16 %v10592_v0 }
 0x464   :  { %v6233_v62 = vpop.eup %6232  ;;  %v8547_v41 = vsel %vm2780_vm4, %v2752_v40, %v10556_v44  ;;  %v10593_v40 = vld [vmem:[#allocation23_spill] sm:$0xff] }
 0x465   :  { %2919 = vmatpush1.bf16.msra.mxu0 %v10552_v45  ;;  %2962 = vmatpush1.bf16.msra.mxu1 %v10553_v46  ;;  %v2753_v49 = vmul.f32 %v6233_v62, %v6231_v23  ;;  %v2798_v23 = vunpack.c.l.bf16 %v10593_v40 }
 0x466   :  { %3135 = vmatprep.subr.bf16.mxu0 %v10554_v47  ;;  %3178 = vmatprep.subr.bf16.mxu1 %v10555_v59  ;;  %v2799_v47 = vunpack.c.h.bf16 %v10590_v61  ;;  %v2801_v59 = vunpack.c.h.bf16 %v10591_v12 }
 0x467   :  { %v8552_v56 = vsel %vm2781_vm5, %v2753_v49, %v10557_v60 }
 0x468   :  { %v2787_v50 = vpack.c.bf16 %v8552_v56, %v8547_v41 }
 0x46a   :  { %2937 = vmatmul.mubr.bf16.vlgmr.msra.gmra.mrb[124].mxu0 %v2787_v50  ;;  %2980 = vmatmul.mubr.bf16.vlgmr.msra.gmra.mrb[124].mxu1 %v2787_v50 }
 0x46b   :  { %3136 = vmatpush1.bf16.msra.mxu0 %v10558_v54  ;;  %3179 = vmatpush1.bf16.msra.mxu1 %v10559_v36  ;;  %v2800_v36 = vunpack.c.h.bf16 %v10592_v0  ;;  %v10595_v0 = vld [vmem:[#allocation88_spill] sm:$0xff] }
 0x46c   :  { %3137 = vmatprep.subr.bf16.mxu0 %v10560_v32  ;;  %3180 = vmatprep.subr.bf16.mxu1 %v10561_v42  ;;  %v2802_v32 = vunpack.c.h.bf16 %v10593_v40  ;;  %v8603_v40 = vpop.permute.xlu1 %3096 }
 0x46d   :  { %3167 = vmatprep.mubr.bf16.mxu0 %v10441_v18  ;;  %3210 = vmatprep.mubr.bf16.mxu1 %v10441_v18  ;;  %10596 = vst [vmem:[#allocation18_spill] sm:$0xff] %v8603_v40  ;;  %vm3099_vm7 = vcmp.eq.s32.totalorder %v8603_v40, 1  ;;  %v8823_v40 = vld [vmem:[#allocation8 + $0xac] ss:$16 sps:$4 sm:$0xff]  }
 0x46e   :  { %10629 = vst [vmem:[#allocation127_spill] sm:$0xff] %v8823_v40 }
 0x46f   :  { %3138 = vmatpush1.bf16.msra.mxu0 %v10562_v28  ;;  %3181 = vmatpush1.bf16.msra.mxu1 %v10563_v31 }
 0x470   :  { %3139 = vmatprep.subr.bf16.mxu0 %v10564_v21  ;;  %3182 = vmatprep.subr.bf16.mxu1 %v10565_v37 }
 0x473   :  { %3140 = vmatpush1.bf16.msra.mxu0 %v10566_v1  ;;  %3183 = vmatpush1.bf16.msra.mxu1 %v10567_v5 }
 0x474   :  { %3141 = vmatprep.subr.bf16.mxu0 %v10568_v14  ;;  %3184 = vmatprep.subr.bf16.mxu1 %v10569_v19 }
 0x477   :  { %3142 = vmatpush1.bf16.msra.mxu0 %v10570_v7  ;;  %3185 = vmatpush1.bf16.msra.mxu1 %v10571_v22 }
 0x478   :  { %3143 = vmatprep.subr.bf16.mxu0 %v10572_v57  ;;  %3186 = vmatprep.subr.bf16.mxu1 %v10573_v25 }
 0x47b   :  { %3144 = vmatpush1.bf16.msra.mxu0 %v10574_v4  ;;  %3187 = vmatpush1.bf16.msra.mxu1 %v10575_v24 }
 0x47c   :  { %3145 = vmatprep.subr.bf16.mxu0 %v10576_v52  ;;  %3188 = vmatprep.subr.bf16.mxu1 %v10577_v2 }
 0x47f   :  { %3146 = vmatpush1.bf16.msra.mxu0 %v10578_v63  ;;  %3189 = vmatpush1.bf16.msra.mxu1 %v10579_v34 }
 0x480   :  { %3147 = vmatprep.subr.bf16.mxu0 %v10580_v3  ;;  %3190 = vmatprep.subr.bf16.mxu1 %v10581_v10 }
 0x483   :  { %3148 = vmatpush1.bf16.msra.mxu0 %v10582_v58  ;;  %3191 = vmatpush1.bf16.msra.mxu1 %v10583_v33 }
 0x484   :  { %3149 = vmatprep.subr.bf16.mxu0 %v10584_v30  ;;  %3192 = vmatprep.subr.bf16.mxu1 %v10585_v48 }
 0x487   :  { %3150 = vmatpush1.bf16.msra.mxu0 %v10586_v35  ;;  %3193 = vmatpush1.bf16.msra.mxu1 %v10587_v9 }
 0x488   :  { %3236 = vmatprep.subr.bf16.mxu0 %v10588_v53  ;;  %3279 = vmatprep.subr.bf16.mxu1 %v10589_v20 }
 0x51b   :  { %v2837_v13 = vpop.f32.mrb[120].mxu0  ;;  %v2880_v55 = vpop.f32.mrb[120].mxu1 }
 0x51c   :  { %v2838_v62 = vadd.f32 %v2837_v13, %v2795_v6  ;;  %v2881_v45 = vadd.f32 %v2880_v55, %v2797_v15  ;;  %v2839_v46 = vpop.f32.mrb[121].mxu0  ;;  %v2882_v49 = vpop.f32.mrb[121].mxu1 }
 0x51d   :  { %v2840_v44 = vadd.f32 %v2839_v46, %v2796_v38  ;;  %v2883_v60 = vadd.f32 %v2882_v49, %v2798_v23  ;;  %v2841_v50 = vpop.f32.mrb[122].mxu0  ;;  %v2884_v54 = vpop.f32.mrb[122].mxu1  ;;  %v2896_v38 = vunpack.c.l.bf16 %v10595_v0  ;;  %v2900_v46 = vunpack.c.h.bf16 %v10595_v0 }
 0x51e   :  { %v5812_v42 = vmul.f32 -1.442695, %v2838_v62  ;;  %v2842_v28 = vadd.f32 %v2841_v50, %v2799_v47  ;;  %v2885_v31 = vadd.f32 %v2884_v54, %v2801_v59  ;;  %v2843_v21 = vpop.f32.mrb[123].mxu0  ;;  %v2886_v37 = vpop.f32.mrb[123].mxu1  ;;  %v5814_v22 = vmul.f32 -1.442695, %v2881_v45 }
 0x51f   :  { %v5813_v1 = vmul.f32 -1.442695, %v2840_v44  ;;  %v2844_v5 = vadd.f32 %v2843_v21, %v2800_v36  ;;  %v2887_v14 = vadd.f32 %v2886_v37, %v2802_v32  ;;  %v8599_v6 = vpop.permute.xlu0 %3093  ;;  %v10597_v62 = vld [vmem:[#allocation90_spill] sm:$0xff]  ;;  %v10598_v59 = vld [vmem:[#allocation89_spill] sm:$0xff] }
 0x520   :  { %6234 = vpow2.f32 %v5812_v42  ;;  %v5815_v19 = vmul.f32 -1.442695, %v2842_v28  ;;  %v5817_v57 = vmul.f32 -1.442695, %v2885_v31  ;;  %10594 = vst [vmem:[#allocation16_spill] sm:$0xff] %v8599_v6  ;;  %vm3098_vm6 = vcmp.eq.s32.totalorder %v8599_v6, 1 }
 0x521   :  { %v5816_v7 = vmul.f32 -1.442695, %v2844_v5  ;;  %6236 = vpow2.f32 %v5813_v1  ;;  %v2898_v45 = vunpack.c.l.bf16 %v10597_v62  ;;  %v2897_v44 = vunpack.c.l.bf16 %v10598_v59  ;;  %v8826_v6 = vld [vmem:[#allocation8 + $0xa0] ss:$16 sps:$4 sm:$0xff]  }
 0x522   :  { %6238 = vpow2.f32 %v5815_v19  ;;  %v2902_v21 = vunpack.c.h.bf16 %v10597_v62  ;;  %v2901_v19 = vunpack.c.h.bf16 %v10598_v59  ;;  %10630 = vst [vmem:[#allocation128_spill] sm:$0xff] %v8826_v6 }
 0x523   :  { %6240 = vpow2.f32 %v5816_v7 }
 0x524   :  { %6242 = vtanh.f32 %v2883_v60  ;;  %v10599_v60 = vld [vmem:[#allocation91_spill] sm:$0xff] }
 0x525   :  { %6244 = vpow2.f32 %v5814_v22  ;;  %v2899_v50 = vunpack.c.l.bf16 %v10599_v60 }
 0x526   :  { %6246 = vpow2.f32 %v5817_v57 }
 0x52a   :  { %v6235_v25 = vpop.eup %6234 }
 0x52b   :  { %v3008_v4 = vadd.f32 1.0, %v6235_v25  ;;  %v6237_v24 = vpop.eup %6236 }
 0x52c   :  { %v6239_v52 = vpop.eup %6238  ;;  %v3009_v2 = vadd.f32 1.0, %v6237_v24 }
 0x52d   :  { %6248 = vrcp.f32 %v3008_v4  ;;  %v3011_v63 = vadd.f32 1.0, %v6239_v52  ;;  %v6241_v34 = vpop.eup %6240 }
 0x52e   :  { %6250 = vtanh.f32 %v2887_v14  ;;  %v3012_v3 = vadd.f32 1.0, %v6241_v34  ;;  %v6243_v10 = vpop.eup %6242 }
 0x52f   :  { %6252 = vrcp.f32 %v3009_v2  ;;  %v6245_v58 = vpop.eup %6244 }
 0x530   :  { %6254 = vrcp.f32 %v3011_v63  ;;  %v6247_v33 = vpop.eup %6246  ;;  %v3010_v53 = vadd.f32 1.0, %v6245_v58 }
 0x531   :  { %6256 = vrcp.f32 %v3012_v3  ;;  %v3013_v55 = vadd.f32 1.0, %v6247_v33 }
 0x532   :  { %6258 = vrcp.f32 %v3010_v53 }
 0x537   :  { %v6249_v30 = vpop.eup %6248 }
 0x538   :  { %v6251_v48 = vpop.eup %6250  ;;  %v3030_v35 = vmul.f32 %v6249_v30, %v6243_v10 }
 0x539   :  { %v6253_v9 = vpop.eup %6252 }
 0x53a   :  { %v6255_v20 = vpop.eup %6254  ;;  %v3028_v61 = vmul.f32 %v6253_v9, %v8472_v11 }
 0x53b   :  { %v3031_v12 = vmul.f32 %v6255_v20, %v6251_v48  ;;  %v6257_v15 = vpop.eup %6256 }
 0x53c   :  { %v3032_v13 = vadd.f32 %v3030_v35, %v3028_v61  ;;  %v3029_v23 = vmul.f32 %v6257_v15, %v8478_v51  ;;  %v6259_v10 = vpop.eup %6258 }
 0x53d   :  { %v2938_v49 = vpop.f32.mrb[124].mxu0  ;;  %v2981_v47 = vpop.f32.mrb[124].mxu1 }
 0x53e   :  { %6260 = vtanh.f32 %v3032_v13  ;;  %v8613_v54 = vsel %vm3098_vm6, %v3032_v13, %v8472_v11  ;;  %v3033_v36 = vadd.f32 %v3031_v12, %v3029_v23  ;;  %v2939_v32 = vadd.f32 %v2938_v49, %v2896_v38  ;;  %v2940_v28 = vpop.f32.mrb[125].mxu0  ;;  %v2983_v31 = vpop.f32.mrb[125].mxu1  ;;  %v8650_v49 = vld [vmem:[#allocation9 + $0x20] ss:$16 sps:$4 sm:$0xff]  }
 0x53f   :  { %v2982_v42 = vadd.f32 %v2981_v47, %v2898_v45  ;;  %6262 = vrcp.f32 %v3013_v55  ;;  %v2941_v37 = vadd.f32 %v2940_v28, %v2897_v44  ;;  %v2984_v1 = vadd.f32 %v2983_v31, %v2899_v50  ;;  %v2942_v5 = vpop.f32.mrb[126].mxu0  ;;  %v2985_v14 = vpop.f32.mrb[126].mxu1  ;;  %v8642_v45 = vld [vmem:[#allocation9 + $0x24] ss:$16 sps:$4 sm:$0xff]   ;;  %v8653_v47 = vld [vmem:[#allocation9 + $0x28] ss:$16 sps:$4 sm:$0xff]  }
 0x540   :  { %6264 = vtanh.f32 %v3033_v36  ;;  %v5818_v7 = vmul.f32 -1.442695, %v2939_v32  ;;  %v2943_v22 = vadd.f32 %v2942_v5, %v2900_v46  ;;  %v2944_v57 = vpop.f32.mrb[127].mxu0  ;;  %v2903_v11 = vunpack.c.h.bf16 %v10599_v60  ;;  %v2987_v25 = vpop.f32.mrb[127].mxu1  ;;  %v8645_v46 = vld [vmem:[#allocation9 + $0x2c] ss:$16 sps:$4 sm:$0xff]  }
 0x541   :  { %v5819_v4 = vmul.f32 -1.442695, %v2941_v37  ;;  %v2986_v24 = vadd.f32 %v2985_v14, %v2902_v21  ;;  %v2945_v52 = vadd.f32 %v2944_v57, %v2901_v19  ;;  %v8622_v34 = vsel %vm3099_vm7, %v3033_v36, %v8478_v51  ;;  %v8656_v44 = vld [vmem:[#allocation9 + $0x44] ss:$16 sps:$4 sm:$0xff]   ;;  %v8659_v60 = vld [vmem:[#allocation9 + $0x4c] ss:$16 sps:$4 sm:$0xff]  }
 0x542   :  { %6266 = vpow2.f32 %v5818_v7  ;;  %v5821_v2 = vmul.f32 -1.442695, %v2943_v22  ;;  %v2988_v63 = vadd.f32 %v2987_v25, %v2903_v11  ;;  %v5820_v48 = vmul.f32 -1.442695, %v2982_v42  ;;  %v8662_v42 = vld [vmem:[#allocation9 + $0x40] ss:$16 sps:$4 sm:$0xff]  }
 0x543   :  { %v5822_v3 = vmul.f32 -1.442695, %v2945_v52  ;;  %6268 = vpow2.f32 %v5819_v4  ;;  %v5823_v9 = vmul.f32 -1.442695, %v2986_v24  ;;  %v8665_v28 = vld [vmem:[#allocation9 + $0x48] ss:$16 sps:$4 sm:$0xff]   ;;  %v8681_v4 = vpop.permute.xlu0 %3107 }
 0x544   :  { %6270 = vpow2.f32 %v5821_v2  ;;  %v8668_v37 = vld [vmem:[#allocation9 + $0x64] ss:$16 sps:$4 sm:$0xff]   ;;  %v8675_v57 = vld [vmem:[#allocation9 + $0x60] ss:$16 sps:$4 sm:$0xff]   ;;  %v8678_v11 = vld [vmem:[#allocation9 + $0x68] ss:$16 sps:$4 sm:$0xff]  }
 0x545   :  { %6272 = vpow2.f32 %v5822_v3  ;;  %10600 = vst [vmem:[#allocation17_spill] sm:$0xff] %v8681_v4  ;;  %v8683_v2 = vld [vmem:[#allocation9 + $0x84] ss:$16 sps:$4 sm:$0xff]   ;;  %vm3112_vm10 = vcmp.eq.s32.totalorder %v8681_v4, 1 }
 0x546   :  { %6274 = vtanh.f32 %v2984_v1  ;;  %v8671_v1 = vld [vmem:[#allocation9 + $0x6c] ss:$16 sps:$4 sm:$0xff]   ;;  %v8832_v4 = vld [vmem:[#allocation8 + $0xc4] ss:$16 sps:$4 sm:$0xff]  }
 0x547   :  { %6276 = vpow2.f32 %v5820_v48  ;;  %v8701_v48 = vld [vmem:[#allocation9 + $0x88] ss:$16 sps:$4 sm:$0xff]   ;;  %10632 = vst [vmem:[#allocation130_spill] sm:$0xff] %v8832_v4 }
 0x548   :  { %v6261_v58 = vpop.eup %6260  ;;  %6278 = vpow2.f32 %v5823_v9 }
 0x549   :  { %v3036_v33 = vmul.f32 %v6261_v58, %v6259_v10  ;;  %v6263_v30 = vpop.eup %6262  ;;  %v8696_v58 = vpop.permute.xlu1 %3110 }
 0x54a   :  { %v6265_v35 = vpop.eup %6264  ;;  %10601 = vst [vmem:[#allocation19_spill] sm:$0xff] %v8696_v58  ;;  %vm3113_vm13 = vcmp.eq.s32.totalorder %v8696_v58, 1  ;;  %v8829_v58 = vld [vmem:[#allocation8 + $0xa8] ss:$16 sps:$4 sm:$0xff]  }
 0x54b   :  { %v3037_v53 = vmul.f32 %v6265_v35, %v6263_v30  ;;  %v8627_v51 = vsel %vm3098_vm6, %v3036_v33, %v8483_v39  ;;  %v8636_v39 = vld [vmem:[#allocation9] ss:$16 sps:$4 sm:$0xff]   ;;  %v8705_v35 = vld [vmem:[#allocation9 + $0xa4] ss:$16 sps:$4 sm:$0xff]   ;;  %10631 = vst [vmem:[#allocation129_spill] sm:$0xff] %v8829_v58 }
 0x54c   :  { %v6267_v20 = vpop.eup %6266  ;;  %v8698_v30 = vld [vmem:[#allocation9 + $0x80] ss:$16 sps:$4 sm:$0xff]  }
 0x54d   :  { %v3056_v61 = vadd.f32 1.0, %v6267_v20  ;;  %v8632_v12 = vsel %vm3099_vm7, %v3037_v53, %v8488_v8  ;;  %v6269_v15 = vpop.eup %6268  ;;  %v8639_v8 = vld [vmem:[#allocation9 + $0x8] ss:$16 sps:$4 sm:$0xff]   ;;  %v8716_v53 = vld [vmem:[#allocation9 + $0xa0] ss:$16 sps:$4 sm:$0xff]  }
 0x54e   :  { %v3118_v13 = vpack.c.bf16 %v8632_v12, %v8627_v51  ;;  %v6271_v55 = vpop.eup %6270  ;;  %v3057_v0 = vadd.f32 1.0, %v6269_v15  ;;  %v8719_v20 = vld [vmem:[#allocation9 + $0xa8] ss:$16 sps:$4 sm:$0xff]   ;;  %v8725_v15 = vld [vmem:[#allocation9 + $0xcc] ss:$16 sps:$4 sm:$0xff]  }
 0x54f   :  { %6280 = vrcp.f32 %v3056_v61  ;;  %v3059_v38 = vadd.f32 1.0, %v6271_v55  ;;  %v6273_v23 = vpop.eup %6272  ;;  %v8722_v61 = vld [vmem:[#allocation9 + $0xc4] ss:$16 sps:$4 sm:$0xff]   ;;  %v8728_v55 = vld [vmem:[#allocation9 + $0xc0] ss:$16 sps:$4 sm:$0xff]  }
 0x550   :  { %6282 = vtanh.f32 %v2988_v63  ;;  %3168 = vmatmul.mubr.bf16.vlgmr.msra.gmra.mrb[128].mxu0 %v3118_v13  ;;  %3211 = vmatmul.mubr.bf16.vlgmr.msra.gmra.mrb[128].mxu1 %v3118_v13  ;;  %v3060_v62 = vadd.f32 1.0, %v6273_v23  ;;  %v6275_v59 = vpop.eup %6274  ;;  %v8686_v63 = vld [vmem:[#allocation9 + $0x8c] ss:$16 sps:$4 sm:$0xff]  }
 0x551   :  { %6284 = vrcp.f32 %v3057_v0  ;;  %3237 = vmatpush1.bf16.msra.mxu0 %v8636_v39  ;;  %3280 = vmatpush1.bf16.msra.mxu1 %v8639_v8  ;;  %v6277_v50 = vpop.eup %6276  ;;  %v8737_v23 = vld [vmem:[#allocation9 + $0xec] ss:$16 sps:$4 sm:$0xff]  }
 0x552   :  { %6286 = vrcp.f32 %v3059_v38  ;;  %3238 = vmatprep.subr.bf16.mxu0 %v8642_v45  ;;  %3281 = vmatprep.subr.bf16.mxu1 %v8645_v46  ;;  %v6279_v36 = vpop.eup %6278  ;;  %v3058_v14 = vadd.f32 1.0, %v6277_v50  ;;  %v8734_v38 = vld [vmem:[#allocation9 + $0xe4] ss:$16 sps:$4 sm:$0xff]   ;;  %10603 = vst [vmem:[#allocation94_spill] sm:$0xff] %v8737_v23 }
 0x553   :  { %3268 = vmatprep.mubr.bf16.mxu0 %v10441_v18  ;;  %3311 = vmatprep.mubr.bf16.mxu1 %v10441_v18  ;;  %6288 = vrcp.f32 %v3060_v62  ;;  %v3061_v52 = vadd.f32 1.0, %v6279_v36  ;;  %10602 = vst [vmem:[#allocation92_spill] sm:$0xff] %v8734_v38  ;;  %v8740_v36 = vld [vmem:[#allocation9 + $0xe0] ss:$16 sps:$4 sm:$0xff]  }
 0x554   :  { %6290 = vrcp.f32 %v3058_v14  ;;  %10604 = vst [vmem:[#allocation93_spill] sm:$0xff] %v8740_v36 }
 0x555   :  { %3239 = vmatpush1.bf16.msra.mxu0 %v8650_v49  ;;  %3282 = vmatpush1.bf16.msra.mxu1 %v8653_v47 }
 0x556   :  { %3240 = vmatprep.subr.bf16.mxu0 %v8656_v44  ;;  %3283 = vmatprep.subr.bf16.mxu1 %v8659_v60 }
 0x559   :  { %v6281_v32 = vpop.eup %6280  ;;  %3241 = vmatpush1.bf16.msra.mxu0 %v8662_v42  ;;  %3284 = vmatpush1.bf16.msra.mxu1 %v8665_v28 }
 0x55a   :  { %v6283_v31 = vpop.eup %6282  ;;  %v3078_v21 = vmul.f32 %v6281_v32, %v6275_v59  ;;  %3242 = vmatprep.subr.bf16.mxu0 %v8668_v37  ;;  %3285 = vmatprep.subr.bf16.mxu1 %v8671_v1  ;;  %v8743_v32 = vld [vmem:[#allocation9 + $0xe8] ss:$16 sps:$4 sm:$0xff]  }
 0x55b   :  { %v6285_v5 = vpop.eup %6284  ;;  %10605 = vst [vmem:[#allocation95_spill] sm:$0xff] %v8743_v32 }
 0x55c   :  { %v6287_v19 = vpop.eup %6286  ;;  %v3076_v7 = vmul.f32 %v6285_v5, %v8518_v29  ;;  %v8749_v5 = vld [vmem:[#allocation8 + $0xc] ss:$16 sps:$4 sm:$0xff]  }
 0x55d   :  { %v3079_v22 = vmul.f32 %v6287_v19, %v6283_v31  ;;  %3243 = vmatpush1.bf16.msra.mxu0 %v8675_v57  ;;  %3286 = vmatpush1.bf16.msra.mxu1 %v8678_v11  ;;  %v6289_v25 = vpop.eup %6288  ;;  %10607 = vst [vmem:[#allocation105_spill] sm:$0xff] %v8749_v5 }
 0x55e   :  { %v3080_v24 = vadd.f32 %v3078_v21, %v3076_v7  ;;  %3244 = vmatprep.subr.bf16.mxu0 %v8683_v2  ;;  %3287 = vmatprep.subr.bf16.mxu1 %v8686_v63  ;;  %v3077_v3 = vmul.f32 %v6289_v25, %v8530_v43  ;;  %v6291_v13 = vpop.eup %6290  ;;  %v8746_v21 = vld [vmem:[#allocation8 + $0x4] ss:$16 sps:$4 sm:$0xff]   ;;  %v8767_v25 = vld [vmem:[#allocation8 + $0x8] ss:$16 sps:$4 sm:$0xff]  }
 0x55f   :  { %10606 = vst [vmem:[#allocation104_spill] sm:$0xff] %v8746_v21  ;;  %10611 = vst [vmem:[#allocation111_spill] sm:$0xff] %v8767_v25 }
 0x560   :  { %6292 = vtanh.f32 %v3080_v24  ;;  %v8694_v10 = vsel %vm3112_vm10, %v3080_v24, %v8518_v29  ;;  %v3081_v33 = vadd.f32 %v3079_v22, %v3077_v3  ;;  %v8708_v29 = vld [vmem:[#allocation9 + $0xac] ss:$16 sps:$4 sm:$0xff]   ;;  %v8764_v22 = vld [vmem:[#allocation8] ss:$16 sps:$4 sm:$0xff]   ;;  %v8784_v3 = vld [vmem:[#allocation8 + $0x44] ss:$16 sps:$4 sm:$0xff]  }
 0x561   :  { %3245 = vmatpush1.bf16.msra.mxu0 %v8698_v30  ;;  %3288 = vmatpush1.bf16.msra.mxu1 %v8701_v48  ;;  %6294 = vrcp.f32 %v3061_v52  ;;  %10610 = vst [vmem:[#allocation110_spill] sm:$0xff] %v8764_v22  ;;  %v8773_v24 = vld [vmem:[#allocation8 + $0x2c] ss:$16 sps:$4 sm:$0xff]   ;;  %v8781_v52 = vld [vmem:[#allocation8 + $0x28] ss:$16 sps:$4 sm:$0xff]   ;;  %10616 = vst [vmem:[#allocation114_spill] sm:$0xff] %v8784_v3 }
 0x562   :  { %3246 = vmatprep.subr.bf16.mxu0 %v8705_v35  ;;  %3289 = vmatprep.subr.bf16.mxu1 %v8708_v29  ;;  %6296 = vtanh.f32 %v3081_v33  ;;  %v8714_v9 = vsel %vm3113_vm13, %v3081_v33, %v8530_v43  ;;  %v8731_v43 = vld [vmem:[#allocation9 + $0xc8] ss:$16 sps:$4 sm:$0xff]   ;;  %10613 = vst [vmem:[#allocation99_spill] sm:$0xff] %v8773_v24  ;;  %10615 = vst [vmem:[#allocation113_spill] sm:$0xff] %v8781_v52  ;;  %v8787_v33 = vld [vmem:[#allocation8 + $0x4c] ss:$16 sps:$4 sm:$0xff]  }
 0x563   :  { %10617 = vst [vmem:[#allocation115_spill] sm:$0xff] %v8787_v33 }
 0x565   :  { %3247 = vmatpush1.bf16.msra.mxu0 %v8716_v53  ;;  %3290 = vmatpush1.bf16.msra.mxu1 %v8719_v20 }
 0x566   :  { %3248 = vmatprep.subr.bf16.mxu0 %v8722_v61  ;;  %3291 = vmatprep.subr.bf16.mxu1 %v8725_v15 }
 0x569   :  { %3249 = vmatpush1.bf16.msra.mxu0 %v8728_v55  ;;  %3292 = vmatpush1.bf16.msra.mxu1 %v8731_v43 }
 0x56a   :  { %v6293_v0 = vpop.eup %6292  ;;  %3250 = vmatprep.subr.bf16.mxu0 %v8734_v38  ;;  %3293 = vmatprep.subr.bf16.mxu1 %v8737_v23 }
 0x56b   :  { %v3084_v62 = vmul.f32 %v6293_v0, %v6291_v13  ;;  %v6295_v59 = vpop.eup %6294  ;;  %v8790_v13 = vld [vmem:[#allocation8 + $0x40] ss:$16 sps:$4 sm:$0xff]   ;;  %v8793_v0 = vld [vmem:[#allocation8 + $0x48] ss:$16 sps:$4 sm:$0xff]  }
 0x56c   :  { %v6297_v50 = vpop.eup %6296  ;;  %10618 = vst [vmem:[#allocation116_spill] sm:$0xff] %v8790_v13  ;;  %10619 = vst [vmem:[#allocation117_spill] sm:$0xff] %v8793_v0 }
 0x56d   :  { %3251 = vmatpush1.bf16.msra.mxu0 %v8740_v36  ;;  %3294 = vmatpush1.bf16.msra.mxu1 %v8743_v32  ;;  %v3085_v31 = vmul.f32 %v6297_v50, %v6295_v59  ;;  %v8755_v14 = vsel %vm3112_vm10, %v3084_v62, %v8547_v41  ;;  %v8770_v41 = vld [vmem:[#allocation8 + $0x24] ss:$16 sps:$4 sm:$0xff]   ;;  %v8799_v59 = vld [vmem:[#allocation8 + $0x6c] ss:$16 sps:$4 sm:$0xff]   ;;  %v8802_v50 = vld [vmem:[#allocation8 + $0x60] ss:$16 sps:$4 sm:$0xff]  }
 0x56e   :  { %3467 = vmatprep.subr.bf16.mxu0 %v8746_v21  ;;  %3510 = vmatprep.subr.bf16.mxu1 %v8749_v5  ;;  %10608 = vst [vmem:[#allocation107_spill] sm:$0xff] %v8755_v14  ;;  %10612 = vst [vmem:[#allocation98_spill] sm:$0xff] %v8770_v41  ;;  %v8796_v62 = vld [vmem:[#allocation8 + $0x64] ss:$16 sps:$4 sm:$0xff]  }
 0x56f   :  { %v8760_v19 = vsel %vm3113_vm13, %v3085_v31, %v8552_v56  ;;  %v8778_v56 = vld [vmem:[#allocation8 + $0x20] ss:$16 sps:$4 sm:$0xff]   ;;  %10620 = vst [vmem:[#allocation118_spill] sm:$0xff] %v8796_v62  ;;  %10621 = vst [vmem:[#allocation119_spill] sm:$0xff] %v8799_v59  ;;  %v8805_v31 = vld [vmem:[#allocation8 + $0x68] ss:$16 sps:$4 sm:$0xff]  }
 0x570   :  { %10609 = vst [vmem:[#allocation108_spill] sm:$0xff] %v8760_v19  ;;  %v3119_v7 = vpack.c.bf16 %v8760_v19, %v8755_v14  ;;  %10614 = vst [vmem:[#allocation112_spill] sm:$0xff] %v8778_v56 }
 0x571   :  { %10622 = vst [vmem:[#allocation120_spill] sm:$0xff] %v8802_v50  ;;  %10623 = vst [vmem:[#allocation121_spill] sm:$0xff] %v8805_v31 }
 0x572   :  { %3269 = vmatmul.mubr.bf16.vlgmr.msra.gmra.mrb[132].mxu0 %v3119_v7  ;;  %3312 = vmatmul.mubr.bf16.vlgmr.msra.gmra.mrb[132].mxu1 %v3119_v7  ;;  %v8808_v7 = vld [vmem:[#allocation8 + $0x84] ss:$16 sps:$4 sm:$0xff]  }
 0x573   :  { %3468 = vmatpush1.bf16.msra.mxu0 %v8764_v22  ;;  %3511 = vmatpush1.bf16.msra.mxu1 %v8767_v25  ;;  %10624 = vst [vmem:[#allocation122_spill] sm:$0xff] %v8808_v7 }
 0x574   :  { %3469 = vmatprep.subr.bf16.mxu0 %v8770_v41  ;;  %3512 = vmatprep.subr.bf16.mxu1 %v8773_v24 }
 0x575   :  { %3499 = vmatprep.mubr.bf16.mxu0 %v10441_v18  ;;  %3542 = vmatprep.mubr.bf16.mxu1 %v10441_v18 }
 0x577   :  { %3470 = vmatpush1.bf16.msra.mxu0 %v8778_v56  ;;  %3513 = vmatpush1.bf16.msra.mxu1 %v8781_v52 }
 0x578   :  { %3471 = vmatprep.subr.bf16.mxu0 %v8784_v3  ;;  %3514 = vmatprep.subr.bf16.mxu1 %v8787_v33 }
 0x57b   :  { %3472 = vmatpush1.bf16.msra.mxu0 %v8790_v13  ;;  %3515 = vmatpush1.bf16.msra.mxu1 %v8793_v0 }
 0x57c   :  { %3473 = vmatprep.subr.bf16.mxu0 %v8796_v62  ;;  %3516 = vmatprep.subr.bf16.mxu1 %v8799_v59  ;;  %v10645_v59 = vld [vmem:[#allocation27_spill] sm:$0xff] }
 0x57d   :  { %v3130_v62 = vunpack.c.l.bf16 %v10645_v59  ;;  %v3134_v25 = vunpack.c.h.bf16 %v10645_v59  ;;  %v8871_v59 = vpop.permute.xlu0 %3425 }
 0x57e   :  { %10646 = vst [vmem:[#allocation140_spill] sm:$0xff] %v8871_v59  ;;  %vm3430_vm9 = vcmp.eq.s32.totalorder %v8871_v59, 1  ;;  %v10684_v59 = vld [vmem:[#allocation128_spill] sm:$0xff] }
 0x57f   :  { %3474 = vmatpush1.bf16.msra.mxu0 %v8802_v50  ;;  %3517 = vmatpush1.bf16.msra.mxu1 %v8805_v31  ;;  %v10644_v50 = vld [vmem:[#allocation25_spill] sm:$0xff] }
 0x580   :  { %3475 = vmatprep.subr.bf16.mxu0 %v8808_v7  ;;  %3518 = vmatprep.subr.bf16.mxu1 %v8811_v26  ;;  %v10643_v26 = vld [vmem:[#allocation26_spill] sm:$0xff]  ;;  %v3132_v41 = vunpack.c.h.bf16 %v10644_v50 }
 0x581   :  { %v3133_v3 = vunpack.c.h.bf16 %v10643_v26 }
 0x583   :  { %3476 = vmatpush1.bf16.msra.mxu0 %v8814_v17  ;;  %3519 = vmatpush1.bf16.msra.mxu1 %v8817_v16  ;;  %v8835_v16 = vld [vmem:[#allocation8 + $0xcc] ss:$16 sps:$4 sm:$0xff]  }
 0x584   :  { %3477 = vmatprep.subr.bf16.mxu0 %v8820_v27  ;;  %3520 = vmatprep.subr.bf16.mxu1 %v8823_v40  ;;  %10633 = vst [vmem:[#allocation131_spill] sm:$0xff] %v8835_v16  ;;  %v8838_v27 = vld [vmem:[#allocation8 + $0xc0] ss:$16 sps:$4 sm:$0xff]   ;;  %v8841_v40 = vld [vmem:[#allocation8 + $0xc8] ss:$16 sps:$4 sm:$0xff]  }
 0x585   :  { %10634 = vst [vmem:[#allocation132_spill] sm:$0xff] %v8838_v27  ;;  %10635 = vst [vmem:[#allocation133_spill] sm:$0xff] %v8841_v40 }
 0x587   :  { %3478 = vmatpush1.bf16.msra.mxu0 %v8826_v6  ;;  %3521 = vmatpush1.bf16.msra.mxu1 %v8829_v58  ;;  %v8844_v6 = vld [vmem:[#allocation8 + $0xe4] ss:$16 sps:$4 sm:$0xff]   ;;  %v8847_v58 = vld [vmem:[#allocation8 + $0xec] ss:$16 sps:$4 sm:$0xff]  }
 0x588   :  { %3479 = vmatprep.subr.bf16.mxu0 %v8832_v4  ;;  %3522 = vmatprep.subr.bf16.mxu1 %v8835_v16  ;;  %10636 = vst [vmem:[#allocation134_spill] sm:$0xff] %v8844_v6  ;;  %10637 = vst [vmem:[#allocation135_spill] sm:$0xff] %v8847_v58  ;;  %v8850_v4 = vld [vmem:[#allocation8 + $0xe0] ss:$16 sps:$4 sm:$0xff]   ;;  %v8853_v16 = vld [vmem:[#allocation8 + $0xe8] ss:$16 sps:$4 sm:$0xff]  }
 0x589   :  { %10638 = vst [vmem:[#allocation136_spill] sm:$0xff] %v8850_v4  ;;  %10639 = vst [vmem:[#allocation137_spill] sm:$0xff] %v8853_v16 }
 0x58b   :  { %3480 = vmatpush1.bf16.msra.mxu0 %v8838_v27  ;;  %3523 = vmatpush1.bf16.msra.mxu1 %v8841_v40  ;;  %v8856_v27 = vld [vmem:[#allocation9 + $0x4] ss:$16 sps:$4 sm:$0xff]   ;;  %v8859_v40 = vld [vmem:[#allocation9 + $0xc] ss:$16 sps:$4 sm:$0xff]  }
 0x58c   :  { %3481 = vmatprep.subr.bf16.mxu0 %v8844_v6  ;;  %3524 = vmatprep.subr.bf16.mxu1 %v8847_v58  ;;  %10640 = vst [vmem:[#allocation138_spill] sm:$0xff] %v8856_v27  ;;  %10641 = vst [vmem:[#allocation139_spill] sm:$0xff] %v8859_v40  ;;  %v10642_v6 = vld [vmem:[#allocation24_spill] sm:$0xff]  ;;  %v3129_v58 = vunpack.c.l.bf16 %v10643_v26 }
 0x58d   :  { %v3127_v17 = vunpack.c.l.bf16 %v10642_v6 }
 0x58f   :  { %3482 = vmatpush1.bf16.msra.mxu0 %v8850_v4  ;;  %3525 = vmatpush1.bf16.msra.mxu1 %v8853_v16  ;;  %v3128_v4 = vunpack.c.l.bf16 %v10644_v50 }
 0x590   :  { %3568 = vmatprep.subr.bf16.mxu0 %v8856_v27  ;;  %3611 = vmatprep.subr.bf16.mxu1 %v8859_v40  ;;  %v3131_v27 = vunpack.c.h.bf16 %v10642_v6 }
 0x623   :  { %v3169_v7 = vpop.f32.mrb[128].mxu0  ;;  %v3212_v31 = vpop.f32.mrb[128].mxu1 }
 0x624   :  { %v3170_v0 = vadd.f32 %v3169_v7, %v3127_v17  ;;  %v3213_v16 = vadd.f32 %v3212_v31, %v3129_v58  ;;  %v3171_v13 = vpop.f32.mrb[129].mxu0  ;;  %v3214_v33 = vpop.f32.mrb[129].mxu1 }
 0x625   :  { %v3172_v52 = vadd.f32 %v3171_v13, %v3128_v4  ;;  %v3215_v40 = vadd.f32 %v3214_v33, %v3130_v62  ;;  %v3173_v56 = vpop.f32.mrb[130].mxu0  ;;  %v3216_v24 = vpop.f32.mrb[130].mxu1 }
 0x626   :  { %v5824_v22 = vmul.f32 -1.442695, %v3170_v0  ;;  %v3174_v19 = vadd.f32 %v3173_v56, %v3131_v27  ;;  %v3217_v14 = vadd.f32 %v3216_v24, %v3133_v3  ;;  %v3175_v5 = vpop.f32.mrb[131].mxu0  ;;  %v3218_v17 = vpop.f32.mrb[131].mxu1  ;;  %v5826_v26 = vmul.f32 -1.442695, %v3213_v16 }
 0x627   :  { %v5825_v58 = vmul.f32 -1.442695, %v3172_v52  ;;  %v3176_v31 = vadd.f32 %v3175_v5, %v3132_v41  ;;  %v3219_v7 = vadd.f32 %v3218_v17, %v3134_v25 }
 0x628   :  { %6298 = vpow2.f32 %v5824_v22  ;;  %v5827_v6 = vmul.f32 -1.442695, %v3174_v19  ;;  %v5829_v4 = vmul.f32 -1.442695, %v3217_v14 }
 0x629   :  { %v5828_v21 = vmul.f32 -1.442695, %v3176_v31  ;;  %6300 = vpow2.f32 %v5825_v58 }
 0x62a   :  { %6302 = vpow2.f32 %v5827_v6 }
 0x62b   :  { %6304 = vpow2.f32 %v5828_v21 }
 0x62c   :  { %6306 = vtanh.f32 %v3215_v40 }
 0x62d   :  { %6308 = vpow2.f32 %v5826_v26  ;;  %v8875_v26 = vpop.permute.xlu1 %3428 }
 0x62e   :  { %6310 = vpow2.f32 %v5829_v4  ;;  %10648 = vst [vmem:[#allocation141_spill] sm:$0xff] %v8875_v26  ;;  %vm3431_vm8 = vcmp.eq.s32.totalorder %v8875_v26, 1  ;;  %v10683_v26 = vld [vmem:[#allocation127_spill] sm:$0xff] }
 0x632   :  { %v6299_v33 = vpop.eup %6298 }
 0x633   :  { %v3340_v13 = vadd.f32 1.0, %v6299_v33  ;;  %v6301_v0 = vpop.eup %6300  ;;  %v10649_v33 = vld [vmem:[#allocation86_spill] sm:$0xff] }
 0x634   :  { %v6303_v27 = vpop.eup %6302  ;;  %v3341_v24 = vadd.f32 1.0, %v6301_v0 }
 0x635   :  { %6312 = vrcp.f32 %v3340_v13  ;;  %v3343_v56 = vadd.f32 1.0, %v6303_v27  ;;  %v6305_v5 = vpop.eup %6304  ;;  %v3230_v13 = vunpack.c.l.bf16 %v10649_v33 }
 0x636   :  { %6314 = vtanh.f32 %v3219_v7  ;;  %v3344_v19 = vadd.f32 1.0, %v6305_v5  ;;  %v6307_v22 = vpop.eup %6306  ;;  %v10647_v7 = vld [vmem:[#allocation84_spill] sm:$0xff] }
 0x637   :  { %6316 = vrcp.f32 %v3341_v24  ;;  %v6309_v21 = vpop.eup %6308  ;;  %v3228_v6 = vunpack.c.l.bf16 %v10647_v7  ;;  %v3232_v0 = vunpack.c.h.bf16 %v10647_v7 }
 0x638   :  { %6318 = vrcp.f32 %v3343_v56  ;;  %v6311_v16 = vpop.eup %6310  ;;  %v3342_v52 = vadd.f32 1.0, %v6309_v21  ;;  %v10650_v56 = vld [vmem:[#allocation85_spill] sm:$0xff] }
 0x639   :  { %6320 = vrcp.f32 %v3344_v19  ;;  %v3345_v31 = vadd.f32 1.0, %v6311_v16  ;;  %v3229_v5 = vunpack.c.l.bf16 %v10650_v56  ;;  %v10651_v19 = vld [vmem:[#allocation87_spill] sm:$0xff]  ;;  %v3233_v32 = vunpack.c.h.bf16 %v10650_v56 }
 0x63a   :  { %6322 = vrcp.f32 %v3342_v52  ;;  %v3234_v52 = vunpack.c.h.bf16 %v10649_v33 }
 0x63f   :  { %v6313_v14 = vpop.eup %6312 }
 0x640   :  { %v6315_v25 = vpop.eup %6314  ;;  %v3362_v40 = vmul.f32 %v6313_v14, %v6307_v22  ;;  %v3231_v22 = vunpack.c.l.bf16 %v10651_v19 }
 0x641   :  { %v6317_v41 = vpop.eup %6316 }
 0x642   :  { %v6319_v3 = vpop.eup %6318  ;;  %v3360_v62 = vmul.f32 %v6317_v41, %v8613_v54 }
 0x643   :  { %v3363_v50 = vmul.f32 %v6319_v3, %v6315_v25  ;;  %v6321_v17 = vpop.eup %6320 }
 0x644   :  { %v3364_v58 = vadd.f32 %v3362_v40, %v3360_v62  ;;  %v3361_v4 = vmul.f32 %v6321_v17, %v8622_v34 }
 0x645   :  { %v3270_v27 = vpop.f32.mrb[132].mxu0  ;;  %v3313_v24 = vpop.f32.mrb[132].mxu1 }
 0x646   :  { %6324 = vtanh.f32 %v3364_v58  ;;  %v8885_v21 = vsel %vm3430_vm9, %v3364_v58, %v8613_v54  ;;  %v3365_v16 = vadd.f32 %v3363_v50, %v3361_v4  ;;  %v3271_v14 = vadd.f32 %v3270_v27, %v3228_v6  ;;  %v3272_v40 = vpop.f32.mrb[133].mxu0  ;;  %v3315_v41 = vpop.f32.mrb[133].mxu1 }
 0x647   :  { %v3314_v25 = vadd.f32 %v3313_v24, %v3230_v13  ;;  %6326 = vrcp.f32 %v3345_v31  ;;  %v3273_v3 = vadd.f32 %v3272_v40, %v3229_v5  ;;  %v3316_v62 = vadd.f32 %v3315_v41, %v3231_v22  ;;  %v3274_v17 = vpop.f32.mrb[134].mxu0  ;;  %v3317_v7 = vpop.f32.mrb[134].mxu1 }
 0x648   :  { %6328 = vtanh.f32 %v3365_v16  ;;  %v5830_v36 = vmul.f32 -1.442695, %v3271_v14  ;;  %v3275_v23 = vadd.f32 %v3274_v17, %v3232_v0  ;;  %v3276_v38 = vpop.f32.mrb[135].mxu0  ;;  %v3235_v54 = vunpack.c.h.bf16 %v10651_v19  ;;  %v3319_v50 = vpop.f32.mrb[135].mxu1 }
 0x649   :  { %v5831_v58 = vmul.f32 -1.442695, %v3273_v3  ;;  %v3318_v6 = vadd.f32 %v3317_v7, %v3234_v52  ;;  %v3277_v4 = vadd.f32 %v3276_v38, %v3233_v32  ;;  %v8894_v13 = vsel %vm3431_vm8, %v3365_v16, %v8622_v34  ;;  %v6323_v0 = vpop.eup %6322 }
 0x64a   :  { %6330 = vpow2.f32 %v5830_v36  ;;  %v5833_v31 = vmul.f32 -1.442695, %v3275_v23  ;;  %v3320_v33 = vadd.f32 %v3319_v50, %v3235_v54  ;;  %v5832_v19 = vmul.f32 -1.442695, %v3314_v25 }
 0x64b   :  { %v5834_v27 = vmul.f32 -1.442695, %v3277_v4  ;;  %6332 = vpow2.f32 %v5831_v58  ;;  %v5835_v14 = vmul.f32 -1.442695, %v3318_v6 }
 0x64c   :  { %6334 = vpow2.f32 %v5833_v31 }
 0x64d   :  { %6336 = vpow2.f32 %v5834_v27 }
 0x64e   :  { %6338 = vtanh.f32 %v3316_v62 }
 0x64f   :  { %6340 = vpow2.f32 %v5832_v19 }
 0x650   :  { %v6325_v24 = vpop.eup %6324  ;;  %6342 = vpow2.f32 %v5835_v14 }
 0x651   :  { %v3368_v56 = vmul.f32 %v6325_v24, %v6323_v0  ;;  %v6327_v5 = vpop.eup %6326  ;;  %v8925_v0 = vpop.permute.xlu0 %3439 }
 0x652   :  { %v6329_v22 = vpop.eup %6328  ;;  %10652 = vst [vmem:[#allocation142_spill] sm:$0xff] %v8925_v0  ;;  %vm3444_vm12 = vcmp.eq.s32.totalorder %v8925_v0, 1  ;;  %v10686_v0 = vld [vmem:[#allocation130_spill] sm:$0xff] }
 0x653   :  { %v3369_v38 = vmul.f32 %v6329_v22, %v6327_v5  ;;  %v8899_v34 = vsel %vm3430_vm9, %v3368_v56, %v8627_v51  ;;  %v8936_v22 = vpop.permute.xlu1 %3442 }
 0x654   :  { %v6331_v36 = vpop.eup %6330  ;;  %10653 = vst [vmem:[#allocation143_spill] sm:$0xff] %v8936_v22  ;;  %vm3445_vm11 = vcmp.eq.s32.totalorder %v8936_v22, 1  ;;  %v10685_v22 = vld [vmem:[#allocation129_spill] sm:$0xff] }
 0x655   :  { %v3388_v23 = vadd.f32 1.0, %v6331_v36  ;;  %v8904_v32 = vsel %vm3431_vm8, %v3369_v38, %v8632_v12  ;;  %v6333_v16 = vpop.eup %6332 }
 0x656   :  { %v3450_v25 = vpack.c.bf16 %v8904_v32, %v8899_v34  ;;  %v6335_v40 = vpop.eup %6334  ;;  %v3389_v41 = vadd.f32 1.0, %v6333_v16  ;;  %v10655_v16 = vld [vmem:[#allocation94_spill] sm:$0xff] }
 0x657   :  { %6344 = vrcp.f32 %v3388_v23  ;;  %v3391_v52 = vadd.f32 1.0, %v6335_v40  ;;  %v6337_v3 = vpop.eup %6336  ;;  %v10654_v23 = vld [vmem:[#allocation92_spill] sm:$0xff] }
 0x658   :  { %6346 = vtanh.f32 %v3320_v33  ;;  %3500 = vmatmul.mubr.bf16.vlgmr.msra.gmra.mrb[136].mxu0 %v3450_v25  ;;  %3543 = vmatmul.mubr.bf16.vlgmr.msra.gmra.mrb[136].mxu1 %v3450_v25  ;;  %v3392_v51 = vadd.f32 1.0, %v6337_v3  ;;  %v6339_v12 = vpop.eup %6338 }
 0x659   :  { %6348 = vrcp.f32 %v3389_v41  ;;  %3569 = vmatpush1.bf16.msra.mxu0 %v8636_v39  ;;  %3612 = vmatpush1.bf16.msra.mxu1 %v8639_v8  ;;  %v6341_v62 = vpop.eup %6340  ;;  %v10656_v41 = vld [vmem:[#allocation93_spill] sm:$0xff] }
 0x65a   :  { %6350 = vrcp.f32 %v3391_v52  ;;  %3570 = vmatprep.subr.bf16.mxu0 %v8642_v45  ;;  %3613 = vmatprep.subr.bf16.mxu1 %v8645_v46  ;;  %v6343_v17 = vpop.eup %6342  ;;  %v3390_v6 = vadd.f32 1.0, %v6341_v62  ;;  %v10657_v52 = vld [vmem:[#allocation95_spill] sm:$0xff] }
 0x65b   :  { %3600 = vmatprep.mubr.bf16.mxu0 %v10441_v18  ;;  %3643 = vmatprep.mubr.bf16.mxu1 %v10441_v18  ;;  %6352 = vrcp.f32 %v3392_v51  ;;  %v3393_v56 = vadd.f32 1.0, %v6343_v17  ;;  %v10658_v51 = vld [vmem:[#allocation104_spill] sm:$0xff]  ;;  %v10660_v62 = vld [vmem:[#allocation107_spill] sm:$0xff] }
 0x65c   :  { %6354 = vrcp.f32 %v3390_v6  ;;  %v10665_v6 = vld [vmem:[#allocation111_spill] sm:$0xff] }
 0x65d   :  { %3571 = vmatpush1.bf16.msra.mxu0 %v8650_v49  ;;  %3614 = vmatpush1.bf16.msra.mxu1 %v8653_v47 }
 0x65e   :  { %3572 = vmatprep.subr.bf16.mxu0 %v8656_v44  ;;  %3615 = vmatprep.subr.bf16.mxu1 %v8659_v60 }
 0x661   :  { %v6345_v7 = vpop.eup %6344  ;;  %3573 = vmatpush1.bf16.msra.mxu0 %v8662_v42  ;;  %3616 = vmatpush1.bf16.msra.mxu1 %v8665_v28 }
 0x662   :  { %v6347_v54 = vpop.eup %6346  ;;  %v3410_v50 = vmul.f32 %v6345_v7, %v6339_v12  ;;  %3574 = vmatprep.subr.bf16.mxu0 %v8668_v37  ;;  %3617 = vmatprep.subr.bf16.mxu1 %v8671_v1  ;;  %v10659_v12 = vld [vmem:[#allocation105_spill] sm:$0xff]  ;;  %v10662_v7 = vld [vmem:[#allocation108_spill] sm:$0xff] }
 0x663   :  { %v6349_v58 = vpop.eup %6348 }
 0x664   :  { %v6351_v4 = vpop.eup %6350  ;;  %v3408_v31 = vmul.f32 %v6349_v58, %v8694_v10  ;;  %v10664_v58 = vld [vmem:[#allocation110_spill] sm:$0xff] }
 0x665   :  { %v3411_v33 = vmul.f32 %v6351_v4, %v6347_v54  ;;  %3575 = vmatpush1.bf16.msra.mxu0 %v8675_v57  ;;  %3618 = vmatpush1.bf16.msra.mxu1 %v8678_v11  ;;  %v6353_v27 = vpop.eup %6352  ;;  %v10666_v4 = vld [vmem:[#allocation98_spill] sm:$0xff] }
 0x666   :  { %v3412_v24 = vadd.f32 %v3410_v50, %v3408_v31  ;;  %3576 = vmatprep.subr.bf16.mxu0 %v8683_v2  ;;  %3619 = vmatprep.subr.bf16.mxu1 %v8686_v63  ;;  %v3409_v5 = vmul.f32 %v6353_v27, %v8714_v9  ;;  %v6355_v38 = vpop.eup %6354  ;;  %v10667_v31 = vld [vmem:[#allocation99_spill] sm:$0xff]  ;;  %v10669_v27 = vld [vmem:[#allocation113_spill] sm:$0xff] }
 0x668   :  { %6356 = vtanh.f32 %v3412_v24  ;;  %v8934_v19 = vsel %vm3444_vm12, %v3412_v24, %v8694_v10  ;;  %v3413_v14 = vadd.f32 %v3411_v33, %v3409_v5  ;;  %v10668_v33 = vld [vmem:[#allocation112_spill] sm:$0xff]  ;;  %v10670_v24 = vld [vmem:[#allocation114_spill] sm:$0xff] }
 0x669   :  { %3577 = vmatpush1.bf16.msra.mxu0 %v8698_v30  ;;  %3620 = vmatpush1.bf16.msra.mxu1 %v8701_v48  ;;  %6358 = vrcp.f32 %v3393_v56  ;;  %v10671_v56 = vld [vmem:[#allocation115_spill] sm:$0xff]  ;;  %v10672_v5 = vld [vmem:[#allocation116_spill] sm:$0xff] }
 0x66a   :  { %3578 = vmatprep.subr.bf16.mxu0 %v8705_v35  ;;  %3621 = vmatprep.subr.bf16.mxu1 %v8708_v29  ;;  %6360 = vtanh.f32 %v3413_v14  ;;  %v8946_v10 = vsel %vm3445_vm11, %v3413_v14, %v8714_v9  ;;  %v10673_v14 = vld [vmem:[#allocation117_spill] sm:$0xff] }
 0x66d   :  { %3579 = vmatpush1.bf16.msra.mxu0 %v8716_v53  ;;  %3622 = vmatpush1.bf16.msra.mxu1 %v8719_v20 }
 0x66e   :  { %3580 = vmatprep.subr.bf16.mxu0 %v8722_v61  ;;  %3623 = vmatprep.subr.bf16.mxu1 %v8725_v15 }
 0x671   :  { %3581 = vmatpush1.bf16.msra.mxu0 %v8728_v55  ;;  %3624 = vmatpush1.bf16.msra.mxu1 %v8731_v43 }
 0x672   :  { %v6357_v36 = vpop.eup %6356  ;;  %3582 = vmatprep.subr.bf16.mxu0 %v10654_v23  ;;  %3625 = vmatprep.subr.bf16.mxu1 %v10655_v16 }
 0x673   :  { %v3416_v9 = vmul.f32 %v6357_v36, %v6355_v38  ;;  %v6359_v25 = vpop.eup %6358  ;;  %v10674_v38 = vld [vmem:[#allocation118_spill] sm:$0xff]  ;;  %v10675_v36 = vld [vmem:[#allocation119_spill] sm:$0xff] }
 0x674   :  { %v6361_v40 = vpop.eup %6360 }
 0x675   :  { %3583 = vmatpush1.bf16.msra.mxu0 %v10656_v41  ;;  %3626 = vmatpush1.bf16.msra.mxu1 %v10657_v52  ;;  %v3417_v3 = vmul.f32 %v6361_v40, %v6359_v25  ;;  %v8963_v17 = vsel %vm3444_vm12, %v3416_v9, %v10660_v62  ;;  %v10676_v9 = vld [vmem:[#allocation120_spill] sm:$0xff]  ;;  %v10677_v25 = vld [vmem:[#allocation121_spill] sm:$0xff]  ;;  %v10678_v40 = vld [vmem:[#allocation122_spill] sm:$0xff] }
 0x676   :  { %3796 = vmatprep.subr.bf16.mxu0 %v10658_v51  ;;  %3839 = vmatprep.subr.bf16.mxu1 %v10659_v12  ;;  %10661 = vst [vmem:[#allocation20_spill] sm:$0xff] %v8963_v17  ;;  %v10680_v62 = vld [vmem:[#allocation124_spill] sm:$0xff] }
 0x677   :  { %v8968_v54 = vsel %vm3445_vm11, %v3417_v3, %v10662_v7  ;;  %v10679_v3 = vld [vmem:[#allocation123_spill] sm:$0xff]  ;;  %v10681_v7 = vld [vmem:[#allocation125_spill] sm:$0xff] }
 0x678   :  { %10663 = vst [vmem:[#allocation22_spill] sm:$0xff] %v8968_v54  ;;  %v3451_v50 = vpack.c.bf16 %v8968_v54, %v8963_v17 }
 0x67a   :  { %3601 = vmatmul.mubr.bf16.vlgmr.msra.gmra.mrb[140].mxu0 %v3451_v50  ;;  %3644 = vmatmul.mubr.bf16.vlgmr.msra.gmra.mrb[140].mxu1 %v3451_v50  ;;  %v10682_v50 = vld [vmem:[#allocation126_spill] sm:$0xff] }
 0x67b   :  { %3797 = vmatpush1.bf16.msra.mxu0 %v10664_v58  ;;  %3840 = vmatpush1.bf16.msra.mxu1 %v10665_v6 }
 0x67c   :  { %3798 = vmatprep.subr.bf16.mxu0 %v10666_v4  ;;  %3841 = vmatprep.subr.bf16.mxu1 %v10667_v31 }
 0x67d   :  { %3828 = vmatprep.mubr.bf16.mxu0 %v10441_v18  ;;  %3871 = vmatprep.mubr.bf16.mxu1 %v10441_v18 }
 0x67f   :  { %3799 = vmatpush1.bf16.msra.mxu0 %v10668_v33  ;;  %3842 = vmatpush1.bf16.msra.mxu1 %v10669_v27 }
 0x680   :  { %3800 = vmatprep.subr.bf16.mxu0 %v10670_v24  ;;  %3843 = vmatprep.subr.bf16.mxu1 %v10671_v56 }
 0x683   :  { %3801 = vmatpush1.bf16.msra.mxu0 %v10672_v5  ;;  %3844 = vmatpush1.bf16.msra.mxu1 %v10673_v14  ;;  %v10698_v14 = vld [vmem:[#allocation29_spill] sm:$0xff]  ;;  %v10699_v5 = vld [vmem:[#allocation31_spill] sm:$0xff] }
 0x684   :  { %3802 = vmatprep.subr.bf16.mxu0 %v10674_v38  ;;  %3845 = vmatprep.subr.bf16.mxu1 %v10675_v36  ;;  %v10697_v36 = vld [vmem:[#allocation30_spill] sm:$0xff]  ;;  %v3464_v4 = vunpack.c.h.bf16 %v10698_v14  ;;  %v3466_v6 = vunpack.c.h.bf16 %v10699_v5 }
 0x687   :  { %3803 = vmatpush1.bf16.msra.mxu0 %v10676_v9  ;;  %3846 = vmatpush1.bf16.msra.mxu1 %v10677_v25  ;;  %v10687_v9 = vld [vmem:[#allocation131_spill] sm:$0xff]  ;;  %v10688_v25 = vld [vmem:[#allocation132_spill] sm:$0xff] }
 0x688   :  { %3804 = vmatprep.subr.bf16.mxu0 %v10678_v40  ;;  %3847 = vmatprep.subr.bf16.mxu1 %v10679_v3  ;;  %v10689_v40 = vld [vmem:[#allocation133_spill] sm:$0xff]  ;;  %v10690_v3 = vld [vmem:[#allocation134_spill] sm:$0xff] }
 0x68b   :  { %3805 = vmatpush1.bf16.msra.mxu0 %v10680_v62  ;;  %3848 = vmatpush1.bf16.msra.mxu1 %v10681_v7  ;;  %v10691_v62 = vld [vmem:[#allocation135_spill] sm:$0xff]  ;;  %v10692_v7 = vld [vmem:[#allocation136_spill] sm:$0xff] }
 0x68c   :  { %3806 = vmatprep.subr.bf16.mxu0 %v10682_v50  ;;  %3849 = vmatprep.subr.bf16.mxu1 %v10683_v26  ;;  %v10693_v50 = vld [vmem:[#allocation137_spill] sm:$0xff]  ;;  %v10694_v26 = vld [vmem:[#allocation138_spill] sm:$0xff] }
 0x68f   :  { %3807 = vmatpush1.bf16.msra.mxu0 %v10684_v59  ;;  %3850 = vmatpush1.bf16.msra.mxu1 %v10685_v22  ;;  %v10695_v59 = vld [vmem:[#allocation139_spill] sm:$0xff]  ;;  %v10696_v22 = vld [vmem:[#allocation28_spill] sm:$0xff] }
 0x690   :  { %3808 = vmatprep.subr.bf16.mxu0 %v10686_v0  ;;  %3851 = vmatprep.subr.bf16.mxu1 %v10687_v9  ;;  %v3459_v0 = vunpack.c.l.bf16 %v10696_v22  ;;  %v3461_v9 = vunpack.c.l.bf16 %v10697_v36 }
 0x693   :  { %3809 = vmatpush1.bf16.msra.mxu0 %v10688_v25  ;;  %3852 = vmatpush1.bf16.msra.mxu1 %v10689_v40  ;;  %v3460_v40 = vunpack.c.l.bf16 %v10698_v14 }
 0x694   :  { %3810 = vmatprep.subr.bf16.mxu0 %v10690_v3  ;;  %3853 = vmatprep.subr.bf16.mxu1 %v10691_v62  ;;  %v3462_v3 = vunpack.c.l.bf16 %v10699_v5 }
 0x697   :  { %3811 = vmatpush1.bf16.msra.mxu0 %v10692_v7  ;;  %3854 = vmatpush1.bf16.msra.mxu1 %v10693_v50  ;;  %v3463_v50 = vunpack.c.h.bf16 %v10696_v22 }
 0x698   :  { %3894 = vmatprep.subr.bf16.mxu0 %v10694_v26  ;;  %3937 = vmatprep.subr.bf16.mxu1 %v10695_v59  ;;  %v3465_v26 = vunpack.c.h.bf16 %v10697_v36 }
 0x72b   :  { %v3501_v38 = vpop.f32.mrb[136].mxu0  ;;  %v3544_v25 = vpop.f32.mrb[136].mxu1 }
 0x72c   :  { %v3502_v56 = vadd.f32 %v3501_v38, %v3459_v0  ;;  %v3545_v62 = vadd.f32 %v3544_v25, %v3461_v9  ;;  %v3503_v24 = vpop.f32.mrb[137].mxu0  ;;  %v3546_v7 = vpop.f32.mrb[137].mxu1 }
 0x72d   :  { %v3504_v27 = vadd.f32 %v3503_v24, %v3460_v40  ;;  %v3547_v59 = vadd.f32 %v3546_v7, %v3462_v3  ;;  %v3505_v33 = vpop.f32.mrb[138].mxu0  ;;  %v3548_v31 = vpop.f32.mrb[138].mxu1 }
 0x72e   :  { %v5836_v58 = vmul.f32 -1.442695, %v3502_v56  ;;  %v3506_v54 = vadd.f32 %v3505_v33, %v3463_v50  ;;  %v3549_v17 = vadd.f32 %v3548_v31, %v3465_v26  ;;  %v3507_v12 = vpop.f32.mrb[139].mxu0  ;;  %v3550_v0 = vpop.f32.mrb[139].mxu1  ;;  %v5838_v24 = vmul.f32 -1.442695, %v3545_v62 }
 0x72f   :  { %v5837_v38 = vmul.f32 -1.442695, %v3504_v27  ;;  %v3508_v9 = vadd.f32 %v3507_v12, %v3464_v4  ;;  %v3551_v25 = vadd.f32 %v3550_v0, %v3466_v6  ;;  %v9015_v7 = vpop.permute.xlu0 %3757 }
 0x730   :  { %6362 = vpow2.f32 %v5836_v58  ;;  %v5839_v22 = vmul.f32 -1.442695, %v3506_v54  ;;  %v5841_v36 = vmul.f32 -1.442695, %v3549_v17  ;;  %vm3762_vm15 = vcmp.eq.s32.totalorder %v9015_v7, 1 }
 0x731   :  { %v5840_v51 = vmul.f32 -1.442695, %v3508_v9  ;;  %6364 = vpow2.f32 %v5837_v38  ;;  %v9318_v7 = vld [vmem:[#allocation8 + $0x24] ss:$16 sps:$4 sm:$0xff]  }
 0x732   :  { %6366 = vpow2.f32 %v5839_v22  ;;  %10761 = vst [vmem:[#allocation27_spill] sm:$0xff] %v9318_v7 }
 0x733   :  { %6368 = vpow2.f32 %v5840_v51 }
 0x734   :  { %6370 = vtanh.f32 %v3547_v59 }
 0x735   :  { %6372 = vpow2.f32 %v5838_v24  ;;  %v9019_v24 = vpop.permute.xlu1 %3760 }
 0x736   :  { %6374 = vpow2.f32 %v5841_v36  ;;  %vm3763_vm14 = vcmp.eq.s32.totalorder %v9019_v24, 1  ;;  %v9321_v24 = vld [vmem:[#allocation8 + $0x2c] ss:$16 sps:$4 sm:$0xff]  }
 0x737   :  { %10762 = vst [vmem:[#allocation84_spill] sm:$0xff] %v9321_v24 }
 0x73a   :  { %v6363_v40 = vpop.eup %6362 }
 0x73b   :  { %v3672_v14 = vadd.f32 1.0, %v6363_v40  ;;  %v6365_v56 = vpop.eup %6364  ;;  %v10701_v40 = vld [vmem:[#allocation82_spill] sm:$0xff] }
 0x73c   :  { %v6367_v26 = vpop.eup %6366  ;;  %v3673_v31 = vadd.f32 1.0, %v6365_v56  ;;  %v10702_v56 = vld [vmem:[#allocation81_spill] sm:$0xff] }
 0x73d   :  { %6376 = vrcp.f32 %v3672_v14  ;;  %v3675_v33 = vadd.f32 1.0, %v6367_v26  ;;  %v6369_v12 = vpop.eup %6368  ;;  %v3562_v14 = vunpack.c.l.bf16 %v10701_v40  ;;  %v3561_v26 = vunpack.c.l.bf16 %v10702_v56 }
 0x73e   :  { %6378 = vtanh.f32 %v3551_v25  ;;  %v3676_v54 = vadd.f32 1.0, %v6369_v12  ;;  %v6371_v58 = vpop.eup %6370  ;;  %v10700_v25 = vld [vmem:[#allocation80_spill] sm:$0xff]  ;;  %v10703_v12 = vld [vmem:[#allocation83_spill] sm:$0xff]  ;;  %v3565_v41 = vunpack.c.h.bf16 %v10702_v56 }
 0x73f   :  { %6380 = vrcp.f32 %v3673_v31  ;;  %v6373_v51 = vpop.eup %6372  ;;  %v3560_v22 = vunpack.c.l.bf16 %v10700_v25 }
 0x740   :  { %6382 = vrcp.f32 %v3675_v33  ;;  %v6375_v6 = vpop.eup %6374  ;;  %v3674_v5 = vadd.f32 1.0, %v6373_v51 }
 0x741   :  { %6384 = vrcp.f32 %v3676_v54  ;;  %v3677_v9 = vadd.f32 1.0, %v6375_v6  ;;  %v3563_v54 = vunpack.c.l.bf16 %v10703_v12 }
 0x742   :  { %6386 = vrcp.f32 %v3674_v5  ;;  %v3566_v5 = vunpack.c.h.bf16 %v10701_v40 }
 0x747   :  { %v6377_v17 = vpop.eup %6376 }
 0x748   :  { %v6379_v4 = vpop.eup %6378  ;;  %v3694_v59 = vmul.f32 %v6377_v17, %v6371_v58  ;;  %v3564_v58 = vunpack.c.h.bf16 %v10700_v25 }
 0x749   :  { %v6381_v27 = vpop.eup %6380 }
 0x74a   :  { %v6383_v3 = vpop.eup %6382  ;;  %v3692_v62 = vmul.f32 %v6381_v27, %v8885_v21 }
 0x74b   :  { %v3695_v50 = vmul.f32 %v6383_v3, %v6379_v4  ;;  %v6385_v0 = vpop.eup %6384 }
 0x74c   :  { %v3696_v38 = vadd.f32 %v3694_v59, %v3692_v62  ;;  %v3693_v36 = vmul.f32 %v6385_v0, %v8894_v13 }
 0x74d   :  { %v3602_v31 = vpop.f32.mrb[140].mxu0  ;;  %v3645_v33 = vpop.f32.mrb[140].mxu1 }
 0x74e   :  { %6388 = vtanh.f32 %v3696_v38  ;;  %v9029_v51 = vsel %vm3762_vm15, %v3696_v38, %v8885_v21  ;;  %v3697_v6 = vadd.f32 %v3695_v50, %v3693_v36  ;;  %v3603_v17 = vadd.f32 %v3602_v31, %v3560_v22  ;;  %v3604_v59 = vpop.f32.mrb[141].mxu0  ;;  %v3647_v27 = vpop.f32.mrb[141].mxu1 }
 0x74f   :  { %v3646_v4 = vadd.f32 %v3645_v33, %v3562_v14  ;;  %6390 = vrcp.f32 %v3677_v9  ;;  %v3605_v3 = vadd.f32 %v3604_v59, %v3561_v26  ;;  %v3648_v62 = vadd.f32 %v3647_v27, %v3563_v54  ;;  %v3606_v0 = vpop.f32.mrb[142].mxu0  ;;  %v3649_v52 = vpop.f32.mrb[142].mxu1 }
 0x750   :  { %6392 = vtanh.f32 %v3697_v6  ;;  %v5842_v25 = vmul.f32 -1.442695, %v3603_v17  ;;  %v3607_v16 = vadd.f32 %v3606_v0, %v3564_v58  ;;  %v3608_v23 = vpop.f32.mrb[143].mxu0  ;;  %v3567_v21 = vunpack.c.h.bf16 %v10703_v12  ;;  %v3651_v50 = vpop.f32.mrb[143].mxu1 }
 0x751   :  { %v5843_v38 = vmul.f32 -1.442695, %v3605_v3  ;;  %v3650_v22 = vadd.f32 %v3649_v52, %v3566_v5  ;;  %v3609_v36 = vadd.f32 %v3608_v23, %v3565_v41  ;;  %v9038_v14 = vsel %vm3763_vm14, %v3697_v6, %v8894_v13  ;;  %v6387_v26 = vpop.eup %6386 }
 0x752   :  { %6394 = vpow2.f32 %v5842_v25  ;;  %v5845_v9 = vmul.f32 -1.442695, %v3607_v16  ;;  %v3652_v40 = vadd.f32 %v3651_v50, %v3567_v21  ;;  %v5844_v54 = vmul.f32 -1.442695, %v3646_v4  ;;  %v9066_v25 = vpop.permute.xlu0 %3771  ;;  %v10708_v50 = vld [vmem:[#allocation104_spill] sm:$0xff] }
 0x753   :  { %v5846_v56 = vmul.f32 -1.442695, %v3609_v36  ;;  %6396 = vpow2.f32 %v5843_v38  ;;  %v5847_v52 = vmul.f32 -1.442695, %v3650_v22  ;;  %vm3776_vm1 = vcmp.eq.s32.totalorder %v9066_v25, 1  ;;  %v10711_v38 = vld [vmem:[#allocation22_spill] sm:$0xff] }
 0x754   :  { %6398 = vpow2.f32 %v5845_v9  ;;  %v10712_v9 = vld [vmem:[#allocation110_spill] sm:$0xff] }
 0x755   :  { %6400 = vpow2.f32 %v5846_v56  ;;  %v10714_v56 = vld [vmem:[#allocation98_spill] sm:$0xff] }
 0x756   :  { %6402 = vtanh.f32 %v3648_v62 }
 0x757   :  { %6404 = vpow2.f32 %v5844_v54  ;;  %v10719_v54 = vld [vmem:[#allocation115_spill] sm:$0xff] }
 0x758   :  { %v6389_v31 = vpop.eup %6388  ;;  %6406 = vpow2.f32 %v5847_v52  ;;  %v10721_v52 = vld [vmem:[#allocation117_spill] sm:$0xff] }
 0x759   :  { %v3700_v33 = vmul.f32 %v6389_v31, %v6387_v26  ;;  %v6391_v12 = vpop.eup %6390  ;;  %v10715_v26 = vld [vmem:[#allocation99_spill] sm:$0xff]  ;;  %v10716_v31 = vld [vmem:[#allocation112_spill] sm:$0xff] }
 0x75a   :  { %v6393_v58 = vpop.eup %6392 }
 0x75b   :  { %v3701_v23 = vmul.f32 %v6393_v58, %v6391_v12  ;;  %v9043_v13 = vsel %vm3762_vm15, %v3700_v33, %v8899_v34  ;;  %v10717_v33 = vld [vmem:[#allocation113_spill] sm:$0xff]  ;;  %v10718_v12 = vld [vmem:[#allocation114_spill] sm:$0xff]  ;;  %v10720_v58 = vld [vmem:[#allocation116_spill] sm:$0xff] }
 0x75c   :  { %v6395_v41 = vpop.eup %6394 }
 0x75d   :  { %v3720_v16 = vadd.f32 1.0, %v6395_v41  ;;  %v9048_v6 = vsel %vm3763_vm14, %v3701_v23, %v8904_v32  ;;  %v6397_v17 = vpop.eup %6396  ;;  %v10722_v23 = vld [vmem:[#allocation118_spill] sm:$0xff]  ;;  %v10723_v41 = vld [vmem:[#allocation119_spill] sm:$0xff] }
 0x75e   :  { %v3782_v4 = vpack.c.bf16 %v9048_v6, %v9043_v13  ;;  %v6399_v59 = vpop.eup %6398  ;;  %v3721_v27 = vadd.f32 1.0, %v6397_v17  ;;  %v10725_v17 = vld [vmem:[#allocation121_spill] sm:$0xff] }
 0x75f   :  { %6408 = vrcp.f32 %v3720_v16  ;;  %v3723_v5 = vadd.f32 1.0, %v6399_v59  ;;  %v6401_v3 = vpop.eup %6400  ;;  %v10724_v16 = vld [vmem:[#allocation120_spill] sm:$0xff]  ;;  %v10727_v59 = vld [vmem:[#allocation123_spill] sm:$0xff] }
 0x760   :  { %6410 = vtanh.f32 %v3652_v40  ;;  %3829 = vmatmul.mubr.bf16.vlgmr.msra.gmra.mrb[144].mxu0 %v3782_v4  ;;  %3872 = vmatmul.mubr.bf16.vlgmr.msra.gmra.mrb[144].mxu1 %v3782_v4  ;;  %v3724_v34 = vadd.f32 1.0, %v6401_v3  ;;  %v6403_v32 = vpop.eup %6402  ;;  %v10713_v40 = vld [vmem:[#allocation111_spill] sm:$0xff]  ;;  %v10726_v4 = vld [vmem:[#allocation122_spill] sm:$0xff] }
 0x761   :  { %6412 = vrcp.f32 %v3721_v27  ;;  %3895 = vmatpush1.bf16.msra.mxu0 %v8636_v39  ;;  %3938 = vmatpush1.bf16.msra.mxu1 %v8639_v8  ;;  %v6405_v39 = vpop.eup %6404  ;;  %v10728_v27 = vld [vmem:[#allocation124_spill] sm:$0xff]  ;;  %v10730_v3 = vld [vmem:[#allocation126_spill] sm:$0xff] }
 0x762   :  { %6414 = vrcp.f32 %v3723_v5  ;;  %3896 = vmatprep.subr.bf16.mxu0 %v8642_v45  ;;  %3939 = vmatprep.subr.bf16.mxu1 %v8645_v46  ;;  %v6407_v8 = vpop.eup %6406  ;;  %v10729_v5 = vld [vmem:[#allocation125_spill] sm:$0xff] }
 0x763   :  { %3926 = vmatprep.mubr.bf16.mxu0 %v10441_v18  ;;  %3969 = vmatprep.mubr.bf16.mxu1 %v10441_v18  ;;  %6416 = vrcp.f32 %v3724_v34  ;;  %v3725_v21 = vadd.f32 1.0, %v6407_v8  ;;  %v10731_v34 = vld [vmem:[#allocation127_spill] sm:$0xff]  ;;  %v10734_v8 = vld [vmem:[#allocation130_spill] sm:$0xff] }
 0x765   :  { %3897 = vmatpush1.bf16.msra.mxu0 %v8650_v49  ;;  %3940 = vmatpush1.bf16.msra.mxu1 %v8653_v47  ;;  %v3722_v47 = vadd.f32 1.0, %v6405_v39  ;;  %v10733_v39 = vld [vmem:[#allocation129_spill] sm:$0xff] }
 0x766   :  { %3898 = vmatprep.subr.bf16.mxu0 %v8656_v44  ;;  %3941 = vmatprep.subr.bf16.mxu1 %v8659_v60 }
 0x767   :  { %6418 = vrcp.f32 %v3722_v47  ;;  %v10739_v47 = vld [vmem:[#allocation135_spill] sm:$0xff] }
 0x769   :  { %v6409_v62 = vpop.eup %6408  ;;  %3899 = vmatpush1.bf16.msra.mxu0 %v8662_v42  ;;  %3942 = vmatpush1.bf16.msra.mxu1 %v8665_v28 }
 0x76a   :  { %v6411_v45 = vpop.eup %6410  ;;  %v3742_v46 = vmul.f32 %v6409_v62, %v6403_v32  ;;  %3900 = vmatprep.subr.bf16.mxu0 %v8668_v37  ;;  %3943 = vmatprep.subr.bf16.mxu1 %v8671_v1  ;;  %v9074_v37 = vpop.permute.xlu1 %3774  ;;  %v10732_v32 = vld [vmem:[#allocation128_spill] sm:$0xff]  ;;  %v10735_v62 = vld [vmem:[#allocation131_spill] sm:$0xff] }
 0x76b   :  { %v6413_v49 = vpop.eup %6412  ;;  %vm3777_vm0 = vcmp.eq.s32.totalorder %v9074_v37, 1 }
 0x76c   :  { %v6415_v0 = vpop.eup %6414  ;;  %v3740_v44 = vmul.f32 %v6413_v49, %v8934_v19  ;;  %v10738_v49 = vld [vmem:[#allocation134_spill] sm:$0xff] }
 0x76d   :  { %v3743_v60 = vmul.f32 %v6415_v0, %v6411_v45  ;;  %3901 = vmatpush1.bf16.msra.mxu0 %v8675_v57  ;;  %3944 = vmatpush1.bf16.msra.mxu1 %v8678_v11  ;;  %v6417_v42 = vpop.eup %6416  ;;  %v10736_v45 = vld [vmem:[#allocation132_spill] sm:$0xff] }
 0x76e   :  { %v3744_v28 = vadd.f32 %v3742_v46, %v3740_v44  ;;  %3902 = vmatprep.subr.bf16.mxu0 %v8683_v2  ;;  %3945 = vmatprep.subr.bf16.mxu1 %v8686_v63  ;;  %v3741_v1 = vmul.f32 %v6417_v42, %v8946_v10  ;;  %v10737_v46 = vld [vmem:[#allocation133_spill] sm:$0xff]  ;;  %v10740_v0 = vld [vmem:[#allocation136_spill] sm:$0xff]  ;;  %v10743_v42 = vld [vmem:[#allocation139_spill] sm:$0xff] }
 0x76f   :  { %v10741_v44 = vld [vmem:[#allocation137_spill] sm:$0xff] }
 0x770   :  { %6420 = vtanh.f32 %v3744_v28  ;;  %v9080_v57 = vsel %vm3776_vm1, %v3744_v28, %v8934_v19  ;;  %v3745_v11 = vadd.f32 %v3743_v60, %v3741_v1  ;;  %v10742_v60 = vld [vmem:[#allocation138_spill] sm:$0xff]  ;;  %v10744_v28 = vld [vmem:[#allocation32_spill] sm:$0xff] }
 0x771   :  { %3903 = vmatpush1.bf16.msra.mxu0 %v8698_v30  ;;  %3946 = vmatpush1.bf16.msra.mxu1 %v8701_v48  ;;  %6422 = vrcp.f32 %v3725_v21  ;;  %v6419_v63 = vpop.eup %6418  ;;  %v10704_v48 = vld [vmem:[#allocation92_spill] sm:$0xff]  ;;  %v3788_v21 = vunpack.c.l.bf16 %v10744_v28  ;;  %v10745_v1 = vld [vmem:[#allocation34_spill] sm:$0xff] }
 0x772   :  { %3904 = vmatprep.subr.bf16.mxu0 %v8705_v35  ;;  %3947 = vmatprep.subr.bf16.mxu1 %v8708_v29  ;;  %6424 = vtanh.f32 %v3745_v11  ;;  %v9090_v2 = vsel %vm3777_vm0, %v3745_v11, %v8946_v10  ;;  %v10705_v35 = vld [vmem:[#allocation94_spill] sm:$0xff]  ;;  %v3790_v11 = vunpack.c.l.bf16 %v10745_v1 }
 0x775   :  { %3905 = vmatpush1.bf16.msra.mxu0 %v8716_v53  ;;  %3948 = vmatpush1.bf16.msra.mxu1 %v8719_v20  ;;  %v10706_v53 = vld [vmem:[#allocation93_spill] sm:$0xff]  ;;  %v10707_v20 = vld [vmem:[#allocation95_spill] sm:$0xff] }
 0x776   :  { %3906 = vmatprep.subr.bf16.mxu0 %v8722_v61  ;;  %3949 = vmatprep.subr.bf16.mxu1 %v8725_v15  ;;  %v10709_v15 = vld [vmem:[#allocation105_spill] sm:$0xff] }
 0x779   :  { %3907 = vmatpush1.bf16.msra.mxu0 %v8728_v55  ;;  %3950 = vmatpush1.bf16.msra.mxu1 %v8731_v43  ;;  %v10710_v55 = vld [vmem:[#allocation20_spill] sm:$0xff] }
 0x77a   :  { %v6421_v30 = vpop.eup %6420  ;;  %3908 = vmatprep.subr.bf16.mxu0 %v10704_v48  ;;  %3951 = vmatprep.subr.bf16.mxu1 %v10705_v35  ;;  %v10746_v48 = vld [vmem:[#allocation33_spill] sm:$0xff] }
 0x77b   :  { %v3748_v29 = vmul.f32 %v6421_v30, %v6419_v63  ;;  %v6423_v19 = vpop.eup %6422  ;;  %v3789_v35 = vunpack.c.l.bf16 %v10746_v48 }
 0x77c   :  { %v6425_v10 = vpop.eup %6424 }
 0x77d   :  { %3909 = vmatpush1.bf16.msra.mxu0 %v10706_v53  ;;  %3952 = vmatpush1.bf16.msra.mxu1 %v10707_v20  ;;  %v3749_v61 = vmul.f32 %v6425_v10, %v6423_v19  ;;  %v9107_v43 = vsel %vm3776_vm1, %v3748_v29, %v10710_v55  ;;  %v10747_v29 = vld [vmem:[#allocation35_spill] sm:$0xff] }
 0x77e   :  { %4098 = vmatprep.subr.bf16.mxu0 %v10708_v50  ;;  %4141 = vmatprep.subr.bf16.mxu1 %v10709_v15  ;;  %v3791_v19 = vunpack.c.l.bf16 %v10747_v29  ;;  %v3792_v50 = vunpack.c.h.bf16 %v10744_v28  ;;  %v3794_v15 = vunpack.c.h.bf16 %v10745_v1 }
 0x77f   :  { %v9112_v22 = vsel %vm3777_vm0, %v3749_v61, %v10711_v38 }
 0x780   :  { %v3783_v36 = vpack.c.bf16 %v9112_v22, %v9107_v43 }
 0x782   :  { %3927 = vmatmul.mubr.bf16.vlgmr.msra.gmra.mrb[148].mxu0 %v3783_v36  ;;  %3970 = vmatmul.mubr.bf16.vlgmr.msra.gmra.mrb[148].mxu1 %v3783_v36 }
 0x783   :  { %4099 = vmatpush1.bf16.msra.mxu0 %v10712_v9  ;;  %4142 = vmatpush1.bf16.msra.mxu1 %v10713_v40  ;;  %v3793_v40 = vunpack.c.h.bf16 %v10746_v48 }
 0x784   :  { %4100 = vmatprep.subr.bf16.mxu0 %v10714_v56  ;;  %4143 = vmatprep.subr.bf16.mxu1 %v10715_v26  ;;  %v3795_v56 = vunpack.c.h.bf16 %v10747_v29  ;;  %v10749_v29 = vld [vmem:[#allocation78_spill] sm:$0xff] }
 0x785   :  { %4130 = vmatprep.mubr.bf16.mxu0 %v10441_v18  ;;  %4173 = vmatprep.mubr.bf16.mxu1 %v10441_v18 }
 0x787   :  { %4101 = vmatpush1.bf16.msra.mxu0 %v10716_v31  ;;  %4144 = vmatpush1.bf16.msra.mxu1 %v10717_v33 }
 0x788   :  { %4102 = vmatprep.subr.bf16.mxu0 %v10718_v12  ;;  %4145 = vmatprep.subr.bf16.mxu1 %v10719_v54 }
 0x78b   :  { %4103 = vmatpush1.bf16.msra.mxu0 %v10720_v58  ;;  %4146 = vmatpush1.bf16.msra.mxu1 %v10721_v52 }
 0x78c   :  { %4104 = vmatprep.subr.bf16.mxu0 %v10722_v23  ;;  %4147 = vmatprep.subr.bf16.mxu1 %v10723_v41 }
 0x78f   :  { %4105 = vmatpush1.bf16.msra.mxu0 %v10724_v16  ;;  %4148 = vmatpush1.bf16.msra.mxu1 %v10725_v17 }
 0x790   :  { %4106 = vmatprep.subr.bf16.mxu0 %v10726_v4  ;;  %4149 = vmatprep.subr.bf16.mxu1 %v10727_v59 }
 0x793   :  { %4107 = vmatpush1.bf16.msra.mxu0 %v10728_v27  ;;  %4150 = vmatpush1.bf16.msra.mxu1 %v10729_v5 }
 0x794   :  { %4108 = vmatprep.subr.bf16.mxu0 %v10730_v3  ;;  %4151 = vmatprep.subr.bf16.mxu1 %v10731_v34 }
 0x797   :  { %4109 = vmatpush1.bf16.msra.mxu0 %v10732_v32  ;;  %4152 = vmatpush1.bf16.msra.mxu1 %v10733_v39 }
 0x798   :  { %4110 = vmatprep.subr.bf16.mxu0 %v10734_v8  ;;  %4153 = vmatprep.subr.bf16.mxu1 %v10735_v62 }
 0x79b   :  { %4111 = vmatpush1.bf16.msra.mxu0 %v10736_v45  ;;  %4154 = vmatpush1.bf16.msra.mxu1 %v10737_v46 }
 0x79c   :  { %4112 = vmatprep.subr.bf16.mxu0 %v10738_v49  ;;  %4155 = vmatprep.subr.bf16.mxu1 %v10739_v47 }
 0x79f   :  { %4113 = vmatpush1.bf16.msra.mxu0 %v10740_v0  ;;  %4156 = vmatpush1.bf16.msra.mxu1 %v10741_v44 }
 0x7a0   :  { %4196 = vmatprep.subr.bf16.mxu0 %v10742_v60  ;;  %4239 = vmatprep.subr.bf16.mxu1 %v10743_v42 }
 0x833   :  { %v3830_v63 = vpop.f32.mrb[144].mxu0  ;;  %v3873_v30 = vpop.f32.mrb[144].mxu1 }
 0x834   :  { %v3831_v10 = vadd.f32 %v3830_v63, %v3788_v21  ;;  %v3874_v53 = vadd.f32 %v3873_v30, %v3790_v11  ;;  %v3832_v20 = vpop.f32.mrb[145].mxu0  ;;  %v3875_v61 = vpop.f32.mrb[145].mxu1  ;;  %v10748_v30 = vld [vmem:[#allocation76_spill] sm:$0xff] }
 0x835   :  { %v3833_v55 = vadd.f32 %v3832_v20, %v3789_v35  ;;  %v3876_v38 = vadd.f32 %v3875_v61, %v3791_v19  ;;  %v3834_v36 = vpop.f32.mrb[146].mxu0  ;;  %v3877_v9 = vpop.f32.mrb[146].mxu1  ;;  %v3886_v48 = vunpack.c.l.bf16 %v10748_v30  ;;  %v3888_v19 = vunpack.c.l.bf16 %v10749_v29  ;;  %v10750_v61 = vld [vmem:[#allocation77_spill] sm:$0xff] }
 0x836   :  { %v5848_v26 = vmul.f32 -1.442695, %v3831_v10  ;;  %v3835_v31 = vadd.f32 %v3834_v36, %v3792_v50  ;;  %v3878_v33 = vadd.f32 %v3877_v9, %v3794_v15  ;;  %v3836_v12 = vpop.f32.mrb[147].mxu0  ;;  %v3879_v54 = vpop.f32.mrb[147].mxu1  ;;  %v5850_v17 = vmul.f32 -1.442695, %v3874_v53 }
 0x837   :  { %v5849_v58 = vmul.f32 -1.442695, %v3833_v55  ;;  %v3837_v52 = vadd.f32 %v3836_v12, %v3793_v40  ;;  %v3880_v23 = vadd.f32 %v3879_v54, %v3795_v56  ;;  %v3890_v10 = vunpack.c.h.bf16 %v10748_v30  ;;  %v10751_v15 = vld [vmem:[#allocation79_spill] sm:$0xff]  ;;  %v9196_v30 = vld [vmem:[#allocation9 + $0x24] ss:$16 sps:$4 sm:$0xff]  }
 0x838   :  { %6426 = vpow2.f32 %v5848_v26  ;;  %v5851_v41 = vmul.f32 -1.442695, %v3835_v31  ;;  %v5853_v4 = vmul.f32 -1.442695, %v3878_v33  ;;  %v3887_v50 = vunpack.c.l.bf16 %v10750_v61 }
 0x839   :  { %v5852_v16 = vmul.f32 -1.442695, %v3837_v52  ;;  %6428 = vpow2.f32 %v5849_v58  ;;  %v3889_v55 = vunpack.c.l.bf16 %v10751_v15  ;;  %v3892_v31 = vunpack.c.h.bf16 %v10749_v29  ;;  %v9207_v29 = vld [vmem:[#allocation9 + $0x28] ss:$16 sps:$4 sm:$0xff]  }
 0x83a   :  { %6430 = vpow2.f32 %v5851_v41  ;;  %v3891_v52 = vunpack.c.h.bf16 %v10750_v61 }
 0x83b   :  { %6432 = vpow2.f32 %v5852_v16 }
 0x83c   :  { %6434 = vtanh.f32 %v3876_v38 }
 0x83d   :  { %6436 = vpow2.f32 %v5850_v17 }
 0x83e   :  { %6438 = vpow2.f32 %v5853_v4 }
 0x842   :  { %v6427_v59 = vpop.eup %6426 }
 0x843   :  { %v3998_v27 = vadd.f32 1.0, %v6427_v59  ;;  %v6429_v5 = vpop.eup %6428 }
 0x844   :  { %v6431_v3 = vpop.eup %6430  ;;  %v3999_v34 = vadd.f32 1.0, %v6429_v5 }
 0x845   :  { %6440 = vrcp.f32 %v3998_v27  ;;  %v4001_v32 = vadd.f32 1.0, %v6431_v3  ;;  %v6433_v39 = vpop.eup %6432 }
 0x846   :  { %6442 = vtanh.f32 %v3880_v23  ;;  %v4002_v8 = vadd.f32 1.0, %v6433_v39  ;;  %v6435_v62 = vpop.eup %6434 }
 0x847   :  { %6444 = vrcp.f32 %v3999_v34  ;;  %v6437_v45 = vpop.eup %6436 }
 0x848   :  { %6446 = vrcp.f32 %v4001_v32  ;;  %v6439_v46 = vpop.eup %6438  ;;  %v4000_v60 = vadd.f32 1.0, %v6437_v45 }
 0x849   :  { %6448 = vrcp.f32 %v4002_v8  ;;  %v4003_v63 = vadd.f32 1.0, %v6439_v46 }
 0x84a   :  { %6450 = vrcp.f32 %v4000_v60 }
 0x84f   :  { %v6441_v49 = vpop.eup %6440 }
 0x850   :  { %v6443_v47 = vpop.eup %6442  ;;  %v4020_v0 = vmul.f32 %v6441_v49, %v6435_v62 }
 0x851   :  { %v6445_v44 = vpop.eup %6444 }
 0x852   :  { %v6447_v42 = vpop.eup %6446  ;;  %v4018_v28 = vmul.f32 %v6445_v44, %v9029_v51 }
 0x853   :  { %v4021_v21 = vmul.f32 %v6447_v42, %v6443_v47  ;;  %v6449_v1 = vpop.eup %6448 }
 0x854   :  { %v4022_v11 = vadd.f32 %v4020_v0, %v4018_v28  ;;  %v4019_v35 = vmul.f32 %v6449_v1, %v9038_v14  ;;  %v6451_v39 = vpop.eup %6450 }
 0x855   :  { %v3928_v53 = vpop.f32.mrb[148].mxu0  ;;  %v3971_v20 = vpop.f32.mrb[148].mxu1 }
 0x856   :  { %6452 = vtanh.f32 %v4022_v11  ;;  %v9168_v38 = vsel %vm3776_vm1, %v4022_v11, %v9029_v51  ;;  %v4023_v36 = vadd.f32 %v4021_v21, %v4019_v35  ;;  %v3929_v9 = vadd.f32 %v3928_v53, %v3886_v48  ;;  %v3930_v56 = vpop.f32.mrb[149].mxu0  ;;  %v3973_v26 = vpop.f32.mrb[149].mxu1  ;;  %v9199_v48 = vld [vmem:[#allocation9 + $0x2c] ss:$16 sps:$4 sm:$0xff]   ;;  %v9204_v35 = vld [vmem:[#allocation9 + $0x20] ss:$16 sps:$4 sm:$0xff]  }
 0x857   :  { %v3972_v40 = vadd.f32 %v3971_v20, %v3888_v19  ;;  %6454 = vrcp.f32 %v4003_v63  ;;  %v3931_v33 = vadd.f32 %v3930_v56, %v3887_v50  ;;  %v3974_v12 = vadd.f32 %v3973_v26, %v3889_v55  ;;  %v3932_v54 = vpop.f32.mrb[150].mxu0  ;;  %v3975_v58 = vpop.f32.mrb[150].mxu1  ;;  %v9213_v53 = vld [vmem:[#allocation9 + $0x4c] ss:$16 sps:$4 sm:$0xff]   ;;  %v9219_v55 = vld [vmem:[#allocation9 + $0x48] ss:$16 sps:$4 sm:$0xff]  }
 0x858   :  { %6456 = vtanh.f32 %v4023_v36  ;;  %v5854_v23 = vmul.f32 -1.442695, %v3929_v9  ;;  %v3933_v41 = vadd.f32 %v3932_v54, %v3890_v10  ;;  %v3934_v16 = vpop.f32.mrb[151].mxu0  ;;  %v3893_v51 = vunpack.c.h.bf16 %v10751_v15  ;;  %v3977_v17 = vpop.f32.mrb[151].mxu1  ;;  %v9210_v10 = vld [vmem:[#allocation9 + $0x44] ss:$16 sps:$4 sm:$0xff]  }
 0x859   :  { %v5855_v4 = vmul.f32 -1.442695, %v3931_v33  ;;  %v3976_v59 = vadd.f32 %v3975_v58, %v3892_v31  ;;  %v3935_v27 = vadd.f32 %v3934_v16, %v3891_v52  ;;  %v9176_v34 = vsel %vm3777_vm0, %v4023_v36, %v9038_v14  ;;  %v9216_v15 = vld [vmem:[#allocation9 + $0x40] ss:$16 sps:$4 sm:$0xff]   ;;  %v9225_v56 = vld [vmem:[#allocation9 + $0x6c] ss:$16 sps:$4 sm:$0xff]  }
 0x85a   :  { %6458 = vpow2.f32 %v5854_v23  ;;  %v5857_v5 = vmul.f32 -1.442695, %v3933_v41  ;;  %v3978_v3 = vadd.f32 %v3977_v17, %v3893_v51  ;;  %v5856_v46 = vmul.f32 -1.442695, %v3972_v40  ;;  %v9222_v40 = vld [vmem:[#allocation9 + $0x64] ss:$16 sps:$4 sm:$0xff]  }
 0x85b   :  { %v5858_v32 = vmul.f32 -1.442695, %v3935_v27  ;;  %6460 = vpow2.f32 %v5855_v4  ;;  %v5859_v47 = vmul.f32 -1.442695, %v3976_v59  ;;  %v9229_v58 = vld [vmem:[#allocation9 + $0x60] ss:$16 sps:$4 sm:$0xff]  }
 0x85c   :  { %6462 = vpow2.f32 %v5857_v5  ;;  %v9232_v52 = vld [vmem:[#allocation9 + $0x68] ss:$16 sps:$4 sm:$0xff]   ;;  %v9235_v51 = vld [vmem:[#allocation9 + $0x84] ss:$16 sps:$4 sm:$0xff]   ;;  %v9238_v17 = vld [vmem:[#allocation9 + $0x8c] ss:$16 sps:$4 sm:$0xff]  }
 0x85d   :  { %6464 = vpow2.f32 %v5858_v32  ;;  %v9247_v5 = vld [vmem:[#allocation9 + $0x80] ss:$16 sps:$4 sm:$0xff]   ;;  %v9253_v32 = vld [vmem:[#allocation9 + $0xa4] ss:$16 sps:$4 sm:$0xff]  }
 0x85e   :  { %6466 = vtanh.f32 %v3974_v12 }
 0x85f   :  { %6468 = vpow2.f32 %v5856_v46  ;;  %v9273_v46 = vld [vmem:[#allocation9 + $0xcc] ss:$16 sps:$4 sm:$0xff]  }
 0x860   :  { %v6453_v8 = vpop.eup %6452  ;;  %6470 = vpow2.f32 %v5859_v47  ;;  %v9276_v47 = vld [vmem:[#allocation9 + $0xc0] ss:$16 sps:$4 sm:$0xff]  }
 0x861   :  { %v4026_v62 = vmul.f32 %v6453_v8, %v6451_v39  ;;  %v6455_v45 = vpop.eup %6454  ;;  %v9256_v39 = vld [vmem:[#allocation9 + $0xac] ss:$16 sps:$4 sm:$0xff]   ;;  %v9264_v8 = vld [vmem:[#allocation9 + $0xa0] ss:$16 sps:$4 sm:$0xff]  }
 0x862   :  { %v6457_v49 = vpop.eup %6456 }
 0x863   :  { %v4027_v0 = vmul.f32 %v6457_v49, %v6455_v45  ;;  %v9181_v14 = vsel %vm3776_vm1, %v4026_v62, %v9043_v13  ;;  %v9190_v13 = vld [vmem:[#allocation9] ss:$16 sps:$4 sm:$0xff]   ;;  %v9267_v62 = vld [vmem:[#allocation9 + $0xa8] ss:$16 sps:$4 sm:$0xff]   ;;  %v9270_v45 = vld [vmem:[#allocation9 + $0xc4] ss:$16 sps:$4 sm:$0xff]  }
 0x864   :  { %v6459_v44 = vpop.eup %6458 }
 0x865   :  { %v4046_v60 = vadd.f32 1.0, %v6459_v44  ;;  %v9186_v42 = vsel %vm3777_vm0, %v4027_v0, %v9048_v6  ;;  %v6461_v28 = vpop.eup %6460  ;;  %v9193_v6 = vld [vmem:[#allocation9 + $0x8] ss:$16 sps:$4 sm:$0xff]   ;;  %v9282_v44 = vld [vmem:[#allocation9 + $0xe4] ss:$16 sps:$4 sm:$0xff]  }
 0x866   :  { %v4084_v21 = vpack.c.bf16 %v9186_v42, %v9181_v14  ;;  %v6463_v1 = vpop.eup %6462  ;;  %v4047_v11 = vadd.f32 1.0, %v6461_v28 }
 0x867   :  { %6472 = vrcp.f32 %v4046_v60  ;;  %v4049_v63 = vadd.f32 1.0, %v6463_v1  ;;  %v6465_v25 = vpop.eup %6464  ;;  %v9285_v60 = vld [vmem:[#allocation9 + $0xec] ss:$16 sps:$4 sm:$0xff]  }
 0x868   :  { %6474 = vtanh.f32 %v3978_v3  ;;  %4131 = vmatmul.mubr.bf16.vlgmr.msra.gmra.mrb[152].mxu0 %v4084_v21  ;;  %4174 = vmatmul.mubr.bf16.vlgmr.msra.gmra.mrb[152].mxu1 %v4084_v21  ;;  %v4050_v37 = vadd.f32 1.0, %v6465_v25  ;;  %v6467_v19 = vpop.eup %6466  ;;  %v9250_v3 = vld [vmem:[#allocation9 + $0x88] ss:$16 sps:$4 sm:$0xff]   ;;  %10752 = vst [vmem:[#allocation21_spill] sm:$0xff] %v9285_v60 }
 0x869   :  { %6476 = vrcp.f32 %v4047_v11  ;;  %4197 = vmatpush1.bf16.msra.mxu0 %v9190_v13  ;;  %4240 = vmatpush1.bf16.msra.mxu1 %v9193_v6  ;;  %v6469_v20 = vpop.eup %6468  ;;  %v9288_v11 = vld [vmem:[#allocation9 + $0xe0] ss:$16 sps:$4 sm:$0xff]  }
 0x86a   :  { %6478 = vrcp.f32 %v4049_v63  ;;  %4198 = vmatprep.subr.bf16.mxu0 %v9196_v30  ;;  %4241 = vmatprep.subr.bf16.mxu1 %v9199_v48  ;;  %v6471_v61 = vpop.eup %6470  ;;  %v4048_v31 = vadd.f32 1.0, %v6469_v20  ;;  %10753 = vst [vmem:[#allocation23_spill] sm:$0xff] %v9288_v11  ;;  %v9291_v63 = vld [vmem:[#allocation9 + $0xe8] ss:$16 sps:$4 sm:$0xff]  }
 0x86b   :  { %4228 = vmatprep.mubr.bf16.mxu0 %v10441_v18  ;;  %4271 = vmatprep.mubr.bf16.mxu1 %v10441_v18  ;;  %6480 = vrcp.f32 %v4050_v37  ;;  %v4051_v16 = vadd.f32 1.0, %v6471_v61  ;;  %10754 = vst [vmem:[#allocation88_spill] sm:$0xff] %v9291_v63  ;;  %v9294_v37 = vld [vmem:[#allocation8 + $0x4] ss:$16 sps:$4 sm:$0xff]  }
 0x86c   :  { %6482 = vrcp.f32 %v4048_v31  ;;  %10755 = vst [vmem:[#allocation90_spill] sm:$0xff] %v9294_v37  ;;  %v9335_v31 = vld [vmem:[#allocation8 + $0x4c] ss:$16 sps:$4 sm:$0xff]  }
 0x86d   :  { %4199 = vmatpush1.bf16.msra.mxu0 %v9204_v35  ;;  %4242 = vmatpush1.bf16.msra.mxu1 %v9207_v29  ;;  %10766 = vst [vmem:[#allocation107_spill] sm:$0xff] %v9335_v31 }
 0x86e   :  { %4200 = vmatprep.subr.bf16.mxu0 %v9210_v10  ;;  %4243 = vmatprep.subr.bf16.mxu1 %v9213_v53 }
 0x871   :  { %v6473_v50 = vpop.eup %6472  ;;  %4201 = vmatpush1.bf16.msra.mxu0 %v9216_v15  ;;  %4244 = vmatpush1.bf16.msra.mxu1 %v9219_v55 }
 0x872   :  { %v6475_v36 = vpop.eup %6474  ;;  %v4068_v9 = vmul.f32 %v6473_v50, %v6467_v19  ;;  %4202 = vmatprep.subr.bf16.mxu0 %v9222_v40  ;;  %4245 = vmatprep.subr.bf16.mxu1 %v9225_v56  ;;  %v9297_v19 = vld [vmem:[#allocation8 + $0xc] ss:$16 sps:$4 sm:$0xff]  }
 0x873   :  { %v6477_v26 = vpop.eup %6476  ;;  %10756 = vst [vmem:[#allocation89_spill] sm:$0xff] %v9297_v19 }
 0x874   :  { %v6479_v33 = vpop.eup %6478  ;;  %v4066_v12 = vmul.f32 %v6477_v26, %v9080_v57  ;;  %v9332_v26 = vld [vmem:[#allocation8 + $0x44] ss:$16 sps:$4 sm:$0xff]  }
 0x875   :  { %v4069_v54 = vmul.f32 %v6479_v33, %v6475_v36  ;;  %4203 = vmatpush1.bf16.msra.mxu0 %v9229_v58  ;;  %4246 = vmatpush1.bf16.msra.mxu1 %v9232_v52  ;;  %v6481_v23 = vpop.eup %6480  ;;  %v9312_v36 = vld [vmem:[#allocation8] ss:$16 sps:$4 sm:$0xff]   ;;  %10765 = vst [vmem:[#allocation87_spill] sm:$0xff] %v9332_v26 }
 0x876   :  { %v4070_v41 = vadd.f32 %v4068_v9, %v4066_v12  ;;  %4204 = vmatprep.subr.bf16.mxu0 %v9235_v51  ;;  %4247 = vmatprep.subr.bf16.mxu1 %v9238_v17  ;;  %v4067_v4 = vmul.f32 %v6481_v23, %v9090_v2  ;;  %v6483_v49 = vpop.eup %6482  ;;  %10759 = vst [vmem:[#allocation26_spill] sm:$0xff] %v9312_v36  ;;  %v9315_v9 = vld [vmem:[#allocation8 + $0x8] ss:$16 sps:$4 sm:$0xff]   ;;  %v9338_v33 = vld [vmem:[#allocation8 + $0x40] ss:$16 sps:$4 sm:$0xff]  }
 0x877   :  { %10760 = vst [vmem:[#allocation25_spill] sm:$0xff] %v9315_v9  ;;  %10767 = vst [vmem:[#allocation108_spill] sm:$0xff] %v9338_v33  ;;  %v9341_v12 = vld [vmem:[#allocation8 + $0x48] ss:$16 sps:$4 sm:$0xff]   ;;  %v9347_v23 = vld [vmem:[#allocation8 + $0x6c] ss:$16 sps:$4 sm:$0xff]  }
 0x878   :  { %6484 = vtanh.f32 %v4070_v41  ;;  %v9245_v59 = vsel %vm3762_vm15, %v4070_v41, %v9080_v57  ;;  %v4071_v27 = vadd.f32 %v4069_v54, %v4067_v4  ;;  %10768 = vst [vmem:[#allocation28_spill] sm:$0xff] %v9341_v12  ;;  %v9344_v54 = vld [vmem:[#allocation8 + $0x64] ss:$16 sps:$4 sm:$0xff]   ;;  %10770 = vst [vmem:[#allocation29_spill] sm:$0xff] %v9347_v23  ;;  %v9350_v41 = vld [vmem:[#allocation8 + $0x60] ss:$16 sps:$4 sm:$0xff]  }
 0x879   :  { %4205 = vmatpush1.bf16.msra.mxu0 %v9247_v5  ;;  %4248 = vmatpush1.bf16.msra.mxu1 %v9250_v3  ;;  %6486 = vrcp.f32 %v4051_v16  ;;  %10769 = vst [vmem:[#allocation30_spill] sm:$0xff] %v9344_v54  ;;  %10771 = vst [vmem:[#allocation31_spill] sm:$0xff] %v9350_v41  ;;  %v9353_v16 = vld [vmem:[#allocation8 + $0x68] ss:$16 sps:$4 sm:$0xff]   ;;  %v9356_v4 = vld [vmem:[#allocation8 + $0x84] ss:$16 sps:$4 sm:$0xff]  }
 0x87a   :  { %4206 = vmatprep.subr.bf16.mxu0 %v9253_v32  ;;  %4249 = vmatprep.subr.bf16.mxu1 %v9256_v39  ;;  %6488 = vtanh.f32 %v4071_v27  ;;  %v9262_v57 = vsel %vm3763_vm14, %v4071_v27, %v9090_v2  ;;  %v9279_v2 = vld [vmem:[#allocation9 + $0xc8] ss:$16 sps:$4 sm:$0xff]   ;;  %10772 = vst [vmem:[#allocation80_spill] sm:$0xff] %v9353_v16  ;;  %10773 = vst [vmem:[#allocation82_spill] sm:$0xff] %v9356_v4  ;;  %v9359_v27 = vld [vmem:[#allocation8 + $0x8c] ss:$16 sps:$4 sm:$0xff]  }
 0x87b   :  { %10774 = vst [vmem:[#allocation81_spill] sm:$0xff] %v9359_v27 }
 0x87d   :  { %4207 = vmatpush1.bf16.msra.mxu0 %v9264_v8  ;;  %4250 = vmatpush1.bf16.msra.mxu1 %v9267_v62 }
 0x87e   :  { %4208 = vmatprep.subr.bf16.mxu0 %v9270_v45  ;;  %4251 = vmatprep.subr.bf16.mxu1 %v9273_v46 }
 0x881   :  { %4209 = vmatpush1.bf16.msra.mxu0 %v9276_v47  ;;  %4252 = vmatpush1.bf16.msra.mxu1 %v9279_v2 }
 0x882   :  { %v6485_v0 = vpop.eup %6484  ;;  %4210 = vmatprep.subr.bf16.mxu0 %v9282_v44  ;;  %4253 = vmatprep.subr.bf16.mxu1 %v9285_v60 }
 0x883   :  { %v4074_v28 = vmul.f32 %v6485_v0, %v6483_v49  ;;  %v6487_v21 = vpop.eup %6486  ;;  %v9362_v49 = vld [vmem:[#allocation8 + $0x80] ss:$16 sps:$4 sm:$0xff]   ;;  %v9365_v0 = vld [vmem:[#allocation8 + $0x88] ss:$16 sps:$4 sm:$0xff]  }
 0x884   :  { %v6489_v1 = vpop.eup %6488  ;;  %10775 = vst [vmem:[#allocation83_spill] sm:$0xff] %v9362_v49  ;;  %10776 = vst [vmem:[#allocation92_spill] sm:$0xff] %v9365_v0 }
 0x885   :  { %4211 = vmatpush1.bf16.msra.mxu0 %v9288_v11  ;;  %4254 = vmatpush1.bf16.msra.mxu1 %v9291_v63  ;;  %v4075_v25 = vmul.f32 %v6489_v1, %v6487_v21  ;;  %v9303_v20 = vsel %vm3762_vm15, %v4074_v28, %v9107_v43  ;;  %v9326_v43 = vld [vmem:[#allocation8 + $0x20] ss:$16 sps:$4 sm:$0xff]   ;;  %v9368_v28 = vld [vmem:[#allocation8 + $0xa4] ss:$16 sps:$4 sm:$0xff]   ;;  %v9371_v21 = vld [vmem:[#allocation8 + $0xac] ss:$16 sps:$4 sm:$0xff]  }
 0x886   :  { %4400 = vmatprep.subr.bf16.mxu0 %v9294_v37  ;;  %4443 = vmatprep.subr.bf16.mxu1 %v9297_v19  ;;  %10757 = vst [vmem:[#allocation91_spill] sm:$0xff] %v9303_v20  ;;  %10763 = vst [vmem:[#allocation86_spill] sm:$0xff] %v9326_v43  ;;  %v9374_v1 = vld [vmem:[#allocation8 + $0xa0] ss:$16 sps:$4 sm:$0xff]  }
 0x887   :  { %v9308_v61 = vsel %vm3763_vm14, %v4075_v25, %v9112_v22  ;;  %v9329_v22 = vld [vmem:[#allocation8 + $0x28] ss:$16 sps:$4 sm:$0xff]   ;;  %10777 = vst [vmem:[#allocation94_spill] sm:$0xff] %v9368_v28  ;;  %10778 = vst [vmem:[#allocation93_spill] sm:$0xff] %v9371_v21 }
 0x888   :  { %10758 = vst [vmem:[#allocation24_spill] sm:$0xff] %v9308_v61  ;;  %v4085_v50 = vpack.c.bf16 %v9308_v61, %v9303_v20  ;;  %10764 = vst [vmem:[#allocation85_spill] sm:$0xff] %v9329_v22  ;;  %v9377_v25 = vld [vmem:[#allocation8 + $0xa8] ss:$16 sps:$4 sm:$0xff]  }
 0x889   :  { %10779 = vst [vmem:[#allocation95_spill] sm:$0xff] %v9374_v1  ;;  %10780 = vst [vmem:[#allocation104_spill] sm:$0xff] %v9377_v25 }
 0x88a   :  { %4229 = vmatmul.mubr.bf16.vlgmr.msra.gmra.mrb[156].mxu0 %v4085_v50  ;;  %4272 = vmatmul.mubr.bf16.vlgmr.msra.gmra.mrb[156].mxu1 %v4085_v50  ;;  %v9380_v50 = vld [vmem:[#allocation8 + $0xc4] ss:$16 sps:$4 sm:$0xff]  }
 0x88b   :  { %4401 = vmatpush1.bf16.msra.mxu0 %v9312_v36  ;;  %4444 = vmatpush1.bf16.msra.mxu1 %v9315_v9  ;;  %10781 = vst [vmem:[#allocation105_spill] sm:$0xff] %v9380_v50 }
 0x88c   :  { %4402 = vmatprep.subr.bf16.mxu0 %v9318_v7  ;;  %4445 = vmatprep.subr.bf16.mxu1 %v9321_v24 }
 0x88d   :  { %4432 = vmatprep.mubr.bf16.mxu0 %v10441_v18  ;;  %4475 = vmatprep.mubr.bf16.mxu1 %v10441_v18 }
 0x88f   :  { %4403 = vmatpush1.bf16.msra.mxu0 %v9326_v43  ;;  %4446 = vmatpush1.bf16.msra.mxu1 %v9329_v22 }
 0x890   :  { %4404 = vmatprep.subr.bf16.mxu0 %v9332_v26  ;;  %4447 = vmatprep.subr.bf16.mxu1 %v9335_v31 }
 0x893   :  { %4405 = vmatpush1.bf16.msra.mxu0 %v9338_v33  ;;  %4448 = vmatpush1.bf16.msra.mxu1 %v9341_v12 }
 0x894   :  { %4406 = vmatprep.subr.bf16.mxu0 %v9344_v54  ;;  %4449 = vmatprep.subr.bf16.mxu1 %v9347_v23  ;;  %v10794_v23 = vld [vmem:[#allocation39_spill] sm:$0xff] }
 0x895   :  { %v4093_v54 = vunpack.c.l.bf16 %v10794_v23  ;;  %v4097_v9 = vunpack.c.h.bf16 %v10794_v23 }
 0x897   :  { %4407 = vmatpush1.bf16.msra.mxu0 %v9350_v41  ;;  %4450 = vmatpush1.bf16.msra.mxu1 %v9353_v16  ;;  %v10793_v41 = vld [vmem:[#allocation37_spill] sm:$0xff] }
 0x898   :  { %4408 = vmatprep.subr.bf16.mxu0 %v9356_v4  ;;  %4451 = vmatprep.subr.bf16.mxu1 %v9359_v27  ;;  %v10792_v27 = vld [vmem:[#allocation38_spill] sm:$0xff]  ;;  %v4095_v7 = vunpack.c.h.bf16 %v10793_v41 }
 0x899   :  { %v4096_v26 = vunpack.c.h.bf16 %v10792_v27 }
 0x89b   :  { %4409 = vmatpush1.bf16.msra.mxu0 %v9362_v49  ;;  %4452 = vmatpush1.bf16.msra.mxu1 %v9365_v0  ;;  %v9383_v0 = vld [vmem:[#allocation8 + $0xcc] ss:$16 sps:$4 sm:$0xff]  }
 0x89c   :  { %4410 = vmatprep.subr.bf16.mxu0 %v9368_v28  ;;  %4453 = vmatprep.subr.bf16.mxu1 %v9371_v21  ;;  %10782 = vst [vmem:[#allocation20_spill] sm:$0xff] %v9383_v0  ;;  %v9386_v28 = vld [vmem:[#allocation8 + $0xc0] ss:$16 sps:$4 sm:$0xff]   ;;  %v9389_v21 = vld [vmem:[#allocation8 + $0xc8] ss:$16 sps:$4 sm:$0xff]  }
 0x89d   :  { %10783 = vst [vmem:[#allocation22_spill] sm:$0xff] %v9386_v28  ;;  %10784 = vst [vmem:[#allocation110_spill] sm:$0xff] %v9389_v21 }
 0x89f   :  { %4411 = vmatpush1.bf16.msra.mxu0 %v9374_v1  ;;  %4454 = vmatpush1.bf16.msra.mxu1 %v9377_v25  ;;  %v9392_v1 = vld [vmem:[#allocation8 + $0xe4] ss:$16 sps:$4 sm:$0xff]   ;;  %v9395_v25 = vld [vmem:[#allocation8 + $0xec] ss:$16 sps:$4 sm:$0xff]  }
 0x8a0   :  { %4412 = vmatprep.subr.bf16.mxu0 %v9380_v50  ;;  %4455 = vmatprep.subr.bf16.mxu1 %v9383_v0  ;;  %10785 = vst [vmem:[#allocation111_spill] sm:$0xff] %v9392_v1  ;;  %10786 = vst [vmem:[#allocation98_spill] sm:$0xff] %v9395_v25  ;;  %v9398_v50 = vld [vmem:[#allocation8 + $0xe0] ss:$16 sps:$4 sm:$0xff]   ;;  %v9401_v0 = vld [vmem:[#allocation8 + $0xe8] ss:$16 sps:$4 sm:$0xff]  }
 0x8a1   :  { %10787 = vst [vmem:[#allocation99_spill] sm:$0xff] %v9398_v50  ;;  %10788 = vst [vmem:[#allocation112_spill] sm:$0xff] %v9401_v0 }
 0x8a3   :  { %4413 = vmatpush1.bf16.msra.mxu0 %v9386_v28  ;;  %4456 = vmatpush1.bf16.msra.mxu1 %v9389_v21  ;;  %v9404_v28 = vld [vmem:[#allocation9 + $0x4] ss:$16 sps:$4 sm:$0xff]   ;;  %v9407_v21 = vld [vmem:[#allocation9 + $0xc] ss:$16 sps:$4 sm:$0xff]  }
 0x8a4   :  { %4414 = vmatprep.subr.bf16.mxu0 %v9392_v1  ;;  %4457 = vmatprep.subr.bf16.mxu1 %v9395_v25  ;;  %10789 = vst [vmem:[#allocation113_spill] sm:$0xff] %v9404_v28  ;;  %10790 = vst [vmem:[#allocation114_spill] sm:$0xff] %v9407_v21  ;;  %v10791_v1 = vld [vmem:[#allocation36_spill] sm:$0xff]  ;;  %v4092_v25 = vunpack.c.l.bf16 %v10792_v27 }
 0x8a5   :  { %v4090_v49 = vunpack.c.l.bf16 %v10791_v1 }
 0x8a7   :  { %4415 = vmatpush1.bf16.msra.mxu0 %v9398_v50  ;;  %4458 = vmatpush1.bf16.msra.mxu1 %v9401_v0  ;;  %v4091_v50 = vunpack.c.l.bf16 %v10793_v41 }
 0x8a8   :  { %4498 = vmatprep.subr.bf16.mxu0 %v9404_v28  ;;  %4541 = vmatprep.subr.bf16.mxu1 %v9407_v21  ;;  %v4094_v28 = vunpack.c.h.bf16 %v10791_v1 }
 0x93b   :  { %v4132_v4 = vpop.f32.mrb[152].mxu0  ;;  %v4175_v16 = vpop.f32.mrb[152].mxu1 }
 0x93c   :  { %v4133_v12 = vadd.f32 %v4132_v4, %v4090_v49  ;;  %v4176_v0 = vadd.f32 %v4175_v16, %v4092_v25  ;;  %v4134_v33 = vpop.f32.mrb[153].mxu0  ;;  %v4177_v31 = vpop.f32.mrb[153].mxu1 }
 0x93d   :  { %v4135_v22 = vadd.f32 %v4134_v33, %v4091_v50  ;;  %v4178_v21 = vadd.f32 %v4177_v31, %v4093_v54  ;;  %v4136_v43 = vpop.f32.mrb[154].mxu0  ;;  %v4179_v24 = vpop.f32.mrb[154].mxu1 }
 0x93e   :  { %v5860_v36 = vmul.f32 -1.442695, %v4133_v12  ;;  %v4137_v61 = vadd.f32 %v4136_v43, %v4094_v28  ;;  %v4180_v20 = vadd.f32 %v4179_v24, %v4096_v26  ;;  %v4138_v19 = vpop.f32.mrb[155].mxu0  ;;  %v4181_v4 = vpop.f32.mrb[155].mxu1  ;;  %v5862_v31 = vmul.f32 -1.442695, %v4176_v0 }
 0x93f   :  { %v5861_v16 = vmul.f32 -1.442695, %v4135_v22  ;;  %v4139_v49 = vadd.f32 %v4138_v19, %v4095_v7  ;;  %v4182_v25 = vadd.f32 %v4181_v4, %v4097_v9 }
 0x940   :  { %6490 = vpow2.f32 %v5860_v36  ;;  %v5863_v1 = vmul.f32 -1.442695, %v4137_v61  ;;  %v5865_v33 = vmul.f32 -1.442695, %v4180_v20 }
 0x941   :  { %v5864_v37 = vmul.f32 -1.442695, %v4139_v49  ;;  %6492 = vpow2.f32 %v5861_v16  ;;  %v10795_v49 = vld [vmem:[#allocation72_spill] sm:$0xff] }
 0x942   :  { %6494 = vpow2.f32 %v5863_v1 }
 0x943   :  { %6496 = vpow2.f32 %v5864_v37 }
 0x944   :  { %6498 = vtanh.f32 %v4178_v21 }
 0x945   :  { %6500 = vpow2.f32 %v5862_v31  ;;  %v10796_v31 = vld [vmem:[#allocation74_spill] sm:$0xff] }
 0x946   :  { %6502 = vpow2.f32 %v5865_v33  ;;  %v4190_v33 = vunpack.c.l.bf16 %v10796_v31 }
 0x94a   :  { %v6491_v54 = vpop.eup %6490 }
 0x94b   :  { %v4300_v41 = vadd.f32 1.0, %v6491_v54  ;;  %v6493_v12 = vpop.eup %6492  ;;  %v4192_v54 = vunpack.c.h.bf16 %v10795_v49 }
 0x94c   :  { %v6495_v24 = vpop.eup %6494  ;;  %v4301_v43 = vadd.f32 1.0, %v6493_v12 }
 0x94d   :  { %6504 = vrcp.f32 %v4300_v41  ;;  %v4303_v22 = vadd.f32 1.0, %v6495_v24  ;;  %v6497_v19 = vpop.eup %6496  ;;  %v10797_v24 = vld [vmem:[#allocation73_spill] sm:$0xff] }
 0x94e   :  { %6506 = vtanh.f32 %v4182_v25  ;;  %v4304_v61 = vadd.f32 1.0, %v6497_v19  ;;  %v6499_v36 = vpop.eup %6498  ;;  %v4188_v25 = vunpack.c.l.bf16 %v10795_v49  ;;  %v4193_v49 = vunpack.c.h.bf16 %v10797_v24 }
 0x94f   :  { %6508 = vrcp.f32 %v4301_v43  ;;  %v6501_v37 = vpop.eup %6500  ;;  %v4189_v43 = vunpack.c.l.bf16 %v10797_v24 }
 0x950   :  { %6510 = vrcp.f32 %v4303_v22  ;;  %v6503_v9 = vpop.eup %6502  ;;  %v4302_v27 = vadd.f32 1.0, %v6501_v37  ;;  %v10798_v22 = vld [vmem:[#allocation75_spill] sm:$0xff] }
 0x951   :  { %6512 = vrcp.f32 %v4304_v61  ;;  %v4305_v16 = vadd.f32 1.0, %v6503_v9  ;;  %v4191_v19 = vunpack.c.l.bf16 %v10798_v22 }
 0x952   :  { %6514 = vrcp.f32 %v4302_v27 }
 0x957   :  { %v6505_v20 = vpop.eup %6504 }
 0x958   :  { %v6507_v7 = vpop.eup %6506  ;;  %v4322_v26 = vmul.f32 %v6505_v20, %v6499_v36 }
 0x959   :  { %v6509_v23 = vpop.eup %6508 }
 0x95a   :  { %v6511_v0 = vpop.eup %6510  ;;  %v4320_v28 = vmul.f32 %v6509_v23, %v9168_v38  ;;  %v4194_v23 = vunpack.c.h.bf16 %v10796_v31 }
 0x95b   :  { %v4323_v21 = vmul.f32 %v6511_v0, %v6507_v7  ;;  %v6513_v50 = vpop.eup %6512 }
 0x95c   :  { %v4324_v4 = vadd.f32 %v4322_v26, %v4320_v28  ;;  %v4321_v1 = vmul.f32 %v6513_v50, %v9176_v34  ;;  %v6515_v24 = vpop.eup %6514 }
 0x95d   :  { %v4230_v41 = vpop.f32.mrb[156].mxu0  ;;  %v4273_v12 = vpop.f32.mrb[156].mxu1 }
 0x95e   :  { %6516 = vtanh.f32 %v4324_v4  ;;  %v9428_v36 = vsel %vm3444_vm12, %v4324_v4, %v9168_v38  ;;  %v4325_v37 = vadd.f32 %v4323_v21, %v4321_v1  ;;  %v4231_v9 = vadd.f32 %v4230_v41, %v4188_v25  ;;  %v4232_v7 = vpop.f32.mrb[157].mxu0  ;;  %v4275_v26 = vpop.f32.mrb[157].mxu1 }
 0x95f   :  { %v4274_v20 = vadd.f32 %v4273_v12, %v4190_v33  ;;  %6518 = vrcp.f32 %v4305_v16  ;;  %v4233_v27 = vadd.f32 %v4232_v7, %v4189_v43  ;;  %v4276_v0 = vadd.f32 %v4275_v26, %v4191_v19  ;;  %v4234_v28 = vpop.f32.mrb[158].mxu0  ;;  %v4277_v50 = vpop.f32.mrb[158].mxu1 }
 0x960   :  { %6520 = vtanh.f32 %v4325_v37  ;;  %v5866_v63 = vmul.f32 -1.442695, %v4231_v9  ;;  %v4235_v11 = vadd.f32 %v4234_v28, %v4192_v54  ;;  %v4236_v60 = vpop.f32.mrb[159].mxu0  ;;  %v4195_v38 = vunpack.c.h.bf16 %v10798_v22  ;;  %v4279_v21 = vpop.f32.mrb[159].mxu1 }
 0x961   :  { %v5867_v4 = vmul.f32 -1.442695, %v4233_v27  ;;  %v4278_v25 = vadd.f32 %v4277_v50, %v4194_v23  ;;  %v4237_v1 = vadd.f32 %v4236_v60, %v4193_v49  ;;  %v9436_v41 = vsel %vm3445_vm11, %v4325_v37, %v9176_v34 }
 0x962   :  { %6522 = vpow2.f32 %v5866_v63  ;;  %v5869_v33 = vmul.f32 -1.442695, %v4235_v11  ;;  %v4280_v31 = vadd.f32 %v4279_v21, %v4195_v38  ;;  %v5868_v19 = vmul.f32 -1.442695, %v4274_v20 }
 0x963   :  { %v5870_v12 = vmul.f32 -1.442695, %v4237_v1  ;;  %6524 = vpow2.f32 %v5867_v4  ;;  %v5871_v7 = vmul.f32 -1.442695, %v4278_v25 }
 0x964   :  { %6526 = vpow2.f32 %v5869_v33 }
 0x965   :  { %6528 = vpow2.f32 %v5870_v12 }
 0x966   :  { %6530 = vtanh.f32 %v4276_v0 }
 0x967   :  { %6532 = vpow2.f32 %v5868_v19 }
 0x968   :  { %v6517_v54 = vpop.eup %6516  ;;  %6534 = vpow2.f32 %v5871_v7 }
 0x969   :  { %v4328_v43 = vmul.f32 %v6517_v54, %v6515_v24  ;;  %v6519_v22 = vpop.eup %6518 }
 0x96a   :  { %v6521_v9 = vpop.eup %6520 }
 0x96b   :  { %v4329_v60 = vmul.f32 %v6521_v9, %v6519_v22  ;;  %v9441_v34 = vsel %vm3444_vm12, %v4328_v43, %v9181_v14  ;;  %v10823_v43 = vld [vmem:[#allocation29_spill] sm:$0xff]  ;;  %v10825_v9 = vld [vmem:[#allocation80_spill] sm:$0xff] }
 0x96c   :  { %v6523_v63 = vpop.eup %6522 }
 0x96d   :  { %v4348_v11 = vadd.f32 1.0, %v6523_v63  ;;  %v9446_v37 = vsel %vm3445_vm11, %v4329_v60, %v9186_v42  ;;  %v6525_v26 = vpop.eup %6524  ;;  %v10803_v63 = vld [vmem:[#allocation21_spill] sm:$0xff] }
 0x96e   :  { %v4386_v20 = vpack.c.bf16 %v9446_v37, %v9441_v34  ;;  %v6527_v23 = vpop.eup %6526  ;;  %v4349_v27 = vadd.f32 1.0, %v6525_v26 }
 0x96f   :  { %6536 = vrcp.f32 %v4348_v11  ;;  %v4351_v0 = vadd.f32 1.0, %v6527_v23  ;;  %v6529_v61 = vpop.eup %6528  ;;  %v10805_v23 = vld [vmem:[#allocation88_spill] sm:$0xff] }
 0x970   :  { %6538 = vtanh.f32 %v4280_v31  ;;  %4433 = vmatmul.mubr.bf16.vlgmr.msra.gmra.mrb[160].mxu0 %v4386_v20  ;;  %4476 = vmatmul.mubr.bf16.vlgmr.msra.gmra.mrb[160].mxu1 %v4386_v20  ;;  %v4352_v14 = vadd.f32 1.0, %v6529_v61  ;;  %v6531_v42 = vpop.eup %6530  ;;  %v10804_v20 = vld [vmem:[#allocation23_spill] sm:$0xff]  ;;  %v10807_v61 = vld [vmem:[#allocation89_spill] sm:$0xff] }
 0x971   :  { %6540 = vrcp.f32 %v4349_v27  ;;  %4499 = vmatpush1.bf16.msra.mxu0 %v9190_v13  ;;  %4542 = vmatpush1.bf16.msra.mxu1 %v9193_v6  ;;  %v6533_v28 = vpop.eup %6532 }
 0x972   :  { %6542 = vrcp.f32 %v4351_v0  ;;  %4500 = vmatprep.subr.bf16.mxu0 %v9196_v30  ;;  %4543 = vmatprep.subr.bf16.mxu1 %v9199_v48  ;;  %v6535_v50 = vpop.eup %6534  ;;  %v4350_v25 = vadd.f32 1.0, %v6533_v28  ;;  %v10806_v0 = vld [vmem:[#allocation90_spill] sm:$0xff]  ;;  %v10810_v28 = vld [vmem:[#allocation24_spill] sm:$0xff] }
 0x973   :  { %4530 = vmatprep.mubr.bf16.mxu0 %v10441_v18  ;;  %4573 = vmatprep.mubr.bf16.mxu1 %v10441_v18  ;;  %6544 = vrcp.f32 %v4352_v14  ;;  %v4353_v24 = vadd.f32 1.0, %v6535_v50  ;;  %v10808_v14 = vld [vmem:[#allocation91_spill] sm:$0xff] }
 0x974   :  { %6546 = vrcp.f32 %v4350_v25  ;;  %v10815_v25 = vld [vmem:[#allocation84_spill] sm:$0xff] }
 0x975   :  { %4501 = vmatpush1.bf16.msra.mxu0 %v9204_v35  ;;  %4544 = vmatpush1.bf16.msra.mxu1 %v9207_v29 }
 0x976   :  { %4502 = vmatprep.subr.bf16.mxu0 %v9210_v10  ;;  %4545 = vmatprep.subr.bf16.mxu1 %v9213_v53 }
 0x979   :  { %v6537_v49 = vpop.eup %6536  ;;  %4503 = vmatpush1.bf16.msra.mxu0 %v9216_v15  ;;  %4546 = vmatpush1.bf16.msra.mxu1 %v9219_v55 }
 0x97a   :  { %v6539_v38 = vpop.eup %6538  ;;  %v4370_v21 = vmul.f32 %v6537_v49, %v6531_v42  ;;  %4504 = vmatprep.subr.bf16.mxu0 %v9222_v40  ;;  %4547 = vmatprep.subr.bf16.mxu1 %v9225_v56 }
 0x97b   :  { %v6541_v4 = vpop.eup %6540 }
 0x97c   :  { %v6543_v1 = vpop.eup %6542  ;;  %v4368_v33 = vmul.f32 %v6541_v4, %v9245_v59  ;;  %v10814_v4 = vld [vmem:[#allocation27_spill] sm:$0xff] }
 0x97d   :  { %v4371_v31 = vmul.f32 %v6543_v1, %v6539_v38  ;;  %4505 = vmatpush1.bf16.msra.mxu0 %v9229_v58  ;;  %4548 = vmatpush1.bf16.msra.mxu1 %v9232_v52  ;;  %v6545_v16 = vpop.eup %6544  ;;  %v10812_v38 = vld [vmem:[#allocation26_spill] sm:$0xff] }
 0x97e   :  { %v4372_v12 = vadd.f32 %v4370_v21, %v4368_v33  ;;  %4506 = vmatprep.subr.bf16.mxu0 %v9235_v51  ;;  %4549 = vmatprep.subr.bf16.mxu1 %v9238_v17  ;;  %v4369_v54 = vmul.f32 %v6545_v16, %v9262_v57  ;;  %v10813_v21 = vld [vmem:[#allocation25_spill] sm:$0xff]  ;;  %v10816_v1 = vld [vmem:[#allocation86_spill] sm:$0xff]  ;;  %v10819_v16 = vld [vmem:[#allocation107_spill] sm:$0xff] }
 0x97f   :  { %v10817_v33 = vld [vmem:[#allocation85_spill] sm:$0xff] }
 0x980   :  { %6548 = vtanh.f32 %v4372_v12  ;;  %v9473_v22 = vsel %vm3430_vm9, %v4372_v12, %v9245_v59  ;;  %v4373_v19 = vadd.f32 %v4371_v31, %v4369_v54  ;;  %v6547_v59 = vpop.eup %6546  ;;  %v10818_v31 = vld [vmem:[#allocation87_spill] sm:$0xff]  ;;  %v10820_v12 = vld [vmem:[#allocation108_spill] sm:$0xff]  ;;  %v10822_v54 = vld [vmem:[#allocation30_spill] sm:$0xff] }
 0x981   :  { %4507 = vmatpush1.bf16.msra.mxu0 %v9247_v5  ;;  %4550 = vmatpush1.bf16.msra.mxu1 %v9250_v3  ;;  %6550 = vrcp.f32 %v4353_v24  ;;  %v10821_v24 = vld [vmem:[#allocation28_spill] sm:$0xff] }
 0x982   :  { %4508 = vmatprep.subr.bf16.mxu0 %v9253_v32  ;;  %4551 = vmatprep.subr.bf16.mxu1 %v9256_v39  ;;  %6552 = vtanh.f32 %v4373_v19  ;;  %v9482_v7 = vsel %vm3431_vm8, %v4373_v19, %v9262_v57  ;;  %v10824_v19 = vld [vmem:[#allocation31_spill] sm:$0xff] }
 0x985   :  { %4509 = vmatpush1.bf16.msra.mxu0 %v9264_v8  ;;  %4552 = vmatpush1.bf16.msra.mxu1 %v9267_v62 }
 0x986   :  { %4510 = vmatprep.subr.bf16.mxu0 %v9270_v45  ;;  %4553 = vmatprep.subr.bf16.mxu1 %v9273_v46 }
 0x989   :  { %4511 = vmatpush1.bf16.msra.mxu0 %v9276_v47  ;;  %4554 = vmatpush1.bf16.msra.mxu1 %v9279_v2 }
 0x98a   :  { %v6549_v60 = vpop.eup %6548  ;;  %4512 = vmatprep.subr.bf16.mxu0 %v9282_v44  ;;  %4555 = vmatprep.subr.bf16.mxu1 %v10803_v63 }
 0x98b   :  { %v4376_v57 = vmul.f32 %v6549_v60, %v6547_v59  ;;  %v6551_v11 = vpop.eup %6550  ;;  %v10826_v59 = vld [vmem:[#allocation82_spill] sm:$0xff]  ;;  %v10827_v60 = vld [vmem:[#allocation81_spill] sm:$0xff] }
 0x98c   :  { %v6553_v26 = vpop.eup %6552 }
 0x98d   :  { %4513 = vmatpush1.bf16.msra.mxu0 %v10804_v20  ;;  %4556 = vmatpush1.bf16.msra.mxu1 %v10805_v23  ;;  %v4377_v27 = vmul.f32 %v6553_v26, %v6551_v11  ;;  %v9499_v42 = vsel %vm3430_vm9, %v4376_v57, %v10808_v14  ;;  %v10828_v57 = vld [vmem:[#allocation83_spill] sm:$0xff]  ;;  %v10829_v11 = vld [vmem:[#allocation92_spill] sm:$0xff]  ;;  %v10830_v26 = vld [vmem:[#allocation94_spill] sm:$0xff] }
 0x98e   :  { %4702 = vmatprep.subr.bf16.mxu0 %v10806_v0  ;;  %4745 = vmatprep.subr.bf16.mxu1 %v10807_v61  ;;  %10809 = vst [vmem:[#allocation115_spill] sm:$0xff] %v9499_v42  ;;  %v10832_v14 = vld [vmem:[#allocation95_spill] sm:$0xff] }
 0x98f   :  { %v9504_v50 = vsel %vm3431_vm8, %v4377_v27, %v10810_v28  ;;  %v10831_v27 = vld [vmem:[#allocation93_spill] sm:$0xff]  ;;  %v10833_v28 = vld [vmem:[#allocation104_spill] sm:$0xff] }
 0x990   :  { %10811 = vst [vmem:[#allocation116_spill] sm:$0xff] %v9504_v50  ;;  %v4387_v49 = vpack.c.bf16 %v9504_v50, %v9499_v42 }
 0x992   :  { %4531 = vmatmul.mubr.bf16.vlgmr.msra.gmra.mrb[164].mxu0 %v4387_v49  ;;  %4574 = vmatmul.mubr.bf16.vlgmr.msra.gmra.mrb[164].mxu1 %v4387_v49  ;;  %v10834_v49 = vld [vmem:[#allocation105_spill] sm:$0xff] }
 0x993   :  { %4703 = vmatpush1.bf16.msra.mxu0 %v10812_v38  ;;  %4746 = vmatpush1.bf16.msra.mxu1 %v10813_v21 }
 0x994   :  { %4704 = vmatprep.subr.bf16.mxu0 %v10814_v4  ;;  %4747 = vmatprep.subr.bf16.mxu1 %v10815_v25 }
 0x995   :  { %4734 = vmatprep.mubr.bf16.mxu0 %v10441_v18  ;;  %4777 = vmatprep.mubr.bf16.mxu1 %v10441_v18 }
 0x997   :  { %4705 = vmatpush1.bf16.msra.mxu0 %v10816_v1  ;;  %4748 = vmatpush1.bf16.msra.mxu1 %v10817_v33 }
 0x998   :  { %4706 = vmatprep.subr.bf16.mxu0 %v10818_v31  ;;  %4749 = vmatprep.subr.bf16.mxu1 %v10819_v16 }
 0x99b   :  { %4707 = vmatpush1.bf16.msra.mxu0 %v10820_v12  ;;  %4750 = vmatpush1.bf16.msra.mxu1 %v10821_v24  ;;  %v10846_v24 = vld [vmem:[#allocation41_spill] sm:$0xff]  ;;  %v10847_v12 = vld [vmem:[#allocation43_spill] sm:$0xff] }
 0x99c   :  { %4708 = vmatprep.subr.bf16.mxu0 %v10822_v54  ;;  %4751 = vmatprep.subr.bf16.mxu1 %v10823_v43  ;;  %v10845_v43 = vld [vmem:[#allocation42_spill] sm:$0xff]  ;;  %v4397_v4 = vunpack.c.h.bf16 %v10846_v24  ;;  %v4399_v21 = vunpack.c.h.bf16 %v10847_v12 }
 0x99f   :  { %4709 = vmatpush1.bf16.msra.mxu0 %v10824_v19  ;;  %4752 = vmatpush1.bf16.msra.mxu1 %v10825_v9  ;;  %v10835_v19 = vld [vmem:[#allocation20_spill] sm:$0xff]  ;;  %v10836_v9 = vld [vmem:[#allocation22_spill] sm:$0xff] }
 0x9a0   :  { %4710 = vmatprep.subr.bf16.mxu0 %v10826_v59  ;;  %4753 = vmatprep.subr.bf16.mxu1 %v10827_v60  ;;  %v10837_v59 = vld [vmem:[#allocation110_spill] sm:$0xff]  ;;  %v10838_v60 = vld [vmem:[#allocation111_spill] sm:$0xff] }
 0x9a3   :  { %4711 = vmatpush1.bf16.msra.mxu0 %v10828_v57  ;;  %4754 = vmatpush1.bf16.msra.mxu1 %v10829_v11  ;;  %v10839_v57 = vld [vmem:[#allocation98_spill] sm:$0xff]  ;;  %v10840_v11 = vld [vmem:[#allocation99_spill] sm:$0xff] }
 0x9a4   :  { %4712 = vmatprep.subr.bf16.mxu0 %v10830_v26  ;;  %4755 = vmatprep.subr.bf16.mxu1 %v10831_v27  ;;  %v10841_v26 = vld [vmem:[#allocation112_spill] sm:$0xff]  ;;  %v10842_v27 = vld [vmem:[#allocation113_spill] sm:$0xff] }
 0x9a7   :  { %4713 = vmatpush1.bf16.msra.mxu0 %v10832_v14  ;;  %4756 = vmatpush1.bf16.msra.mxu1 %v10833_v28  ;;  %v10843_v14 = vld [vmem:[#allocation114_spill] sm:$0xff]  ;;  %v10844_v28 = vld [vmem:[#allocation40_spill] sm:$0xff] }
 0x9a8   :  { %4714 = vmatprep.subr.bf16.mxu0 %v10834_v49  ;;  %4757 = vmatprep.subr.bf16.mxu1 %v10835_v19  ;;  %v4392_v49 = vunpack.c.l.bf16 %v10844_v28  ;;  %v4394_v19 = vunpack.c.l.bf16 %v10845_v43 }
 0x9ab   :  { %4715 = vmatpush1.bf16.msra.mxu0 %v10836_v9  ;;  %4758 = vmatpush1.bf16.msra.mxu1 %v10837_v59  ;;  %v4393_v59 = vunpack.c.l.bf16 %v10846_v24 }
 0x9ac   :  { %4716 = vmatprep.subr.bf16.mxu0 %v10838_v60  ;;  %4759 = vmatprep.subr.bf16.mxu1 %v10839_v57  ;;  %v4395_v60 = vunpack.c.l.bf16 %v10847_v12 }
 0x9af   :  { %4717 = vmatpush1.bf16.msra.mxu0 %v10840_v11  ;;  %4760 = vmatpush1.bf16.msra.mxu1 %v10841_v26  ;;  %v4396_v26 = vunpack.c.h.bf16 %v10844_v28 }
 0x9b0   :  { %4800 = vmatprep.subr.bf16.mxu0 %v10842_v27  ;;  %4843 = vmatprep.subr.bf16.mxu1 %v10843_v14  ;;  %v4398_v27 = vunpack.c.h.bf16 %v10845_v43 }
 0xa43   :  { %v4434_v54 = vpop.f32.mrb[160].mxu0  ;;  %v4477_v9 = vpop.f32.mrb[160].mxu1 }
 0xa44   :  { %v4435_v16 = vadd.f32 %v4434_v54, %v4392_v49  ;;  %v4478_v57 = vadd.f32 %v4477_v9, %v4394_v19  ;;  %v4436_v31 = vpop.f32.mrb[161].mxu0  ;;  %v4479_v11 = vpop.f32.mrb[161].mxu1 }
 0xa45   :  { %v4437_v33 = vadd.f32 %v4436_v31, %v4393_v59  ;;  %v4480_v14 = vadd.f32 %v4479_v11, %v4395_v60  ;;  %v4438_v1 = vpop.f32.mrb[162].mxu0  ;;  %v4481_v25 = vpop.f32.mrb[162].mxu1 }
 0xa46   :  { %v5872_v38 = vmul.f32 -1.442695, %v4435_v16  ;;  %v4439_v50 = vadd.f32 %v4438_v1, %v4396_v26  ;;  %v4482_v42 = vadd.f32 %v4481_v25, %v4398_v27  ;;  %v4440_v61 = vpop.f32.mrb[163].mxu0  ;;  %v4483_v54 = vpop.f32.mrb[163].mxu1  ;;  %v5874_v31 = vmul.f32 -1.442695, %v4478_v57 }
 0xa47   :  { %v5873_v19 = vmul.f32 -1.442695, %v4437_v33  ;;  %v4441_v9 = vadd.f32 %v4440_v61, %v4397_v4  ;;  %v4484_v49 = vadd.f32 %v4483_v54, %v4399_v21 }
 0xa48   :  { %6554 = vpow2.f32 %v5872_v38  ;;  %v5875_v28 = vmul.f32 -1.442695, %v4439_v50  ;;  %v5877_v43 = vmul.f32 -1.442695, %v4482_v42 }
 0xa49   :  { %v5876_v0 = vmul.f32 -1.442695, %v4441_v9  ;;  %6556 = vpow2.f32 %v5873_v19  ;;  %v10848_v9 = vld [vmem:[#allocation68_spill] sm:$0xff] }
 0xa4a   :  { %6558 = vpow2.f32 %v5875_v28 }
 0xa4b   :  { %6560 = vpow2.f32 %v5876_v0 }
 0xa4c   :  { %6562 = vtanh.f32 %v4480_v14 }
 0xa4d   :  { %6564 = vpow2.f32 %v5874_v31  ;;  %v10849_v31 = vld [vmem:[#allocation70_spill] sm:$0xff] }
 0xa4e   :  { %6566 = vpow2.f32 %v5877_v43  ;;  %v4492_v43 = vunpack.c.l.bf16 %v10849_v31 }
 0xa52   :  { %v6555_v59 = vpop.eup %6554 }
 0xa53   :  { %v4602_v24 = vadd.f32 1.0, %v6555_v59  ;;  %v6557_v16 = vpop.eup %6556  ;;  %v4494_v59 = vunpack.c.h.bf16 %v10848_v9 }
 0xa54   :  { %v6559_v25 = vpop.eup %6558  ;;  %v4603_v1 = vadd.f32 1.0, %v6557_v16 }
 0xa55   :  { %6568 = vrcp.f32 %v4602_v24  ;;  %v4605_v33 = vadd.f32 1.0, %v6559_v25  ;;  %v6561_v61 = vpop.eup %6560  ;;  %v10850_v25 = vld [vmem:[#allocation69_spill] sm:$0xff] }
 0xa56   :  { %6570 = vtanh.f32 %v4484_v49  ;;  %v4606_v50 = vadd.f32 1.0, %v6561_v61  ;;  %v6563_v38 = vpop.eup %6562  ;;  %v4490_v49 = vunpack.c.l.bf16 %v10848_v9  ;;  %v4495_v9 = vunpack.c.h.bf16 %v10850_v25 }
 0xa57   :  { %6572 = vrcp.f32 %v4603_v1  ;;  %v6565_v0 = vpop.eup %6564  ;;  %v4491_v1 = vunpack.c.l.bf16 %v10850_v25 }
 0xa58   :  { %6574 = vrcp.f32 %v4605_v33  ;;  %v6567_v21 = vpop.eup %6566  ;;  %v4604_v57 = vadd.f32 1.0, %v6565_v0  ;;  %v10851_v33 = vld [vmem:[#allocation71_spill] sm:$0xff] }
 0xa59   :  { %6576 = vrcp.f32 %v4606_v50  ;;  %v4607_v19 = vadd.f32 1.0, %v6567_v21  ;;  %v4493_v61 = vunpack.c.l.bf16 %v10851_v33 }
 0xa5a   :  { %6578 = vrcp.f32 %v4604_v57 }
 0xa5f   :  { %v6569_v42 = vpop.eup %6568 }
 0xa60   :  { %v6571_v4 = vpop.eup %6570  ;;  %v4624_v12 = vmul.f32 %v6569_v42, %v6563_v38 }
 0xa61   :  { %v6573_v60 = vpop.eup %6572 }
 0xa62   :  { %v6575_v11 = vpop.eup %6574  ;;  %v4622_v26 = vmul.f32 %v6573_v60, %v9428_v36  ;;  %v4496_v60 = vunpack.c.h.bf16 %v10849_v31 }
 0xa63   :  { %v4625_v27 = vmul.f32 %v6575_v11, %v6571_v4  ;;  %v6577_v14 = vpop.eup %6576 }
 0xa64   :  { %v4626_v54 = vadd.f32 %v4624_v12, %v4622_v26  ;;  %v4623_v28 = vmul.f32 %v6577_v14, %v9436_v41  ;;  %v6579_v25 = vpop.eup %6578 }
 0xa65   :  { %v4532_v24 = vpop.f32.mrb[164].mxu0  ;;  %v4575_v16 = vpop.f32.mrb[164].mxu1 }
 0xa66   :  { %6580 = vtanh.f32 %v4626_v54  ;;  %v9560_v38 = vsel %vm3112_vm10, %v4626_v54, %v9428_v36  ;;  %v4627_v0 = vadd.f32 %v4625_v27, %v4623_v28  ;;  %v4533_v21 = vadd.f32 %v4532_v24, %v4490_v49  ;;  %v4534_v4 = vpop.f32.mrb[165].mxu0  ;;  %v4577_v12 = vpop.f32.mrb[165].mxu1 }
 0xa67   :  { %v4576_v42 = vadd.f32 %v4575_v16, %v4492_v43  ;;  %6582 = vrcp.f32 %v4607_v19  ;;  %v4535_v57 = vadd.f32 %v4534_v4, %v4491_v1  ;;  %v4578_v11 = vadd.f32 %v4577_v12, %v4493_v61  ;;  %v4536_v26 = vpop.f32.mrb[166].mxu0  ;;  %v4579_v14 = vpop.f32.mrb[166].mxu1  ;;  %v10867_v19 = vld [vmem:[#allocation86_spill] sm:$0xff] }
 0xa68   :  { %6584 = vtanh.f32 %v4627_v0  ;;  %v5878_v23 = vmul.f32 -1.442695, %v4533_v21  ;;  %v4537_v20 = vadd.f32 %v4536_v26, %v4494_v59  ;;  %v4538_v63 = vpop.f32.mrb[167].mxu0  ;;  %v4497_v36 = vunpack.c.h.bf16 %v10851_v33  ;;  %v4581_v27 = vpop.f32.mrb[167].mxu1 }
 0xa69   :  { %v5879_v54 = vmul.f32 -1.442695, %v4535_v57  ;;  %v4580_v49 = vadd.f32 %v4579_v14, %v4496_v60  ;;  %v4539_v28 = vadd.f32 %v4538_v63, %v4495_v9  ;;  %v9568_v24 = vsel %vm3113_vm13, %v4627_v0, %v9436_v41 }
 0xa6a   :  { %6586 = vpow2.f32 %v5878_v23  ;;  %v5881_v43 = vmul.f32 -1.442695, %v4537_v20  ;;  %v4582_v31 = vadd.f32 %v4581_v27, %v4497_v36  ;;  %v5880_v61 = vmul.f32 -1.442695, %v4576_v42 }
 0xa6b   :  { %v5882_v16 = vmul.f32 -1.442695, %v4539_v28  ;;  %6588 = vpow2.f32 %v5879_v54  ;;  %v5883_v4 = vmul.f32 -1.442695, %v4580_v49  ;;  %v10863_v49 = vld [vmem:[#allocation26_spill] sm:$0xff]  ;;  %v10864_v28 = vld [vmem:[#allocation25_spill] sm:$0xff] }
 0xa6c   :  { %6590 = vpow2.f32 %v5881_v43  ;;  %v10865_v43 = vld [vmem:[#allocation27_spill] sm:$0xff] }
 0xa6d   :  { %6592 = vpow2.f32 %v5882_v16  ;;  %v10868_v16 = vld [vmem:[#allocation85_spill] sm:$0xff] }
 0xa6e   :  { %6594 = vtanh.f32 %v4578_v11 }
 0xa6f   :  { %6596 = vpow2.f32 %v5880_v61  ;;  %v10873_v61 = vld [vmem:[#allocation30_spill] sm:$0xff] }
 0xa70   :  { %v6581_v59 = vpop.eup %6580  ;;  %6598 = vpow2.f32 %v5883_v4  ;;  %v10875_v4 = vld [vmem:[#allocation31_spill] sm:$0xff] }
 0xa71   :  { %v4630_v1 = vmul.f32 %v6581_v59, %v6579_v25  ;;  %v6583_v33 = vpop.eup %6582  ;;  %v10869_v25 = vld [vmem:[#allocation87_spill] sm:$0xff] }
 0xa72   :  { %v6585_v21 = vpop.eup %6584  ;;  %v10870_v59 = vld [vmem:[#allocation107_spill] sm:$0xff] }
 0xa73   :  { %v4631_v63 = vmul.f32 %v6585_v21, %v6583_v33  ;;  %v9573_v41 = vsel %vm3112_vm10, %v4630_v1, %v9441_v34  ;;  %v10871_v1 = vld [vmem:[#allocation108_spill] sm:$0xff]  ;;  %v10874_v21 = vld [vmem:[#allocation29_spill] sm:$0xff] }
 0xa74   :  { %v6587_v23 = vpop.eup %6586  ;;  %v10872_v33 = vld [vmem:[#allocation28_spill] sm:$0xff] }
 0xa75   :  { %v4650_v20 = vadd.f32 1.0, %v6587_v23  ;;  %v9578_v0 = vsel %vm3113_vm13, %v4631_v63, %v9446_v37  ;;  %v6589_v12 = vpop.eup %6588  ;;  %v10876_v63 = vld [vmem:[#allocation80_spill] sm:$0xff]  ;;  %v10877_v23 = vld [vmem:[#allocation82_spill] sm:$0xff] }
 0xa76   :  { %v4688_v42 = vpack.c.bf16 %v9578_v0, %v9573_v41  ;;  %v6591_v60 = vpop.eup %6590  ;;  %v4651_v57 = vadd.f32 1.0, %v6589_v12  ;;  %v10879_v12 = vld [vmem:[#allocation83_spill] sm:$0xff] }
 0xa77   :  { %6600 = vrcp.f32 %v4650_v20  ;;  %v4653_v11 = vadd.f32 1.0, %v6591_v60  ;;  %v6593_v50 = vpop.eup %6592  ;;  %v10878_v20 = vld [vmem:[#allocation81_spill] sm:$0xff]  ;;  %v10881_v60 = vld [vmem:[#allocation94_spill] sm:$0xff] }
 0xa78   :  { %6602 = vtanh.f32 %v4582_v31  ;;  %4735 = vmatmul.mubr.bf16.vlgmr.msra.gmra.mrb[168].mxu0 %v4688_v42  ;;  %4778 = vmatmul.mubr.bf16.vlgmr.msra.gmra.mrb[168].mxu1 %v4688_v42  ;;  %v4654_v34 = vadd.f32 1.0, %v6593_v50  ;;  %v6595_v37 = vpop.eup %6594  ;;  %v10866_v31 = vld [vmem:[#allocation84_spill] sm:$0xff] }
 0xa79   :  { %6604 = vrcp.f32 %v4651_v57  ;;  %4801 = vmatpush1.bf16.msra.mxu0 %v9190_v13  ;;  %4844 = vmatpush1.bf16.msra.mxu1 %v9193_v6  ;;  %v6597_v13 = vpop.eup %6596  ;;  %v10880_v42 = vld [vmem:[#allocation92_spill] sm:$0xff]  ;;  %v10882_v57 = vld [vmem:[#allocation93_spill] sm:$0xff] }
 0xa7a   :  { %6606 = vrcp.f32 %v4653_v11  ;;  %4802 = vmatprep.subr.bf16.mxu0 %v9196_v30  ;;  %4845 = vmatprep.subr.bf16.mxu1 %v9199_v48  ;;  %v6599_v6 = vpop.eup %6598  ;;  %v10883_v11 = vld [vmem:[#allocation95_spill] sm:$0xff]  ;;  %v10884_v50 = vld [vmem:[#allocation104_spill] sm:$0xff] }
 0xa7b   :  { %4832 = vmatprep.mubr.bf16.mxu0 %v10441_v18  ;;  %4875 = vmatprep.mubr.bf16.mxu1 %v10441_v18  ;;  %6608 = vrcp.f32 %v4654_v34  ;;  %v4655_v36 = vadd.f32 1.0, %v6599_v6  ;;  %v10885_v34 = vld [vmem:[#allocation105_spill] sm:$0xff]  ;;  %v10888_v6 = vld [vmem:[#allocation110_spill] sm:$0xff] }
 0xa7d   :  { %4803 = vmatpush1.bf16.msra.mxu0 %v9204_v35  ;;  %4846 = vmatpush1.bf16.msra.mxu1 %v9207_v29  ;;  %v4652_v29 = vadd.f32 1.0, %v6597_v13  ;;  %v10887_v13 = vld [vmem:[#allocation22_spill] sm:$0xff] }
 0xa7e   :  { %4804 = vmatprep.subr.bf16.mxu0 %v9210_v10  ;;  %4847 = vmatprep.subr.bf16.mxu1 %v9213_v53 }
 0xa7f   :  { %6610 = vrcp.f32 %v4652_v29  ;;  %v10893_v29 = vld [vmem:[#allocation113_spill] sm:$0xff] }
 0xa81   :  { %v6601_v26 = vpop.eup %6600  ;;  %4805 = vmatpush1.bf16.msra.mxu0 %v9216_v15  ;;  %4848 = vmatpush1.bf16.msra.mxu1 %v9219_v55 }
 0xa82   :  { %v6603_v30 = vpop.eup %6602  ;;  %v4672_v48 = vmul.f32 %v6601_v26, %v6595_v37  ;;  %4806 = vmatprep.subr.bf16.mxu0 %v9222_v40  ;;  %4849 = vmatprep.subr.bf16.mxu1 %v9225_v56  ;;  %v10886_v37 = vld [vmem:[#allocation20_spill] sm:$0xff]  ;;  %v10889_v26 = vld [vmem:[#allocation111_spill] sm:$0xff]  ;;  %v10897_v40 = vld [vmem:[#allocation45_spill] sm:$0xff] }
 0xa83   :  { %v6605_v35 = vpop.eup %6604 }
 0xa84   :  { %v6607_v14 = vpop.eup %6606  ;;  %v4670_v10 = vmul.f32 %v6605_v35, %v9473_v22  ;;  %v10892_v35 = vld [vmem:[#allocation112_spill] sm:$0xff] }
 0xa85   :  { %v4673_v9 = vmul.f32 %v6607_v14, %v6603_v30  ;;  %4807 = vmatpush1.bf16.msra.mxu0 %v9229_v58  ;;  %4850 = vmatpush1.bf16.msra.mxu1 %v9232_v52  ;;  %v6609_v53 = vpop.eup %6608  ;;  %v10890_v30 = vld [vmem:[#allocation98_spill] sm:$0xff]  ;;  %v10898_v58 = vld [vmem:[#allocation47_spill] sm:$0xff] }
 0xa86   :  { %v4674_v15 = vadd.f32 %v4672_v48, %v4670_v10  ;;  %4808 = vmatprep.subr.bf16.mxu0 %v9235_v51  ;;  %4851 = vmatprep.subr.bf16.mxu1 %v9238_v17  ;;  %v4671_v55 = vmul.f32 %v6609_v53, %v9482_v7  ;;  %v10891_v48 = vld [vmem:[#allocation99_spill] sm:$0xff]  ;;  %v10894_v14 = vld [vmem:[#allocation114_spill] sm:$0xff]  ;;  %v10895_v10 = vld [vmem:[#allocation44_spill] sm:$0xff] }
 0xa87   :  { %v10896_v53 = vld [vmem:[#allocation46_spill] sm:$0xff] }
 0xa88   :  { %6612 = vtanh.f32 %v4674_v15  ;;  %v9605_v56 = vsel %vm3098_vm6, %v4674_v15, %v9473_v22  ;;  %v4675_v27 = vadd.f32 %v4673_v9, %v4671_v55  ;;  %v10859_v22 = vld [vmem:[#allocation90_spill] sm:$0xff]  ;;  %v4694_v9 = vunpack.c.l.bf16 %v10895_v10 }
 0xa89   :  { %4809 = vmatpush1.bf16.msra.mxu0 %v9247_v5  ;;  %4852 = vmatpush1.bf16.msra.mxu1 %v9250_v3  ;;  %6614 = vrcp.f32 %v4655_v36  ;;  %v6611_v51 = vpop.eup %6610  ;;  %v10856_v5 = vld [vmem:[#allocation21_spill] sm:$0xff]  ;;  %v4696_v15 = vunpack.c.l.bf16 %v10896_v53 }
 0xa8a   :  { %4810 = vmatprep.subr.bf16.mxu0 %v9253_v32  ;;  %4853 = vmatprep.subr.bf16.mxu1 %v9256_v39  ;;  %6616 = vtanh.f32 %v4675_v27  ;;  %v9614_v52 = vsel %vm3099_vm7, %v4675_v27, %v9482_v7  ;;  %v4695_v27 = vunpack.c.l.bf16 %v10897_v40 }
 0xa8d   :  { %4811 = vmatpush1.bf16.msra.mxu0 %v9264_v8  ;;  %4854 = vmatpush1.bf16.msra.mxu1 %v9267_v62  ;;  %v10857_v8 = vld [vmem:[#allocation23_spill] sm:$0xff]  ;;  %v10858_v62 = vld [vmem:[#allocation88_spill] sm:$0xff] }
 0xa8e   :  { %4812 = vmatprep.subr.bf16.mxu0 %v9270_v45  ;;  %4855 = vmatprep.subr.bf16.mxu1 %v9273_v46  ;;  %v10860_v46 = vld [vmem:[#allocation89_spill] sm:$0xff] }
 0xa91   :  { %4813 = vmatpush1.bf16.msra.mxu0 %v9276_v47  ;;  %4856 = vmatpush1.bf16.msra.mxu1 %v9279_v2  ;;  %v10861_v47 = vld [vmem:[#allocation115_spill] sm:$0xff] }
 0xa92   :  { %v6613_v17 = vpop.eup %6612  ;;  %4814 = vmatprep.subr.bf16.mxu0 %v9282_v44  ;;  %4857 = vmatprep.subr.bf16.mxu1 %v10856_v5  ;;  %v10862_v44 = vld [vmem:[#allocation116_spill] sm:$0xff] }
 0xa93   :  { %v4678_v3 = vmul.f32 %v6613_v17, %v6611_v51  ;;  %v6615_v32 = vpop.eup %6614  ;;  %v4697_v51 = vunpack.c.l.bf16 %v10898_v58 }
 0xa94   :  { %v6617_v39 = vpop.eup %6616 }
 0xa95   :  { %4815 = vmatpush1.bf16.msra.mxu0 %v10857_v8  ;;  %4858 = vmatpush1.bf16.msra.mxu1 %v10858_v62  ;;  %v4679_v45 = vmul.f32 %v6617_v39, %v6615_v32  ;;  %v9631_v2 = vsel %vm3098_vm6, %v4678_v3, %v10861_v47  ;;  %v4698_v39 = vunpack.c.h.bf16 %v10895_v10  ;;  %v4700_v8 = vunpack.c.h.bf16 %v10896_v53 }
 0xa96   :  { %5004 = vmatprep.subr.bf16.mxu0 %v10859_v22  ;;  %5047 = vmatprep.subr.bf16.mxu1 %v10860_v46  ;;  %v4699_v47 = vunpack.c.h.bf16 %v10897_v40  ;;  %v10901_v40 = vld [vmem:[#allocation65_spill] sm:$0xff] }
 0xa97   :  { %v9636_v7 = vsel %vm3099_vm7, %v4679_v45, %v10862_v44  ;;  %v4701_v44 = vunpack.c.h.bf16 %v10898_v58 }
 0xa98   :  { %v4689_v54 = vpack.c.bf16 %v9636_v7, %v9631_v2 }
 0xa9a   :  { %4833 = vmatmul.mubr.bf16.vlgmr.msra.gmra.mrb[172].mxu0 %v4689_v54  ;;  %4876 = vmatmul.mubr.bf16.vlgmr.msra.gmra.mrb[172].mxu1 %v4689_v54 }
 0xa9b   :  { %5005 = vmatpush1.bf16.msra.mxu0 %v10863_v49  ;;  %5048 = vmatpush1.bf16.msra.mxu1 %v10864_v28 }
 0xa9c   :  { %5006 = vmatprep.subr.bf16.mxu0 %v10865_v43  ;;  %5049 = vmatprep.subr.bf16.mxu1 %v10866_v31 }
 0xa9d   :  { %5036 = vmatprep.mubr.bf16.mxu0 %v10441_v18  ;;  %5079 = vmatprep.mubr.bf16.mxu1 %v10441_v18 }
 0xa9f   :  { %5007 = vmatpush1.bf16.msra.mxu0 %v10867_v19  ;;  %5050 = vmatpush1.bf16.msra.mxu1 %v10868_v16 }
 0xaa0   :  { %5008 = vmatprep.subr.bf16.mxu0 %v10869_v25  ;;  %5051 = vmatprep.subr.bf16.mxu1 %v10870_v59 }
 0xaa3   :  { %5009 = vmatpush1.bf16.msra.mxu0 %v10871_v1  ;;  %5052 = vmatpush1.bf16.msra.mxu1 %v10872_v33 }
 0xaa4   :  { %5010 = vmatprep.subr.bf16.mxu0 %v10873_v61  ;;  %5053 = vmatprep.subr.bf16.mxu1 %v10874_v21 }
 0xaa7   :  { %5011 = vmatpush1.bf16.msra.mxu0 %v10875_v4  ;;  %5054 = vmatpush1.bf16.msra.mxu1 %v10876_v63 }
 0xaa8   :  { %5012 = vmatprep.subr.bf16.mxu0 %v10877_v23  ;;  %5055 = vmatprep.subr.bf16.mxu1 %v10878_v20 }
 0xaab   :  { %5013 = vmatpush1.bf16.msra.mxu0 %v10879_v12  ;;  %5056 = vmatpush1.bf16.msra.mxu1 %v10880_v42 }
 0xaac   :  { %5014 = vmatprep.subr.bf16.mxu0 %v10881_v60  ;;  %5057 = vmatprep.subr.bf16.mxu1 %v10882_v57 }
 0xaaf   :  { %5015 = vmatpush1.bf16.msra.mxu0 %v10883_v11  ;;  %5058 = vmatpush1.bf16.msra.mxu1 %v10884_v50 }
 0xab0   :  { %5016 = vmatprep.subr.bf16.mxu0 %v10885_v34  ;;  %5059 = vmatprep.subr.bf16.mxu1 %v10886_v37 }
 0xab3   :  { %5017 = vmatpush1.bf16.msra.mxu0 %v10887_v13  ;;  %5060 = vmatpush1.bf16.msra.mxu1 %v10888_v6 }
 0xab4   :  { %5018 = vmatprep.subr.bf16.mxu0 %v10889_v26  ;;  %5061 = vmatprep.subr.bf16.mxu1 %v10890_v30 }
 0xab7   :  { %5019 = vmatpush1.bf16.msra.mxu0 %v10891_v48  ;;  %5062 = vmatpush1.bf16.msra.mxu1 %v10892_v35 }
 0xab8   :  { %5102 = vmatprep.subr.bf16.mxu0 %v10893_v29  ;;  %5145 = vmatprep.subr.bf16.mxu1 %v10894_v14 }
 0xb4b   :  { %v4736_v36 = vpop.f32.mrb[168].mxu0  ;;  %v4779_v55 = vpop.f32.mrb[168].mxu1 }
 0xb4c   :  { %v4737_v17 = vadd.f32 %v4736_v36, %v4694_v9  ;;  %v4780_v5 = vadd.f32 %v4779_v55, %v4696_v15  ;;  %v4738_v3 = vpop.f32.mrb[169].mxu0  ;;  %v4781_v32 = vpop.f32.mrb[169].mxu1  ;;  %v10899_v9 = vld [vmem:[#allocation64_spill] sm:$0xff]  ;;  %v10900_v36 = vld [vmem:[#allocation66_spill] sm:$0xff] }
 0xb4d   :  { %v4739_v62 = vadd.f32 %v4738_v3, %v4695_v27  ;;  %v4782_v45 = vadd.f32 %v4781_v32, %v4697_v51  ;;  %v4740_v22 = vpop.f32.mrb[170].mxu0  ;;  %v4783_v46 = vpop.f32.mrb[170].mxu1  ;;  %v4792_v53 = vunpack.c.l.bf16 %v10899_v9  ;;  %v4794_v55 = vunpack.c.l.bf16 %v10900_v36 }
 0xb4e   :  { %v5884_v54 = vmul.f32 -1.442695, %v4737_v17  ;;  %v4741_v49 = vadd.f32 %v4740_v22, %v4698_v39  ;;  %v4784_v28 = vadd.f32 %v4783_v46, %v4700_v8  ;;  %v4742_v43 = vpop.f32.mrb[171].mxu0  ;;  %v4785_v31 = vpop.f32.mrb[171].mxu1  ;;  %v5886_v33 = vmul.f32 -1.442695, %v4780_v5 }
 0xb4f   :  { %v5885_v19 = vmul.f32 -1.442695, %v4739_v62  ;;  %v4743_v16 = vadd.f32 %v4742_v43, %v4699_v47  ;;  %v4786_v25 = vadd.f32 %v4785_v31, %v4701_v44  ;;  %v4793_v27 = vunpack.c.l.bf16 %v10901_v40  ;;  %v10902_v17 = vld [vmem:[#allocation67_spill] sm:$0xff] }
 0xb50   :  { %6618 = vpow2.f32 %v5884_v54  ;;  %v5887_v59 = vmul.f32 -1.442695, %v4741_v49  ;;  %v5889_v61 = vmul.f32 -1.442695, %v4784_v28  ;;  %v4795_v5 = vunpack.c.l.bf16 %v10902_v17 }
 0xb51   :  { %v5888_v1 = vmul.f32 -1.442695, %v4743_v16  ;;  %6620 = vpow2.f32 %v5885_v19  ;;  %v4796_v3 = vunpack.c.h.bf16 %v10899_v9  ;;  %v4798_v47 = vunpack.c.h.bf16 %v10900_v36  ;;  %v9720_v9 = vld [vmem:[#allocation9 + $0x24] ss:$16 sps:$4 sm:$0xff]   ;;  %v9731_v36 = vld [vmem:[#allocation9 + $0x28] ss:$16 sps:$4 sm:$0xff]  }
 0xb52   :  { %6622 = vpow2.f32 %v5887_v59  ;;  %v4797_v43 = vunpack.c.h.bf16 %v10901_v40  ;;  %v9734_v40 = vld [vmem:[#allocation9 + $0x44] ss:$16 sps:$4 sm:$0xff]  }
 0xb53   :  { %6624 = vpow2.f32 %v5888_v1 }
 0xb54   :  { %6626 = vtanh.f32 %v4782_v45 }
 0xb55   :  { %6628 = vpow2.f32 %v5886_v33 }
 0xb56   :  { %6630 = vpow2.f32 %v5889_v61 }
 0xb5a   :  { %v6619_v21 = vpop.eup %6618 }
 0xb5b   :  { %v4904_v4 = vadd.f32 1.0, %v6619_v21  ;;  %v6621_v63 = vpop.eup %6620 }
 0xb5c   :  { %v6623_v23 = vpop.eup %6622  ;;  %v4905_v20 = vadd.f32 1.0, %v6621_v63 }
 0xb5d   :  { %6632 = vrcp.f32 %v4904_v4  ;;  %v4907_v12 = vadd.f32 1.0, %v6623_v23  ;;  %v6625_v42 = vpop.eup %6624  ;;  %v9777_v4 = vld [vmem:[#allocation9 + $0xa4] ss:$16 sps:$4 sm:$0xff]  }
 0xb5e   :  { %6634 = vtanh.f32 %v4786_v25  ;;  %v4908_v60 = vadd.f32 1.0, %v6625_v42  ;;  %v6627_v57 = vpop.eup %6626 }
 0xb5f   :  { %6636 = vrcp.f32 %v4905_v20  ;;  %v6629_v11 = vpop.eup %6628 }
 0xb60   :  { %6638 = vrcp.f32 %v4907_v12  ;;  %v6631_v50 = vpop.eup %6630  ;;  %v4906_v26 = vadd.f32 1.0, %v6629_v11 }
 0xb61   :  { %6640 = vrcp.f32 %v4908_v60  ;;  %v4909_v10 = vadd.f32 1.0, %v6631_v50 }
 0xb62   :  { %6642 = vrcp.f32 %v4906_v26 }
 0xb67   :  { %v6633_v34 = vpop.eup %6632 }
 0xb68   :  { %v6635_v37 = vpop.eup %6634  ;;  %v4926_v13 = vmul.f32 %v6633_v34, %v6627_v57 }
 0xb69   :  { %v6637_v6 = vpop.eup %6636 }
 0xb6a   :  { %v6639_v30 = vpop.eup %6638  ;;  %v4924_v48 = vmul.f32 %v6637_v6, %v9560_v38 }
 0xb6b   :  { %v4927_v35 = vmul.f32 %v6639_v30, %v6635_v37  ;;  %v6641_v29 = vpop.eup %6640 }
 0xb6c   :  { %v4928_v14 = vadd.f32 %v4926_v13, %v4924_v48  ;;  %v4925_v15 = vmul.f32 %v6641_v29, %v9568_v24  ;;  %v6643_v20 = vpop.eup %6642 }
 0xb6d   :  { %v4834_v58 = vpop.f32.mrb[172].mxu0  ;;  %v4877_v51 = vpop.f32.mrb[172].mxu1 }
 0xb6e   :  { %6644 = vtanh.f32 %v4928_v14  ;;  %v9692_v39 = vsel %vm2780_vm4, %v4928_v14, %v9560_v38  ;;  %v4929_v8 = vadd.f32 %v4927_v35, %v4925_v15  ;;  %v4835_v62 = vadd.f32 %v4834_v58, %v4792_v53  ;;  %v4836_v22 = vpop.f32.mrb[173].mxu0  ;;  %v4879_v46 = vpop.f32.mrb[173].mxu1  ;;  %v9723_v53 = vld [vmem:[#allocation9 + $0x2c] ss:$16 sps:$4 sm:$0xff]   ;;  %v9728_v15 = vld [vmem:[#allocation9 + $0x20] ss:$16 sps:$4 sm:$0xff]  }
 0xb6f   :  { %v4878_v45 = vadd.f32 %v4877_v51, %v4794_v55  ;;  %6646 = vrcp.f32 %v4909_v10  ;;  %v4837_v44 = vadd.f32 %v4836_v22, %v4793_v27  ;;  %v4880_v54 = vadd.f32 %v4879_v46, %v4795_v5  ;;  %v4838_v49 = vpop.f32.mrb[174].mxu0  ;;  %v4881_v28 = vpop.f32.mrb[174].mxu1  ;;  %v9737_v27 = vld [vmem:[#allocation9 + $0x4c] ss:$16 sps:$4 sm:$0xff]   ;;  %v9740_v5 = vld [vmem:[#allocation9 + $0x40] ss:$16 sps:$4 sm:$0xff]  }
 0xb70   :  { %6648 = vtanh.f32 %v4929_v8  ;;  %v5890_v31 = vmul.f32 -1.442695, %v4835_v62  ;;  %v4839_v19 = vadd.f32 %v4838_v49, %v4796_v3  ;;  %v4840_v16 = vpop.f32.mrb[175].mxu0  ;;  %v4799_v38 = vunpack.c.h.bf16 %v10902_v17  ;;  %v4883_v25 = vpop.f32.mrb[175].mxu1  ;;  %v9743_v3 = vld [vmem:[#allocation9 + $0x48] ss:$16 sps:$4 sm:$0xff]  }
 0xb71   :  { %v5891_v59 = vmul.f32 -1.442695, %v4837_v44  ;;  %v4882_v1 = vadd.f32 %v4881_v28, %v4798_v47  ;;  %v4841_v33 = vadd.f32 %v4840_v16, %v4797_v43  ;;  %v9700_v63 = vsel %vm2781_vm5, %v4929_v8, %v9568_v24  ;;  %v9746_v62 = vld [vmem:[#allocation9 + $0x64] ss:$16 sps:$4 sm:$0xff]   ;;  %v9753_v49 = vld [vmem:[#allocation9 + $0x60] ss:$16 sps:$4 sm:$0xff]  }
 0xb72   :  { %6650 = vpow2.f32 %v5890_v31  ;;  %v5893_v61 = vmul.f32 -1.442695, %v4839_v19  ;;  %v4884_v21 = vadd.f32 %v4883_v25, %v4799_v38  ;;  %v5892_v57 = vmul.f32 -1.442695, %v4878_v45  ;;  %v9749_v45 = vld [vmem:[#allocation9 + $0x6c] ss:$16 sps:$4 sm:$0xff]  }
 0xb73   :  { %v5894_v23 = vmul.f32 -1.442695, %v4841_v33  ;;  %6652 = vpow2.f32 %v5891_v59  ;;  %v5895_v50 = vmul.f32 -1.442695, %v4882_v1  ;;  %v9756_v28 = vld [vmem:[#allocation9 + $0x68] ss:$16 sps:$4 sm:$0xff]  }
 0xb74   :  { %6654 = vpow2.f32 %v5893_v61  ;;  %v9759_v16 = vld [vmem:[#allocation9 + $0x84] ss:$16 sps:$4 sm:$0xff]   ;;  %v9762_v38 = vld [vmem:[#allocation9 + $0x8c] ss:$16 sps:$4 sm:$0xff]   ;;  %v9771_v61 = vld [vmem:[#allocation9 + $0x80] ss:$16 sps:$4 sm:$0xff]  }
 0xb75   :  { %6656 = vpow2.f32 %v5894_v23  ;;  %v9780_v23 = vld [vmem:[#allocation9 + $0xac] ss:$16 sps:$4 sm:$0xff]   ;;  %v7047_v59 = vld [vmem:[#allocation8 + $0x68] ss:$16 sps:$4 sm:$0xff]  }
 0xb76   :  { %6658 = vtanh.f32 %v4880_v54 }
 0xb77   :  { %6660 = vpow2.f32 %v5892_v57  ;;  %v9797_v57 = vld [vmem:[#allocation9 + $0xcc] ss:$16 sps:$4 sm:$0xff]  }
 0xb78   :  { %v6645_v12 = vpop.eup %6644  ;;  %6662 = vpow2.f32 %v5895_v50  ;;  %v9800_v50 = vld [vmem:[#allocation9 + $0xc0] ss:$16 sps:$4 sm:$0xff]  }
 0xb79   :  { %v4932_v42 = vmul.f32 %v6645_v12, %v6643_v20  ;;  %v6647_v60 = vpop.eup %6646  ;;  %v9788_v12 = vld [vmem:[#allocation9 + $0xa0] ss:$16 sps:$4 sm:$0xff]  }
 0xb7a   :  { %v6649_v11 = vpop.eup %6648 }
 0xb7b   :  { %v4933_v34 = vmul.f32 %v6649_v11, %v6647_v60  ;;  %v9705_v24 = vsel %vm2780_vm4, %v4932_v42, %v9573_v41  ;;  %v9714_v41 = vld [vmem:[#allocation9] ss:$16 sps:$4 sm:$0xff]   ;;  %v9791_v42 = vld [vmem:[#allocation9 + $0xa8] ss:$16 sps:$4 sm:$0xff]   ;;  %v9794_v60 = vld [vmem:[#allocation9 + $0xc4] ss:$16 sps:$4 sm:$0xff]  }
 0xb7c   :  { %v6651_v37 = vpop.eup %6650 }
 0xb7d   :  { %v4952_v13 = vadd.f32 1.0, %v6651_v37  ;;  %v9710_v6 = vsel %vm2781_vm5, %v4933_v34, %v9578_v0  ;;  %v6653_v26 = vpop.eup %6652  ;;  %v9717_v0 = vld [vmem:[#allocation9 + $0x8] ss:$16 sps:$4 sm:$0xff]   ;;  %v9806_v37 = vld [vmem:[#allocation9 + $0xe4] ss:$16 sps:$4 sm:$0xff]  }
 0xb7e   :  { %v4990_v30 = vpack.c.bf16 %v9710_v6, %v9705_v24  ;;  %v6655_v48 = vpop.eup %6654  ;;  %v4953_v35 = vadd.f32 1.0, %v6653_v26 }
 0xb7f   :  { %6664 = vrcp.f32 %v4952_v13  ;;  %v4955_v29 = vadd.f32 1.0, %v6655_v48  ;;  %v6657_v14 = vpop.eup %6656  ;;  %v9809_v13 = vld [vmem:[#allocation9 + $0xec] ss:$16 sps:$4 sm:$0xff]  }
 0xb80   :  { %6666 = vtanh.f32 %v4884_v21  ;;  %5037 = vmatmul.mubr.bf16.vlgmr.msra.gmra.mrb[176].mxu0 %v4990_v30  ;;  %5080 = vmatmul.mubr.bf16.vlgmr.msra.gmra.mrb[176].mxu1 %v4990_v30  ;;  %v4956_v10 = vadd.f32 1.0, %v6657_v14  ;;  %v6659_v55 = vpop.eup %6658  ;;  %v9774_v21 = vld [vmem:[#allocation9 + $0x88] ss:$16 sps:$4 sm:$0xff]   ;;  %10907 = vst [vmem:[#allocation117_spill] sm:$0xff] %v9809_v13 }
 0xb81   :  { %6668 = vrcp.f32 %v4953_v35  ;;  %5103 = vmatpush1.bf16.msra.mxu0 %v9714_v41  ;;  %5146 = vmatpush1.bf16.msra.mxu1 %v9717_v0  ;;  %v6661_v58 = vpop.eup %6660  ;;  %v9812_v35 = vld [vmem:[#allocation9 + $0xe0] ss:$16 sps:$4 sm:$0xff]  }
 0xb82   :  { %6670 = vrcp.f32 %v4955_v29  ;;  %5104 = vmatprep.subr.bf16.mxu0 %v9720_v9  ;;  %5147 = vmatprep.subr.bf16.mxu1 %v9723_v53  ;;  %v6663_v51 = vpop.eup %6662  ;;  %v4954_v46 = vadd.f32 1.0, %v6661_v58  ;;  %10908 = vst [vmem:[#allocation118_spill] sm:$0xff] %v9812_v35  ;;  %v9815_v29 = vld [vmem:[#allocation9 + $0xe8] ss:$16 sps:$4 sm:$0xff]  }
 0xb83   :  { %5134 = vmatprep.mubr.bf16.mxu0 %v10441_v18  ;;  %5177 = vmatprep.mubr.bf16.mxu1 %v10441_v18  ;;  %6672 = vrcp.f32 %v4956_v10  ;;  %v4957_v19 = vadd.f32 1.0, %v6663_v51  ;;  %10909 = vst [vmem:[#allocation119_spill] sm:$0xff] %v9815_v29  ;;  %v7032_v10 = vld [vmem:[#allocation8 + $0x4] ss:$16 sps:$4 sm:$0xff]  }
 0xb84   :  { %6674 = vrcp.f32 %v4954_v46  ;;  %v7037_v46 = vld [vmem:[#allocation8 + $0x2c] ss:$16 sps:$4 sm:$0xff]  }
 0xb85   :  { %5105 = vmatpush1.bf16.msra.mxu0 %v9728_v15  ;;  %5148 = vmatpush1.bf16.msra.mxu1 %v9731_v36 }
 0xb86   :  { %5106 = vmatprep.subr.bf16.mxu0 %v9734_v40  ;;  %5149 = vmatprep.subr.bf16.mxu1 %v9737_v27 }
 0xb89   :  { %v6665_v17 = vpop.eup %6664  ;;  %5107 = vmatpush1.bf16.msra.mxu0 %v9740_v5  ;;  %5150 = vmatpush1.bf16.msra.mxu1 %v9743_v3 }
 0xb8a   :  { %v6667_v32 = vpop.eup %6666  ;;  %v4974_v8 = vmul.f32 %v6665_v17, %v6659_v55  ;;  %5108 = vmatprep.subr.bf16.mxu0 %v9746_v62  ;;  %5151 = vmatprep.subr.bf16.mxu1 %v9749_v45  ;;  %v7033_v55 = vld [vmem:[#allocation8 + $0xc] ss:$16 sps:$4 sm:$0xff]  }
 0xb8b   :  { %v6669_v22 = vpop.eup %6668 }
 0xb8c   :  { %v6671_v47 = vpop.eup %6670  ;;  %v4972_v44 = vmul.f32 %v6669_v22, %v9605_v56  ;;  %v7036_v22 = vld [vmem:[#allocation8 + $0x24] ss:$16 sps:$4 sm:$0xff]  }
 0xb8d   :  { %v4975_v54 = vmul.f32 %v6671_v47, %v6667_v32  ;;  %5109 = vmatpush1.bf16.msra.mxu0 %v9753_v49  ;;  %5152 = vmatpush1.bf16.msra.mxu1 %v9756_v28  ;;  %v6673_v43 = vpop.eup %6672  ;;  %v7034_v32 = vld [vmem:[#allocation8] ss:$16 sps:$4 sm:$0xff]   ;;  %v7040_v47 = vld [vmem:[#allocation8 + $0x44] ss:$16 sps:$4 sm:$0xff]  }
 0xb8e   :  { %v4976_v31 = vadd.f32 %v4974_v8, %v4972_v44  ;;  %5110 = vmatprep.subr.bf16.mxu0 %v9759_v16  ;;  %5153 = vmatprep.subr.bf16.mxu1 %v9762_v38  ;;  %v4973_v25 = vmul.f32 %v6673_v43, %v9614_v52  ;;  %v6675_v11 = vpop.eup %6674  ;;  %v7035_v8 = vld [vmem:[#allocation8 + $0x8] ss:$16 sps:$4 sm:$0xff]   ;;  %v7041_v44 = vld [vmem:[#allocation8 + $0x4c] ss:$16 sps:$4 sm:$0xff]  }
 0xb8f   :  { %v7043_v43 = vld [vmem:[#allocation8 + $0x48] ss:$16 sps:$4 sm:$0xff]  }
 0xb90   :  { %6676 = vtanh.f32 %v4976_v31  ;;  %v9769_v1 = vsel %vm2766_vm2, %v4976_v31, %v9605_v56  ;;  %v4977_v33 = vadd.f32 %v4975_v54, %v4973_v25  ;;  %v7042_v54 = vld [vmem:[#allocation8 + $0x40] ss:$16 sps:$4 sm:$0xff]   ;;  %v7044_v31 = vld [vmem:[#allocation8 + $0x64] ss:$16 sps:$4 sm:$0xff]   ;;  %v7049_v56 = vld [vmem:[#allocation8 + $0x8c] ss:$16 sps:$4 sm:$0xff]  }
 0xb91   :  { %5111 = vmatpush1.bf16.msra.mxu0 %v9771_v61  ;;  %5154 = vmatpush1.bf16.msra.mxu1 %v9774_v21  ;;  %6678 = vrcp.f32 %v4957_v19  ;;  %v7045_v19 = vld [vmem:[#allocation8 + $0x6c] ss:$16 sps:$4 sm:$0xff]   ;;  %v7046_v25 = vld [vmem:[#allocation8 + $0x60] ss:$16 sps:$4 sm:$0xff]  }
 0xb92   :  { %5112 = vmatprep.subr.bf16.mxu0 %v9777_v4  ;;  %5155 = vmatprep.subr.bf16.mxu1 %v9780_v23  ;;  %6680 = vtanh.f32 %v4977_v33  ;;  %v9786_v20 = vsel %vm2767_vm3, %v4977_v33, %v9614_v52  ;;  %v9803_v52 = vld [vmem:[#allocation9 + $0xc8] ss:$16 sps:$4 sm:$0xff]   ;;  %v7048_v33 = vld [vmem:[#allocation8 + $0x84] ss:$16 sps:$4 sm:$0xff]  }
 0xb95   :  { %5113 = vmatpush1.bf16.msra.mxu0 %v9788_v12  ;;  %5156 = vmatpush1.bf16.msra.mxu1 %v9791_v42 }
 0xb96   :  { %5114 = vmatprep.subr.bf16.mxu0 %v9794_v60  ;;  %5157 = vmatprep.subr.bf16.mxu1 %v9797_v57 }
 0xb99   :  { %5115 = vmatpush1.bf16.msra.mxu0 %v9800_v50  ;;  %5158 = vmatpush1.bf16.msra.mxu1 %v9803_v52 }
 0xb9a   :  { %v6677_v34 = vpop.eup %6676  ;;  %5116 = vmatprep.subr.bf16.mxu0 %v9806_v37  ;;  %5159 = vmatprep.subr.bf16.mxu1 %v9809_v13 }
 0xb9b   :  { %v4980_v26 = vmul.f32 %v6677_v34, %v6675_v11  ;;  %v6679_v30 = vpop.eup %6678  ;;  %v7050_v11 = vld [vmem:[#allocation8 + $0x80] ss:$16 sps:$4 sm:$0xff]   ;;  %v7051_v34 = vld [vmem:[#allocation8 + $0x88] ss:$16 sps:$4 sm:$0xff]  }
 0xb9c   :  { %v6681_v48 = vpop.eup %6680 }
 0xb9d   :  { %5117 = vmatpush1.bf16.msra.mxu0 %v9812_v35  ;;  %5160 = vmatpush1.bf16.msra.mxu1 %v9815_v29  ;;  %v4981_v14 = vmul.f32 %v6681_v48, %v6679_v30  ;;  %v9821_v58 = vsel %vm2766_vm2, %v4980_v26, %v9631_v2  ;;  %v7038_v2 = vld [vmem:[#allocation8 + $0x20] ss:$16 sps:$4 sm:$0xff]   ;;  %v7052_v26 = vld [vmem:[#allocation8 + $0xa4] ss:$16 sps:$4 sm:$0xff]   ;;  %v7053_v30 = vld [vmem:[#allocation8 + $0xac] ss:$16 sps:$4 sm:$0xff]  }
 0xb9e   :  { %5306 = vmatprep.subr.bf16.mxu0 %v7032_v10  ;;  %5349 = vmatprep.subr.bf16.mxu1 %v7033_v55  ;;  %10910 = vst [vmem:[#allocation120_spill] sm:$0xff] %v9821_v58  ;;  %v7054_v48 = vld [vmem:[#allocation8 + $0xa0] ss:$16 sps:$4 sm:$0xff]   ;;  %v7056_v10 = vld [vmem:[#allocation8 + $0xc4] ss:$16 sps:$4 sm:$0xff]  }
 0xb9f   :  { %v9826_v51 = vsel %vm2767_vm3, %v4981_v14, %v9636_v7  ;;  %v7039_v7 = vld [vmem:[#allocation8 + $0x28] ss:$16 sps:$4 sm:$0xff]   ;;  %v7057_v55 = vld [vmem:[#allocation8 + $0xcc] ss:$16 sps:$4 sm:$0xff]  }
 0xba0   :  { %10911 = vst [vmem:[#allocation121_spill] sm:$0xff] %v9826_v51  ;;  %v4991_v17 = vpack.c.bf16 %v9826_v51, %v9821_v58  ;;  %v7055_v14 = vld [vmem:[#allocation8 + $0xa8] ss:$16 sps:$4 sm:$0xff]  }
 0xba2   :  { %5135 = vmatmul.mubr.bf16.vlgmr.msra.gmra.mrb[180].mxu0 %v4991_v17  ;;  %5178 = vmatmul.mubr.bf16.vlgmr.msra.gmra.mrb[180].mxu1 %v4991_v17  ;;  %v7058_v17 = vld [vmem:[#allocation8 + $0xc0] ss:$16 sps:$4 sm:$0xff]  }
 0xba3   :  { %5307 = vmatpush1.bf16.msra.mxu0 %v7034_v32  ;;  %5350 = vmatpush1.bf16.msra.mxu1 %v7035_v8  ;;  %v7059_v32 = vld [vmem:[#allocation8 + $0xc8] ss:$16 sps:$4 sm:$0xff]   ;;  %v7060_v8 = vld [vmem:[#allocation8 + $0xe4] ss:$16 sps:$4 sm:$0xff]  }
 0xba4   :  { %5308 = vmatprep.subr.bf16.mxu0 %v7036_v22  ;;  %5351 = vmatprep.subr.bf16.mxu1 %v7037_v46  ;;  %v7061_v22 = vld [vmem:[#allocation8 + $0xec] ss:$16 sps:$4 sm:$0xff]   ;;  %v7062_v46 = vld [vmem:[#allocation8 + $0xe0] ss:$16 sps:$4 sm:$0xff]  }
 0xba5   :  { %5338 = vmatprep.mubr.bf16.mxu0 %v10441_v18  ;;  %5381 = vmatprep.mubr.bf16.mxu1 %v10441_v18 }
 0xba7   :  { %5309 = vmatpush1.bf16.msra.mxu0 %v7038_v2  ;;  %5352 = vmatpush1.bf16.msra.mxu1 %v7039_v7  ;;  %v7063_v2 = vld [vmem:[#allocation8 + $0xe8] ss:$16 sps:$4 sm:$0xff]   ;;  %v7064_v7 = vld [vmem:[#allocation9 + $0x4] ss:$16 sps:$4 sm:$0xff]  }
 0xba8   :  { %5310 = vmatprep.subr.bf16.mxu0 %v7040_v47  ;;  %5353 = vmatprep.subr.bf16.mxu1 %v7041_v44  ;;  %v7065_v47 = vld [vmem:[#allocation9 + $0xc] ss:$16 sps:$4 sm:$0xff]   ;;  %v10912_v44 = vld [vmem:[#allocation48_spill] sm:$0xff] }
 0xbab   :  { %5311 = vmatpush1.bf16.msra.mxu0 %v7042_v54  ;;  %5354 = vmatpush1.bf16.msra.mxu1 %v7043_v43  ;;  %v4996_v54 = vunpack.c.l.bf16 %v10912_v44  ;;  %v10913_v43 = vld [vmem:[#allocation50_spill] sm:$0xff] }
 0xbac   :  { %5312 = vmatprep.subr.bf16.mxu0 %v7044_v31  ;;  %5355 = vmatprep.subr.bf16.mxu1 %v7045_v19  ;;  %v4998_v31 = vunpack.c.l.bf16 %v10913_v43 }
 0xbaf   :  { %5313 = vmatpush1.bf16.msra.mxu0 %v7046_v25  ;;  %5356 = vmatpush1.bf16.msra.mxu1 %v7047_v59  ;;  %v10914_v59 = vld [vmem:[#allocation49_spill] sm:$0xff] }
 0xbb0   :  { %5314 = vmatprep.subr.bf16.mxu0 %v7048_v33  ;;  %5357 = vmatprep.subr.bf16.mxu1 %v7049_v56  ;;  %v4997_v33 = vunpack.c.l.bf16 %v10914_v59  ;;  %v10915_v56 = vld [vmem:[#allocation51_spill] sm:$0xff] }
 0xbb3   :  { %5315 = vmatpush1.bf16.msra.mxu0 %v7050_v11  ;;  %5358 = vmatpush1.bf16.msra.mxu1 %v7051_v34  ;;  %v4999_v11 = vunpack.c.l.bf16 %v10915_v56 }
 0xbb4   :  { %5316 = vmatprep.subr.bf16.mxu0 %v7052_v26  ;;  %5359 = vmatprep.subr.bf16.mxu1 %v7053_v30 }
 0xbb7   :  { %5317 = vmatpush1.bf16.msra.mxu0 %v7054_v48  ;;  %5360 = vmatpush1.bf16.msra.mxu1 %v7055_v14  ;;  %v5000_v14 = vunpack.c.h.bf16 %v10912_v44 }
 0xbb8   :  { %5318 = vmatprep.subr.bf16.mxu0 %v7056_v10  ;;  %5361 = vmatprep.subr.bf16.mxu1 %v7057_v55  ;;  %v5002_v10 = vunpack.c.h.bf16 %v10913_v43 }
 0xbbb   :  { %5319 = vmatpush1.bf16.msra.mxu0 %v7058_v17  ;;  %5362 = vmatpush1.bf16.msra.mxu1 %v7059_v32 }
 0xbbc   :  { %5320 = vmatprep.subr.bf16.mxu0 %v7060_v8  ;;  %5363 = vmatprep.subr.bf16.mxu1 %v7061_v22  ;;  %v5001_v22 = vunpack.c.h.bf16 %v10914_v59 }
 0xbbf   :  { %5321 = vmatpush1.bf16.msra.mxu0 %v7062_v46  ;;  %5364 = vmatpush1.bf16.msra.mxu1 %v7063_v2  ;;  %v5003_v46 = vunpack.c.h.bf16 %v10915_v56 }
 0xbc0   :  { %5404 = vmatprep.subr.bf16.mxu0 %v7064_v7  ;;  %5447 = vmatprep.subr.bf16.mxu1 %v7065_v47 }
 0xc53   :  { %v5038_v19 = vpop.f32.mrb[176].mxu0  ;;  %v5081_v25 = vpop.f32.mrb[176].mxu1 }
 0xc54   :  { %v5039_v34 = vadd.f32 %v5038_v19, %v4996_v54  ;;  %v5082_v26 = vadd.f32 %v5081_v25, %v4998_v31  ;;  %v5040_v30 = vpop.f32.mrb[177].mxu0  ;;  %v5083_v48 = vpop.f32.mrb[177].mxu1 }
 0xc55   :  { %v5041_v55 = vadd.f32 %v5040_v30, %v4997_v33  ;;  %v5084_v17 = vadd.f32 %v5083_v48, %v4999_v11  ;;  %v5042_v32 = vpop.f32.mrb[178].mxu0  ;;  %v5085_v8 = vpop.f32.mrb[178].mxu1 }
 0xc56   :  { %v5896_v2 = vmul.f32 -1.442695, %v5039_v34  ;;  %v5043_v7 = vadd.f32 %v5042_v32, %v5000_v14  ;;  %v5086_v47 = vadd.f32 %v5085_v8, %v5002_v10  ;;  %v5044_v51 = vpop.f32.mrb[179].mxu0  ;;  %v5087_v54 = vpop.f32.mrb[179].mxu1  ;;  %v5898_v43 = vmul.f32 -1.442695, %v5082_v26 }
 0xc57   :  { %v5897_v31 = vmul.f32 -1.442695, %v5041_v55  ;;  %v5045_v19 = vadd.f32 %v5044_v51, %v5001_v22  ;;  %v5088_v25 = vadd.f32 %v5087_v54, %v5003_v46 }
 0xc58   :  { %6682 = vpow2.f32 %v5896_v2  ;;  %v5899_v44 = vmul.f32 -1.442695, %v5043_v7  ;;  %v5901_v33 = vmul.f32 -1.442695, %v5086_v47 }
 0xc59   :  { %v5900_v58 = vmul.f32 -1.442695, %v5045_v19  ;;  %6684 = vpow2.f32 %v5897_v31  ;;  %v10916_v19 = vld [vmem:[#allocation60_spill] sm:$0xff] }
 0xc5a   :  { %6686 = vpow2.f32 %v5899_v44 }
 0xc5b   :  { %6688 = vpow2.f32 %v5900_v58 }
 0xc5c   :  { %6690 = vtanh.f32 %v5084_v17 }
 0xc5d   :  { %6692 = vpow2.f32 %v5898_v43  ;;  %v10917_v43 = vld [vmem:[#allocation62_spill] sm:$0xff] }
 0xc5e   :  { %6694 = vpow2.f32 %v5901_v33  ;;  %v5096_v33 = vunpack.c.l.bf16 %v10917_v43 }
 0xc62   :  { %v6683_v11 = vpop.eup %6682 }
 0xc63   :  { %v5206_v59 = vadd.f32 1.0, %v6683_v11  ;;  %v6685_v56 = vpop.eup %6684  ;;  %v5098_v11 = vunpack.c.h.bf16 %v10916_v19 }
 0xc64   :  { %v6687_v34 = vpop.eup %6686  ;;  %v5207_v30 = vadd.f32 1.0, %v6685_v56 }
 0xc65   :  { %6696 = vrcp.f32 %v5206_v59  ;;  %v5209_v48 = vadd.f32 1.0, %v6687_v34  ;;  %v6689_v51 = vpop.eup %6688  ;;  %v10918_v34 = vld [vmem:[#allocation61_spill] sm:$0xff] }
 0xc66   :  { %6698 = vtanh.f32 %v5088_v25  ;;  %v5210_v14 = vadd.f32 1.0, %v6689_v51  ;;  %v6691_v10 = vpop.eup %6690  ;;  %v5094_v25 = vunpack.c.l.bf16 %v10916_v19  ;;  %v5099_v19 = vunpack.c.h.bf16 %v10918_v34 }
 0xc67   :  { %6700 = vrcp.f32 %v5207_v30  ;;  %v6693_v58 = vpop.eup %6692  ;;  %v5095_v30 = vunpack.c.l.bf16 %v10918_v34 }
 0xc68   :  { %6702 = vrcp.f32 %v5209_v48  ;;  %v6695_v26 = vpop.eup %6694  ;;  %v5208_v22 = vadd.f32 1.0, %v6693_v58  ;;  %v10919_v48 = vld [vmem:[#allocation63_spill] sm:$0xff] }
 0xc69   :  { %6704 = vrcp.f32 %v5210_v14  ;;  %v5211_v31 = vadd.f32 1.0, %v6695_v26  ;;  %v5097_v51 = vunpack.c.l.bf16 %v10919_v48  ;;  %v10920_v14 = vld [vmem:[#allocation146_spill] sm:$0xff] }
 0xc6a   :  { %6706 = vrcp.f32 %v5208_v22  ;;  %vm10921_vm8 = vcmp.eq.s32.totalorder %v10920_v14, 1 }
 0xc6b   :  { %vm10924_vm11 = vmmov %vm10921_vm8 }
 0xc6f   :  { %v6697_v55 = vpop.eup %6696 }
 0xc70   :  { %v6699_v32 = vpop.eup %6698  ;;  %v5228_v17 = vmul.f32 %v6697_v55, %v6691_v10 }
 0xc71   :  { %v6701_v8 = vpop.eup %6700 }
 0xc72   :  { %v6703_v46 = vpop.eup %6702  ;;  %v5226_v2 = vmul.f32 %v6701_v8, %v9692_v39  ;;  %v5100_v8 = vunpack.c.h.bf16 %v10917_v43 }
 0xc73   :  { %v5229_v7 = vmul.f32 %v6703_v46, %v6699_v32  ;;  %v6705_v47 = vpop.eup %6704 }
 0xc74   :  { %v5230_v54 = vadd.f32 %v5228_v17, %v5226_v2  ;;  %v5227_v44 = vmul.f32 %v6705_v47, %v9700_v63  ;;  %v6707_v34 = vpop.eup %6706 }
 0xc75   :  { %v5136_v59 = vpop.f32.mrb[180].mxu0  ;;  %v5179_v56 = vpop.f32.mrb[180].mxu1 }
 0xc76   :  { %6708 = vtanh.f32 %v5230_v54  ;;  %v9850_v10 = vsel %vm10921_vm8, %v5230_v54, %v9692_v39  ;;  %v5231_v58 = vadd.f32 %v5229_v7, %v5227_v44  ;;  %v5137_v26 = vadd.f32 %v5136_v59, %v5094_v25  ;;  %v5138_v32 = vpop.f32.mrb[181].mxu0  ;;  %v5181_v17 = vpop.f32.mrb[181].mxu1 }
 0xc77   :  { %v5180_v55 = vadd.f32 %v5179_v56, %v5096_v33  ;;  %6710 = vrcp.f32 %v5211_v31  ;;  %v5139_v22 = vadd.f32 %v5138_v32, %v5095_v30  ;;  %v5182_v46 = vadd.f32 %v5181_v17, %v5097_v51  ;;  %v5140_v2 = vpop.f32.mrb[182].mxu0  ;;  %v5183_v47 = vpop.f32.mrb[182].mxu1  ;;  %v10922_v31 = vld [vmem:[#allocation147_spill] sm:$0xff] }
 0xc78   :  { %6712 = vtanh.f32 %v5231_v58  ;;  %v5902_v29 = vmul.f32 -1.442695, %v5137_v26  ;;  %v5141_v35 = vadd.f32 %v5140_v2, %v5098_v11  ;;  %v5142_v13 = vpop.f32.mrb[183].mxu0  ;;  %v5101_v39 = vunpack.c.h.bf16 %v10919_v48  ;;  %v5185_v7 = vpop.f32.mrb[183].mxu1 }
 0xc79   :  { %v5903_v54 = vmul.f32 -1.442695, %v5139_v22  ;;  %v5184_v25 = vadd.f32 %v5183_v47, %v5100_v8  ;;  %v5143_v44 = vadd.f32 %v5142_v13, %v5099_v19  ;;  %vm10923_vm9 = vcmp.eq.s32.totalorder %v10922_v31, 1 }
 0xc7a   :  { %6714 = vpow2.f32 %v5902_v29  ;;  %v5905_v33 = vmul.f32 -1.442695, %v5141_v35  ;;  %v5186_v43 = vadd.f32 %v5185_v7, %v5101_v39  ;;  %v9858_v59 = vsel %vm10923_vm9, %v5231_v58, %v9700_v63  ;;  %vm10925_vm12 = vmmov %vm10923_vm9 }
 0xc7b   :  { %v5906_v56 = vmul.f32 -1.442695, %v5143_v44  ;;  %6716 = vpow2.f32 %v5903_v54  ;;  %v5904_v51 = vmul.f32 -1.442695, %v5180_v55  ;;  %v5907_v32 = vmul.f32 -1.442695, %v5184_v25 }
 0xc7c   :  { %6718 = vpow2.f32 %v5905_v33  ;;  %v10938_v54 = vld [vmem:[#allocation54_spill] sm:$0xff] }
 0xc7d   :  { %6720 = vpow2.f32 %v5906_v56  ;;  %v5300_v25 = vunpack.c.l.bf16 %v10938_v54  ;;  %v10940_v56 = vld [vmem:[#allocation55_spill] sm:$0xff] }
 0xc7e   :  { %6722 = vtanh.f32 %v5182_v46 }
 0xc7f   :  { %6724 = vpow2.f32 %v5904_v51 }
 0xc80   :  { %v6709_v11 = vpop.eup %6708  ;;  %6726 = vpow2.f32 %v5907_v32  ;;  %v5304_v32 = vunpack.c.h.bf16 %v10938_v54 }
 0xc81   :  { %v5234_v30 = vmul.f32 %v6709_v11, %v6707_v34  ;;  %v6711_v48 = vpop.eup %6710  ;;  %v5301_v34 = vunpack.c.l.bf16 %v10940_v56 }
 0xc82   :  { %v6713_v26 = vpop.eup %6712 }
 0xc83   :  { %v5235_v13 = vmul.f32 %v6713_v26, %v6711_v48  ;;  %v9863_v63 = vsel %vm10924_vm11, %v5234_v30, %v9705_v24 }
 0xc84   :  { %v6715_v29 = vpop.eup %6714 }
 0xc85   :  { %v5254_v35 = vadd.f32 1.0, %v6715_v29  ;;  %v9868_v58 = vsel %vm10925_vm12, %v5235_v13, %v9710_v6  ;;  %v6717_v17 = vpop.eup %6716 }
 0xc86   :  { %v5292_v55 = vpack.c.bf16 %v9868_v58, %v9863_v63  ;;  %v6719_v8 = vpop.eup %6718  ;;  %v5255_v22 = vadd.f32 1.0, %v6717_v17 }
 0xc87   :  { %6728 = vrcp.f32 %v5254_v35  ;;  %v5257_v46 = vadd.f32 1.0, %v6719_v8  ;;  %v6721_v14 = vpop.eup %6720  ;;  %v5305_v8 = vunpack.c.h.bf16 %v10940_v56 }
 0xc88   :  { %6730 = vtanh.f32 %v5186_v43  ;;  %5339 = vmatmul.mubr.bf16.vlgmr.msra.gmra.mrb[184].mxu0 %v5292_v55  ;;  %5382 = vmatmul.mubr.bf16.vlgmr.msra.gmra.mrb[184].mxu1 %v5292_v55  ;;  %v5258_v24 = vadd.f32 1.0, %v6721_v14  ;;  %v6723_v6 = vpop.eup %6722  ;;  %v10939_v43 = vld [vmem:[#allocation53_spill] sm:$0xff] }
 0xc89   :  { %6732 = vrcp.f32 %v5255_v22  ;;  %5405 = vmatpush1.bf16.msra.mxu0 %v9714_v41  ;;  %5448 = vmatpush1.bf16.msra.mxu1 %v9717_v0  ;;  %v6725_v41 = vpop.eup %6724  ;;  %v5299_v31 = vunpack.c.l.bf16 %v10939_v43  ;;  %v5303_v55 = vunpack.c.h.bf16 %v10939_v43 }
 0xc8a   :  { %6734 = vrcp.f32 %v5257_v46  ;;  %5406 = vmatprep.subr.bf16.mxu0 %v9720_v9  ;;  %5449 = vmatprep.subr.bf16.mxu1 %v9723_v53  ;;  %v6727_v0 = vpop.eup %6726 }
 0xc8b   :  { %5436 = vmatprep.mubr.bf16.mxu0 %v10441_v18  ;;  %5479 = vmatprep.mubr.bf16.mxu1 %v10441_v18  ;;  %6736 = vrcp.f32 %v5258_v24  ;;  %v5259_v19 = vadd.f32 1.0, %v6727_v0 }
 0xc8d   :  { %5407 = vmatpush1.bf16.msra.mxu0 %v9728_v15  ;;  %5450 = vmatpush1.bf16.msra.mxu1 %v9731_v36  ;;  %v5256_v15 = vadd.f32 1.0, %v6725_v41 }
 0xc8e   :  { %5408 = vmatprep.subr.bf16.mxu0 %v9734_v40  ;;  %5451 = vmatprep.subr.bf16.mxu1 %v9737_v27 }
 0xc8f   :  { %6738 = vrcp.f32 %v5256_v15 }
 0xc91   :  { %v6729_v2 = vpop.eup %6728  ;;  %5409 = vmatpush1.bf16.msra.mxu0 %v9740_v5  ;;  %5452 = vmatpush1.bf16.msra.mxu1 %v9743_v3 }
 0xc92   :  { %v6731_v9 = vpop.eup %6730  ;;  %v5276_v53 = vmul.f32 %v6729_v2, %v6723_v6  ;;  %5410 = vmatprep.subr.bf16.mxu0 %v9746_v62  ;;  %5453 = vmatprep.subr.bf16.mxu1 %v9749_v45  ;;  %v10926_v62 = vld [vmem:[#allocation144_spill] sm:$0xff] }
 0xc93   :  { %v6733_v18 = vpop.eup %6732  ;;  %vm10927_vm14 = vcmp.eq.s32.totalorder %v10926_v62, 1 }
 0xc94   :  { %v6735_v36 = vpop.eup %6734  ;;  %v5274_v40 = vmul.f32 %v6733_v18, %v9769_v1  ;;  %vm10934_vm0 = vmmov %vm10927_vm14 }
 0xc95   :  { %v5277_v47 = vmul.f32 %v6735_v36, %v6731_v9  ;;  %5411 = vmatpush1.bf16.msra.mxu0 %v9753_v49  ;;  %5454 = vmatpush1.bf16.msra.mxu1 %v9756_v28  ;;  %v6737_v27 = vpop.eup %6736  ;;  %v10928_v49 = vld [vmem:[#allocation145_spill] sm:$0xff] }
 0xc96   :  { %v5278_v5 = vadd.f32 %v5276_v53, %v5274_v40  ;;  %5412 = vmatprep.subr.bf16.mxu0 %v9759_v16  ;;  %5455 = vmatprep.subr.bf16.mxu1 %v9762_v38  ;;  %v5275_v3 = vmul.f32 %v6737_v27, %v9786_v20  ;;  %vm10929_vm15 = vcmp.eq.s32.totalorder %v10928_v49, 1 }
 0xc97   :  { %vm10936_vm1 = vmmov %vm10929_vm15 }
 0xc98   :  { %6740 = vtanh.f32 %v5278_v5  ;;  %v9895_v45 = vsel %vm10927_vm14, %v5278_v5, %v9769_v1  ;;  %v5279_v39 = vadd.f32 %v5277_v47, %v5275_v3  ;;  %v10930_v1 = vld [vmem:[#allocation117_spill] sm:$0xff] }
 0xc99   :  { %5413 = vmatpush1.bf16.msra.mxu0 %v9771_v61  ;;  %5456 = vmatpush1.bf16.msra.mxu1 %v9774_v21  ;;  %6742 = vrcp.f32 %v5259_v19  ;;  %v6739_v16 = vpop.eup %6738 }
 0xc9a   :  { %5414 = vmatprep.subr.bf16.mxu0 %v9777_v4  ;;  %5457 = vmatprep.subr.bf16.mxu1 %v9780_v23  ;;  %6744 = vtanh.f32 %v5279_v39  ;;  %v9904_v28 = vsel %vm10929_vm15, %v5279_v39, %v9786_v20  ;;  %v10931_v23 = vld [vmem:[#allocation118_spill] sm:$0xff]  ;;  %v10932_v20 = vld [vmem:[#allocation119_spill] sm:$0xff] }
 0xc9d   :  { %5415 = vmatpush1.bf16.msra.mxu0 %v9788_v12  ;;  %5458 = vmatpush1.bf16.msra.mxu1 %v9791_v42  ;;  %v10933_v42 = vld [vmem:[#allocation120_spill] sm:$0xff] }
 0xc9e   :  { %5416 = vmatprep.subr.bf16.mxu0 %v9794_v60  ;;  %5459 = vmatprep.subr.bf16.mxu1 %v9797_v57  ;;  %v10935_v57 = vld [vmem:[#allocation121_spill] sm:$0xff] }
 0xca1   :  { %5417 = vmatpush1.bf16.msra.mxu0 %v9800_v50  ;;  %5460 = vmatpush1.bf16.msra.mxu1 %v9803_v52 }
 0xca2   :  { %v6741_v38 = vpop.eup %6740  ;;  %5418 = vmatprep.subr.bf16.mxu0 %v9806_v37  ;;  %5461 = vmatprep.subr.bf16.mxu1 %v10930_v1  ;;  %v10937_v37 = vld [vmem:[#allocation52_spill] sm:$0xff] }
 0xca3   :  { %v5282_v61 = vmul.f32 %v6741_v38, %v6739_v16  ;;  %v6743_v21 = vpop.eup %6742  ;;  %v5298_v7 = vunpack.c.l.bf16 %v10937_v37  ;;  %v5302_v26 = vunpack.c.h.bf16 %v10937_v37 }
 0xca4   :  { %v6745_v4 = vpop.eup %6744 }
 0xca5   :  { %5419 = vmatpush1.bf16.msra.mxu0 %v10931_v23  ;;  %5462 = vmatpush1.bf16.msra.mxu1 %v10932_v20  ;;  %v5283_v12 = vmul.f32 %v6745_v4, %v6743_v21  ;;  %v9919_v60 = vsel %vm10934_vm0, %v5282_v61, %v10933_v42 }
 0xca7   :  { %v9924_v50 = vsel %vm10936_vm1, %v5283_v12, %v10935_v57 }
 0xca8   :  { %v5293_v52 = vpack.c.bf16 %v9924_v50, %v9919_v60 }
 0xcaa   :  { %5437 = vmatmul.mubr.bf16.vlgmr.msra.gmra.mrb[188].mxu0 %v5293_v52  ;;  %5480 = vmatmul.mubr.bf16.vlgmr.msra.gmra.mrb[188].mxu1 %v5293_v52 }
 0xd5b   :  { %v5340_v44 = vpop.f32.mrb[184].mxu0  ;;  %v5383_v33 = vpop.f32.mrb[184].mxu1 }
 0xd5c   :  { %v5341_v11 = vadd.f32 %v5340_v44, %v5298_v7  ;;  %v5384_v30 = vadd.f32 %v5383_v33, %v5300_v25  ;;  %v5342_v48 = vpop.f32.mrb[185].mxu0  ;;  %v5385_v51 = vpop.f32.mrb[185].mxu1  ;;  %v10941_v7 = vld [vmem:[#allocation56_spill] sm:$0xff]  ;;  %v10942_v25 = vld [vmem:[#allocation58_spill] sm:$0xff] }
 0xd5d   :  { %v5343_v13 = vadd.f32 %v5342_v48, %v5299_v31  ;;  %v5386_v29 = vadd.f32 %v5385_v51, %v5301_v34  ;;  %v5344_v35 = vpop.f32.mrb[186].mxu0  ;;  %v5387_v17 = vpop.f32.mrb[186].mxu1  ;;  %v5396_v54 = vunpack.c.l.bf16 %v10941_v7  ;;  %v5398_v44 = vunpack.c.l.bf16 %v10942_v25  ;;  %v10943_v31 = vld [vmem:[#allocation57_spill] sm:$0xff]  ;;  %v10944_v34 = vld [vmem:[#allocation59_spill] sm:$0xff] }
 0xd5e   :  { %v5908_v22 = vmul.f32 -1.442695, %v5341_v11  ;;  %v5345_v46 = vadd.f32 %v5344_v35, %v5302_v26  ;;  %v5388_v14 = vadd.f32 %v5387_v17, %v5304_v32  ;;  %v5346_v24 = vpop.f32.mrb[187].mxu0  ;;  %v5389_v6 = vpop.f32.mrb[187].mxu1  ;;  %v5910_v18 = vmul.f32 -1.442695, %v5384_v30 }
 0xd5f   :  { %v5909_v41 = vmul.f32 -1.442695, %v5343_v13  ;;  %v5347_v0 = vadd.f32 %v5346_v24, %v5303_v55  ;;  %v5390_v2 = vadd.f32 %v5389_v6, %v5305_v8  ;;  %v5397_v56 = vunpack.c.l.bf16 %v10943_v31 }
 0xd60   :  { %6746 = vpow2.f32 %v5908_v22  ;;  %v5911_v9 = vmul.f32 -1.442695, %v5345_v46  ;;  %v5913_v15 = vmul.f32 -1.442695, %v5388_v14  ;;  %v5399_v11 = vunpack.c.l.bf16 %v10944_v34 }
 0xd61   :  { %v5912_v53 = vmul.f32 -1.442695, %v5347_v0  ;;  %6748 = vpow2.f32 %v5909_v41  ;;  %v5401_v55 = vunpack.c.h.bf16 %v10943_v31  ;;  %v5403_v14 = vunpack.c.h.bf16 %v10944_v34 }
 0xd62   :  { %6750 = vpow2.f32 %v5911_v9 }
 0xd63   :  { %6752 = vpow2.f32 %v5912_v53 }
 0xd64   :  { %6754 = vtanh.f32 %v5386_v29 }
 0xd65   :  { %6756 = vpow2.f32 %v5910_v18 }
 0xd66   :  { %6758 = vpow2.f32 %v5913_v15 }
 0xd6a   :  { %v6747_v36 = vpop.eup %6746 }
 0xd6b   :  { %v5508_v40 = vadd.f32 1.0, %v6747_v36  ;;  %v6749_v47 = vpop.eup %6748 }
 0xd6c   :  { %v6751_v27 = vpop.eup %6750  ;;  %v5509_v5 = vadd.f32 1.0, %v6749_v47 }
 0xd6d   :  { %6760 = vrcp.f32 %v5508_v40  ;;  %v5511_v19 = vadd.f32 1.0, %v6751_v27  ;;  %v6753_v3 = vpop.eup %6752 }
 0xd6e   :  { %6762 = vtanh.f32 %v5390_v2  ;;  %v5512_v62 = vadd.f32 1.0, %v6753_v3  ;;  %v6755_v39 = vpop.eup %6754 }
 0xd6f   :  { %6764 = vrcp.f32 %v5509_v5  ;;  %v6757_v49 = vpop.eup %6756 }
 0xd70   :  { %6766 = vrcp.f32 %v5511_v19  ;;  %v6759_v16 = vpop.eup %6758  ;;  %v5510_v4 = vadd.f32 1.0, %v6757_v49  ;;  %v10945_v19 = vld [vmem:[#allocation100_spill] sm:$0xff] }
 0xd71   :  { %6768 = vrcp.f32 %v5512_v62  ;;  %v5513_v52 = vadd.f32 1.0, %v6759_v16  ;;  %vm10946_vm2 = vcmp.eq.s32.totalorder %v10945_v19, 1  ;;  %v10947_v16 = vld [vmem:[#allocation109_spill] sm:$0xff] }
 0xd72   :  { %6770 = vrcp.f32 %v5510_v4  ;;  %vm10948_vm3 = vcmp.eq.s32.totalorder %v10947_v16, 1 }
 0xd77   :  { %v6761_v38 = vpop.eup %6760 }
 0xd78   :  { %v6763_v1 = vpop.eup %6762  ;;  %v5530_v61 = vmul.f32 %v6761_v38, %v6755_v39 }
 0xd79   :  { %v6765_v21 = vpop.eup %6764 }
 0xd7a   :  { %v6767_v23 = vpop.eup %6766  ;;  %v5528_v20 = vmul.f32 %v6765_v21, %v9850_v10  ;;  %v5400_v10 = vunpack.c.h.bf16 %v10941_v7 }
 0xd7b   :  { %v5531_v12 = vmul.f32 %v6767_v23, %v6763_v1  ;;  %v6769_v42 = vpop.eup %6768 }
 0xd7c   :  { %v5532_v57 = vadd.f32 %v5530_v61, %v5528_v20  ;;  %v5529_v37 = vmul.f32 %v6769_v42, %v9858_v59  ;;  %v5402_v59 = vunpack.c.h.bf16 %v10942_v25  ;;  %v6771_v18 = vpop.eup %6770 }
 0xd7d   :  { %v5438_v33 = vpop.f32.mrb[188].mxu0  ;;  %v5481_v43 = vpop.f32.mrb[188].mxu1 }
 0xd7e   :  { %6772 = vtanh.f32 %v5532_v57  ;;  %v5533_v30 = vadd.f32 %v5531_v12, %v5529_v37  ;;  %v5439_v48 = vadd.f32 %v5438_v33, %v5396_v54  ;;  %v5482_v51 = vadd.f32 %v5481_v43, %v5398_v44  ;;  %v5440_v26 = vpop.f32.mrb[189].mxu0  ;;  %v5483_v32 = vpop.f32.mrb[189].mxu1 }
 0xd7f   :  { %6774 = vrcp.f32 %v5513_v52  ;;  %v5441_v13 = vadd.f32 %v5440_v26, %v5397_v56  ;;  %v5484_v29 = vadd.f32 %v5483_v32, %v5399_v11  ;;  %v5442_v35 = vpop.f32.mrb[190].mxu0  ;;  %v5485_v17 = vpop.f32.mrb[190].mxu1 }
 0xd80   :  { %6776 = vtanh.f32 %v5533_v30  ;;  %v5914_v8 = vmul.f32 -1.442695, %v5439_v48  ;;  %v5443_v22 = vadd.f32 %v5442_v35, %v5400_v10  ;;  %v5444_v46 = vpop.f32.mrb[191].mxu0  ;;  %v5487_v24 = vpop.f32.mrb[191].mxu1  ;;  %v5486_v41 = vadd.f32 %v5485_v17, %v5402_v59 }
 0xd81   :  { %v5915_v6 = vmul.f32 -1.442695, %v5441_v13  ;;  %v5445_v0 = vadd.f32 %v5444_v46, %v5401_v55  ;;  %v5488_v9 = vadd.f32 %v5487_v24, %v5403_v14  ;;  %v5916_v47 = vmul.f32 -1.442695, %v5482_v51 }
 0xd82   :  { %6778 = vpow2.f32 %v5914_v8  ;;  %v5917_v2 = vmul.f32 -1.442695, %v5443_v22  ;;  %v5919_v5 = vmul.f32 -1.442695, %v5486_v41 }
 0xd83   :  { %v5918_v53 = vmul.f32 -1.442695, %v5445_v0  ;;  %6780 = vpow2.f32 %v5915_v6 }
 0xd84   :  { %6782 = vpow2.f32 %v5917_v2 }
 0xd85   :  { %6784 = vpow2.f32 %v5918_v53 }
 0xd86   :  { %6786 = vtanh.f32 %v5484_v29 }
 0xd87   :  { %6788 = vpow2.f32 %v5916_v47 }
 0xd88   :  { %v6773_v15 = vpop.eup %6772  ;;  %6790 = vpow2.f32 %v5919_v5 }
 0xd89   :  { %v5536_v36 = vmul.f32 %v6773_v15, %v6771_v18  ;;  %v6775_v40 = vpop.eup %6774 }
 0xd8a   :  { %v6777_v27 = vpop.eup %6776 }
 0xd8b   :  { %v5586_v3 = vsel %vm10946_vm2, %v5536_v36, %v9863_v63  ;;  %v5537_v62 = vmul.f32 %v6777_v27, %v6775_v40 }
 0xd8c   :  { %5590 = vst [vmem:[#allocation11] sm:$0xff] %v5586_v3  ;;  %v6779_v39 = vpop.eup %6778 }
 0xd8d   :  { %v5556_v49 = vadd.f32 1.0, %v6779_v39  ;;  %v5587_v38 = vsel %vm10948_vm3, %v5537_v62, %v9868_v58  ;;  %v6781_v1 = vpop.eup %6780 }
 0xd8e   :  { %5592 = vst [vmem:[#allocation11 + $0x10] sm:$0xff] %v5587_v38  ;;  %v6783_v61 = vpop.eup %6782  ;;  %v5557_v21 = vadd.f32 1.0, %v6781_v1 }
 0xd8f   :  { %6792 = vrcp.f32 %v5556_v49  ;;  %v5559_v4 = vadd.f32 1.0, %v6783_v61  ;;  %v6785_v23 = vpop.eup %6784 }
 0xd90   :  { %6794 = vtanh.f32 %v5488_v9  ;;  %v5560_v63 = vadd.f32 1.0, %v6785_v23  ;;  %v6787_v20 = vpop.eup %6786 }
 0xd91   :  { %6796 = vrcp.f32 %v5557_v21  ;;  %v6789_v12 = vpop.eup %6788 }
 0xd92   :  { %6798 = vrcp.f32 %v5559_v4  ;;  %v6791_v42 = vpop.eup %6790  ;;  %v5558_v7 = vadd.f32 1.0, %v6789_v12 }
 0xd93   :  { %6800 = vrcp.f32 %v5560_v63  ;;  %v5561_v31 = vadd.f32 1.0, %v6791_v42 }
 0xd94   :  { %6802 = vrcp.f32 %v5558_v7 }
 0xd99   :  { %v6793_v57 = vpop.eup %6792 }
 0xd9a   :  { %v6795_v52 = vpop.eup %6794  ;;  %v5578_v37 = vmul.f32 %v6793_v57, %v6787_v20 }
 0xd9b   :  { %v6797_v58 = vpop.eup %6796 }
 0xd9c   :  { %v6799_v54 = vpop.eup %6798  ;;  %v5576_v25 = vmul.f32 %v6797_v58, %v9895_v45  ;;  %v10949_v45 = vld [vmem:[#allocation96_spill] sm:$0xff] }
 0xd9d   :  { %v5579_v44 = vmul.f32 %v6799_v54, %v6795_v52  ;;  %v6801_v33 = vpop.eup %6800  ;;  %vm10950_vm4 = vcmp.eq.s32.totalorder %v10949_v45, 1 }
 0xd9e   :  { %v5580_v43 = vadd.f32 %v5578_v37, %v5576_v25  ;;  %v5577_v56 = vmul.f32 %v6801_v33, %v9904_v28  ;;  %v6803_v11 = vpop.eup %6802  ;;  %v10951_v28 = vld [vmem:[#allocation97_spill] sm:$0xff] }
 0xd9f   :  { %vm10952_vm5 = vcmp.eq.s32.totalorder %v10951_v28, 1 }
 0xda0   :  { %6804 = vtanh.f32 %v5580_v43  ;;  %v5581_v34 = vadd.f32 %v5579_v44, %v5577_v56 }
 0xda1   :  { %6806 = vrcp.f32 %v5561_v31 }
 0xda2   :  { %6808 = vtanh.f32 %v5581_v34 }
 0xdaa   :  { %v6805_v10 = vpop.eup %6804 }
 0xdab   :  { %v5584_v30 = vmul.f32 %v6805_v10, %v6803_v11  ;;  %v6807_v48 = vpop.eup %6806 }
 0xdac   :  { %v6809_v51 = vpop.eup %6808 }
 0xdad   :  { %v5588_v26 = vsel %vm10950_vm4, %v5584_v30, %v9919_v60  ;;  %v5585_v32 = vmul.f32 %v6809_v51, %v6807_v48 }
 0xdae   :  { %5591 = vst [vmem:[#allocation11 + $0x8] sm:$0xff] %v5588_v26 }
 0xdaf   :  { %v5589_v59 = vsel %vm10952_vm5, %v5585_v32, %v9924_v50 }
 0xdb0   :  { %5593 = vst [vmem:[#allocation11 + $0x18] sm:$0xff] %v5589_v59 }
 0xdb1   :  { %7165 = shalt.err (!%p7162_p8)
}
 0xdb2   :  { %s7166_s7 = scalar_lea.hbm %s9981_s6, 512 }
 0xdb3   :  { %p7167_p9 = scmp.ne.s32.totalorder %s9981_s6, %s7166_s7  ;;  %p7170_p10 = scmp.lt.u32.totalorder %s7166_s7, %s9981_s6 }
 0xdb5   :  { %p7172_p11 = pnand %p7170_p10, %p7167_p9 }
 0xdb7   :  { %7175 = shalt.err (!%p7172_p11)
}
 0xdb8   :  { %5605 = dma.vmem_to_hbm [thread:$0]  %s5600_s27, 512, %s9981_s6, [#allocation5], %s7191_s0, %s7191_s0, %s7192_s10  }
 0xdb9   :  { %7182 = dma.done.wait [#allocation5], 512  }
 0xdba   :  { %7183 = vsyncadd [#allocation5], 4294966784 }
 0xdbb   :  { %5609 = vsyncpa [#allocation4], 1 }
 0xdbc   :  { %5610 = vsyncpa [#allocation7], 1 }
 0xdbd   :  { %5611 = vsyncpa [#allocation10], 1 }
 0xdbe   :  { %5612 = vsyncpa [#allocation5], 1 }

</bundles_post_ra>
